<compile_context>
chip_gen: v7x
topology: tpu7x:2x2x1
jax: 0.10.0
libtpu: 0.0.40
codegen_flags: <defaults>
</compile_context>

<pallas_src>
import numpy as np
import jax
import jax.numpy as jnp
from jax import lax
from jax.experimental import pallas as pl
from jax.experimental.pallas import tpu as pltpu

EPS = 1e-5  # PyTorch BatchNorm2d default


# ----------------------------------------------------------------------------
# Weight preparation (runs ONCE, outside the forward hot path)
# ----------------------------------------------------------------------------
def _conv_map(H, W, k, stride, pad):
    """0/1 map A[(hi,wi), (ki,kj), (ho,wo)] for Conv2d: hi = stride*ho+ki-pad."""
    Ho = (H + 2 * pad - k) // stride + 1
    Wo = (W + 2 * pad - k) // stride + 1
    A = np.zeros((H * W, k * k, Ho * Wo), np.float32)
    for ho in range(Ho):
        for wo in range(Wo):
            for ki in range(k):
                for kj in range(k):
                    hi = stride * ho + ki - pad
                    wi = stride * wo + kj - pad
                    if 0 <= hi < H and 0 <= wi < W:
                        A[hi * W + wi, ki * k + kj, ho * Wo + wo] = 1.0
    return A, Ho, Wo


def _convT_map(H, W, k, stride, pad):
    """0/1 map for ConvTranspose2d: ho = stride*hi + ki - pad (PyTorch)."""
    Ho = (H - 1) * stride - 2 * pad + k
    Wo = (W - 1) * stride - 2 * pad + k
    A = np.zeros((H * W, k * k, Ho * Wo), np.float32)
    for hi in range(H):
        for wi in range(W):
            for ki in range(k):
                for kj in range(k):
                    ho = stride * hi + ki - pad
                    wo = stride * wi + kj - pad
                    if 0 <= ho < Ho and 0 <= wo < Wo:
                        A[hi * W + wi, ki * k + kj, ho * Wo + wo] = 1.0
    return A, Ho, Wo


_LAYERS = (  # (name, transposed?, use_bn?, n_matmul_inputs)
    ("enc1", False, True, 1), ("enc2", False, True, 1),
    ("enc3", False, True, 1), ("enc4", False, True, 1),
    ("dec1", True, False, 1), ("dec2", True, True, 2),
    ("dec3", True, True, 2), ("dec4", True, True, 2),
)


def prepare_unet(params, N, H, W):
    """Unroll every conv into a (Cin*H*W, Cout*Ho*Wo) matrix, pre-broadcast
    bias / BN affine params and build per-channel selector matrices.
    Returns (flat tuple of f32 arrays in kernel order, static per-layer meta)."""
    arrays, meta = [], []
    h, w = H, W
    for name, transposed, use_bn, n_split in _LAYERS:
        p = params[name]
        wgt = p["w"]
        k = wgt.shape[2]
        if transposed:                       # ConvTranspose2d: (Cin, Cout, k, k)
            Cin, Cout = wgt.shape[0], wgt.shape[1]
            A, Ho, Wo = _convT_map(h, w, k, 2, 1)
            wr = wgt.reshape(Cin, Cout, k * k)
        else:                                # Conv2d: (Cout, Cin, k, k)
            Cout, Cin = wgt.shape[0], wgt.shape[1]
            A, Ho, Wo = _conv_map(h, w, k, 2, 1)
            wr = jnp.transpose(wgt, (1, 0, 2, 3)).reshape(Cin, Cout, k * k)
        S_in, S_out = h * w, Ho * Wo
        # M[(ci,s),(co,t)] = sum_k wr[ci,co,k] * A[s,k,t]
        M = jnp.einsum("cok,skt->csot", wr, jnp.asarray(A))
        M = M.reshape(Cin * S_in, Cout * S_out)
        if n_split == 1:
            arrays.append(M)
        else:                                # skip concat -> split matmul
            half = (Cin // 2) * S_in
            arrays.extend([M[:half], M[half:]])
        arrays.append(jnp.repeat(p["b"], S_out).reshape(1, Cout * S_out))
        if use_bn:
            sel = np.kron(np.eye(Cout, dtype=np.float32),
                          np.ones((S_out, 1), np.float32))   # (Cout*S_out, Cout)
            arrays.append(jnp.repeat(p["gamma"], S_out).reshape(1, Cout * S_out))
            arrays.append(jnp.repeat(p["beta"], S_out).reshape(1, Cout * S_out))
            arrays.append(jnp.asarray(sel))
            arrays.append(jnp.asarray(sel.T))
        meta.append({"use_bn": use_bn, "inv_count": 1.0 / float(N * S_out)})
        h, w = Ho, Wo
    return tuple(jnp.asarray(a, jnp.float32) for a in arrays), tuple(meta)


# ----------------------------------------------------------------------------
# The single fused Pallas kernel
# ----------------------------------------------------------------------------
def _make_unet_kernel(meta):
    """Whole-UNet kernel: 8 fused (matmul + bias + BN + activation) layers,
    all activations VMEM-resident.  Only jnp.dot / elementwise / sublane
    reductions are used inside the kernel."""

    def kernel(*args):
        in_refs, o_ref = args[:-1], args[-1]
        cur = [1]

        def nxt():
            v = in_refs[cur[0]][...]
            cur[0] += 1
            return v

        def layer(xs, m, leaky):
            # conv / transposed conv (skip concat realized as split matmul)
            y = None
            for xp in xs:
                t = jnp.dot(xp, nxt(), preferred_element_type=jnp.float32)
                y = t if y is None else y + t
            y = y + nxt()                                    # bias (1, R)
            if m["use_bn"]:
                gamma, beta, sel, sel_t = nxt(), nxt(), nxt(), nxt()
                inv_n = m["inv_count"]
                colsum = jnp.sum(y, axis=0, keepdims=True)   # (1, R)
                mean_c = jnp.dot(colsum, sel,
                                 preferred_element_type=jnp.float32) * inv_n  # (1, C)
                mean = jnp.dot(mean_c, sel_t,
                               preferred_element_type=jnp.float32)            # (1, R)
                d = y - mean
                var_c = jnp.dot(jnp.sum(d * d, axis=0, keepdims=True), sel,
                                preferred_element_type=jnp.float32) * inv_n   # (1, C)
                inv_std = jnp.dot(lax.rsqrt(var_c + EPS), sel_t,
                                  preferred_element_type=jnp.float32)         # (1, R)
                y = d * inv_std * gamma + beta
            if leaky:
                y = jnp.where(y >= 0.0, y, 0.2 * y)          # LeakyReLU(0.2)
            else:
                y = jnp.maximum(y, 0.0)                      # ReLU
            return y

        x = in_refs[0][...]                                  # (N, Cin*H*W)
        e1 = layer([x], meta[0], True)
        e2 = layer([e1], meta[1], True)
        e3 = layer([e2], meta[2], True)
        e4 = layer([e3], meta[3], True)
        d1 = layer([e4], meta[4], False)
        d2 = layer([d1, e3], meta[5], False)                 # cat([d1, e3], 1)
        d3 = layer([d2, e2], meta[6], False)                 # cat([d2, e2], 1)
        d4 = layer([d3, e1], meta[7], False)                 # cat([d3, e1], 1)
        o_ref[...] = d4

    return kernel


def make_unet_forward(meta, N, C, H, W):
    kernel = _make_unet_kernel(meta)
    vspec = pl.BlockSpec(memory_space=pltpu.MemorySpace.VMEM)

    @jax.jit
    def forward(x, *weight_arrays):
        x_flat = x.reshape(N, C * H * W)     # NCHW row-major flatten (free)
        out = pl.pallas_call(
            kernel,
            out_shape=jax.ShapeDtypeStruct((N, C * H * W), jnp.float32),
            in_specs=[vspec] * (1 + len(weight_arrays)),
            out_specs=vspec,
        )(x_flat, *weight_arrays)
        return out.reshape(N, C, H, W)

    return forward


# ----------------------------------------------------------------------------
# Deterministic parameter init (shapes follow the nn.Module __init__)
# ----------------------------------------------------------------------------
def init_params(key, n_in):
    def layer(key, w_shape, cout):
        k1, k2, k3, k4 = jax.random.split(key, 4)
        return {
            "w": 0.1 * jax.random.normal(k1, w_shape, jnp.float32),
            "b": 0.1 * jax.random.normal(k2, (cout,), jnp.float32),
            "gamma": 1.0 + 0.1 * jax.random.normal(k3, (cout,), jnp.float32),
            "beta": 0.1 * jax.random.normal(k4, (cout,), jnp.float32),
        }

    ks = jax.random.split(key, 8)
    c = n_in
    return {
        "enc1": layer(ks[0], (c, c, 4, 4), c),        # Conv2d: (Cout, Cin, 4, 4)
        "enc2": layer(ks[1], (c, c, 4, 4), c),
        "enc3": layer(ks[2], (c, c, 4, 4), c),
        "enc4": layer(ks[3], (c, c, 4, 4), c),
        "dec1": layer(ks[4], (c, c, 4, 4), c),        # ConvTranspose2d: (Cin, Cout, 4, 4)
        "dec2": layer(ks[5], (2 * c, c, 4, 4), c),
        "dec3": layer(ks[6], (2 * c, c, 4, 4), c),
        "dec4": layer(ks[7], (2 * c, c, 4, 4), c),
    }


# ----------------------------------------------------------------------------
# Pure-JAX reference (lax.conv) for the correctness check
# ----------------------------------------------------------------------------
def _ref_bn(y, gamma, beta):
    mean = jnp.mean(y, axis=(0, 2, 3), keepdims=True)
    var = jnp.mean((y - mean) ** 2, axis=(0, 2, 3), keepdims=True)
    return (y - mean) * lax.rsqrt(var + EPS) * gamma.reshape(1, -1, 1, 1) \
        + beta.reshape(1, -1, 1, 1)


def _ref_down(x, p, use_bn=True):
    y = lax.conv_general_dilated(x, p["w"], (2, 2), ((1, 1), (1, 1)),
                                 dimension_numbers=("NCHW", "OIHW", "NCHW"))
    y = y + p["b"].reshape(1, -1, 1, 1)
    if use_bn:
        y = _ref_bn(y, p["gamma"], p["beta"])
    return jnp.where(y >= 0.0, y, 0.2 * y)


def _ref_up(x, p, use_bn=True):
    w_conv = jnp.flip(p["w"], axis=(2, 3)).transpose(1, 0, 2, 3)
    y = lax.conv_general_dilated(x, w_conv, (1, 1), ((2, 2), (2, 2)),
                                 lhs_dilation=(2, 2),
                                 dimension_numbers=("NCHW", "OIHW", "NCHW"))
    y = y + p["b"].reshape(1, -1, 1, 1)
    if use_bn:
        y = _ref_bn(y, p["gamma"], p["beta"])
    return jnp.maximum(y, 0.0)


def ref_forward(x, params):
    e1 = _ref_down(x, params["enc1"])
    e2 = _ref_down(e1, params["enc2"])
    e3 = _ref_down(e2, params["enc3"])
    e4 = _ref_down(e3, params["enc4"])
    d1 = _ref_up(e4, params["dec1"], use_bn=False)
    d2 = _ref_up(jnp.concatenate([d1, e3], axis=1), params["dec2"])
    d3 = _ref_up(jnp.concatenate([d2, e2], axis=1), params["dec3"])
    d4 = _ref_up(jnp.concatenate([d3, e1], axis=1), params["dec4"])
    return d4


if __name__ == "__main__":
    key = jax.random.PRNGKey(0)
    kx, kp = jax.random.split(key)
    n_in, N, H, W = 4, 2, 16, 16
    x = jax.random.normal(kx, (N, n_in, H, W), jnp.float32)     # NCHW
    params = init_params(kp, n_in)

    weight_arrays, meta = prepare_unet(params, N, H, W)         # one-time prep
    unet = make_unet_forward(meta, N, n_in, H, W)

    out = jax.block_until_ready(unet(x, *weight_arrays))
    ref = jax.block_until_ready(ref_forward(x, params))

    assert out.shape == (N, n_in, H, W), out.shape
    np.testing.assert_allclose(np.asarray(out), np.asarray(ref),
                               rtol=1e-4, atol=1e-4)
    print("KERNEL_OK")
</pallas_src>

<mosaic_0001>
module attributes {stable_mosaic.version = 11 : i64} {
  func.func @kernel(%arg0: memref<2x1024xf32, #tpu.memory_space<vmem>>, %arg1: memref<1024x256xf32, #tpu.memory_space<vmem>>, %arg2: memref<1x256xf32, #tpu.memory_space<vmem>>, %arg3: memref<1x256xf32, #tpu.memory_space<vmem>>, %arg4: memref<1x256xf32, #tpu.memory_space<vmem>>, %arg5: memref<256x4xf32, #tpu.memory_space<vmem>>, %arg6: memref<4x256xf32, #tpu.memory_space<vmem>>, %arg7: memref<256x64xf32, #tpu.memory_space<vmem>>, %arg8: memref<1x64xf32, #tpu.memory_space<vmem>>, %arg9: memref<1x64xf32, #tpu.memory_space<vmem>>, %arg10: memref<1x64xf32, #tpu.memory_space<vmem>>, %arg11: memref<64x4xf32, #tpu.memory_space<vmem>>, %arg12: memref<4x64xf32, #tpu.memory_space<vmem>>, %arg13: memref<64x16xf32, #tpu.memory_space<vmem>>, %arg14: memref<1x16xf32, #tpu.memory_space<vmem>>, %arg15: memref<1x16xf32, #tpu.memory_space<vmem>>, %arg16: memref<1x16xf32, #tpu.memory_space<vmem>>, %arg17: memref<16x4xf32, #tpu.memory_space<vmem>>, %arg18: memref<4x16xf32, #tpu.memory_space<vmem>>, %arg19: memref<16x4xf32, #tpu.memory_space<vmem>>, %arg20: memref<1x4xf32, #tpu.memory_space<vmem>>, %arg21: memref<1x4xf32, #tpu.memory_space<vmem>>, %arg22: memref<1x4xf32, #tpu.memory_space<vmem>>, %arg23: memref<4x4xf32, #tpu.memory_space<vmem>>, %arg24: memref<4x4xf32, #tpu.memory_space<vmem>>, %arg25: memref<4x16xf32, #tpu.memory_space<vmem>>, %arg26: memref<1x16xf32, #tpu.memory_space<vmem>>, %arg27: memref<16x64xf32, #tpu.memory_space<vmem>>, %arg28: memref<16x64xf32, #tpu.memory_space<vmem>>, %arg29: memref<1x64xf32, #tpu.memory_space<vmem>>, %arg30: memref<1x64xf32, #tpu.memory_space<vmem>>, %arg31: memref<1x64xf32, #tpu.memory_space<vmem>>, %arg32: memref<64x4xf32, #tpu.memory_space<vmem>>, %arg33: memref<4x64xf32, #tpu.memory_space<vmem>>, %arg34: memref<64x256xf32, #tpu.memory_space<vmem>>, %arg35: memref<64x256xf32, #tpu.memory_space<vmem>>, %arg36: memref<1x256xf32, #tpu.memory_space<vmem>>, %arg37: memref<1x256xf32, #tpu.memory_space<vmem>>, %arg38: memref<1x256xf32, #tpu.memory_space<vmem>>, %arg39: memref<256x4xf32, #tpu.memory_space<vmem>>, %arg40: memref<4x256xf32, #tpu.memory_space<vmem>>, %arg41: memref<256x1024xf32, #tpu.memory_space<vmem>>, %arg42: memref<256x1024xf32, #tpu.memory_space<vmem>>, %arg43: memref<1x1024xf32, #tpu.memory_space<vmem>>, %arg44: memref<1x1024xf32, #tpu.memory_space<vmem>>, %arg45: memref<1x1024xf32, #tpu.memory_space<vmem>>, %arg46: memref<1024x4xf32, #tpu.memory_space<vmem>>, %arg47: memref<4x1024xf32, #tpu.memory_space<vmem>>, %arg48: memref<2x1024xf32, #tpu.memory_space<vmem>>) attributes {dimension_semantics = [], scalar_prefetch = 0 : i64, scratch_operands = 0 : i64, tpu.core_type = #tpu.core_type<tc>} {
    %c0 = arith.constant 0 : index
    %c0_0 = arith.constant 0 : index
    %0 = vector.load %arg0[%c0, %c0_0] : memref<2x1024xf32, #tpu.memory_space<vmem>>, vector<2x1024xf32>
    %c0_1 = arith.constant 0 : index
    %c0_2 = arith.constant 0 : index
    %1 = vector.load %arg1[%c0_1, %c0_2] : memref<1024x256xf32, #tpu.memory_space<vmem>>, vector<1024x256xf32>
    %cst = arith.constant dense<0.000000e+00> : vector<2x256xf32>
    %2 = tpu.matmul %0, %1, %cst {dimension_numbers = #tpu.dot_dimension_numbers<[1], [0], [0], [1], [0, 0, 1, 1], [], []>} : vector<2x1024xf32>, vector<1024x256xf32>, vector<2x256xf32> -> vector<2x256xf32>
    %c0_3 = arith.constant 0 : index
    %c0_4 = arith.constant 0 : index
    %3 = vector.load %arg2[%c0_3, %c0_4] : memref<1x256xf32, #tpu.memory_space<vmem>>, vector<1x256xf32>
    %4 = vector.broadcast %3 : vector<1x256xf32> to vector<2x256xf32>
    %5 = arith.addf %2, %4 : vector<2x256xf32>
    %c0_5 = arith.constant 0 : index
    %c0_6 = arith.constant 0 : index
    %6 = vector.load %arg3[%c0_5, %c0_6] : memref<1x256xf32, #tpu.memory_space<vmem>>, vector<1x256xf32>
    %c0_7 = arith.constant 0 : index
    %c0_8 = arith.constant 0 : index
    %7 = vector.load %arg4[%c0_7, %c0_8] : memref<1x256xf32, #tpu.memory_space<vmem>>, vector<1x256xf32>
    %c0_9 = arith.constant 0 : index
    %c0_10 = arith.constant 0 : index
    %8 = vector.load %arg5[%c0_9, %c0_10] : memref<256x4xf32, #tpu.memory_space<vmem>>, vector<256x4xf32>
    %c0_11 = arith.constant 0 : index
    %c0_12 = arith.constant 0 : index
    %9 = vector.load %arg6[%c0_11, %c0_12] : memref<4x256xf32, #tpu.memory_space<vmem>>, vector<4x256xf32>
    %cst_13 = arith.constant dense<0.000000e+00> : vector<256xf32>
    %10 = vector.multi_reduction <add>, %5, %cst_13 [0] : vector<2x256xf32> to vector<256xf32>
    %11 = vector.shape_cast %10 : vector<256xf32> to vector<1x256xf32>
    %cst_14 = arith.constant dense<0.000000e+00> : vector<1x4xf32>
    %12 = tpu.matmul %11, %8, %cst_14 {dimension_numbers = #tpu.dot_dimension_numbers<[1], [0], [0], [1], [0, 0, 1, 1], [], []>} : vector<1x256xf32>, vector<256x4xf32>, vector<1x4xf32> -> vector<1x4xf32>
    %cst_15 = arith.constant 7.812500e-03 : f32
    %13 = vector.broadcast %cst_15 : f32 to vector<1x4xf32>
    %14 = arith.mulf %12, %13 : vector<1x4xf32>
    %cst_16 = arith.constant dense<0.000000e+00> : vector<1x256xf32>
    %15 = tpu.matmul %14, %9, %cst_16 {dimension_numbers = #tpu.dot_dimension_numbers<[1], [0], [0], [1], [0, 0, 1, 1], [], []>} : vector<1x4xf32>, vector<4x256xf32>, vector<1x256xf32> -> vector<1x256xf32>
    %16 = vector.broadcast %15 : vector<1x256xf32> to vector<2x256xf32>
    %17 = arith.subf %5, %16 : vector<2x256xf32>
    %18 = arith.mulf %17, %17 : vector<2x256xf32>
    %cst_17 = arith.constant dense<0.000000e+00> : vector<256xf32>
    %19 = vector.multi_reduction <add>, %18, %cst_17 [0] : vector<2x256xf32> to vector<256xf32>
    %20 = vector.shape_cast %19 : vector<256xf32> to vector<1x256xf32>
    %cst_18 = arith.constant dense<0.000000e+00> : vector<1x4xf32>
    %21 = tpu.matmul %20, %8, %cst_18 {dimension_numbers = #tpu.dot_dimension_numbers<[1], [0], [0], [1], [0, 0, 1, 1], [], []>} : vector<1x256xf32>, vector<256x4xf32>, vector<1x4xf32> -> vector<1x4xf32>
    %cst_19 = arith.constant 7.812500e-03 : f32
    %22 = vector.broadcast %cst_19 : f32 to vector<1x4xf32>
    %23 = arith.mulf %21, %22 : vector<1x4xf32>
    %cst_20 = arith.constant 9.99999974E-6 : f32
    %24 = vector.broadcast %cst_20 : f32 to vector<1x4xf32>
    %25 = arith.addf %23, %24 : vector<1x4xf32>
    %26 = math.rsqrt %25 : vector<1x4xf32>
    %cst_21 = arith.constant dense<0.000000e+00> : vector<1x256xf32>
    %27 = tpu.matmul %26, %9, %cst_21 {dimension_numbers = #tpu.dot_dimension_numbers<[1], [0], [0], [1], [0, 0, 1, 1], [], []>} : vector<1x4xf32>, vector<4x256xf32>, vector<1x256xf32> -> vector<1x256xf32>
    %28 = vector.broadcast %27 : vector<1x256xf32> to vector<2x256xf32>
    %29 = arith.mulf %17, %28 : vector<2x256xf32>
    %30 = vector.broadcast %6 : vector<1x256xf32> to vector<2x256xf32>
    %31 = arith.mulf %29, %30 : vector<2x256xf32>
    %32 = vector.broadcast %7 : vector<1x256xf32> to vector<2x256xf32>
    %33 = arith.addf %31, %32 : vector<2x256xf32>
    %cst_22 = arith.constant 0.000000e+00 : f32
    %34 = vector.broadcast %cst_22 : f32 to vector<2x256xf32>
    %35 = arith.cmpf oge, %33, %34 : vector<2x256xf32>
    %cst_23 = arith.constant 2.000000e-01 : f32
    %36 = vector.broadcast %cst_23 : f32 to vector<2x256xf32>
    %37 = arith.mulf %36, %33 : vector<2x256xf32>
    %38 = arith.select %35, %33, %37 : vector<2x256xi1>, vector<2x256xf32>
    %c0_24 = arith.constant 0 : index
    %c0_25 = arith.constant 0 : index
    %39 = vector.load %arg7[%c0_24, %c0_25] : memref<256x64xf32, #tpu.memory_space<vmem>>, vector<256x64xf32>
    %cst_26 = arith.constant dense<0.000000e+00> : vector<2x64xf32>
    %40 = tpu.matmul %38, %39, %cst_26 {dimension_numbers = #tpu.dot_dimension_numbers<[1], [0], [0], [1], [0, 0, 1, 1], [], []>} : vector<2x256xf32>, vector<256x64xf32>, vector<2x64xf32> -> vector<2x64xf32>
    %c0_27 = arith.constant 0 : index
    %c0_28 = arith.constant 0 : index
    %41 = vector.load %arg8[%c0_27, %c0_28] : memref<1x64xf32, #tpu.memory_space<vmem>>, vector<1x64xf32>
    %42 = vector.broadcast %41 : vector<1x64xf32> to vector<2x64xf32>
    %43 = arith.addf %40, %42 : vector<2x64xf32>
    %c0_29 = arith.constant 0 : index
    %c0_30 = arith.constant 0 : index
    %44 = vector.load %arg9[%c0_29, %c0_30] : memref<1x64xf32, #tpu.memory_space<vmem>>, vector<1x64xf32>
    %c0_31 = arith.constant 0 : index
    %c0_32 = arith.constant 0 : index
    %45 = vector.load %arg10[%c0_31, %c0_32] : memref<1x64xf32, #tpu.memory_space<vmem>>, vector<1x64xf32>
    %c0_33 = arith.constant 0 : index
    %c0_34 = arith.constant 0 : index
    %46 = vector.load %arg11[%c0_33, %c0_34] : memref<64x4xf32, #tpu.memory_space<vmem>>, vector<64x4xf32>
    %c0_35 = arith.constant 0 : index
    %c0_36 = arith.constant 0 : index
    %47 = vector.load %arg12[%c0_35, %c0_36] : memref<4x64xf32, #tpu.memory_space<vmem>>, vector<4x64xf32>
    %cst_37 = arith.constant dense<0.000000e+00> : vector<64xf32>
    %48 = vector.multi_reduction <add>, %43, %cst_37 [0] : vector<2x64xf32> to vector<64xf32>
    %49 = vector.shape_cast %48 : vector<64xf32> to vector<1x64xf32>
    %cst_38 = arith.constant dense<0.000000e+00> : vector<1x4xf32>
    %50 = tpu.matmul %49, %46, %cst_38 {dimension_numbers = #tpu.dot_dimension_numbers<[1], [0], [0], [1], [0, 0, 1, 1], [], []>} : vector<1x64xf32>, vector<64x4xf32>, vector<1x4xf32> -> vector<1x4xf32>
    %cst_39 = arith.constant 3.125000e-02 : f32
    %51 = vector.broadcast %cst_39 : f32 to vector<1x4xf32>
    %52 = arith.mulf %50, %51 : vector<1x4xf32>
    %cst_40 = arith.constant dense<0.000000e+00> : vector<1x64xf32>
    %53 = tpu.matmul %52, %47, %cst_40 {dimension_numbers = #tpu.dot_dimension_numbers<[1], [0], [0], [1], [0, 0, 1, 1], [], []>} : vector<1x4xf32>, vector<4x64xf32>, vector<1x64xf32> -> vector<1x64xf32>
    %54 = vector.broadcast %53 : vector<1x64xf32> to vector<2x64xf32>
    %55 = arith.subf %43, %54 : vector<2x64xf32>
    %56 = arith.mulf %55, %55 : vector<2x64xf32>
    %cst_41 = arith.constant dense<0.000000e+00> : vector<64xf32>
    %57 = vector.multi_reduction <add>, %56, %cst_41 [0] : vector<2x64xf32> to vector<64xf32>
    %58 = vector.shape_cast %57 : vector<64xf32> to vector<1x64xf32>
    %cst_42 = arith.constant dense<0.000000e+00> : vector<1x4xf32>
    %59 = tpu.matmul %58, %46, %cst_42 {dimension_numbers = #tpu.dot_dimension_numbers<[1], [0], [0], [1], [0, 0, 1, 1], [], []>} : vector<1x64xf32>, vector<64x4xf32>, vector<1x4xf32> -> vector<1x4xf32>
    %cst_43 = arith.constant 3.125000e-02 : f32
    %60 = vector.broadcast %cst_43 : f32 to vector<1x4xf32>
    %61 = arith.mulf %59, %60 : vector<1x4xf32>
    %cst_44 = arith.constant 9.99999974E-6 : f32
    %62 = vector.broadcast %cst_44 : f32 to vector<1x4xf32>
    %63 = arith.addf %61, %62 : vector<1x4xf32>
    %64 = math.rsqrt %63 : vector<1x4xf32>
    %cst_45 = arith.constant dense<0.000000e+00> : vector<1x64xf32>
    %65 = tpu.matmul %64, %47, %cst_45 {dimension_numbers = #tpu.dot_dimension_numbers<[1], [0], [0], [1], [0, 0, 1, 1], [], []>} : vector<1x4xf32>, vector<4x64xf32>, vector<1x64xf32> -> vector<1x64xf32>
    %66 = vector.broadcast %65 : vector<1x64xf32> to vector<2x64xf32>
    %67 = arith.mulf %55, %66 : vector<2x64xf32>
    %68 = vector.broadcast %44 : vector<1x64xf32> to vector<2x64xf32>
    %69 = arith.mulf %67, %68 : vector<2x64xf32>
    %70 = vector.broadcast %45 : vector<1x64xf32> to vector<2x64xf32>
    %71 = arith.addf %69, %70 : vector<2x64xf32>
    %cst_46 = arith.constant 0.000000e+00 : f32
    %72 = vector.broadcast %cst_46 : f32 to vector<2x64xf32>
    %73 = arith.cmpf oge, %71, %72 : vector<2x64xf32>
    %cst_47 = arith.constant 2.000000e-01 : f32
    %74 = vector.broadcast %cst_47 : f32 to vector<2x64xf32>
    %75 = arith.mulf %74, %71 : vector<2x64xf32>
    %76 = arith.select %73, %71, %75 : vector<2x64xi1>, vector<2x64xf32>
    %c0_48 = arith.constant 0 : index
    %c0_49 = arith.constant 0 : index
    %77 = vector.load %arg13[%c0_48, %c0_49] : memref<64x16xf32, #tpu.memory_space<vmem>>, vector<64x16xf32>
    %cst_50 = arith.constant dense<0.000000e+00> : vector<2x16xf32>
    %78 = tpu.matmul %76, %77, %cst_50 {dimension_numbers = #tpu.dot_dimension_numbers<[1], [0], [0], [1], [0, 0, 1, 1], [], []>} : vector<2x64xf32>, vector<64x16xf32>, vector<2x16xf32> -> vector<2x16xf32>
    %c0_51 = arith.constant 0 : index
    %c0_52 = arith.constant 0 : index
    %79 = vector.load %arg14[%c0_51, %c0_52] : memref<1x16xf32, #tpu.memory_space<vmem>>, vector<1x16xf32>
    %80 = vector.broadcast %79 : vector<1x16xf32> to vector<2x16xf32>
    %81 = arith.addf %78, %80 : vector<2x16xf32>
    %c0_53 = arith.constant 0 : index
    %c0_54 = arith.constant 0 : index
    %82 = vector.load %arg15[%c0_53, %c0_54] : memref<1x16xf32, #tpu.memory_space<vmem>>, vector<1x16xf32>
    %c0_55 = arith.constant 0 : index
    %c0_56 = arith.constant 0 : index
    %83 = vector.load %arg16[%c0_55, %c0_56] : memref<1x16xf32, #tpu.memory_space<vmem>>, vector<1x16xf32>
    %c0_57 = arith.constant 0 : index
    %c0_58 = arith.constant 0 : index
    %84 = vector.load %arg17[%c0_57, %c0_58] : memref<16x4xf32, #tpu.memory_space<vmem>>, vector<16x4xf32>
    %c0_59 = arith.constant 0 : index
    %c0_60 = arith.constant 0 : index
    %85 = vector.load %arg18[%c0_59, %c0_60] : memref<4x16xf32, #tpu.memory_space<vmem>>, vector<4x16xf32>
    %cst_61 = arith.constant dense<0.000000e+00> : vector<16xf32>
    %86 = vector.multi_reduction <add>, %81, %cst_61 [0] : vector<2x16xf32> to vector<16xf32>
    %87 = vector.shape_cast %86 : vector<16xf32> to vector<1x16xf32>
    %cst_62 = arith.constant dense<0.000000e+00> : vector<1x4xf32>
    %88 = tpu.matmul %87, %84, %cst_62 {dimension_numbers = #tpu.dot_dimension_numbers<[1], [0], [0], [1], [0, 0, 1, 1], [], []>} : vector<1x16xf32>, vector<16x4xf32>, vector<1x4xf32> -> vector<1x4xf32>
    %cst_63 = arith.constant 1.250000e-01 : f32
    %89 = vector.broadcast %cst_63 : f32 to vector<1x4xf32>
    %90 = arith.mulf %88, %89 : vector<1x4xf32>
    %cst_64 = arith.constant dense<0.000000e+00> : vector<1x16xf32>
    %91 = tpu.matmul %90, %85, %cst_64 {dimension_numbers = #tpu.dot_dimension_numbers<[1], [0], [0], [1], [0, 0, 1, 1], [], []>} : vector<1x4xf32>, vector<4x16xf32>, vector<1x16xf32> -> vector<1x16xf32>
    %92 = vector.broadcast %91 : vector<1x16xf32> to vector<2x16xf32>
    %93 = arith.subf %81, %92 : vector<2x16xf32>
    %94 = arith.mulf %93, %93 : vector<2x16xf32>
    %cst_65 = arith.constant dense<0.000000e+00> : vector<16xf32>
    %95 = vector.multi_reduction <add>, %94, %cst_65 [0] : vector<2x16xf32> to vector<16xf32>
    %96 = vector.shape_cast %95 : vector<16xf32> to vector<1x16xf32>
    %cst_66 = arith.constant dense<0.000000e+00> : vector<1x4xf32>
    %97 = tpu.matmul %96, %84, %cst_66 {dimension_numbers = #tpu.dot_dimension_numbers<[1], [0], [0], [1], [0, 0, 1, 1], [], []>} : vector<1x16xf32>, vector<16x4xf32>, vector<1x4xf32> -> vector<1x4xf32>
    %cst_67 = arith.constant 1.250000e-01 : f32
    %98 = vector.broadcast %cst_67 : f32 to vector<1x4xf32>
    %99 = arith.mulf %97, %98 : vector<1x4xf32>
    %cst_68 = arith.constant 9.99999974E-6 : f32
    %100 = vector.broadcast %cst_68 : f32 to vector<1x4xf32>
    %101 = arith.addf %99, %100 : vector<1x4xf32>
    %102 = math.rsqrt %101 : vector<1x4xf32>
    %cst_69 = arith.constant dense<0.000000e+00> : vector<1x16xf32>
    %103 = tpu.matmul %102, %85, %cst_69 {dimension_numbers = #tpu.dot_dimension_numbers<[1], [0], [0], [1], [0, 0, 1, 1], [], []>} : vector<1x4xf32>, vector<4x16xf32>, vector<1x16xf32> -> vector<1x16xf32>
    %104 = vector.broadcast %103 : vector<1x16xf32> to vector<2x16xf32>
    %105 = arith.mulf %93, %104 : vector<2x16xf32>
    %106 = vector.broadcast %82 : vector<1x16xf32> to vector<2x16xf32>
    %107 = arith.mulf %105, %106 : vector<2x16xf32>
    %108 = vector.broadcast %83 : vector<1x16xf32> to vector<2x16xf32>
    %109 = arith.addf %107, %108 : vector<2x16xf32>
    %cst_70 = arith.constant 0.000000e+00 : f32
    %110 = vector.broadcast %cst_70 : f32 to vector<2x16xf32>
    %111 = arith.cmpf oge, %109, %110 : vector<2x16xf32>
    %cst_71 = arith.constant 2.000000e-01 : f32
    %112 = vector.broadcast %cst_71 : f32 to vector<2x16xf32>
    %113 = arith.mulf %112, %109 : vector<2x16xf32>
    %114 = arith.select %111, %109, %113 : vector<2x16xi1>, vector<2x16xf32>
    %c0_72 = arith.constant 0 : index
    %c0_73 = arith.constant 0 : index
    %115 = vector.load %arg19[%c0_72, %c0_73] : memref<16x4xf32, #tpu.memory_space<vmem>>, vector<16x4xf32>
    %cst_74 = arith.constant dense<0.000000e+00> : vector<2x4xf32>
    %116 = tpu.matmul %114, %115, %cst_74 {dimension_numbers = #tpu.dot_dimension_numbers<[1], [0], [0], [1], [0, 0, 1, 1], [], []>} : vector<2x16xf32>, vector<16x4xf32>, vector<2x4xf32> -> vector<2x4xf32>
    %c0_75 = arith.constant 0 : index
    %c0_76 = arith.constant 0 : index
    %117 = vector.load %arg20[%c0_75, %c0_76] : memref<1x4xf32, #tpu.memory_space<vmem>>, vector<1x4xf32>
    %118 = vector.broadcast %117 : vector<1x4xf32> to vector<2x4xf32>
    %119 = arith.addf %116, %118 : vector<2x4xf32>
    %c0_77 = arith.constant 0 : index
    %c0_78 = arith.constant 0 : index
    %120 = vector.load %arg21[%c0_77, %c0_78] : memref<1x4xf32, #tpu.memory_space<vmem>>, vector<1x4xf32>
    %c0_79 = arith.constant 0 : index
    %c0_80 = arith.constant 0 : index
    %121 = vector.load %arg22[%c0_79, %c0_80] : memref<1x4xf32, #tpu.memory_space<vmem>>, vector<1x4xf32>
    %c0_81 = arith.constant 0 : index
    %c0_82 = arith.constant 0 : index
    %122 = vector.load %arg23[%c0_81, %c0_82] : memref<4x4xf32, #tpu.memory_space<vmem>>, vector<4x4xf32>
    %c0_83 = arith.constant 0 : index
    %c0_84 = arith.constant 0 : index
    %123 = vector.load %arg24[%c0_83, %c0_84] : memref<4x4xf32, #tpu.memory_space<vmem>>, vector<4x4xf32>
    %cst_85 = arith.constant dense<0.000000e+00> : vector<4xf32>
    %124 = vector.multi_reduction <add>, %119, %cst_85 [0] : vector<2x4xf32> to vector<4xf32>
    %125 = vector.shape_cast %124 : vector<4xf32> to vector<1x4xf32>
    %cst_86 = arith.constant dense<0.000000e+00> : vector<1x4xf32>
    %126 = tpu.matmul %125, %122, %cst_86 {dimension_numbers = #tpu.dot_dimension_numbers<[1], [0], [0], [1], [0, 0, 1, 1], [], []>} : vector<1x4xf32>, vector<4x4xf32>, vector<1x4xf32> -> vector<1x4xf32>
    %cst_87 = arith.constant 5.000000e-01 : f32
    %127 = vector.broadcast %cst_87 : f32 to vector<1x4xf32>
    %128 = arith.mulf %126, %127 : vector<1x4xf32>
    %cst_88 = arith.constant dense<0.000000e+00> : vector<1x4xf32>
    %129 = tpu.matmul %128, %123, %cst_88 {dimension_numbers = #tpu.dot_dimension_numbers<[1], [0], [0], [1], [0, 0, 1, 1], [], []>} : vector<1x4xf32>, vector<4x4xf32>, vector<1x4xf32> -> vector<1x4xf32>
    %130 = vector.broadcast %129 : vector<1x4xf32> to vector<2x4xf32>
    %131 = arith.subf %119, %130 : vector<2x4xf32>
    %132 = arith.mulf %131, %131 : vector<2x4xf32>
    %cst_89 = arith.constant dense<0.000000e+00> : vector<4xf32>
    %133 = vector.multi_reduction <add>, %132, %cst_89 [0] : vector<2x4xf32> to vector<4xf32>
    %134 = vector.shape_cast %133 : vector<4xf32> to vector<1x4xf32>
    %cst_90 = arith.constant dense<0.000000e+00> : vector<1x4xf32>
    %135 = tpu.matmul %134, %122, %cst_90 {dimension_numbers = #tpu.dot_dimension_numbers<[1], [0], [0], [1], [0, 0, 1, 1], [], []>} : vector<1x4xf32>, vector<4x4xf32>, vector<1x4xf32> -> vector<1x4xf32>
    %cst_91 = arith.constant 5.000000e-01 : f32
    %136 = vector.broadcast %cst_91 : f32 to vector<1x4xf32>
    %137 = arith.mulf %135, %136 : vector<1x4xf32>
    %cst_92 = arith.constant 9.99999974E-6 : f32
    %138 = vector.broadcast %cst_92 : f32 to vector<1x4xf32>
    %139 = arith.addf %137, %138 : vector<1x4xf32>
    %140 = math.rsqrt %139 : vector<1x4xf32>
    %cst_93 = arith.constant dense<0.000000e+00> : vector<1x4xf32>
    %141 = tpu.matmul %140, %123, %cst_93 {dimension_numbers = #tpu.dot_dimension_numbers<[1], [0], [0], [1], [0, 0, 1, 1], [], []>} : vector<1x4xf32>, vector<4x4xf32>, vector<1x4xf32> -> vector<1x4xf32>
    %142 = vector.broadcast %141 : vector<1x4xf32> to vector<2x4xf32>
    %143 = arith.mulf %131, %142 : vector<2x4xf32>
    %144 = vector.broadcast %120 : vector<1x4xf32> to vector<2x4xf32>
    %145 = arith.mulf %143, %144 : vector<2x4xf32>
    %146 = vector.broadcast %121 : vector<1x4xf32> to vector<2x4xf32>
    %147 = arith.addf %145, %146 : vector<2x4xf32>
    %cst_94 = arith.constant 0.000000e+00 : f32
    %148 = vector.broadcast %cst_94 : f32 to vector<2x4xf32>
    %149 = arith.cmpf oge, %147, %148 : vector<2x4xf32>
    %cst_95 = arith.constant 2.000000e-01 : f32
    %150 = vector.broadcast %cst_95 : f32 to vector<2x4xf32>
    %151 = arith.mulf %150, %147 : vector<2x4xf32>
    %152 = arith.select %149, %147, %151 : vector<2x4xi1>, vector<2x4xf32>
    %c0_96 = arith.constant 0 : index
    %c0_97 = arith.constant 0 : index
    %153 = vector.load %arg25[%c0_96, %c0_97] : memref<4x16xf32, #tpu.memory_space<vmem>>, vector<4x16xf32>
    %cst_98 = arith.constant dense<0.000000e+00> : vector<2x16xf32>
    %154 = tpu.matmul %152, %153, %cst_98 {dimension_numbers = #tpu.dot_dimension_numbers<[1], [0], [0], [1], [0, 0, 1, 1], [], []>} : vector<2x4xf32>, vector<4x16xf32>, vector<2x16xf32> -> vector<2x16xf32>
    %c0_99 = arith.constant 0 : index
    %c0_100 = arith.constant 0 : index
    %155 = vector.load %arg26[%c0_99, %c0_100] : memref<1x16xf32, #tpu.memory_space<vmem>>, vector<1x16xf32>
    %156 = vector.broadcast %155 : vector<1x16xf32> to vector<2x16xf32>
    %157 = arith.addf %154, %156 : vector<2x16xf32>
    %cst_101 = arith.constant 0.000000e+00 : f32
    %158 = vector.broadcast %cst_101 : f32 to vector<2x16xf32>
    %159 = arith.maximumf %157, %158 : vector<2x16xf32>
    %c0_102 = arith.constant 0 : index
    %c0_103 = arith.constant 0 : index
    %160 = vector.load %arg27[%c0_102, %c0_103] : memref<16x64xf32, #tpu.memory_space<vmem>>, vector<16x64xf32>
    %cst_104 = arith.constant dense<0.000000e+00> : vector<2x64xf32>
    %161 = tpu.matmul %159, %160, %cst_104 {dimension_numbers = #tpu.dot_dimension_numbers<[1], [0], [0], [1], [0, 0, 1, 1], [], []>} : vector<2x16xf32>, vector<16x64xf32>, vector<2x64xf32> -> vector<2x64xf32>
    %c0_105 = arith.constant 0 : index
    %c0_106 = arith.constant 0 : index
    %162 = vector.load %arg28[%c0_105, %c0_106] : memref<16x64xf32, #tpu.memory_space<vmem>>, vector<16x64xf32>
    %cst_107 = arith.constant dense<0.000000e+00> : vector<2x64xf32>
    %163 = tpu.matmul %114, %162, %cst_107 {dimension_numbers = #tpu.dot_dimension_numbers<[1], [0], [0], [1], [0, 0, 1, 1], [], []>} : vector<2x16xf32>, vector<16x64xf32>, vector<2x64xf32> -> vector<2x64xf32>
    %164 = arith.addf %161, %163 : vector<2x64xf32>
    %c0_108 = arith.constant 0 : index
    %c0_109 = arith.constant 0 : index
    %165 = vector.load %arg29[%c0_108, %c0_109] : memref<1x64xf32, #tpu.memory_space<vmem>>, vector<1x64xf32>
    %166 = vector.broadcast %165 : vector<1x64xf32> to vector<2x64xf32>
    %167 = arith.addf %164, %166 : vector<2x64xf32>
    %c0_110 = arith.constant 0 : index
    %c0_111 = arith.constant 0 : index
    %168 = vector.load %arg30[%c0_110, %c0_111] : memref<1x64xf32, #tpu.memory_space<vmem>>, vector<1x64xf32>
    %c0_112 = arith.constant 0 : index
    %c0_113 = arith.constant 0 : index
    %169 = vector.load %arg31[%c0_112, %c0_113] : memref<1x64xf32, #tpu.memory_space<vmem>>, vector<1x64xf32>
    %c0_114 = arith.constant 0 : index
    %c0_115 = arith.constant 0 : index
    %170 = vector.load %arg32[%c0_114, %c0_115] : memref<64x4xf32, #tpu.memory_space<vmem>>, vector<64x4xf32>
    %c0_116 = arith.constant 0 : index
    %c0_117 = arith.constant 0 : index
    %171 = vector.load %arg33[%c0_116, %c0_117] : memref<4x64xf32, #tpu.memory_space<vmem>>, vector<4x64xf32>
    %cst_118 = arith.constant dense<0.000000e+00> : vector<64xf32>
    %172 = vector.multi_reduction <add>, %167, %cst_118 [0] : vector<2x64xf32> to vector<64xf32>
    %173 = vector.shape_cast %172 : vector<64xf32> to vector<1x64xf32>
    %cst_119 = arith.constant dense<0.000000e+00> : vector<1x4xf32>
    %174 = tpu.matmul %173, %170, %cst_119 {dimension_numbers = #tpu.dot_dimension_numbers<[1], [0], [0], [1], [0, 0, 1, 1], [], []>} : vector<1x64xf32>, vector<64x4xf32>, vector<1x4xf32> -> vector<1x4xf32>
    %cst_120 = arith.constant 3.125000e-02 : f32
    %175 = vector.broadcast %cst_120 : f32 to vector<1x4xf32>
    %176 = arith.mulf %174, %175 : vector<1x4xf32>
    %cst_121 = arith.constant dense<0.000000e+00> : vector<1x64xf32>
    %177 = tpu.matmul %176, %171, %cst_121 {dimension_numbers = #tpu.dot_dimension_numbers<[1], [0], [0], [1], [0, 0, 1, 1], [], []>} : vector<1x4xf32>, vector<4x64xf32>, vector<1x64xf32> -> vector<1x64xf32>
    %178 = vector.broadcast %177 : vector<1x64xf32> to vector<2x64xf32>
    %179 = arith.subf %167, %178 : vector<2x64xf32>
    %180 = arith.mulf %179, %179 : vector<2x64xf32>
    %cst_122 = arith.constant dense<0.000000e+00> : vector<64xf32>
    %181 = vector.multi_reduction <add>, %180, %cst_122 [0] : vector<2x64xf32> to vector<64xf32>
    %182 = vector.shape_cast %181 : vector<64xf32> to vector<1x64xf32>
    %cst_123 = arith.constant dense<0.000000e+00> : vector<1x4xf32>
    %183 = tpu.matmul %182, %170, %cst_123 {dimension_numbers = #tpu.dot_dimension_numbers<[1], [0], [0], [1], [0, 0, 1, 1], [], []>} : vector<1x64xf32>, vector<64x4xf32>, vector<1x4xf32> -> vector<1x4xf32>
    %cst_124 = arith.constant 3.125000e-02 : f32
    %184 = vector.broadcast %cst_124 : f32 to vector<1x4xf32>
    %185 = arith.mulf %183, %184 : vector<1x4xf32>
    %cst_125 = arith.constant 9.99999974E-6 : f32
    %186 = vector.broadcast %cst_125 : f32 to vector<1x4xf32>
    %187 = arith.addf %185, %186 : vector<1x4xf32>
    %188 = math.rsqrt %187 : vector<1x4xf32>
    %cst_126 = arith.constant dense<0.000000e+00> : vector<1x64xf32>
    %189 = tpu.matmul %188, %171, %cst_126 {dimension_numbers = #tpu.dot_dimension_numbers<[1], [0], [0], [1], [0, 0, 1, 1], [], []>} : vector<1x4xf32>, vector<4x64xf32>, vector<1x64xf32> -> vector<1x64xf32>
    %190 = vector.broadcast %189 : vector<1x64xf32> to vector<2x64xf32>
    %191 = arith.mulf %179, %190 : vector<2x64xf32>
    %192 = vector.broadcast %168 : vector<1x64xf32> to vector<2x64xf32>
    %193 = arith.mulf %191, %192 : vector<2x64xf32>
    %194 = vector.broadcast %169 : vector<1x64xf32> to vector<2x64xf32>
    %195 = arith.addf %193, %194 : vector<2x64xf32>
    %cst_127 = arith.constant 0.000000e+00 : f32
    %196 = vector.broadcast %cst_127 : f32 to vector<2x64xf32>
    %197 = arith.maximumf %195, %196 : vector<2x64xf32>
    %c0_128 = arith.constant 0 : index
    %c0_129 = arith.constant 0 : index
    %198 = vector.load %arg34[%c0_128, %c0_129] : memref<64x256xf32, #tpu.memory_space<vmem>>, vector<64x256xf32>
    %cst_130 = arith.constant dense<0.000000e+00> : vector<2x256xf32>
    %199 = tpu.matmul %197, %198, %cst_130 {dimension_numbers = #tpu.dot_dimension_numbers<[1], [0], [0], [1], [0, 0, 1, 1], [], []>} : vector<2x64xf32>, vector<64x256xf32>, vector<2x256xf32> -> vector<2x256xf32>
    %c0_131 = arith.constant 0 : index
    %c0_132 = arith.constant 0 : index
    %200 = vector.load %arg35[%c0_131, %c0_132] : memref<64x256xf32, #tpu.memory_space<vmem>>, vector<64x256xf32>
    %cst_133 = arith.constant dense<0.000000e+00> : vector<2x256xf32>
    %201 = tpu.matmul %76, %200, %cst_133 {dimension_numbers = #tpu.dot_dimension_numbers<[1], [0], [0], [1], [0, 0, 1, 1], [], []>} : vector<2x64xf32>, vector<64x256xf32>, vector<2x256xf32> -> vector<2x256xf32>
    %202 = arith.addf %199, %201 : vector<2x256xf32>
    %c0_134 = arith.constant 0 : index
    %c0_135 = arith.constant 0 : index
    %203 = vector.load %arg36[%c0_134, %c0_135] : memref<1x256xf32, #tpu.memory_space<vmem>>, vector<1x256xf32>
    %204 = vector.broadcast %203 : vector<1x256xf32> to vector<2x256xf32>
    %205 = arith.addf %202, %204 : vector<2x256xf32>
    %c0_136 = arith.constant 0 : index
    %c0_137 = arith.constant 0 : index
    %206 = vector.load %arg37[%c0_136, %c0_137] : memref<1x256xf32, #tpu.memory_space<vmem>>, vector<1x256xf32>
    %c0_138 = arith.constant 0 : index
    %c0_139 = arith.constant 0 : index
    %207 = vector.load %arg38[%c0_138, %c0_139] : memref<1x256xf32, #tpu.memory_space<vmem>>, vector<1x256xf32>
    %c0_140 = arith.constant 0 : index
    %c0_141 = arith.constant 0 : index
    %208 = vector.load %arg39[%c0_140, %c0_141] : memref<256x4xf32, #tpu.memory_space<vmem>>, vector<256x4xf32>
    %c0_142 = arith.constant 0 : index
    %c0_143 = arith.constant 0 : index
    %209 = vector.load %arg40[%c0_142, %c0_143] : memref<4x256xf32, #tpu.memory_space<vmem>>, vector<4x256xf32>
    %cst_144 = arith.constant dense<0.000000e+00> : vector<256xf32>
    %210 = vector.multi_reduction <add>, %205, %cst_144 [0] : vector<2x256xf32> to vector<256xf32>
    %211 = vector.shape_cast %210 : vector<256xf32> to vector<1x256xf32>
    %cst_145 = arith.constant dense<0.000000e+00> : vector<1x4xf32>
    %212 = tpu.matmul %211, %208, %cst_145 {dimension_numbers = #tpu.dot_dimension_numbers<[1], [0], [0], [1], [0, 0, 1, 1], [], []>} : vector<1x256xf32>, vector<256x4xf32>, vector<1x4xf32> -> vector<1x4xf32>
    %cst_146 = arith.constant 7.812500e-03 : f32
    %213 = vector.broadcast %cst_146 : f32 to vector<1x4xf32>
    %214 = arith.mulf %212, %213 : vector<1x4xf32>
    %cst_147 = arith.constant dense<0.000000e+00> : vector<1x256xf32>
    %215 = tpu.matmul %214, %209, %cst_147 {dimension_numbers = #tpu.dot_dimension_numbers<[1], [0], [0], [1], [0, 0, 1, 1], [], []>} : vector<1x4xf32>, vector<4x256xf32>, vector<1x256xf32> -> vector<1x256xf32>
    %216 = vector.broadcast %215 : vector<1x256xf32> to vector<2x256xf32>
    %217 = arith.subf %205, %216 : vector<2x256xf32>
    %218 = arith.mulf %217, %217 : vector<2x256xf32>
    %cst_148 = arith.constant dense<0.000000e+00> : vector<256xf32>
    %219 = vector.multi_reduction <add>, %218, %cst_148 [0] : vector<2x256xf32> to vector<256xf32>
    %220 = vector.shape_cast %219 : vector<256xf32> to vector<1x256xf32>
    %cst_149 = arith.constant dense<0.000000e+00> : vector<1x4xf32>
    %221 = tpu.matmul %220, %208, %cst_149 {dimension_numbers = #tpu.dot_dimension_numbers<[1], [0], [0], [1], [0, 0, 1, 1], [], []>} : vector<1x256xf32>, vector<256x4xf32>, vector<1x4xf32> -> vector<1x4xf32>
    %cst_150 = arith.constant 7.812500e-03 : f32
    %222 = vector.broadcast %cst_150 : f32 to vector<1x4xf32>
    %223 = arith.mulf %221, %222 : vector<1x4xf32>
    %cst_151 = arith.constant 9.99999974E-6 : f32
    %224 = vector.broadcast %cst_151 : f32 to vector<1x4xf32>
    %225 = arith.addf %223, %224 : vector<1x4xf32>
    %226 = math.rsqrt %225 : vector<1x4xf32>
    %cst_152 = arith.constant dense<0.000000e+00> : vector<1x256xf32>
    %227 = tpu.matmul %226, %209, %cst_152 {dimension_numbers = #tpu.dot_dimension_numbers<[1], [0], [0], [1], [0, 0, 1, 1], [], []>} : vector<1x4xf32>, vector<4x256xf32>, vector<1x256xf32> -> vector<1x256xf32>
    %228 = vector.broadcast %227 : vector<1x256xf32> to vector<2x256xf32>
    %229 = arith.mulf %217, %228 : vector<2x256xf32>
    %230 = vector.broadcast %206 : vector<1x256xf32> to vector<2x256xf32>
    %231 = arith.mulf %229, %230 : vector<2x256xf32>
    %232 = vector.broadcast %207 : vector<1x256xf32> to vector<2x256xf32>
    %233 = arith.addf %231, %232 : vector<2x256xf32>
    %cst_153 = arith.constant 0.000000e+00 : f32
    %234 = vector.broadcast %cst_153 : f32 to vector<2x256xf32>
    %235 = arith.maximumf %233, %234 : vector<2x256xf32>
    %c0_154 = arith.constant 0 : index
    %c0_155 = arith.constant 0 : index
    %236 = vector.load %arg41[%c0_154, %c0_155] : memref<256x1024xf32, #tpu.memory_space<vmem>>, vector<256x1024xf32>
    %cst_156 = arith.constant dense<0.000000e+00> : vector<2x1024xf32>
    %237 = tpu.matmul %235, %236, %cst_156 {dimension_numbers = #tpu.dot_dimension_numbers<[1], [0], [0], [1], [0, 0, 1, 1], [], []>} : vector<2x256xf32>, vector<256x1024xf32>, vector<2x1024xf32> -> vector<2x1024xf32>
    %c0_157 = arith.constant 0 : index
    %c0_158 = arith.constant 0 : index
    %238 = vector.load %arg42[%c0_157, %c0_158] : memref<256x1024xf32, #tpu.memory_space<vmem>>, vector<256x1024xf32>
    %cst_159 = arith.constant dense<0.000000e+00> : vector<2x1024xf32>
    %239 = tpu.matmul %38, %238, %cst_159 {dimension_numbers = #tpu.dot_dimension_numbers<[1], [0], [0], [1], [0, 0, 1, 1], [], []>} : vector<2x256xf32>, vector<256x1024xf32>, vector<2x1024xf32> -> vector<2x1024xf32>
    %240 = arith.addf %237, %239 : vector<2x1024xf32>
    %c0_160 = arith.constant 0 : index
    %c0_161 = arith.constant 0 : index
    %241 = vector.load %arg43[%c0_160, %c0_161] : memref<1x1024xf32, #tpu.memory_space<vmem>>, vector<1x1024xf32>
    %242 = vector.broadcast %241 : vector<1x1024xf32> to vector<2x1024xf32>
    %243 = arith.addf %240, %242 : vector<2x1024xf32>
    %c0_162 = arith.constant 0 : index
    %c0_163 = arith.constant 0 : index
    %244 = vector.load %arg44[%c0_162, %c0_163] : memref<1x1024xf32, #tpu.memory_space<vmem>>, vector<1x1024xf32>
    %c0_164 = arith.constant 0 : index
    %c0_165 = arith.constant 0 : index
    %245 = vector.load %arg45[%c0_164, %c0_165] : memref<1x1024xf32, #tpu.memory_space<vmem>>, vector<1x1024xf32>
    %c0_166 = arith.constant 0 : index
    %c0_167 = arith.constant 0 : index
    %246 = vector.load %arg46[%c0_166, %c0_167] : memref<1024x4xf32, #tpu.memory_space<vmem>>, vector<1024x4xf32>
    %c0_168 = arith.constant 0 : index
    %c0_169 = arith.constant 0 : index
    %247 = vector.load %arg47[%c0_168, %c0_169] : memref<4x1024xf32, #tpu.memory_space<vmem>>, vector<4x1024xf32>
    %cst_170 = arith.constant dense<0.000000e+00> : vector<1024xf32>
    %248 = vector.multi_reduction <add>, %243, %cst_170 [0] : vector<2x1024xf32> to vector<1024xf32>
    %249 = vector.shape_cast %248 : vector<1024xf32> to vector<1x1024xf32>
    %cst_171 = arith.constant dense<0.000000e+00> : vector<1x4xf32>
    %250 = tpu.matmul %249, %246, %cst_171 {dimension_numbers = #tpu.dot_dimension_numbers<[1], [0], [0], [1], [0, 0, 1, 1], [], []>} : vector<1x1024xf32>, vector<1024x4xf32>, vector<1x4xf32> -> vector<1x4xf32>
    %cst_172 = arith.constant 0.001953125 : f32
    %251 = vector.broadcast %cst_172 : f32 to vector<1x4xf32>
    %252 = arith.mulf %250, %251 : vector<1x4xf32>
    %cst_173 = arith.constant dense<0.000000e+00> : vector<1x1024xf32>
    %253 = tpu.matmul %252, %247, %cst_173 {dimension_numbers = #tpu.dot_dimension_numbers<[1], [0], [0], [1], [0, 0, 1, 1], [], []>} : vector<1x4xf32>, vector<4x1024xf32>, vector<1x1024xf32> -> vector<1x1024xf32>
    %254 = vector.broadcast %253 : vector<1x1024xf32> to vector<2x1024xf32>
    %255 = arith.subf %243, %254 : vector<2x1024xf32>
    %256 = arith.mulf %255, %255 : vector<2x1024xf32>
    %cst_174 = arith.constant dense<0.000000e+00> : vector<1024xf32>
    %257 = vector.multi_reduction <add>, %256, %cst_174 [0] : vector<2x1024xf32> to vector<1024xf32>
    %258 = vector.shape_cast %257 : vector<1024xf32> to vector<1x1024xf32>
    %cst_175 = arith.constant dense<0.000000e+00> : vector<1x4xf32>
    %259 = tpu.matmul %258, %246, %cst_175 {dimension_numbers = #tpu.dot_dimension_numbers<[1], [0], [0], [1], [0, 0, 1, 1], [], []>} : vector<1x1024xf32>, vector<1024x4xf32>, vector<1x4xf32> -> vector<1x4xf32>
    %cst_176 = arith.constant 0.001953125 : f32
    %260 = vector.broadcast %cst_176 : f32 to vector<1x4xf32>
    %261 = arith.mulf %259, %260 : vector<1x4xf32>
    %cst_177 = arith.constant 9.99999974E-6 : f32
    %262 = vector.broadcast %cst_177 : f32 to vector<1x4xf32>
    %263 = arith.addf %261, %262 : vector<1x4xf32>
    %264 = math.rsqrt %263 : vector<1x4xf32>
    %cst_178 = arith.constant dense<0.000000e+00> : vector<1x1024xf32>
    %265 = tpu.matmul %264, %247, %cst_178 {dimension_numbers = #tpu.dot_dimension_numbers<[1], [0], [0], [1], [0, 0, 1, 1], [], []>} : vector<1x4xf32>, vector<4x1024xf32>, vector<1x1024xf32> -> vector<1x1024xf32>
    %266 = vector.broadcast %265 : vector<1x1024xf32> to vector<2x1024xf32>
    %267 = arith.mulf %255, %266 : vector<2x1024xf32>
    %268 = vector.broadcast %244 : vector<1x1024xf32> to vector<2x1024xf32>
    %269 = arith.mulf %267, %268 : vector<2x1024xf32>
    %270 = vector.broadcast %245 : vector<1x1024xf32> to vector<2x1024xf32>
    %271 = arith.addf %269, %270 : vector<2x1024xf32>
    %cst_179 = arith.constant 0.000000e+00 : f32
    %272 = vector.broadcast %cst_179 : f32 to vector<2x1024xf32>
    %273 = arith.maximumf %271, %272 : vector<2x1024xf32>
    %c0_180 = arith.constant 0 : index
    %c0_181 = arith.constant 0 : index
    %274 = vector.load %arg48[%c0_180, %c0_181] : memref<2x1024xf32, #tpu.memory_space<vmem>>, vector<2x1024xf32>
    tpu.vector_store %arg48[%c0_180, %c0_181], %273 {strides = array<i32>} : memref<2x1024xf32, #tpu.memory_space<vmem>>, vector<2x1024xf32>,
    return
  }
}

</mosaic_0001>

<bundles_post_ra>
// kernel: forward.1
= control target key start
LH: loop header
LB: loop body
LE: loop exit
PB: predicated region body
PF: predicated region fallthrough
CT: control target
= control target key end

     0   :  { %s9590_s6 = smov 1   ;;  %s9591_s10 = smov 2   ;;  %s11456_s0 = inlined_call_operand.smem [shape: u32[49], index: -1, kind: input, shape index: {}] }
   0x1   :  { %s9675_s5 = sld [smem:[%s11456_s0]]   ;;  %s9592_s14 = smov 3  }
   0x2   :  { %s9680_s9 = sld [smem:[%s11456_s0 + %s9590_s6]]   ;;  %s9593_s18 = smov 4  }
   0x3   :  { %s9685_s13 = sld [smem:[%s11456_s0 + %s9591_s10]]   ;;  %s9594_s22 = smov 5  }
   0x4   :  { %s9690_s17 = sld [smem:[%s11456_s0 + %s9592_s14]]   ;;  %s9595_s26 = smov 6  }
   0x5   :  { %s9695_s21 = sld [smem:[%s11456_s0 + %s9593_s18]]   ;;  %s9596_s30 = smov 7  }
   0x6   :  { %s9700_s25 = sld [smem:[%s11456_s0 + %s9594_s22]]   ;;  %s9597_s4 = smov 8  }
   0x7   :  { %11535 = sst [smem:[#allocation49_spill]] %s9675_s5  ;;  %s9598_s10 = smov 9  }
   0x8   :  { %11536 = sst [smem:[#allocation50_spill]] %s9680_s9  ;;  %s9599_s15 = smov 10  }
   0x9   :  { %s9705_s29 = sld [smem:[%s11456_s0 + %s9595_s26]]   ;;  %s9600_s20 = smov 11  }
   0xa   :  { %s9710_s3 = sld [smem:[%s11456_s0 + %s9596_s30]]   ;;  %s9601_s26 = smov 12  }
   0xb   :  { %s9715_s8 = sld [smem:[%s11456_s0 + %s9597_s4]]   ;;  %s9602_s1 = smov 13  }
   0xc   :  { %11537 = sst [smem:[#allocation51_spill]] %s9700_s25  ;;  %s9603_s7 = smov 14  }
   0xd   :  { %s9720_s14 = sld [smem:[%s11456_s0 + %s9598_s10]]   ;;  %s9605_s22 = smov 16  }
   0xe   :  { %s9725_s19 = sld [smem:[%s11456_s0 + %s9599_s15]]   ;;  %s9604_s15 = smov 15  }
   0xf   :  { %s9730_s24 = sld [smem:[%s11456_s0 + %s9600_s20]]   ;;  %s9606_s28 = smov 17  }
  0x10   :  { %11538 = sst [smem:[#allocation52_spill]] %s9710_s3 }
  0x11   :  { %s9735_s30 = sld [smem:[%s11456_s0 + %s9601_s26]]  }
  0x12   :  { %s9740_s6 = sld [smem:[%s11456_s0 + %s9602_s1]]  }
  0x13   :  { %s9745_s12 = sld [smem:[%s11456_s0 + %s9603_s7]]   ;;  %s9607_s7 = smov 18  }
  0x14   :  { %11539 = sst [smem:[#allocation53_spill]] %s9725_s19 }
  0x15   :  { %11540 = sst [smem:[#allocation54_spill]] %s9730_s24 }
  0x16   :  { %s9750_s20 = sld [smem:[%s11456_s0 + %s9604_s15]]   ;;  %s9608_s15 = smov 19  }
  0x17   :  { %s9755_s27 = sld [smem:[%s11456_s0 + %s9605_s22]]   ;;  %s9609_s22 = smov 20  }
  0x18   :  { %11541 = sst [smem:[#allocation55_spill]] %s9740_s6 }
  0x19   :  { %11542 = sst [smem:[#allocation56_spill]] %s9745_s12 }
  0x1a   :  { %s9760_s4 = sld [smem:[%s11456_s0 + %s9606_s28]]   ;;  %s9610_s28 = smov 21  }
  0x1b   :  { %s9765_s6 = sld [smem:[%s11456_s0 + %s9607_s7]]   ;;  %s9611_s7 = smov 22  }
  0x1c   :  { %s9770_s24 = sld [smem:[%s11456_s0 + %s9608_s15]]   ;;  %s9612_s15 = smov 23  }
  0x1d   :  { %11543 = sst [smem:[#allocation57_spill]] %s9755_s27 }
  0x1e   :  { %s9775_s3 = sld [smem:[%s11456_s0 + %s9609_s22]]   ;;  %s9613_s22 = smov 24  }
  0x1f   :  { %s9795_s25 = sld [smem:[%s11456_s0 + %s9613_s22]]   ;;  %s9617_s22 = smov 28  }
  0x20   :  { %11544 = sst [smem:[#allocation58_spill]] %s9760_s4 }
  0x21   :  { %11545 = sst [smem:[#allocation59_spill]] %s9765_s6 }
  0x22   :  { %11546 = sst [smem:[#allocation60_spill]] %s9770_s24 }
  0x23   :  { %s9780_s4 = sld [smem:[%s11456_s0 + %s9610_s28]]   ;;  %s9614_s28 = smov 25  }
  0x24   :  { %s9785_s6 = sld [smem:[%s11456_s0 + %s9611_s7]]   ;;  %s9615_s7 = smov 26  }
  0x25   :  { %s9790_s24 = sld [smem:[%s11456_s0 + %s9612_s15]]   ;;  %s9616_s15 = smov 27  }
  0x26   :  { %s9800_s5 = sld [smem:[%s11456_s0 + %s9614_s28]]   ;;  %s9618_s28 = smov 29  }
  0x27   :  { %s9805_s9 = sld [smem:[%s11456_s0 + %s9615_s7]]   ;;  %s9619_s7 = smov 30  }
  0x28   :  { %s9825_s27 = sld [smem:[%s11456_s0 + %s9619_s7]]   ;;  %s9623_s7 = smov 34  }
  0x29   :  { %11547 = sst [smem:[#allocation61_spill]] %s9780_s4 }
  0x2a   :  { %s9815_s4 = sld [smem:[%s11456_s0 + %s9617_s22]]   ;;  %s9621_s22 = smov 32  }
  0x2b   :  { %11548 = sst [smem:[#allocation62_spill]] %s9790_s24 }
  0x2c   :  { %11549 = sst [smem:[#allocation63_spill]] %s9800_s5 }
  0x2d   :  { %s9810_s24 = sld [smem:[%s11456_s0 + %s9616_s15]]   ;;  %s9620_s15 = smov 31  }
  0x2e   :  { %s9820_s5 = sld [smem:[%s11456_s0 + %s9618_s28]]   ;;  %s9622_s28 = smov 33  }
  0x2f   :  { %s9845_s12 = sld [smem:[%s11456_s0 + %s9623_s7]]   ;;  %s9627_s7 = smov 38  }
  0x30   :  { %11551 = sst [smem:[#allocation65_spill]] %s9815_s4 }
  0x31   :  { %s9835_s4 = sld [smem:[%s11456_s0 + %s9621_s22]]   ;;  %s9625_s22 = smov 36  }
  0x33   :  { %11550 = sst [smem:[#allocation64_spill]] %s9810_s24 }
  0x34   :  { %11552 = sst [smem:[#allocation66_spill]] %s9820_s5 }
  0x35   :  { %s9830_s24 = sld [smem:[%s11456_s0 + %s9620_s15]]   ;;  %s9624_s15 = smov 35  }
  0x36   :  { %s9840_s5 = sld [smem:[%s11456_s0 + %s9622_s28]]   ;;  %s9626_s28 = smov 37  }
  0x37   :  { %11554 = sst [smem:[#allocation68_spill]] %s9835_s4 }
  0x38   :  { %11556 = sst [smem:[#allocation70_spill]] %s9845_s12 }
  0x39   :  { %s9855_s4 = sld [smem:[%s11456_s0 + %s9625_s22]]   ;;  %s9629_s22 = smov 40  }
  0x3a   :  { %s9865_s12 = sld [smem:[%s11456_s0 + %s9627_s7]]   ;;  %s9631_s7 = smov 42  }
  0x3b   :  { %11553 = sst [smem:[#allocation67_spill]] %s9830_s24 }
  0x3c   :  { %11555 = sst [smem:[#allocation69_spill]] %s9840_s5 }
  0x3d   :  { %s9850_s24 = sld [smem:[%s11456_s0 + %s9624_s15]]   ;;  %s9628_s15 = smov 39  }
  0x3e   :  { %s9860_s5 = sld [smem:[%s11456_s0 + %s9626_s28]]   ;;  %s9630_s28 = smov 41  }
  0x3f   :  { %11558 = sst [smem:[#allocation72_spill]] %s9855_s4 }
  0x40   :  { %11560 = sst [smem:[#allocation74_spill]] %s9865_s12 }
  0x41   :  { %s9875_s4 = sld [smem:[%s11456_s0 + %s9629_s22]]   ;;  %s9633_s22 = smov 44  }
  0x42   :  { %s9885_s12 = sld [smem:[%s11456_s0 + %s9631_s7]]   ;;  %s9635_s7 = smov 46  }
  0x43   :  { %11557 = sst [smem:[#allocation71_spill]] %s9850_s24 }
  0x44   :  { %11559 = sst [smem:[#allocation73_spill]] %s9860_s5 }
  0x45   :  { %s9870_s24 = sld [smem:[%s11456_s0 + %s9628_s15]]   ;;  %s9632_s15 = smov 43  }
  0x46   :  { %s9880_s5 = sld [smem:[%s11456_s0 + %s9630_s28]]   ;;  %s9634_s28 = smov 45  }
  0x47   :  { %11562 = sst [smem:[#allocation76_spill]] %s9875_s4 }
  0x48   :  { %11563 = sst [smem:[#allocation77_spill]] %s9885_s12 }
  0x49   :  { %s9895_s4 = sld [smem:[%s11456_s0 + %s9633_s22]]   ;;  %s9637_s22 = smov 48  }
  0x4a   :  { %s9900_s19 = sld [smem:[%s11456_s0 + %s9634_s28]]  }
  0x4b   :  { %11561 = sst [smem:[#allocation75_spill]] %s9870_s24 }
  0x4c   :  { %s9890_s24 = sld [smem:[%s11456_s0 + %s9632_s15]]   ;;  %s9636_s15 = smov 47  }
  0x4d   :  { %s9905_s12 = sld [smem:[%s11456_s0 + %s9635_s7]]  }
  0x4f   :  { %11565 = sst [smem:[#allocation79_spill]] %s9895_s4 }
  0x50   :  { %s9915_s4 = sld [smem:[%s11456_s0 + %s9637_s22]]  }
  0x52   :  { %11564 = sst [smem:[#allocation78_spill]] %s9890_s24 }
  0x53   :  { %s9910_s24 = sld [smem:[%s11456_s0 + %s9636_s15]]  }
  0x54   :  { %102 = vsyncpa [#allocation3], 0 }
  0x55   :  { %103 = vsyncpa [#allocation5], 0 }
  0x56   :  { %104 = vsyncpa [#allocation8], 0 }
  0x57   :  { %105 = vsyncpa [#allocation11], 0 }
  0x58   :  { %106 = vsyncpa [#allocation14], 0 }
  0x59   :  { %107 = vsyncpa [#allocation17], 0 }
  0x5a   :  { %108 = vsyncpa [#allocation20], 0 }
  0x5b   :  { %109 = vsyncpa [#allocation23], 0 }
  0x5c   :  { %110 = vsyncpa [#allocation26], 0 }
  0x5d   :  { %111 = vsyncpa [#allocation29], 0 }
  0x5e   :  { %112 = vsyncpa [#allocation32], 0 }
  0x5f   :  { %113 = vsyncpa [#allocation35], 0  ;;  %s9638_s28 = smov [#allocation4]   ;;  %s9639_s2 = smov [#allocation7]  }
  0x60   :  { %s134_s1 = sshll.u32 %s9638_s28, 4  ;;  %s156_s0 = sshll.u32 %s9639_s2, 4  ;;  %s135_s1 = int_to_ptr.vmem [resolvable:$true] %s134_s1  ;;  %s157_s0 = int_to_ptr.vmem [resolvable:$true] %s156_s0 }
  0x61   :  { %s9060_s7 = scalar_lea.hbm %s9690_s17, 32 }
  0x62   :  { %p9061_p0 = scmp.ne.s32.totalorder %s9690_s17, %s9060_s7  ;;  %p9064_p1 = scmp.lt.u32.totalorder %s9060_s7, %s9690_s17 }
  0x64   :  { %p9066_p2 = pnand %p9064_p1, %p9061_p0 }
  0x66   :  { %9069 = shalt.err (!%p9066_p2)
}
  0x67   :  { %s9070_s10 = scalar_lea.vmem %s135_s1, 32  ;;  %p9075_p4 = scmp.lt.s32.totalorder %s135_s1, %s135_s1 }
  0x68   :  { %p9071_p3 = scmp.ne.s32.totalorder %s135_s1, %s9070_s10  ;;  %p9076_p5 = scmp.lt.s32.totalorder %s9070_s10, %s9070_s10 }
  0x6a   :  { %p9077_p6 = por %p9076_p5, %p9075_p4 }
  0x6c   :  { %p9078_p7 = pnand %p9077_p6, %p9071_p3 }
  0x6e   :  { %9081 = shalt.err (!%p9078_p7)
}
  0x6f   :  { %137 = dma.hbm_to_vmem [thread:$0]  %s9690_s17, 32, %s135_s1, [#allocation5]  }
  0x70   :  { %s9082_s11 = scalar_lea.hbm %s9705_s29, 128 }
  0x71   :  { %p9083_p8 = scmp.ne.s32.totalorder %s9705_s29, %s9082_s11  ;;  %p9086_p9 = scmp.lt.u32.totalorder %s9082_s11, %s9705_s29 }
  0x73   :  { %p9088_p10 = pnand %p9086_p9, %p9083_p8 }
  0x75   :  { %9091 = shalt.err (!%p9088_p10)
}
  0x76   :  { %s9092_s15 = scalar_lea.vmem %s157_s0, 128  ;;  %p9097_p12 = scmp.lt.s32.totalorder %s157_s0, %s157_s0 }
  0x77   :  { %p9093_p11 = scmp.ne.s32.totalorder %s157_s0, %s9092_s15  ;;  %p9098_p13 = scmp.lt.s32.totalorder %s9092_s15, %s9092_s15 }
  0x79   :  { %p9099_p0 = por %p9098_p13, %p9097_p12 }
  0x7b   :  { %p9100_p1 = pnand %p9099_p0, %p9093_p11 }
  0x7d   :  { %9103 = shalt.err (!%p9100_p1)
}
  0x7e   :  { %159 = dma.hbm_to_vmem [thread:$0]  %s9705_s29, 128, %s157_s0, [#allocation8]  }
  0x7f   :  { %s9640_s16 = smov [#allocation10]   ;;  %s9641_s17 = smov [#allocation13]  }
  0x80   :  { %s178_s18 = sshll.u32 %s9640_s16, 4  ;;  %s200_s22 = sshll.u32 %s9641_s17, 4  ;;  %s179_s18 = int_to_ptr.vmem [resolvable:$true] %s178_s18  ;;  %s201_s22 = int_to_ptr.vmem [resolvable:$true] %s200_s22 }
  0x81   :  { %s9104_s23 = scalar_lea.hbm %s9720_s14, 16 }
  0x82   :  { %p9105_p2 = scmp.ne.s32.totalorder %s9720_s14, %s9104_s23  ;;  %p9108_p3 = scmp.lt.u32.totalorder %s9104_s23, %s9720_s14 }
  0x84   :  { %p9110_p4 = pnand %p9108_p3, %p9105_p2 }
  0x86   :  { %9113 = shalt.err (!%p9110_p4)
}
  0x87   :  { %s9114_s26 = scalar_lea.vmem %s179_s18, 16  ;;  %s9118_s28 = scalar_lea.vmem %s179_s18, 32 }
  0x88   :  { %p9115_p5 = scmp.ne.s32.totalorder %s179_s18, %s9114_s26  ;;  %p9119_p6 = scmp.lt.s32.totalorder %s179_s18, %s179_s18 }
  0x89   :  { %p9120_p7 = scmp.lt.s32.totalorder %s9118_s28, %s9114_s26 }
  0x8b   :  { %p9121_p8 = por %p9120_p7, %p9119_p6 }
  0x8d   :  { %p9122_p9 = pnand %p9121_p8, %p9115_p5 }
  0x8f   :  { %9125 = shalt.err (!%p9122_p9)
}
  0x90   :  { %181 = dma.hbm_to_vmem [thread:$0]  %s9720_s14, 16, %s179_s18, [#allocation11]  }
  0x91   :  { %s9126_s29 = scalar_lea.hbm %s9735_s30, 64 }
  0x92   :  { %p9127_p10 = scmp.ne.s32.totalorder %s9735_s30, %s9126_s29  ;;  %p9130_p11 = scmp.lt.u32.totalorder %s9126_s29, %s9735_s30 }
  0x94   :  { %p9132_p12 = pnand %p9130_p11, %p9127_p10 }
  0x96   :  { %9135 = shalt.err (!%p9132_p12)
}
  0x97   :  { %s9136_s1 = scalar_lea.vmem %s201_s22, 64  ;;  %p9141_p0 = scmp.lt.s32.totalorder %s201_s22, %s201_s22 }
  0x98   :  { %p9137_p13 = scmp.ne.s32.totalorder %s201_s22, %s9136_s1  ;;  %p9142_p1 = scmp.lt.s32.totalorder %s9136_s1, %s9136_s1 }
  0x9a   :  { %p9143_p2 = por %p9142_p1, %p9141_p0 }
  0x9c   :  { %p9144_p3 = pnand %p9143_p2, %p9137_p13 }
  0x9e   :  { %9147 = shalt.err (!%p9144_p3)
}
  0x9f   :  { %203 = dma.hbm_to_vmem [thread:$0]  %s9735_s30, 64, %s201_s22, [#allocation14]  }
  0xa0   :  { %s9642_s2 = smov [#allocation16]   ;;  %s9643_s14 = smov [#allocation19]  }
  0xa1   :  { %s222_s0 = sshll.u32 %s9642_s2, 4  ;;  %s248_s7 = sshll.u32 %s9643_s14, 4  ;;  %s223_s0 = int_to_ptr.vmem [resolvable:$true] %s222_s0  ;;  %s249_s7 = int_to_ptr.vmem [resolvable:$true] %s248_s7 }
  0xa2   :  { %s9148_s10 = scalar_lea.hbm %s9750_s20, 16 }
  0xa3   :  { %p9149_p4 = scmp.ne.s32.totalorder %s9750_s20, %s9148_s10  ;;  %p9152_p5 = scmp.lt.u32.totalorder %s9148_s10, %s9750_s20 }
  0xa5   :  { %p9154_p6 = pnand %p9152_p5, %p9149_p4 }
  0xa7   :  { %9157 = shalt.err (!%p9154_p6)
}
  0xa8   :  { %s9158_s11 = scalar_lea.vmem %s223_s0, 16  ;;  %s9162_s15 = scalar_lea.vmem %s223_s0, 32 }
  0xa9   :  { %p9159_p7 = scmp.ne.s32.totalorder %s223_s0, %s9158_s11  ;;  %p9163_p8 = scmp.lt.s32.totalorder %s223_s0, %s223_s0 }
  0xaa   :  { %p9164_p9 = scmp.lt.s32.totalorder %s9162_s15, %s9158_s11 }
  0xac   :  { %p9165_p10 = por %p9164_p9, %p9163_p8 }
  0xae   :  { %p9166_p11 = pnand %p9165_p10, %p9159_p7 }
  0xb0   :  { %9169 = shalt.err (!%p9166_p11)
}
  0xb1   :  { %225 = dma.hbm_to_vmem [thread:$0]  %s9750_s20, 16, %s223_s0, [#allocation17]  }
  0xb2   :  { %s9170_s30 = scalar_lea.hbm %s9775_s3, 16 }
  0xb3   :  { %p9171_p12 = scmp.ne.s32.totalorder %s9775_s3, %s9170_s30  ;;  %p9174_p13 = scmp.lt.u32.totalorder %s9170_s30, %s9775_s3 }
  0xb5   :  { %p9176_p0 = pnand %p9174_p13, %p9171_p12 }
  0xb7   :  { %9179 = shalt.err (!%p9176_p0)
}
  0xb8   :  { %s9180_s16 = scalar_lea.vmem %s249_s7, 16  ;;  %s9184_s18 = scalar_lea.vmem %s249_s7, 32 }
  0xb9   :  { %p9181_p1 = scmp.ne.s32.totalorder %s249_s7, %s9180_s16  ;;  %p9185_p2 = scmp.lt.s32.totalorder %s249_s7, %s249_s7 }
  0xba   :  { %p9186_p3 = scmp.lt.s32.totalorder %s9184_s18, %s9180_s16 }
  0xbc   :  { %p9187_p4 = por %p9186_p3, %p9185_p2 }
  0xbe   :  { %p9188_p5 = pnand %p9187_p4, %p9181_p1 }
  0xc0   :  { %9191 = shalt.err (!%p9188_p5)
}
  0xc1   :  { %251 = dma.hbm_to_vmem [thread:$0]  %s9775_s3, 16, %s249_s7, [#allocation20]  }
  0xc2   :  { %s9644_s17 = smov [#allocation22]   ;;  %s9645_s22 = smov [#allocation25]  }
  0xc3   :  { %s268_s20 = sshll.u32 %s9644_s17, 4  ;;  %s288_s23 = sshll.u32 %s9645_s22, 4  ;;  %s269_s20 = int_to_ptr.vmem [resolvable:$true] %s268_s20  ;;  %s289_s23 = int_to_ptr.vmem [resolvable:$true] %s288_s23 }
  0xc4   :  { %s9192_s26 = scalar_lea.hbm %s9785_s6, 16 }
  0xc5   :  { %p9193_p6 = scmp.ne.s32.totalorder %s9785_s6, %s9192_s26  ;;  %p9196_p7 = scmp.lt.u32.totalorder %s9192_s26, %s9785_s6 }
  0xc7   :  { %p9198_p8 = pnand %p9196_p7, %p9193_p6 }
  0xc9   :  { %9201 = shalt.err (!%p9198_p8)
}
  0xca   :  { %s9202_s28 = scalar_lea.vmem %s269_s20, 16  ;;  %s9206_s29 = scalar_lea.vmem %s269_s20, 32 }
  0xcb   :  { %p9203_p9 = scmp.ne.s32.totalorder %s269_s20, %s9202_s28  ;;  %p9207_p10 = scmp.lt.s32.totalorder %s269_s20, %s269_s20 }
  0xcc   :  { %p9208_p11 = scmp.lt.s32.totalorder %s9206_s29, %s9202_s28 }
  0xce   :  { %p9209_p12 = por %p9208_p11, %p9207_p10 }
  0xd0   :  { %p9210_p13 = pnand %p9209_p12, %p9203_p9 }
  0xd2   :  { %9213 = shalt.err (!%p9210_p13)
}
  0xd3   :  { %271 = dma.hbm_to_vmem [thread:$0]  %s9785_s6, 16, %s269_s20, [#allocation23]  }
  0xd4   :  { %s9214_s3 = scalar_lea.hbm %s9795_s25, 64 }
  0xd5   :  { %p9215_p0 = scmp.ne.s32.totalorder %s9795_s25, %s9214_s3  ;;  %p9218_p1 = scmp.lt.u32.totalorder %s9214_s3, %s9795_s25 }
  0xd7   :  { %p9220_p2 = pnand %p9218_p1, %p9215_p0 }
  0xd9   :  { %9223 = shalt.err (!%p9220_p2)
}
  0xda   :  { %s9224_s1 = scalar_lea.vmem %s289_s23, 64  ;;  %p9229_p4 = scmp.lt.s32.totalorder %s289_s23, %s289_s23 }
  0xdb   :  { %p9225_p3 = scmp.ne.s32.totalorder %s289_s23, %s9224_s1  ;;  %p9230_p5 = scmp.lt.s32.totalorder %s9224_s1, %s9224_s1 }
  0xdd   :  { %p9231_p6 = por %p9230_p5, %p9229_p4 }
  0xdf   :  { %p9232_p7 = pnand %p9231_p6, %p9225_p3 }
  0xe1   :  { %9235 = shalt.err (!%p9232_p7)
}
  0xe2   :  { %291 = dma.hbm_to_vmem [thread:$0]  %s9795_s25, 64, %s289_s23, [#allocation26]  }
  0xe3   :  { %s9646_s2 = smov [#allocation28]   ;;  %s9647_s6 = smov [#allocation31]  }
  0xe4   :  { %s308_s0 = sshll.u32 %s9646_s2, 4  ;;  %s332_s14 = sshll.u32 %s9647_s6, 4  ;;  %s309_s0 = int_to_ptr.vmem [resolvable:$true] %s308_s0  ;;  %s333_s14 = int_to_ptr.vmem [resolvable:$true] %s332_s14 }
  0xe5   :  { %s9236_s7 = scalar_lea.hbm %s9805_s9, 16 }
  0xe6   :  { %p9237_p8 = scmp.ne.s32.totalorder %s9805_s9, %s9236_s7  ;;  %p9240_p9 = scmp.lt.u32.totalorder %s9236_s7, %s9805_s9 }
  0xe8   :  { %p9242_p10 = pnand %p9240_p9, %p9237_p8 }
  0xea   :  { %9245 = shalt.err (!%p9242_p10)
}
  0xeb   :  { %s9246_s10 = scalar_lea.vmem %s309_s0, 16  ;;  %s9250_s11 = scalar_lea.vmem %s309_s0, 32 }
  0xec   :  { %p9247_p11 = scmp.ne.s32.totalorder %s309_s0, %s9246_s10  ;;  %p9251_p12 = scmp.lt.s32.totalorder %s309_s0, %s309_s0 }
  0xed   :  { %p9252_p13 = scmp.lt.s32.totalorder %s9250_s11, %s9246_s10 }
  0xef   :  { %p9253_p0 = por %p9252_p13, %p9251_p12 }
  0xf1   :  { %p9254_p1 = pnand %p9253_p0, %p9247_p11 }
  0xf3   :  { %9257 = shalt.err (!%p9254_p1)
}
  0xf4   :  { %311 = dma.hbm_to_vmem [thread:$0]  %s9805_s9, 16, %s309_s0, [#allocation29]  }
  0xf5   :  { %s9258_s25 = scalar_lea.hbm %s9825_s27, 16 }
  0xf6   :  { %p9259_p2 = scmp.ne.s32.totalorder %s9825_s27, %s9258_s25  ;;  %p9262_p3 = scmp.lt.u32.totalorder %s9258_s25, %s9825_s27 }
  0xf8   :  { %p9264_p4 = pnand %p9262_p3, %p9259_p2 }
  0xfa   :  { %9267 = shalt.err (!%p9264_p4)
}
  0xfb   :  { %s9268_s15 = scalar_lea.vmem %s333_s14, 16  ;;  %s9272_s30 = scalar_lea.vmem %s333_s14, 32 }
  0xfc   :  { %p9269_p5 = scmp.ne.s32.totalorder %s333_s14, %s9268_s15  ;;  %p9273_p6 = scmp.lt.s32.totalorder %s333_s14, %s333_s14 }
  0xfd   :  { %p9274_p7 = scmp.lt.s32.totalorder %s9272_s30, %s9268_s15 }
  0xff   :  { %p9275_p8 = por %p9274_p7, %p9273_p6 }
 0x101   :  { %p9276_p9 = pnand %p9275_p8, %p9269_p5 }
 0x103   :  { %9279 = shalt.err (!%p9276_p9)
}
 0x104   :  { %335 = dma.hbm_to_vmem [thread:$0]  %s9825_s27, 16, %s333_s14, [#allocation32]  }
 0x105   :  { %s9648_s16 = smov [#allocation34]   ;;  %s9280_s18 = scalar_lea.hbm %s9880_s5, 32768 }
 0x106   :  { %s369_s9 = sshll.u32 %s9648_s16, 4  ;;  %p9281_p10 = scmp.ne.s32.totalorder %s9880_s5, %s9280_s18  ;;  %s370_s9 = int_to_ptr.vmem [resolvable:$true] %s369_s9 }
 0x107   :  { %p9284_p11 = scmp.lt.u32.totalorder %s9280_s18, %s9880_s5 }
 0x109   :  { %p9286_p12 = pnand %p9284_p11, %p9281_p10 }
 0x10b   :  { %9289 = shalt.err (!%p9286_p12)
}
 0x10c   :  { %s9290_s17 = scalar_lea.vmem %s370_s9, 32768  ;;  %p9295_p0 = scmp.lt.s32.totalorder %s370_s9, %s370_s9 }
 0x10d   :  { %p9291_p13 = scmp.ne.s32.totalorder %s370_s9, %s9290_s17  ;;  %p9296_p1 = scmp.lt.s32.totalorder %s9290_s17, %s9290_s17 }
 0x10f   :  { %p9297_p2 = por %p9296_p1, %p9295_p0 }
 0x111   :  { %p9298_p3 = pnand %p9297_p2, %p9291_p13 }
 0x113   :  { %9301 = shalt.err (!%p9298_p3)
}
 0x114   :  { %s9649_s20 = smov 1024   ;;  %s9650_s27 = smov 64  }
 0x115   :  { %375 = dma.hbm_to_vmem [thread:$0]  %s9880_s5, 32768, %s370_s9, [#allocation35], %s9649_s20, %s9649_s20, %s9650_s27  }
 0x116   :  { %s9651_s22 = smov [#allocation2]   ;;  %s9652_s26 = smov [#allocation6]  }
 0x117   :  { %s124_s23 = sshll.u32 %s9651_s22, 4  ;;  %s144_s28 = sshll.u32 %s9652_s26, 4  ;;  %s125_s23 = int_to_ptr.vmem [resolvable:$true] %s124_s23  ;;  %s145_s28 = int_to_ptr.vmem [resolvable:$true] %s144_s28 }
 0x118   :  { %s9302_s29 = scalar_lea.hbm %s9685_s13, 32 }
 0x119   :  { %p9303_p4 = scmp.ne.s32.totalorder %s9685_s13, %s9302_s29  ;;  %p9306_p5 = scmp.lt.u32.totalorder %s9302_s29, %s9685_s13 }
 0x11b   :  { %p9308_p6 = pnand %p9306_p5, %p9303_p4 }
 0x11d   :  { %9311 = shalt.err (!%p9308_p6)
}
 0x11e   :  { %s9312_s3 = scalar_lea.vmem %s125_s23, 32  ;;  %p9317_p8 = scmp.lt.s32.totalorder %s125_s23, %s125_s23 }
 0x11f   :  { %p9313_p7 = scmp.ne.s32.totalorder %s125_s23, %s9312_s3  ;;  %p9318_p9 = scmp.lt.s32.totalorder %s9312_s3, %s9312_s3 }
 0x121   :  { %p9319_p10 = por %p9318_p9, %p9317_p8 }
 0x123   :  { %p9320_p11 = pnand %p9319_p10, %p9313_p7 }
 0x125   :  { %9323 = shalt.err (!%p9320_p11)
}
 0x126   :  { %127 = dma.hbm_to_vmem [thread:$0]  %s9685_s13, 32, %s125_s23, [#allocation3]  }
 0x127   :  { %s9324_s5 = scalar_lea.hbm %s9695_s21, 32 }
 0x128   :  { %p9325_p12 = scmp.ne.s32.totalorder %s9695_s21, %s9324_s5  ;;  %p9328_p13 = scmp.lt.u32.totalorder %s9324_s5, %s9695_s21 }
 0x12a   :  { %p9330_p0 = pnand %p9328_p13, %p9325_p12 }
 0x12c   :  { %9333 = shalt.err (!%p9330_p0)
}
 0x12d   :  { %s9334_s1 = scalar_lea.vmem %s145_s28, 32  ;;  %p9339_p2 = scmp.lt.s32.totalorder %s145_s28, %s145_s28 }
 0x12e   :  { %p9335_p1 = scmp.ne.s32.totalorder %s145_s28, %s9334_s1  ;;  %p9340_p3 = scmp.lt.s32.totalorder %s9334_s1, %s9334_s1 }
 0x130   :  { %p9341_p4 = por %p9340_p3, %p9339_p2 }
 0x132   :  { %p9342_p5 = pnand %p9341_p4, %p9335_p1 }
 0x134   :  { %9345 = shalt.err (!%p9342_p5)
}
 0x135   :  { %147 = dma.hbm_to_vmem [thread:$0]  %s9695_s21, 32, %s145_s28, [#allocation5]  }
 0x136   :  { %s9653_s2 = smov [#allocation9]   ;;  %s9654_s0 = smov [#allocation12]  }
 0x137   :  { %s168_s13 = sshll.u32 %s9653_s2, 4  ;;  %s188_s6 = sshll.u32 %s9654_s0, 4  ;;  %s169_s13 = int_to_ptr.vmem [resolvable:$true] %s168_s13  ;;  %s189_s6 = int_to_ptr.vmem [resolvable:$true] %s188_s6 }
 0x138   :  { %s9346_s14 = scalar_lea.hbm %s9715_s8, 16 }
 0x139   :  { %p9347_p6 = scmp.ne.s32.totalorder %s9715_s8, %s9346_s14  ;;  %p9350_p7 = scmp.lt.u32.totalorder %s9346_s14, %s9715_s8 }
 0x13b   :  { %p9352_p8 = pnand %p9350_p7, %p9347_p6 }
 0x13d   :  { %9355 = shalt.err (!%p9352_p8)
}
 0x13e   :  { %s9356_s7 = scalar_lea.vmem %s169_s13, 16  ;;  %s9360_s10 = scalar_lea.vmem %s169_s13, 32 }
 0x13f   :  { %p9357_p9 = scmp.ne.s32.totalorder %s169_s13, %s9356_s7  ;;  %p9361_p10 = scmp.lt.s32.totalorder %s169_s13, %s169_s13 }
 0x140   :  { %p9362_p11 = scmp.lt.s32.totalorder %s9360_s10, %s9356_s7 }
 0x142   :  { %p9363_p12 = por %p9362_p11, %p9361_p10 }
 0x144   :  { %p9364_p13 = pnand %p9363_p12, %p9357_p9 }
 0x146   :  { %9367 = shalt.err (!%p9364_p13)
}
 0x147   :  { %s11566_s21 = sld [smem:[#allocation53_spill]] }
 0x148   :  { %171 = dma.hbm_to_vmem [thread:$0]  %s9715_s8, 16, %s169_s13, [#allocation8]  }
 0x14d   :  { %s9368_s11 = scalar_lea.hbm %s11566_s21, 16 }
 0x14e   :  { %p9369_p0 = scmp.ne.s32.totalorder %s11566_s21, %s9368_s11  ;;  %p9372_p1 = scmp.lt.u32.totalorder %s9368_s11, %s11566_s21 }
 0x150   :  { %p9374_p2 = pnand %p9372_p1, %p9369_p0 }
 0x152   :  { %9377 = shalt.err (!%p9374_p2)
}
 0x153   :  { %s9378_s25 = scalar_lea.vmem %s189_s6, 16  ;;  %s9382_s15 = scalar_lea.vmem %s189_s6, 32 }
 0x154   :  { %p9379_p3 = scmp.ne.s32.totalorder %s189_s6, %s9378_s25  ;;  %p9383_p4 = scmp.lt.s32.totalorder %s189_s6, %s189_s6 }
 0x155   :  { %p9384_p5 = scmp.lt.s32.totalorder %s9382_s15, %s9378_s25 }
 0x157   :  { %p9385_p6 = por %p9384_p5, %p9383_p4 }
 0x159   :  { %p9386_p7 = pnand %p9385_p6, %p9379_p3 }
 0x15b   :  { %9389 = shalt.err (!%p9386_p7)
}
 0x15c   :  { %s11567_s30 = sld [smem:[#allocation56_spill]]  ;;  %s9655_s8 = smov [#allocation15]  }
 0x15d   :  { %191 = dma.hbm_to_vmem [thread:$0]  %s11566_s21, 16, %s189_s6, [#allocation11]  }
 0x15e   :  { %s212_s16 = sshll.u32 %s9655_s8, 4  ;;  %s9656_s9 = smov [#allocation18]   ;;  %s213_s16 = int_to_ptr.vmem [resolvable:$true] %s212_s16 }
 0x15f   :  { %s232_s18 = sshll.u32 %s9656_s9, 4  ;;  %s233_s18 = int_to_ptr.vmem [resolvable:$true] %s232_s18 }
 0x162   :  { %s9390_s17 = scalar_lea.hbm %s11567_s30, 16 }
 0x163   :  { %p9391_p8 = scmp.ne.s32.totalorder %s11567_s30, %s9390_s17  ;;  %p9394_p9 = scmp.lt.u32.totalorder %s9390_s17, %s11567_s30 }
 0x165   :  { %p9396_p10 = pnand %p9394_p9, %p9391_p8 }
 0x167   :  { %9399 = shalt.err (!%p9396_p10)
}
 0x168   :  { %s9400_s22 = scalar_lea.vmem %s213_s16, 16  ;;  %s9404_s23 = scalar_lea.vmem %s213_s16, 32 }
 0x169   :  { %p9401_p11 = scmp.ne.s32.totalorder %s213_s16, %s9400_s22  ;;  %p9405_p12 = scmp.lt.s32.totalorder %s213_s16, %s213_s16 }
 0x16a   :  { %p9406_p13 = scmp.lt.s32.totalorder %s9404_s23, %s9400_s22 }
 0x16c   :  { %p9407_p0 = por %p9406_p13, %p9405_p12 }
 0x16e   :  { %p9408_p1 = pnand %p9407_p0, %p9401_p11 }
 0x170   :  { %9411 = shalt.err (!%p9408_p1)
}
 0x171   :  { %s11568_s26 = sld [smem:[#allocation57_spill]] }
 0x172   :  { %215 = dma.hbm_to_vmem [thread:$0]  %s11567_s30, 16, %s213_s16, [#allocation14]  }
 0x177   :  { %s9412_s28 = scalar_lea.hbm %s11568_s26, 16 }
 0x178   :  { %p9413_p2 = scmp.ne.s32.totalorder %s11568_s26, %s9412_s28  ;;  %p9416_p3 = scmp.lt.u32.totalorder %s9412_s28, %s11568_s26 }
 0x17a   :  { %p9418_p4 = pnand %p9416_p3, %p9413_p2 }
 0x17c   :  { %9421 = shalt.err (!%p9418_p4)
}
 0x17d   :  { %s9422_s29 = scalar_lea.vmem %s233_s18, 16  ;;  %s9426_s3 = scalar_lea.vmem %s233_s18, 32 }
 0x17e   :  { %p9423_p5 = scmp.ne.s32.totalorder %s233_s18, %s9422_s29  ;;  %p9427_p6 = scmp.lt.s32.totalorder %s233_s18, %s233_s18 }
 0x17f   :  { %p9428_p7 = scmp.lt.s32.totalorder %s9426_s3, %s9422_s29 }
 0x181   :  { %p9429_p8 = por %p9428_p7, %p9427_p6 }
 0x183   :  { %p9430_p9 = pnand %p9429_p8, %p9423_p5 }
 0x185   :  { %9433 = shalt.err (!%p9430_p9)
}
 0x186   :  { %s11569_s5 = sld [smem:[#allocation61_spill]]  ;;  %s9657_s1 = smov [#allocation21]  }
 0x187   :  { %235 = dma.hbm_to_vmem [thread:$0]  %s11568_s26, 16, %s233_s18, [#allocation17]  }
 0x188   :  { %s258_s2 = sshll.u32 %s9657_s1, 4  ;;  %s9658_s13 = smov [#allocation24]   ;;  %s259_s2 = int_to_ptr.vmem [resolvable:$true] %s258_s2 }
 0x189   :  { %s278_s0 = sshll.u32 %s9658_s13, 4  ;;  %s279_s0 = int_to_ptr.vmem [resolvable:$true] %s278_s0 }
 0x18c   :  { %s9434_s6 = scalar_lea.hbm %s11569_s5, 16 }
 0x18d   :  { %p9435_p10 = scmp.ne.s32.totalorder %s11569_s5, %s9434_s6  ;;  %p9438_p11 = scmp.lt.u32.totalorder %s9434_s6, %s11569_s5 }
 0x18f   :  { %p9440_p12 = pnand %p9438_p11, %p9435_p10 }
 0x191   :  { %9443 = shalt.err (!%p9440_p12)
}
 0x192   :  { %s9444_s14 = scalar_lea.vmem %s259_s2, 16  ;;  %s9448_s7 = scalar_lea.vmem %s259_s2, 32 }
 0x193   :  { %p9445_p13 = scmp.ne.s32.totalorder %s259_s2, %s9444_s14  ;;  %p9449_p0 = scmp.lt.s32.totalorder %s259_s2, %s259_s2 }
 0x194   :  { %p9450_p1 = scmp.lt.s32.totalorder %s9448_s7, %s9444_s14 }
 0x196   :  { %p9451_p2 = por %p9450_p1, %p9449_p0 }
 0x198   :  { %p9452_p3 = pnand %p9451_p2, %p9445_p13 }
 0x19a   :  { %9455 = shalt.err (!%p9452_p3)
}
 0x19b   :  { %s11570_s10 = sld [smem:[#allocation62_spill]] }
 0x19c   :  { %261 = dma.hbm_to_vmem [thread:$0]  %s11569_s5, 16, %s259_s2, [#allocation20]  }
 0x1a1   :  { %s9456_s21 = scalar_lea.hbm %s11570_s10, 64 }
 0x1a2   :  { %p9457_p4 = scmp.ne.s32.totalorder %s11570_s10, %s9456_s21  ;;  %p9460_p5 = scmp.lt.u32.totalorder %s9456_s21, %s11570_s10 }
 0x1a4   :  { %p9462_p6 = pnand %p9460_p5, %p9457_p4 }
 0x1a6   :  { %9465 = shalt.err (!%p9462_p6)
}
 0x1a7   :  { %s9466_s11 = scalar_lea.vmem %s279_s0, 64  ;;  %p9471_p8 = scmp.lt.s32.totalorder %s279_s0, %s279_s0 }
 0x1a8   :  { %p9467_p7 = scmp.ne.s32.totalorder %s279_s0, %s9466_s11  ;;  %p9472_p9 = scmp.lt.s32.totalorder %s9466_s11, %s9466_s11 }
 0x1aa   :  { %p9473_p10 = por %p9472_p9, %p9471_p8 }
 0x1ac   :  { %p9474_p11 = pnand %p9473_p10, %p9467_p7 }
 0x1ae   :  { %9477 = shalt.err (!%p9474_p11)
}
 0x1af   :  { %s11571_s25 = sld [smem:[#allocation63_spill]]  ;;  %s9659_s15 = smov [#allocation27]  }
 0x1b0   :  { %281 = dma.hbm_to_vmem [thread:$0]  %s11570_s10, 64, %s279_s0, [#allocation23]  }
 0x1b1   :  { %s298_s30 = sshll.u32 %s9659_s15, 4  ;;  %s9660_s8 = smov [#allocation30]   ;;  %s299_s30 = int_to_ptr.vmem [resolvable:$true] %s298_s30 }
 0x1b2   :  { %s322_s16 = sshll.u32 %s9660_s8, 4  ;;  %s323_s16 = int_to_ptr.vmem [resolvable:$true] %s322_s16 }
 0x1b5   :  { %s9478_s9 = scalar_lea.hbm %s11571_s25, 64 }
 0x1b6   :  { %p9479_p12 = scmp.ne.s32.totalorder %s11571_s25, %s9478_s9  ;;  %p9482_p13 = scmp.lt.u32.totalorder %s9478_s9, %s11571_s25 }
 0x1b8   :  { %p9484_p0 = pnand %p9482_p13, %p9479_p12 }
 0x1ba   :  { %9487 = shalt.err (!%p9484_p0)
}
 0x1bb   :  { %s9488_s18 = scalar_lea.vmem %s299_s30, 64  ;;  %p9493_p2 = scmp.lt.s32.totalorder %s299_s30, %s299_s30 }
 0x1bc   :  { %p9489_p1 = scmp.ne.s32.totalorder %s299_s30, %s9488_s18  ;;  %p9494_p3 = scmp.lt.s32.totalorder %s9488_s18, %s9488_s18 }
 0x1be   :  { %p9495_p4 = por %p9494_p3, %p9493_p2 }
 0x1c0   :  { %p9496_p5 = pnand %p9495_p4, %p9489_p1 }
 0x1c2   :  { %9499 = shalt.err (!%p9496_p5)
}
 0x1c3   :  { %s11572_s17 = sld [smem:[#allocation66_spill]] }
 0x1c4   :  { %301 = dma.hbm_to_vmem [thread:$0]  %s11571_s25, 64, %s299_s30, [#allocation26]  }
 0x1c9   :  { %s9500_s22 = scalar_lea.hbm %s11572_s17, 16 }
 0x1ca   :  { %p9501_p6 = scmp.ne.s32.totalorder %s11572_s17, %s9500_s22  ;;  %p9504_p7 = scmp.lt.u32.totalorder %s9500_s22, %s11572_s17 }
 0x1cc   :  { %p9506_p8 = pnand %p9504_p7, %p9501_p6 }
 0x1ce   :  { %9509 = shalt.err (!%p9506_p8)
}
 0x1cf   :  { %s9510_s23 = scalar_lea.vmem %s323_s16, 16  ;;  %s9514_s26 = scalar_lea.vmem %s323_s16, 32 }
 0x1d0   :  { %p9511_p9 = scmp.ne.s32.totalorder %s323_s16, %s9510_s23  ;;  %p9515_p10 = scmp.lt.s32.totalorder %s323_s16, %s323_s16 }
 0x1d1   :  { %p9516_p11 = scmp.lt.s32.totalorder %s9514_s26, %s9510_s23 }
 0x1d3   :  { %p9517_p12 = por %p9516_p11, %p9515_p10 }
 0x1d5   :  { %p9518_p13 = pnand %p9517_p12, %p9511_p9 }
 0x1d7   :  { %9521 = shalt.err (!%p9518_p13)
}
 0x1d8   :  { %s11573_s28 = sld [smem:[#allocation67_spill]]  ;;  %s9661_s29 = smov [#allocation33]  }
 0x1d9   :  { %325 = dma.hbm_to_vmem [thread:$0]  %s11572_s17, 16, %s323_s16, [#allocation29]  }
 0x1da   :  { %s342_s3 = sshll.u32 %s9661_s29, 4  ;;  %s9662_s5 = smov [#allocation36]   ;;  %s343_s3 = int_to_ptr.vmem [resolvable:$true] %s342_s3 }
 0x1db   :  { %s381_s1 = sshll.u32 %s9662_s5, 4  ;;  %s382_s1 = int_to_ptr.vmem [resolvable:$true] %s381_s1 }
 0x1de   :  { %s9522_s2 = scalar_lea.hbm %s11573_s28, 16 }
 0x1df   :  { %p9523_p0 = scmp.ne.s32.totalorder %s11573_s28, %s9522_s2  ;;  %p9526_p1 = scmp.lt.u32.totalorder %s9522_s2, %s11573_s28 }
 0x1e1   :  { %p9528_p2 = pnand %p9526_p1, %p9523_p0 }
 0x1e3   :  { %9531 = shalt.err (!%p9528_p2)
}
 0x1e4   :  { %s9532_s13 = scalar_lea.vmem %s343_s3, 16  ;;  %s9536_s0 = scalar_lea.vmem %s343_s3, 32 }
 0x1e5   :  { %p9533_p3 = scmp.ne.s32.totalorder %s343_s3, %s9532_s13  ;;  %p9537_p4 = scmp.lt.s32.totalorder %s343_s3, %s343_s3 }
 0x1e6   :  { %p9538_p5 = scmp.lt.s32.totalorder %s9536_s0, %s9532_s13 }
 0x1e8   :  { %p9539_p6 = por %p9538_p5, %p9537_p4 }
 0x1ea   :  { %p9540_p7 = pnand %p9539_p6, %p9533_p3 }
 0x1ec   :  { %9543 = shalt.err (!%p9540_p7)
}
 0x1ed   :  { %s11574_s6 = sld [smem:[#allocation77_spill]] }
 0x1ee   :  { %345 = dma.hbm_to_vmem [thread:$0]  %s11573_s28, 16, %s343_s3, [#allocation32]  }
 0x1f3   :  { %s9544_s14 = scalar_lea.hbm %s11574_s6, 32768 }
 0x1f4   :  { %p9545_p8 = scmp.ne.s32.totalorder %s11574_s6, %s9544_s14  ;;  %p9548_p9 = scmp.lt.u32.totalorder %s9544_s14, %s11574_s6 }
 0x1f6   :  { %p9550_p10 = pnand %p9548_p9, %p9545_p8 }
 0x1f8   :  { %9553 = shalt.err (!%p9550_p10)
}
 0x1f9   :  { %s9554_s7 = scalar_lea.vmem %s382_s1, 32768  ;;  %p9559_p12 = scmp.lt.s32.totalorder %s382_s1, %s382_s1 }
 0x1fa   :  { %p9555_p11 = scmp.ne.s32.totalorder %s382_s1, %s9554_s7  ;;  %p9560_p13 = scmp.lt.s32.totalorder %s9554_s7, %s9554_s7 }
 0x1fc   :  { %p9561_p0 = por %p9560_p13, %p9559_p12 }
 0x1fe   :  { %p9562_p1 = pnand %p9561_p0, %p9555_p11 }
 0x200   :  { %9565 = shalt.err (!%p9562_p1)
}
 0x201   :  { %387 = dma.hbm_to_vmem [thread:$0]  %s11574_s6, 32768, %s382_s1, [#allocation35], %s9649_s20, %s9649_s20, %s9650_s27  }
 0x202   :  { %9566 = dma.done.wait [#allocation3], 32  }
 0x203   :  { %9567 = vsyncadd [#allocation3], 4294967264 }
 0x204   :  { %9568 = dma.done.wait [#allocation5], 64  }
 0x205   :  { %9569 = vsyncadd [#allocation5], 4294967232 }
 0x206   :  { %9570 = dma.done.wait [#allocation8], 144  }
 0x207   :  { %9571 = vsyncadd [#allocation8], 4294967152 }
 0x208   :  { %9572 = dma.done.wait [#allocation11], 32  }
 0x209   :  { %9573 = vsyncadd [#allocation11], 4294967264 }
 0x20a   :  { %9574 = dma.done.wait [#allocation14], 80  }
 0x20b   :  { %9575 = vsyncadd [#allocation14], 4294967216 }
 0x20c   :  { %9576 = dma.done.wait [#allocation17], 32  }
 0x20d   :  { %9577 = vsyncadd [#allocation17], 4294967264 }
 0x20e   :  { %9578 = dma.done.wait [#allocation20], 32  }
 0x20f   :  { %9579 = vsyncadd [#allocation20], 4294967264 }
 0x210   :  { %9580 = dma.done.wait [#allocation23], 80  }
 0x211   :  { %9581 = vsyncadd [#allocation23], 4294967216 }
 0x212   :  { %9582 = dma.done.wait [#allocation26], 128  }
 0x213   :  { %9583 = vsyncadd [#allocation26], 4294967168 }
 0x214   :  { %9584 = dma.done.wait [#allocation29], 32  }
 0x215   :  { %9585 = vsyncadd [#allocation29], 4294967264 }
 0x216   :  { %9586 = dma.done.wait [#allocation32], 32  }
 0x217   :  { %9587 = vsyncadd [#allocation32], 4294967264 }
 0x218   :  { %9588 = dma.done.wait [#allocation35], 65536  }
 0x219   :  { %9589 = vsyncadd [#allocation35], 4294901760  ;;  %s11575_s20 = sld [smem:[#allocation50_spill]]  ;;  %v727_v25 = vlaneseq  ;;  %v9663_v26 = vmov 1983009808   ;;  %s11576_s27 = sld [smem:[#allocation49_spill]] }
 0x21a   :  { %v741_v27 = vunpack.c.l.s4 %v9663_v26  ;;  %s11578_s10 = sld [smem:[#allocation51_spill]]  ;;  %vm1100_vm0 = vcmask 1041408   ;;  %vm1192_vm1 = vcmask 1043456   ;;  %vm1188_vm2 = vcmask 31744   ;;  %s11581_s21 = sld [smem:[#allocation52_spill]] }
 0x21b   :  { %v10037_v34 = vshrl.u32 %v727_v25, 7  ;;  %s11582_s11 = sld [smem:[#allocation54_spill]]  ;;  %vm9666_vm5 = vmmov 0   ;;  %vm1603_vm6 = vcmask 517120   ;;  %vm1611_vm7 = vcmask 523264   ;;  %s11583_s25 = sld [smem:[#allocation55_spill]] }
 0x21c   :  { %v742_v35 = vunpack.c.0.s8 %v741_v27  ;;  %s11584_s15 = sld [smem:[#allocation58_spill]]  ;;  %s11585_s30 = sld [smem:[#allocation59_spill]]  ;;  %vm2039_vm9 = vcmask 123904   ;;  %vm2047_vm10 = vcmask 130048   ;;  %vm2468_vm12 = vcmask 25600  }
 0x21d   :  { %s11586_s8 = sld [smem:[#allocation60_spill]]  ;;  %s11587_s16 = sld [smem:[#allocation65_spill]] }
 0x21e   :  { %v10044_v42 = vsub.s32 %v742_v35, %v10037_v34  ;;  %s11588_s9 = sld [smem:[#allocation64_spill]]  ;;  %s11589_s18 = sld [smem:[#allocation68_spill]] }
 0x21f   :  { %v470_v0 = vld [vmem:[%s11575_s20 + $0x8] sm:$0xff]  ;;  %v472_v1 = vld [vmem:[%s11575_s20 + $0x18] sm:$0xff]  ;;  %v469_v2 = vld [vmem:[%s11575_s20] sm:$0xff]  ;;  %s11590_s17 = sld [smem:[#allocation69_spill]]  ;;  %s11591_s22 = sld [smem:[#allocation71_spill]] }
 0x220   :  { %v7652_v3 = vpack.c.bf16 %v472_v1, %v470_v0  ;;  %v471_v4 = vld [vmem:[%s11575_s20 + $0x10] sm:$0xff]  ;;  %v474_v5 = vld [vmem:[%s11575_s20 + $0x28] sm:$0xff]  ;;  %v476_v6 = vld [vmem:[%s11575_s20 + $0x38] sm:$0xff]  ;;  %11577 = vst [vmem:[#allocation80_spill] sm:$0xff] %v10044_v42  ;;  %s11592_s23 = sld [smem:[#allocation70_spill]]  ;;  %s11593_s26 = sld [smem:[#allocation75_spill]] }
 0x221   :  { %v7654_v7 = vpack.c.bf16 %v471_v4, %v469_v2  ;;  %v7656_v8 = vpack.c.bf16 %v476_v6, %v474_v5  ;;  %v473_v9 = vld [vmem:[%s11575_s20 + $0x20] sm:$0xff]  ;;  %v475_v10 = vld [vmem:[%s11575_s20 + $0x30] sm:$0xff]  ;;  %v478_v11 = vld [vmem:[%s11575_s20 + $0x48] sm:$0xff]  ;;  %s11594_s28 = sld [smem:[#allocation72_spill]]  ;;  %s11595_s29 = sld [smem:[#allocation76_spill]] }
 0x222   :  { %7653 = vmatprep.subr.bf16.mxu0 %v7652_v3  ;;  %v480_v12 = vld [vmem:[%s11575_s20 + $0x58] sm:$0xff]  ;;  %v7658_v13 = vpack.c.bf16 %v475_v10, %v473_v9  ;;  %v477_v15 = vld [vmem:[%s11575_s20 + $0x40] sm:$0xff]  ;;  %v479_v16 = vld [vmem:[%s11575_s20 + $0x50] sm:$0xff]  ;;  %s11596_s3 = sld [smem:[#allocation73_spill]]  ;;  %s11597_s5 = sld [smem:[#allocation74_spill]] }
 0x223   :  { %7655 = vmatpush1.bf16.msra.mxu0 %v7654_v7  ;;  %v7660_v14 = vpack.c.bf16 %v480_v12, %v478_v11  ;;  %v482_v17 = vld [vmem:[%s11575_s20 + $0x68] sm:$0xff]  ;;  %v484_v18 = vld [vmem:[%s11575_s20 + $0x78] sm:$0xff]  ;;  %v7662_v19 = vpack.c.bf16 %v479_v16, %v477_v15  ;;  %v481_v21 = vld [vmem:[%s11575_s20 + $0x60] sm:$0xff]  ;;  %s11598_s1 = sld [smem:[#allocation78_spill]] }
 0x224   :  { %7657 = vmatprep.subr.bf16.mxu0 %v7656_v8  ;;  %v7664_v20 = vpack.c.bf16 %v484_v18, %v482_v17  ;;  %v483_v22 = vld [vmem:[%s11575_s20 + $0x70] sm:$0xff]  ;;  %v486_v23 = vld [vmem:[%s11575_s20 + $0x88] sm:$0xff]  ;;  %v488_v24 = vld [vmem:[%s11575_s20 + $0x98] sm:$0xff] }
 0x225   :  { %v7666_v28 = vpack.c.bf16 %v483_v22, %v481_v21  ;;  %v7668_v29 = vpack.c.bf16 %v488_v24, %v486_v23  ;;  %v485_v30 = vld [vmem:[%s11575_s20 + $0x80] sm:$0xff]  ;;  %v487_v31 = vld [vmem:[%s11575_s20 + $0x90] sm:$0xff]  ;;  %v490_v32 = vld [vmem:[%s11575_s20 + $0xa8] sm:$0xff] }
 0x226   :  { %v492_v33 = vld [vmem:[%s11575_s20 + $0xb8] sm:$0xff]  ;;  %v7670_v36 = vpack.c.bf16 %v487_v31, %v485_v30  ;;  %v489_v38 = vld [vmem:[%s11575_s20 + $0xa0] sm:$0xff]  ;;  %v491_v39 = vld [vmem:[%s11575_s20 + $0xb0] sm:$0xff] }
 0x227   :  { %7659 = vmatpush1.bf16.msra.mxu0 %v7658_v13  ;;  %v7672_v37 = vpack.c.bf16 %v492_v33, %v490_v32  ;;  %v494_v40 = vld [vmem:[%s11575_s20 + $0xc8] sm:$0xff]  ;;  %v496_v41 = vld [vmem:[%s11575_s20 + $0xd8] sm:$0xff]  ;;  %v7674_v43 = vpack.c.bf16 %v491_v39, %v489_v38  ;;  %v493_v45 = vld [vmem:[%s11575_s20 + $0xc0] sm:$0xff] }
 0x228   :  { %7661 = vmatprep.subr.bf16.mxu0 %v7660_v14  ;;  %v7676_v44 = vpack.c.bf16 %v496_v41, %v494_v40  ;;  %v495_v46 = vld [vmem:[%s11575_s20 + $0xd0] sm:$0xff]  ;;  %v10049_v47 = vld [vmem:[%s11576_s27] sm:$0xff]  ;;  %v498_v48 = vld [vmem:[%s11575_s20 + $0xe8] sm:$0xff] }
 0x229   :  { %v500_v49 = vld [vmem:[%s11575_s20 + $0xf8] sm:$0xff]  ;;  %v10055_v50 = vrot.slane %v10049_v47, %v10044_v42  ;;  %v7678_v51 = vpack.c.bf16 %v495_v46, %v493_v45  ;;  %v497_v54 = vld [vmem:[%s11575_s20 + $0xe0] sm:$0xff]  ;;  %v499_v55 = vld [vmem:[%s11575_s20 + $0xf0] sm:$0xff]  ;;  %v739_v38 = vcombine.high %v10049_v47, %v10049_v47 }
 0x22a   :  { %v7680_v53 = vpack.c.bf16 %v500_v49, %v498_v48  ;;  %v502_v56 = vld [vmem:[%s11575_s20 + $0x108] sm:$0xff]  ;;  %v504_v57 = vld [vmem:[%s11575_s20 + $0x118] sm:$0xff]  ;;  %v7682_v58 = vpack.c.bf16 %v499_v55, %v497_v54  ;;  %v501_v60 = vld [vmem:[%s11575_s20 + $0x100] sm:$0xff] }
 0x22b   :  { %7663 = vmatpush1.bf16.msra.mxu0 %v7662_v19  ;;  %v754_v52 = vcombine.high %v10055_v50, %v10055_v50  ;;  %v7684_v59 = vpack.c.bf16 %v504_v57, %v502_v56  ;;  %v503_v61 = vld [vmem:[%s11575_s20 + $0x110] sm:$0xff]  ;;  %v506_v62 = vld [vmem:[%s11575_s20 + $0x128] sm:$0xff]  ;;  %v508_v63 = vld [vmem:[%s11575_s20 + $0x138] sm:$0xff]  ;;  %v10098_v46 = vrot.slane %v739_v38, %v10044_v42 }
 0x22c   :  { %7665 = vmatprep.subr.bf16.mxu0 %v7664_v20  ;;  %v7686_v0 = vpack.c.bf16 %v503_v61, %v501_v60  ;;  %v7688_v1 = vpack.c.bf16 %v508_v63, %v506_v62  ;;  %v505_v2 = vld [vmem:[%s11575_s20 + $0x120] sm:$0xff]  ;;  %v507_v3 = vld [vmem:[%s11575_s20 + $0x130] sm:$0xff]  ;;  %v510_v4 = vld [vmem:[%s11575_s20 + $0x148] sm:$0xff] }
 0x22d   :  { %845 = vmatprep.mubr.f32.mxu0 %v754_v52  ;;  %v512_v5 = vld [vmem:[%s11575_s20 + $0x158] sm:$0xff]  ;;  %v7690_v6 = vpack.c.bf16 %v507_v3, %v505_v2  ;;  %v509_v8 = vld [vmem:[%s11575_s20 + $0x140] sm:$0xff]  ;;  %v511_v9 = vld [vmem:[%s11575_s20 + $0x150] sm:$0xff]  ;;  %v755_v54 = vcombine.high %v10098_v46, %v10098_v46 }
 0x22e   :  { %v7692_v7 = vpack.c.bf16 %v512_v5, %v510_v4  ;;  %v514_v10 = vld [vmem:[%s11575_s20 + $0x168] sm:$0xff]  ;;  %v516_v11 = vld [vmem:[%s11575_s20 + $0x178] sm:$0xff]  ;;  %v7694_v12 = vpack.c.bf16 %v511_v9, %v509_v8  ;;  %v513_v14 = vld [vmem:[%s11575_s20 + $0x160] sm:$0xff] }
 0x22f   :  { %7667 = vmatpush1.bf16.msra.mxu0 %v7666_v28  ;;  %v7696_v13 = vpack.c.bf16 %v516_v11, %v514_v10  ;;  %v515_v15 = vld [vmem:[%s11575_s20 + $0x170] sm:$0xff]  ;;  %v518_v16 = vld [vmem:[%s11575_s20 + $0x188] sm:$0xff]  ;;  %v520_v17 = vld [vmem:[%s11575_s20 + $0x198] sm:$0xff] }
 0x230   :  { %7669 = vmatprep.subr.bf16.mxu0 %v7668_v29  ;;  %v7698_v18 = vpack.c.bf16 %v515_v15, %v513_v14  ;;  %v7700_v19 = vpack.c.bf16 %v520_v17, %v518_v16  ;;  %v517_v20 = vld [vmem:[%s11575_s20 + $0x180] sm:$0xff]  ;;  %v519_v21 = vld [vmem:[%s11575_s20 + $0x190] sm:$0xff]  ;;  %v522_v22 = vld [vmem:[%s11575_s20 + $0x1a8] sm:$0xff] }
 0x231   :  { %v524_v23 = vld [vmem:[%s11575_s20 + $0x1b8] sm:$0xff]  ;;  %v7702_v24 = vpack.c.bf16 %v519_v21, %v517_v20  ;;  %v521_v26 = vld [vmem:[%s11575_s20 + $0x1a0] sm:$0xff]  ;;  %v523_v27 = vld [vmem:[%s11575_s20 + $0x1b0] sm:$0xff] }
 0x232   :  { %v7704_v25 = vpack.c.bf16 %v524_v23, %v522_v22  ;;  %v526_v28 = vld [vmem:[%s11575_s20 + $0x1c8] sm:$0xff]  ;;  %v528_v29 = vld [vmem:[%s11575_s20 + $0x1d8] sm:$0xff]  ;;  %v7706_v30 = vpack.c.bf16 %v523_v27, %v521_v26  ;;  %v525_v32 = vld [vmem:[%s11575_s20 + $0x1c0] sm:$0xff] }
 0x233   :  { %7671 = vmatpush1.bf16.msra.mxu0 %v7670_v36  ;;  %v7708_v31 = vpack.c.bf16 %v528_v29, %v526_v28  ;;  %v527_v33 = vld [vmem:[%s11575_s20 + $0x1d0] sm:$0xff]  ;;  %v530_v35 = vld [vmem:[%s11575_s20 + $0x1e8] sm:$0xff]  ;;  %v532_v36 = vld [vmem:[%s11575_s20 + $0x1f8] sm:$0xff] }
 0x234   :  { %7673 = vmatprep.subr.bf16.mxu0 %v7672_v37  ;;  %v7710_v37 = vpack.c.bf16 %v527_v33, %v525_v32  ;;  %v7712_v39 = vpack.c.bf16 %v532_v36, %v530_v35  ;;  %v529_v40 = vld [vmem:[%s11575_s20 + $0x1e0] sm:$0xff]  ;;  %v531_v41 = vld [vmem:[%s11575_s20 + $0x1f0] sm:$0xff]  ;;  %v538_v47 = vld [vmem:[%s11575_s20 + $0x228] sm:$0xff] }
 0x235   :  { %v7714_v45 = vpack.c.bf16 %v531_v41, %v529_v40  ;;  %v533_v49 = vld [vmem:[%s11575_s20 + $0x200] sm:$0xff]  ;;  %v540_v52 = vld [vmem:[%s11575_s20 + $0x238] sm:$0xff]  ;;  %v539_v57 = vld [vmem:[%s11575_s20 + $0x230] sm:$0xff] }
 0x236   :  { %v7720_v55 = vpack.c.bf16 %v540_v52, %v538_v47  ;;  %v537_v56 = vld [vmem:[%s11575_s20 + $0x220] sm:$0xff]  ;;  %v543_v63 = vld [vmem:[%s11575_s20 + $0x250] sm:$0xff]  ;;  %v550_v5 = vld [vmem:[%s11575_s20 + $0x288] sm:$0xff] }
 0x237   :  { %7675 = vmatpush1.bf16.msra.mxu0 %v7674_v43  ;;  %v534_v43 = vld [vmem:[%s11575_s20 + $0x208] sm:$0xff]  ;;  %v7722_v60 = vpack.c.bf16 %v539_v57, %v537_v56  ;;  %v541_v62 = vld [vmem:[%s11575_s20 + $0x240] sm:$0xff]  ;;  %v547_v4 = vld [vmem:[%s11575_s20 + $0x270] sm:$0xff] }
 0x238   :  { %7677 = vmatprep.subr.bf16.mxu0 %v7676_v44  ;;  %v536_v44 = vld [vmem:[%s11575_s20 + $0x218] sm:$0xff]  ;;  %v7726_v2 = vpack.c.bf16 %v543_v63, %v541_v62  ;;  %v549_v9 = vld [vmem:[%s11575_s20 + $0x280] sm:$0xff]  ;;  %v551_v10 = vld [vmem:[%s11575_s20 + $0x290] sm:$0xff] }
 0x239   :  { %v7716_v48 = vpack.c.bf16 %v536_v44, %v534_v43  ;;  %v554_v11 = vld [vmem:[%s11575_s20 + $0x2a8] sm:$0xff]  ;;  %v553_v15 = vld [vmem:[%s11575_s20 + $0x2a0] sm:$0xff]  ;;  %v555_v16 = vld [vmem:[%s11575_s20 + $0x2b0] sm:$0xff] }
 0x23a   :  { %v558_v17 = vld [vmem:[%s11575_s20 + $0x2c8] sm:$0xff]  ;;  %v557_v21 = vld [vmem:[%s11575_s20 + $0x2c0] sm:$0xff]  ;;  %v559_v22 = vld [vmem:[%s11575_s20 + $0x2d0] sm:$0xff] }
 0x23b   :  { %7679 = vmatpush1.bf16.msra.mxu0 %v7678_v51  ;;  %v535_v51 = vld [vmem:[%s11575_s20 + $0x210] sm:$0xff]  ;;  %v562_v23 = vld [vmem:[%s11575_s20 + $0x2e8] sm:$0xff]  ;;  %v561_v27 = vld [vmem:[%s11575_s20 + $0x2e0] sm:$0xff] }
 0x23c   :  { %7681 = vmatprep.subr.bf16.mxu0 %v7680_v53  ;;  %v7718_v53 = vpack.c.bf16 %v535_v51, %v533_v49  ;;  %v563_v28 = vld [vmem:[%s11575_s20 + $0x2f0] sm:$0xff]  ;;  %v566_v29 = vld [vmem:[%s11575_s20 + $0x308] sm:$0xff]  ;;  %v565_v33 = vld [vmem:[%s11575_s20 + $0x300] sm:$0xff] }
 0x23d   :  { %v567_v35 = vld [vmem:[%s11575_s20 + $0x310] sm:$0xff]  ;;  %v570_v36 = vld [vmem:[%s11575_s20 + $0x328] sm:$0xff]  ;;  %v569_v40 = vld [vmem:[%s11575_s20 + $0x320] sm:$0xff] }
 0x23e   :  { %v7750_v38 = vpack.c.bf16 %v567_v35, %v565_v33  ;;  %v571_v41 = vld [vmem:[%s11575_s20 + $0x330] sm:$0xff]  ;;  %v574_v43 = vld [vmem:[%s11575_s20 + $0x348] sm:$0xff]  ;;  %v576_v44 = vld [vmem:[%s11575_s20 + $0x358] sm:$0xff] }
 0x23f   :  { %7683 = vmatpush1.bf16.msra.mxu0 %v7682_v58  ;;  %v542_v58 = vld [vmem:[%s11575_s20 + $0x248] sm:$0xff]  ;;  %v573_v49 = vld [vmem:[%s11575_s20 + $0x340] sm:$0xff]  ;;  %v575_v51 = vld [vmem:[%s11575_s20 + $0x350] sm:$0xff] }
 0x240   :  { %7685 = vmatprep.subr.bf16.mxu0 %v7684_v59  ;;  %v544_v59 = vld [vmem:[%s11575_s20 + $0x258] sm:$0xff]  ;;  %v578_v47 = vld [vmem:[%s11575_s20 + $0x368] sm:$0xff]  ;;  %v579_v56 = vld [vmem:[%s11575_s20 + $0x370] sm:$0xff] }
 0x241   :  { %v7724_v61 = vpack.c.bf16 %v544_v59, %v542_v58  ;;  %v580_v52 = vld [vmem:[%s11575_s20 + $0x378] sm:$0xff]  ;;  %v582_v57 = vld [vmem:[%s11575_s20 + $0x388] sm:$0xff]  ;;  %v583_v62 = vld [vmem:[%s11575_s20 + $0x390] sm:$0xff] }
 0x242   :  { %v584_v58 = vld [vmem:[%s11575_s20 + $0x398] sm:$0xff]  ;;  %v586_v63 = vld [vmem:[%s11575_s20 + $0x3a8] sm:$0xff]  ;;  %v605_v33 = vld [vmem:[%s11575_s20 + $0x440] sm:$0xff] }
 0x243   :  { %7687 = vmatpush1.bf16.msra.mxu0 %v7686_v0  ;;  %v546_v0 = vld [vmem:[%s11575_s20 + $0x268] sm:$0xff]  ;;  %v607_v35 = vld [vmem:[%s11575_s20 + $0x450] sm:$0xff] }
 0x244   :  { %7689 = vmatprep.subr.bf16.mxu0 %v7688_v1  ;;  %v548_v1 = vld [vmem:[%s11575_s20 + $0x278] sm:$0xff] }
 0x245   :  { %v7728_v3 = vpack.c.bf16 %v548_v1, %v546_v0  ;;  %v588_v0 = vld [vmem:[%s11575_s20 + $0x3b8] sm:$0xff] }
 0x247   :  { %7691 = vmatpush1.bf16.msra.mxu0 %v7690_v6  ;;  %v552_v6 = vld [vmem:[%s11575_s20 + $0x298] sm:$0xff] }
 0x248   :  { %7693 = vmatprep.subr.bf16.mxu0 %v7692_v7  ;;  %v7732_v8 = vpack.c.bf16 %v552_v6, %v550_v5  ;;  %v592_v5 = vld [vmem:[%s11575_s20 + $0x3d8] sm:$0xff] }
 0x24b   :  { %7695 = vmatpush1.bf16.msra.mxu0 %v7694_v12  ;;  %v556_v12 = vld [vmem:[%s11575_s20 + $0x2b8] sm:$0xff] }
 0x24c   :  { %7697 = vmatprep.subr.bf16.mxu0 %v7696_v13  ;;  %v7734_v13 = vpack.c.bf16 %v551_v10, %v549_v9  ;;  %v7736_v14 = vpack.c.bf16 %v556_v12, %v554_v11  ;;  %v591_v9 = vld [vmem:[%s11575_s20 + $0x3d0] sm:$0xff]  ;;  %v594_v10 = vld [vmem:[%s11575_s20 + $0x3e8] sm:$0xff]  ;;  %v596_v11 = vld [vmem:[%s11575_s20 + $0x3f8] sm:$0xff] }
 0x24f   :  { %7699 = vmatpush1.bf16.msra.mxu0 %v7698_v18  ;;  %v560_v18 = vld [vmem:[%s11575_s20 + $0x2d8] sm:$0xff] }
 0x250   :  { %7701 = vmatprep.subr.bf16.mxu0 %v7700_v19  ;;  %v7738_v19 = vpack.c.bf16 %v555_v16, %v553_v15  ;;  %v7740_v20 = vpack.c.bf16 %v560_v18, %v558_v17  ;;  %v595_v15 = vld [vmem:[%s11575_s20 + $0x3f0] sm:$0xff]  ;;  %v10166_v16 = vld [vmem:[%s11576_s27 + $0x8] sm:$0xff]  ;;  %v600_v18 = vld [vmem:[%s11575_s20 + $0x418] sm:$0xff] }
 0x251   :  { %v598_v17 = vld [vmem:[%s11575_s20 + $0x408] sm:$0xff] }
 0x253   :  { %7703 = vmatpush1.bf16.msra.mxu0 %v7702_v24  ;;  %v564_v24 = vld [vmem:[%s11575_s20 + $0x2f8] sm:$0xff] }
 0x254   :  { %7705 = vmatprep.subr.bf16.mxu0 %v7704_v25  ;;  %v7742_v25 = vpack.c.bf16 %v559_v22, %v557_v21  ;;  %v7744_v26 = vpack.c.bf16 %v564_v24, %v562_v23  ;;  %v7780_v21 = vpack.c.bf16 %v600_v18, %v598_v17  ;;  %v597_v22 = vld [vmem:[%s11575_s20 + $0x400] sm:$0xff]  ;;  %v599_v23 = vld [vmem:[%s11575_s20 + $0x410] sm:$0xff]  ;;  %v602_v24 = vld [vmem:[%s11575_s20 + $0x428] sm:$0xff] }
 0x255   :  { %v619_v17 = vld [vmem:[%s11575_s20 + $0x4b0] sm:$0xff]  ;;  %v622_v18 = vld [vmem:[%s11575_s20 + $0x4c8] sm:$0xff] }
 0x257   :  { %7707 = vmatpush1.bf16.msra.mxu0 %v7706_v30  ;;  %v568_v30 = vld [vmem:[%s11575_s20 + $0x318] sm:$0xff] }
 0x258   :  { %7709 = vmatprep.subr.bf16.mxu0 %v7708_v31  ;;  %v7746_v31 = vpack.c.bf16 %v563_v28, %v561_v27  ;;  %v7748_v32 = vpack.c.bf16 %v568_v30, %v566_v29  ;;  %v601_v29 = vld [vmem:[%s11575_s20 + $0x420] sm:$0xff]  ;;  %v603_v30 = vld [vmem:[%s11575_s20 + $0x430] sm:$0xff] }
 0x25b   :  { %7711 = vmatpush1.bf16.msra.mxu0 %v7710_v37  ;;  %v572_v37 = vld [vmem:[%s11575_s20 + $0x338] sm:$0xff] }
 0x25c   :  { %7713 = vmatprep.subr.bf16.mxu0 %v7712_v39  ;;  %v7752_v39 = vpack.c.bf16 %v572_v37, %v570_v36  ;;  %v1083_v36 = vld [vmem:[%s11578_s10 + $0x80] sm:$0xff]  ;;  %v1084_v37 = vld [vmem:[%s11578_s10 + $0x88] sm:$0xff] }
 0x25f   :  { %7715 = vmatpush1.bf16.msra.mxu0 %v7714_v45  ;;  %v7754_v45 = vpack.c.bf16 %v571_v41, %v569_v40  ;;  %v10190_v40 = vpack.c.bf16 %v1084_v37, %v1083_v36  ;;  %v1068_v41 = vld [vmem:[%s11578_s10 + $0x8] sm:$0xff]  ;;  %v629_v36 = vld [vmem:[%s11575_s20 + $0x500] sm:$0xff]  ;;  %v631_v37 = vld [vmem:[%s11575_s20 + $0x510] sm:$0xff] }
 0x260   :  { %7717 = vmatprep.subr.bf16.mxu0 %v7716_v48  ;;  %v7756_v48 = vpack.c.bf16 %v576_v44, %v574_v43  ;;  %v1085_v43 = vld [vmem:[%s11578_s10 + $0x90] sm:$0xff]  ;;  %v1086_v44 = vld [vmem:[%s11578_s10 + $0x98] sm:$0xff] }
 0x261   :  { %7909 = vmatprep.subr.bf16.mxu1 %v10190_v40 }
 0x262   :  { %846 = vmatmul.mubr.f32.vlgmr.msra.gmra.mrb[0].mxu0 %v10055_v50  ;;  %v545_v50 = vld [vmem:[%s11575_s20 + $0x260] sm:$0xff] }
 0x263   :  { %7719 = vmatpush1.bf16.msra.mxu0 %v7718_v53  ;;  %916 = vmatprep.mubr.f32.mxu0 %v755_v54  ;;  %v7730_v7 = vpack.c.bf16 %v547_v4, %v545_v50  ;;  %v7758_v53 = vpack.c.bf16 %v575_v51, %v573_v49  ;;  %v7760_v54 = vpack.c.bf16 %v580_v52, %v578_v47  ;;  %v587_v50 = vld [vmem:[%s11575_s20 + $0x3b0] sm:$0xff]  ;;  %v590_v4 = vld [vmem:[%s11575_s20 + $0x3c8] sm:$0xff]  ;;  %v1070_v51 = vld [vmem:[%s11578_s10 + $0x18] sm:$0xff] }
 0x264   :  { %7721 = vmatprep.subr.bf16.mxu0 %v7720_v55  ;;  %v577_v55 = vld [vmem:[%s11575_s20 + $0x360] sm:$0xff]  ;;  %v1069_v49 = vld [vmem:[%s11578_s10 + $0x10] sm:$0xff]  ;;  %v610_v52 = vld [vmem:[%s11575_s20 + $0x468] sm:$0xff] }
 0x265   :  { %v7762_v59 = vpack.c.bf16 %v579_v56, %v577_v55  ;;  %v1087_v47 = vld [vmem:[%s11578_s10 + $0xa0] sm:$0xff]  ;;  %v10207_v55 = vpack.c.bf16 %v1070_v51, %v1069_v49  ;;  %v7790_v56 = vpack.c.bf16 %v607_v35, %v605_v33  ;;  %v638_v49 = vld [vmem:[%s11575_s20 + $0x548] sm:$0xff]  ;;  %v640_v51 = vld [vmem:[%s11575_s20 + $0x558] sm:$0xff] }
 0x267   :  { %7723 = vmatpush1.bf16.msra.mxu0 %v7722_v60  ;;  %v7764_v60 = vpack.c.bf16 %v584_v58, %v582_v57  ;;  %v609_v57 = vld [vmem:[%s11575_s20 + $0x460] sm:$0xff] }
 0x268   :  { %7725 = vmatprep.subr.bf16.mxu0 %v7724_v61  ;;  %v581_v61 = vld [vmem:[%s11575_s20 + $0x380] sm:$0xff] }
 0x269   :  { %v7766_v1 = vpack.c.bf16 %v583_v62, %v581_v61  ;;  %v611_v62 = vld [vmem:[%s11575_s20 + $0x470] sm:$0xff] }
 0x26b   :  { %7727 = vmatpush1.bf16.msra.mxu0 %v7726_v2  ;;  %v7768_v2 = vpack.c.bf16 %v588_v0, %v586_v63  ;;  %v1089_v63 = vld [vmem:[%s11578_s10 + $0xb0] sm:$0xff]  ;;  %v1090_v0 = vld [vmem:[%s11578_s10 + $0xb8] sm:$0xff] }
 0x26c   :  { %7729 = vmatprep.subr.bf16.mxu0 %v7728_v3  ;;  %v585_v3 = vld [vmem:[%s11575_s20 + $0x3a0] sm:$0xff] }
 0x26d   :  { %v7770_v6 = vpack.c.bf16 %v587_v50, %v585_v3  ;;  %v7794_v50 = vpack.c.bf16 %v611_v62, %v609_v57  ;;  %v644_v57 = vld [vmem:[%s11575_s20 + $0x578] sm:$0xff]  ;;  %v643_v62 = vld [vmem:[%s11575_s20 + $0x570] sm:$0xff] }
 0x26f   :  { %7731 = vmatpush1.bf16.msra.mxu0 %v7730_v7  ;;  %v7772_v7 = vpack.c.bf16 %v592_v5, %v590_v4  ;;  %v10224_v4 = vpack.c.bf16 %v1090_v0, %v1089_v63  ;;  %v1073_v5 = vld [vmem:[%s11578_s10 + $0x30] sm:$0xff]  ;;  %v646_v63 = vld [vmem:[%s11575_s20 + $0x588] sm:$0xff]  ;;  %v648_v0 = vld [vmem:[%s11575_s20 + $0x598] sm:$0xff] }
 0x270   :  { %7733 = vmatprep.subr.bf16.mxu0 %v7732_v8  ;;  %v589_v8 = vld [vmem:[%s11575_s20 + $0x3c0] sm:$0xff] }
 0x271   :  { %v7774_v12 = vpack.c.bf16 %v591_v9, %v589_v8  ;;  %v613_v8 = vld [vmem:[%s11575_s20 + $0x480] sm:$0xff]  ;;  %v615_v9 = vld [vmem:[%s11575_s20 + $0x490] sm:$0xff] }
 0x273   :  { %7735 = vmatpush1.bf16.msra.mxu0 %v7734_v13  ;;  %v7776_v13 = vpack.c.bf16 %v596_v11, %v594_v10  ;;  %v618_v10 = vld [vmem:[%s11575_s20 + $0x4a8] sm:$0xff]  ;;  %v620_v11 = vld [vmem:[%s11575_s20 + $0x4b8] sm:$0xff] }
 0x274   :  { %7737 = vmatprep.subr.bf16.mxu0 %v7736_v14  ;;  %v593_v14 = vld [vmem:[%s11575_s20 + $0x3e0] sm:$0xff] }
 0x277   :  { %7739 = vmatpush1.bf16.msra.mxu0 %v7738_v19  ;;  %v7778_v19 = vpack.c.bf16 %v595_v15, %v593_v14  ;;  %v7800_v14 = vpack.c.bf16 %v620_v11, %v618_v10  ;;  %v617_v15 = vld [vmem:[%s11575_s20 + $0x4a0] sm:$0xff]  ;;  %v651_v11 = vld [vmem:[%s11575_s20 + $0x5b0] sm:$0xff] }
 0x278   :  { %7741 = vmatprep.subr.bf16.mxu0 %v7740_v20  ;;  %v10172_v20 = vrot.slane %v10166_v16, %v10044_v42  ;;  %v649_v10 = vld [vmem:[%s11575_s20 + $0x5a0] sm:$0xff] }
 0x27a   :  { %v771_v27 = vcombine.high %v10172_v20, %v10172_v20 }
 0x27b   :  { %7743 = vmatpush1.bf16.msra.mxu0 %v7742_v25  ;;  %v604_v25 = vld [vmem:[%s11575_s20 + $0x438] sm:$0xff] }
 0x27c   :  { %7745 = vmatprep.subr.bf16.mxu0 %v7744_v26  ;;  %v7782_v26 = vpack.c.bf16 %v599_v23, %v597_v22  ;;  %v7784_v28 = vpack.c.bf16 %v604_v25, %v602_v24  ;;  %v621_v23 = vld [vmem:[%s11575_s20 + $0x4c0] sm:$0xff]  ;;  %v623_v24 = vld [vmem:[%s11575_s20 + $0x4d0] sm:$0xff]  ;;  %v626_v25 = vld [vmem:[%s11575_s20 + $0x4e8] sm:$0xff] }
 0x27f   :  { %7747 = vmatpush1.bf16.msra.mxu0 %v7746_v31  ;;  %v606_v31 = vld [vmem:[%s11575_s20 + $0x448] sm:$0xff] }
 0x280   :  { %7749 = vmatprep.subr.bf16.mxu0 %v7748_v32  ;;  %v608_v32 = vld [vmem:[%s11575_s20 + $0x458] sm:$0xff] }
 0x283   :  { %7751 = vmatpush1.bf16.msra.mxu0 %v7750_v38  ;;  %v1067_v38 = vld [vmem:[%s11578_s10] sm:$0xff] }
 0x284   :  { %7753 = vmatprep.subr.bf16.mxu0 %v7752_v39  ;;  %v7786_v39 = vpack.c.bf16 %v603_v30, %v601_v29  ;;  %v625_v29 = vld [vmem:[%s11575_s20 + $0x4e0] sm:$0xff]  ;;  %v627_v30 = vld [vmem:[%s11575_s20 + $0x4f0] sm:$0xff] }
 0x285   :  { %v7810_v33 = vpack.c.bf16 %v627_v30, %v625_v29  ;;  %v664_v29 = vld [vmem:[%s11575_s20 + $0x618] sm:$0xff] }
 0x287   :  { %7755 = vmatpush1.bf16.msra.mxu0 %v7754_v45  ;;  %v10195_v45 = vpack.c.bf16 %v1068_v41, %v1067_v38  ;;  %v634_v38 = vld [vmem:[%s11575_s20 + $0x528] sm:$0xff]  ;;  %v7814_v41 = vpack.c.bf16 %v631_v37, %v629_v36  ;;  %v668_v36 = vld [vmem:[%s11575_s20 + $0x638] sm:$0xff] }
 0x288   :  { %7757 = vmatprep.subr.bf16.mxu0 %v7756_v48  ;;  %v10197_v48 = vpack.c.bf16 %v1086_v44, %v1085_v43  ;;  %v633_v44 = vld [vmem:[%s11575_s20 + $0x520] sm:$0xff] }
 0x289   :  { %7911 = vmatpush3.bf16.msra.mxu1 %v10195_v45 }
 0x28a   :  { %7913 = vmatprep.subr.bf16.mxu1 %v10197_v48 }
 0x28b   :  { %7759 = vmatpush1.bf16.msra.mxu0 %v7758_v53  ;;  %v612_v53 = vld [vmem:[%s11575_s20 + $0x478] sm:$0xff] }
 0x28c   :  { %7761 = vmatprep.subr.bf16.mxu0 %v7760_v54  ;;  %v1088_v54 = vld [vmem:[%s11578_s10 + $0xa8] sm:$0xff]  ;;  %v7792_v61 = vpack.c.bf16 %v612_v53, %v610_v52  ;;  %v7820_v52 = vpack.c.bf16 %v640_v51, %v638_v49  ;;  %v637_v53 = vld [vmem:[%s11575_s20 + $0x540] sm:$0xff] }
 0x28d   :  { %v10211_v58 = vpack.c.bf16 %v1088_v54, %v1087_v47  ;;  %7915 = vmatpush3.bf16.msra.mxu1 %v10207_v55  ;;  %v639_v54 = vld [vmem:[%s11575_s20 + $0x550] sm:$0xff] }
 0x28f   :  { %7763 = vmatpush1.bf16.msra.mxu0 %v7762_v59  ;;  %v1071_v59 = vld [vmem:[%s11578_s10 + $0x20] sm:$0xff]  ;;  %7917 = vmatprep.subr.bf16.mxu1 %v10211_v58 }
 0x290   :  { %7765 = vmatprep.subr.bf16.mxu0 %v7764_v60  ;;  %v1072_v60 = vld [vmem:[%s11578_s10 + $0x28] sm:$0xff] }
 0x291   :  { %v10221_v3 = vpack.c.bf16 %v1072_v60, %v1071_v59  ;;  %v7822_v59 = vpack.c.bf16 %v639_v54, %v637_v53  ;;  %v674_v53 = vld [vmem:[%s11575_s20 + $0x668] sm:$0xff]  ;;  %v676_v54 = vld [vmem:[%s11575_s20 + $0x678] sm:$0xff] }
 0x293   :  { %7767 = vmatpush1.bf16.msra.mxu0 %v7766_v1  ;;  %v614_v1 = vld [vmem:[%s11575_s20 + $0x488] sm:$0xff]  ;;  %7919 = vmatpush3.bf16.msra.mxu1 %v10221_v3 }
 0x294   :  { %7769 = vmatprep.subr.bf16.mxu0 %v7768_v2  ;;  %v616_v2 = vld [vmem:[%s11575_s20 + $0x498] sm:$0xff]  ;;  %7921 = vmatprep.subr.bf16.mxu1 %v10224_v4 }
 0x297   :  { %7771 = vmatpush1.bf16.msra.mxu0 %v7770_v6  ;;  %v1074_v6 = vld [vmem:[%s11578_s10 + $0x38] sm:$0xff] }
 0x298   :  { %7773 = vmatprep.subr.bf16.mxu0 %v7772_v7  ;;  %v7796_v7 = vpack.c.bf16 %v616_v2, %v614_v1  ;;  %v7828_v2 = vpack.c.bf16 %v648_v0, %v646_v63  ;;  %v677_v0 = vld [vmem:[%s11575_s20 + $0x680] sm:$0xff] }
 0x29b   :  { %7775 = vmatpush1.bf16.msra.mxu0 %v7774_v12  ;;  %v10233_v12 = vpack.c.bf16 %v1074_v6, %v1073_v5  ;;  %v647_v5 = vld [vmem:[%s11575_s20 + $0x590] sm:$0xff]  ;;  %v650_v6 = vld [vmem:[%s11575_s20 + $0x5a8] sm:$0xff] }
 0x29c   :  { %7777 = vmatprep.subr.bf16.mxu0 %v7776_v13  ;;  %v7798_v13 = vpack.c.bf16 %v615_v9, %v613_v8 }
 0x29d   :  { %7923 = vmatpush3.bf16.msra.mxu1 %v10233_v12 }
 0x29f   :  { %7779 = vmatpush1.bf16.msra.mxu0 %v7778_v19  ;;  %v624_v19 = vld [vmem:[%s11575_s20 + $0x4d8] sm:$0xff] }
 0x2a0   :  { %7781 = vmatprep.subr.bf16.mxu0 %v7780_v21  ;;  %v7802_v21 = vpack.c.bf16 %v619_v17, %v617_v15  ;;  %v7804_v22 = vpack.c.bf16 %v624_v19, %v622_v18  ;;  %v7834_v15 = vpack.c.bf16 %v651_v11, %v649_v10  ;;  %v653_v18 = vld [vmem:[%s11575_s20 + $0x5c0] sm:$0xff]  ;;  %v655_v19 = vld [vmem:[%s11575_s20 + $0x5d0] sm:$0xff]  ;;  %v688_v10 = vld [vmem:[%s11575_s20 + $0x6d8] sm:$0xff] }
 0x2a2   :  { %917 = vmatmul.mubr.f32.vlgmr.msra.gmra.mrb[0].mxu0 %v10098_v46  ;;  %v7788_v46 = vpack.c.bf16 %v608_v32, %v606_v31  ;;  %v630_v31 = vld [vmem:[%s11575_s20 + $0x508] sm:$0xff]  ;;  %v632_v32 = vld [vmem:[%s11575_s20 + $0x518] sm:$0xff] }
 0x2a3   :  { %7783 = vmatpush1.bf16.msra.mxu0 %v7782_v26  ;;  %987 = vmatprep.mubr.f32.mxu0 %v771_v27  ;;  %v628_v26 = vld [vmem:[%s11575_s20 + $0x4f8] sm:$0xff]  ;;  %v7806_v27 = vpack.c.bf16 %v623_v24, %v621_v23  ;;  %v7812_v35 = vpack.c.bf16 %v632_v32, %v630_v31  ;;  %v7838_v23 = vpack.c.bf16 %v655_v19, %v653_v18 }
 0x2a4   :  { %7785 = vmatprep.subr.bf16.mxu0 %v7784_v28  ;;  %v7808_v28 = vpack.c.bf16 %v628_v26, %v626_v25  ;;  %v756_v24 = vcombine.high %v10166_v16, %v10166_v16  ;;  %v657_v26 = vld [vmem:[%s11575_s20 + $0x5e0] sm:$0xff]  ;;  %v666_v16 = vld [vmem:[%s11575_s20 + $0x628] sm:$0xff]  ;;  %v692_v18 = vld [vmem:[%s11575_s20 + $0x6f8] sm:$0xff] }
 0x2a6   :  { %v10284_v31 = vrot.slane %v756_v24, %v10044_v42  ;;  %v694_v24 = vld [vmem:[%s11575_s20 + $0x708] sm:$0xff] }
 0x2a7   :  { %7787 = vmatpush1.bf16.msra.mxu0 %v7786_v39  ;;  %v636_v39 = vld [vmem:[%s11575_s20 + $0x538] sm:$0xff] }
 0x2a8   :  { %7789 = vmatprep.subr.bf16.mxu0 %v7788_v46  ;;  %v7816_v43 = vpack.c.bf16 %v636_v39, %v634_v38  ;;  %v635_v46 = vld [vmem:[%s11575_s20 + $0x530] sm:$0xff]  ;;  %v772_v38 = vcombine.high %v10284_v31, %v10284_v31  ;;  %v7848_v39 = vpack.c.bf16 %v668_v36, %v666_v16  ;;  %v697_v16 = vld [vmem:[%s11575_s20 + $0x720] sm:$0xff] }
 0x2a9   :  { %v7818_v47 = vpack.c.bf16 %v635_v46, %v633_v44  ;;  %v670_v44 = vld [vmem:[%s11575_s20 + $0x648] sm:$0xff]  ;;  %v672_v46 = vld [vmem:[%s11575_s20 + $0x658] sm:$0xff]  ;;  %v699_v36 = vld [vmem:[%s11575_s20 + $0x730] sm:$0xff] }
 0x2aa   :  { %v7852_v51 = vpack.c.bf16 %v672_v46, %v670_v44  ;;  %v703_v44 = vld [vmem:[%s11575_s20 + $0x750] sm:$0xff]  ;;  %v706_v46 = vld [vmem:[%s11575_s20 + $0x768] sm:$0xff] }
 0x2ab   :  { %7791 = vmatpush1.bf16.msra.mxu0 %v7790_v56  ;;  %v642_v56 = vld [vmem:[%s11575_s20 + $0x568] sm:$0xff] }
 0x2ac   :  { %7793 = vmatprep.subr.bf16.mxu0 %v7792_v61  ;;  %v7824_v60 = vpack.c.bf16 %v644_v57, %v642_v56  ;;  %v641_v61 = vld [vmem:[%s11575_s20 + $0x560] sm:$0xff]  ;;  %v7856_v57 = vpack.c.bf16 %v676_v54, %v674_v53  ;;  %v707_v53 = vld [vmem:[%s11575_s20 + $0x770] sm:$0xff]  ;;  %v710_v54 = vld [vmem:[%s11575_s20 + $0x788] sm:$0xff] }
 0x2ad   :  { %v7826_v1 = vpack.c.bf16 %v643_v62, %v641_v61  ;;  %v680_v61 = vld [vmem:[%s11575_s20 + $0x698] sm:$0xff] }
 0x2af   :  { %7795 = vmatpush1.bf16.msra.mxu0 %v7794_v50  ;;  %v645_v50 = vld [vmem:[%s11575_s20 + $0x580] sm:$0xff] }
 0x2b0   :  { %7797 = vmatprep.subr.bf16.mxu0 %v7796_v7  ;;  %v652_v7 = vld [vmem:[%s11575_s20 + $0x5b8] sm:$0xff]  ;;  %v7830_v8 = vpack.c.bf16 %v647_v5, %v645_v50 }
 0x2b1   :  { %v7832_v9 = vpack.c.bf16 %v652_v7, %v650_v6  ;;  %v684_v50 = vld [vmem:[%s11575_s20 + $0x6b8] sm:$0xff]  ;;  %v681_v7 = vld [vmem:[%s11575_s20 + $0x6a0] sm:$0xff] }
 0x2b3   :  { %7799 = vmatpush1.bf16.msra.mxu0 %v7798_v13  ;;  %v654_v13 = vld [vmem:[%s11575_s20 + $0x5c8] sm:$0xff] }
 0x2b4   :  { %7801 = vmatprep.subr.bf16.mxu0 %v7800_v14  ;;  %v656_v14 = vld [vmem:[%s11575_s20 + $0x5d8] sm:$0xff] }
 0x2b5   :  { %v7836_v17 = vpack.c.bf16 %v656_v14, %v654_v13  ;;  %v685_v14 = vld [vmem:[%s11575_s20 + $0x6c0] sm:$0xff] }
 0x2b7   :  { %7803 = vmatpush1.bf16.msra.mxu0 %v7802_v21  ;;  %v658_v21 = vld [vmem:[%s11575_s20 + $0x5e8] sm:$0xff] }
 0x2b8   :  { %7805 = vmatprep.subr.bf16.mxu0 %v7804_v22  ;;  %v660_v22 = vld [vmem:[%s11575_s20 + $0x5f8] sm:$0xff] }
 0x2b9   :  { %v7840_v25 = vpack.c.bf16 %v660_v22, %v658_v21  ;;  %v689_v22 = vld [vmem:[%s11575_s20 + $0x6e0] sm:$0xff] }
 0x2bb   :  { %7807 = vmatpush1.bf16.msra.mxu0 %v7806_v27  ;;  %v659_v27 = vld [vmem:[%s11575_s20 + $0x5f0] sm:$0xff] }
 0x2bc   :  { %7809 = vmatprep.subr.bf16.mxu0 %v7808_v28  ;;  %v662_v28 = vld [vmem:[%s11575_s20 + $0x608] sm:$0xff]  ;;  %v7842_v30 = vpack.c.bf16 %v659_v27, %v657_v26 }
 0x2bd   :  { %v7844_v32 = vpack.c.bf16 %v664_v29, %v662_v28  ;;  %v693_v28 = vld [vmem:[%s11575_s20 + $0x700] sm:$0xff]  ;;  %v695_v29 = vld [vmem:[%s11575_s20 + $0x710] sm:$0xff] }
 0x2bf   :  { %7811 = vmatpush1.bf16.msra.mxu0 %v7810_v33  ;;  %v661_v33 = vld [vmem:[%s11575_s20 + $0x600] sm:$0xff] }
 0x2c0   :  { %7813 = vmatprep.subr.bf16.mxu0 %v7812_v35  ;;  %v663_v35 = vld [vmem:[%s11575_s20 + $0x610] sm:$0xff] }
 0x2c1   :  { %v7846_v37 = vpack.c.bf16 %v663_v35, %v661_v33  ;;  %v7878_v33 = vpack.c.bf16 %v695_v29, %v693_v28  ;;  %v1077_v28 = vld [vmem:[%s11578_s10 + $0x50] sm:$0xff]  ;;  %v1078_v29 = vld [vmem:[%s11578_s10 + $0x58] sm:$0xff] }
 0x2c3   :  { %7815 = vmatpush1.bf16.msra.mxu0 %v7814_v41  ;;  %v665_v41 = vld [vmem:[%s11575_s20 + $0x620] sm:$0xff] }
 0x2c4   :  { %7817 = vmatprep.subr.bf16.mxu0 %v7816_v43  ;;  %v667_v43 = vld [vmem:[%s11575_s20 + $0x630] sm:$0xff] }
 0x2c5   :  { %v7850_v49 = vpack.c.bf16 %v667_v43, %v665_v41  ;;  %v701_v43 = vld [vmem:[%s11575_s20 + $0x740] sm:$0xff] }
 0x2c7   :  { %7819 = vmatpush1.bf16.msra.mxu0 %v7818_v47  ;;  %v669_v47 = vld [vmem:[%s11575_s20 + $0x640] sm:$0xff] }
 0x2c8   :  { %7821 = vmatprep.subr.bf16.mxu0 %v7820_v52  ;;  %v671_v52 = vld [vmem:[%s11575_s20 + $0x650] sm:$0xff] }
 0x2c9   :  { %v7854_v56 = vpack.c.bf16 %v671_v52, %v669_v47  ;;  %v705_v52 = vld [vmem:[%s11575_s20 + $0x760] sm:$0xff] }
 0x2cb   :  { %7823 = vmatpush1.bf16.msra.mxu0 %v7822_v59  ;;  %v675_v59 = vld [vmem:[%s11575_s20 + $0x670] sm:$0xff] }
 0x2cc   :  { %7825 = vmatprep.subr.bf16.mxu0 %v7824_v60  ;;  %v678_v60 = vld [vmem:[%s11575_s20 + $0x688] sm:$0xff] }
 0x2cd   :  { %v7860_v63 = vpack.c.bf16 %v680_v61, %v678_v60  ;;  %v711_v60 = vld [vmem:[%s11575_s20 + $0x790] sm:$0xff]  ;;  %v714_v61 = vld [vmem:[%s11575_s20 + $0x7a8] sm:$0xff] }
 0x2cf   :  { %7827 = vmatpush1.bf16.msra.mxu0 %v7826_v1  ;;  %v679_v1 = vld [vmem:[%s11575_s20 + $0x690] sm:$0xff] }
 0x2d0   :  { %7829 = vmatprep.subr.bf16.mxu0 %v7828_v2  ;;  %v682_v2 = vld [vmem:[%s11575_s20 + $0x6a8] sm:$0xff]  ;;  %v7862_v5 = vpack.c.bf16 %v679_v1, %v677_v0  ;;  %v713_v1 = vld [vmem:[%s11575_s20 + $0x7a0] sm:$0xff] }
 0x2d1   :  { %v7864_v6 = vpack.c.bf16 %v684_v50, %v682_v2  ;;  %v715_v2 = vld [vmem:[%s11575_s20 + $0x7b0] sm:$0xff]  ;;  %v718_v50 = vld [vmem:[%s11575_s20 + $0x7c8] sm:$0xff] }
 0x2d3   :  { %7831 = vmatpush1.bf16.msra.mxu0 %v7830_v8  ;;  %v683_v8 = vld [vmem:[%s11575_s20 + $0x6b0] sm:$0xff] }
 0x2d4   :  { %7833 = vmatprep.subr.bf16.mxu0 %v7832_v9  ;;  %v686_v9 = vld [vmem:[%s11575_s20 + $0x6c8] sm:$0xff]  ;;  %v7866_v11 = vpack.c.bf16 %v683_v8, %v681_v7  ;;  %v717_v8 = vld [vmem:[%s11575_s20 + $0x7c0] sm:$0xff] }
 0x2d5   :  { %v7868_v13 = vpack.c.bf16 %v688_v10, %v686_v9  ;;  %v719_v9 = vld [vmem:[%s11575_s20 + $0x7d0] sm:$0xff]  ;;  %v722_v10 = vld [vmem:[%s11575_s20 + $0x7e8] sm:$0xff] }
 0x2d7   :  { %7835 = vmatpush1.bf16.msra.mxu0 %v7834_v15  ;;  %v687_v15 = vld [vmem:[%s11575_s20 + $0x6d0] sm:$0xff] }
 0x2d8   :  { %7837 = vmatprep.subr.bf16.mxu0 %v7836_v17  ;;  %v690_v17 = vld [vmem:[%s11575_s20 + $0x6e8] sm:$0xff]  ;;  %v7870_v19 = vpack.c.bf16 %v687_v15, %v685_v14  ;;  %v721_v15 = vld [vmem:[%s11575_s20 + $0x7e0] sm:$0xff] }
 0x2d9   :  { %v7872_v21 = vpack.c.bf16 %v692_v18, %v690_v17  ;;  %v723_v17 = vld [vmem:[%s11575_s20 + $0x7f0] sm:$0xff] }
 0x2da   :  { %v7906_v18 = vpack.c.bf16 %v723_v17, %v721_v15 }
 0x2db   :  { %7839 = vmatpush1.bf16.msra.mxu0 %v7838_v23  ;;  %v691_v23 = vld [vmem:[%s11575_s20 + $0x6f0] sm:$0xff] }
 0x2dc   :  { %7841 = vmatprep.subr.bf16.mxu0 %v7840_v25  ;;  %v696_v25 = vld [vmem:[%s11575_s20 + $0x718] sm:$0xff]  ;;  %v7874_v26 = vpack.c.bf16 %v691_v23, %v689_v22  ;;  %v1075_v23 = vld [vmem:[%s11578_s10 + $0x40] sm:$0xff] }
 0x2dd   :  { %v7876_v27 = vpack.c.bf16 %v696_v25, %v694_v24  ;;  %v1076_v24 = vld [vmem:[%s11578_s10 + $0x48] sm:$0xff] }
 0x2de   :  { %v10358_v25 = vpack.c.bf16 %v1076_v24, %v1075_v23 }
 0x2df   :  { %7843 = vmatpush1.bf16.msra.mxu0 %v7842_v30  ;;  %v698_v30 = vld [vmem:[%s11575_s20 + $0x728] sm:$0xff] }
 0x2e0   :  { %7845 = vmatprep.subr.bf16.mxu0 %v7844_v32  ;;  %v700_v32 = vld [vmem:[%s11575_s20 + $0x738] sm:$0xff] }
 0x2e1   :  { %v7880_v35 = vpack.c.bf16 %v700_v32, %v698_v30  ;;  %v10368_v30 = vpack.c.bf16 %v1078_v29, %v1077_v28  ;;  %v1095_v32 = vld [vmem:[%s11578_s10 + $0xe0] sm:$0xff] }
 0x2e2   :  { %988 = vmatmul.mubr.f32.vlgmr.msra.gmra.mrb[0].mxu0 %v10172_v20  ;;  %v673_v20 = vld [vmem:[%s11575_s20 + $0x660] sm:$0xff] }
 0x2e3   :  { %7847 = vmatpush1.bf16.msra.mxu0 %v7846_v37  ;;  %1058 = vmatprep.mubr.f32.mxu0 %v772_v38  ;;  %v7858_v62 = vpack.c.bf16 %v675_v59, %v673_v20  ;;  %v702_v37 = vld [vmem:[%s11575_s20 + $0x748] sm:$0xff]  ;;  %v704_v38 = vld [vmem:[%s11575_s20 + $0x758] sm:$0xff]  ;;  %v709_v59 = vld [vmem:[%s11575_s20 + $0x780] sm:$0xff] }
 0x2e4   :  { %7849 = vmatprep.subr.bf16.mxu0 %v7848_v39  ;;  %v7882_v39 = vpack.c.bf16 %v699_v36, %v697_v16  ;;  %v7884_v41 = vpack.c.bf16 %v704_v38, %v702_v37  ;;  %v1079_v16 = vld [vmem:[%s11578_s10 + $0x60] sm:$0xff]  ;;  %v1080_v36 = vld [vmem:[%s11578_s10 + $0x68] sm:$0xff]  ;;  %v1097_v38 = vld [vmem:[%s11578_s10 + $0xf0] sm:$0xff] }
 0x2e5   :  { %v7934_v37 = vpack.c.bf16 %v1080_v36, %v1079_v16  ;;  %v1500_v16 = vld [vmem:[%s11581_s21 + $0x88] sm:$0xff] }
 0x2e7   :  { %7851 = vmatpush1.bf16.msra.mxu0 %v7850_v49  ;;  %v708_v49 = vld [vmem:[%s11575_s20 + $0x778] sm:$0xff] }
 0x2e8   :  { %7853 = vmatprep.subr.bf16.mxu0 %v7852_v51  ;;  %v7886_v51 = vpack.c.bf16 %v703_v44, %v701_v43  ;;  %v7888_v47 = vpack.c.bf16 %v708_v49, %v706_v46  ;;  %v1082_v44 = vld [vmem:[%s11578_s10 + $0x78] sm:$0xff]  ;;  %v10384_v49 = vsub.s32 0, %v10037_v34 }
 0x2ea   :  { %11579 = vst [vmem:[#allocation81_spill] sm:$0xff] %v10384_v49 }
 0x2eb   :  { %7855 = vmatpush1.bf16.msra.mxu0 %v7854_v56  ;;  %v712_v56 = vld [vmem:[%s11575_s20 + $0x798] sm:$0xff] }
 0x2ec   :  { %7857 = vmatprep.subr.bf16.mxu0 %v7856_v57  ;;  %v7890_v57 = vpack.c.bf16 %v707_v53, %v705_v52  ;;  %v7892_v20 = vpack.c.bf16 %v712_v56, %v710_v54 }
 0x2ef   :  { %7859 = vmatpush1.bf16.msra.mxu0 %v7858_v62  ;;  %v716_v62 = vld [vmem:[%s11575_s20 + $0x7b8] sm:$0xff] }
 0x2f0   :  { %7861 = vmatprep.subr.bf16.mxu0 %v7860_v63  ;;  %v7894_v63 = vpack.c.bf16 %v711_v60, %v709_v59  ;;  %v7896_v0 = vpack.c.bf16 %v716_v62, %v714_v61 }
 0x2f3   :  { %7863 = vmatpush1.bf16.msra.mxu0 %v7862_v5  ;;  %v720_v5 = vld [vmem:[%s11575_s20 + $0x7d8] sm:$0xff] }
 0x2f4   :  { %7865 = vmatprep.subr.bf16.mxu0 %v7864_v6  ;;  %v7898_v6 = vpack.c.bf16 %v715_v2, %v713_v1  ;;  %v7900_v7 = vpack.c.bf16 %v720_v5, %v718_v50 }
 0x2f7   :  { %7867 = vmatpush1.bf16.msra.mxu0 %v7866_v11  ;;  %v724_v11 = vld [vmem:[%s11575_s20 + $0x7f8] sm:$0xff] }
 0x2f8   :  { %7869 = vmatprep.subr.bf16.mxu0 %v7868_v13  ;;  %v7902_v13 = vpack.c.bf16 %v719_v9, %v717_v8  ;;  %v7904_v14 = vpack.c.bf16 %v724_v11, %v722_v10  ;;  %v1099_v10 = vld [vmem:[#allocation7] sm:$0xff] }
 0x2f9   :  { %v1187_v11 = vcombine.high %v1099_v10, %v1099_v10 }
 0x2fb   :  { %7871 = vmatpush1.bf16.msra.mxu0 %v7870_v19  ;;  %v1091_v19 = vld [vmem:[%s11578_s10 + $0xc0] sm:$0xff] }
 0x2fc   :  { %7873 = vmatprep.subr.bf16.mxu0 %v7872_v21  ;;  %v1092_v21 = vld [vmem:[%s11578_s10 + $0xc8] sm:$0xff] }
 0x2fd   :  { %v10354_v22 = vpack.c.bf16 %v1092_v21, %v1091_v19 }
 0x2ff   :  { %7875 = vmatpush1.bf16.msra.mxu0 %v7874_v26  ;;  %7925 = vmatprep.subr.bf16.mxu1 %v10354_v22  ;;  %v1093_v26 = vld [vmem:[%s11578_s10 + $0xd0] sm:$0xff] }
 0x300   :  { %7877 = vmatprep.subr.bf16.mxu0 %v7876_v27  ;;  %7927 = vmatpush3.bf16.msra.mxu1 %v10358_v25 }
 0x303   :  { %7879 = vmatpush1.bf16.msra.mxu0 %v7878_v33  ;;  %v1096_v33 = vld [vmem:[%s11578_s10 + $0xe8] sm:$0xff] }
 0x304   :  { %7881 = vmatprep.subr.bf16.mxu0 %v7880_v35  ;;  %v10374_v35 = vpack.c.bf16 %v1096_v33, %v1095_v32 }
 0x307   :  { %7883 = vmatpush1.bf16.msra.mxu0 %v7882_v39  ;;  %v1098_v39 = vld [vmem:[%s11578_s10 + $0xf8] sm:$0xff] }
 0x308   :  { %7885 = vmatprep.subr.bf16.mxu0 %v7884_v41  ;;  %v1081_v41 = vld [vmem:[%s11578_s10 + $0x70] sm:$0xff]  ;;  %v7936_v43 = vpack.c.bf16 %v1098_v39, %v1097_v38 }
 0x309   :  { %v7938_v46 = vpack.c.bf16 %v1082_v44, %v1081_v41  ;;  %v1483_v44 = vld [vmem:[%s11581_s21] sm:$0xff] }
 0x30b   :  { %7887 = vmatpush1.bf16.msra.mxu0 %v7886_v51  ;;  %v725_v51 = vld [vmem:[#allocation2] sm:$0x3] }
 0x30c   :  { %7889 = vmatprep.subr.bf16.mxu0 %v7888_v47  ;;  %v10387_v47 = vsub.s32 1, %v10037_v34  ;;  %v730_v52 = vrot.slane %v725_v51, %v10384_v49 }
 0x30e   :  { %11580 = vst [vmem:[#allocation82_spill] sm:$0xff] %v10387_v47  ;;  %v734_v53 = vrot.slane %v725_v51, %v10387_v47  ;;  %v1501_v51 = vld [vmem:[%s11581_s21 + $0x90] sm:$0xff] }
 0x30f   :  { %7891 = vmatpush1.bf16.msra.mxu0 %v7890_v57 }
 0x310   :  { %7893 = vmatprep.subr.bf16.mxu0 %v7892_v20 }
 0x313   :  { %7895 = vmatpush1.bf16.msra.mxu0 %v7894_v63 }
 0x314   :  { %7897 = vmatprep.subr.bf16.mxu0 %v7896_v0 }
 0x317   :  { %7899 = vmatpush1.bf16.msra.mxu0 %v7898_v6 }
 0x318   :  { %7901 = vmatprep.subr.bf16.mxu0 %v7900_v7 }
 0x31b   :  { %7903 = vmatpush1.bf16.msra.mxu0 %v7902_v13  ;;  %v11480_v13 = vmov 0.0  }
 0x31c   :  { %7905 = vmatprep.subr.bf16.mxu0 %v7904_v14 }
 0x31f   :  { %7907 = vmatpush1.bf16.msra.mxu0 %v7906_v18 }
 0x322   :  { %1059 = vmatmul.mubr.f32.vlgmr.msra.gmra.mrb[0].mxu0 %v10284_v31  ;;  %v1094_v31 = vld [vmem:[%s11578_s10 + $0xd8] sm:$0xff] }
 0x323   :  { %v10364_v27 = vpack.c.bf16 %v1094_v31, %v1093_v26 }
 0x325   :  { %7929 = vmatprep.subr.bf16.mxu1 %v10364_v27 }
 0x326   :  { %7931 = vmatpush3.bf16.msra.mxu1 %v10368_v30 }
 0x327   :  { %7933 = vmatprep.subr.bf16.mxu1 %v10374_v35 }
 0x32a   :  { %7935 = vmatpush3.bf16.msra.mxu1 %v7934_v37 }
 0x32b   :  { %7937 = vmatprep.subr.bf16.mxu1 %v7936_v43 }
 0x32e   :  { %7939 = vmatpush3.bf16.msra.mxu1 %v7938_v46 }
 0x32f   :  { %6847 = vmatprep.subr.msk.mxu1 %vm1192_vm1, %v1187_v11 }
 0x3f5   :  { %v1060_v54 = vpop.f32.mrb[0].mxu0 }
 0x3f6   :  { %v8943_v56 = vadd.f32 %v1060_v54, %v730_v52  ;;  %v1062_v57 = vpop.f32.mrb[1].mxu0  ;;  %v1502_v52 = vld [vmem:[%s11581_s21 + $0x98] sm:$0xff] }
 0x3f7   :  { %v8944_v20 = vadd.f32 %v1062_v57, %v734_v53  ;;  %v7976_v54 = vpack.c.bf16 %v1502_v52, %v1501_v51  ;;  %v1486_v57 = vld [vmem:[%s11581_s21 + $0x18] sm:$0xff] }
 0x3f8   :  { %v1101_v59 = vsel %vm1100_vm0, %v8943_v56, 0.0 }
 0x3f9   :  { %v1102_v60 = vrot.slane %v1101_v59, 4  ;;  %v1108_v61 = vsel %vm1100_vm0, %v8944_v20, 0.0 }
 0x3fa   :  { %v1109_v62 = vrot.slane %v1108_v61, 4 }
 0x3fb   :  { %v1103_v63 = vadd.f32 %v1102_v60, %v1101_v59  ;;  %v1503_v59 = vld [vmem:[%s11581_s21 + $0xa0] sm:$0xff]  ;;  %v1504_v60 = vld [vmem:[%s11581_s21 + $0xa8] sm:$0xff] }
 0x3fc   :  { %v1110_v0 = vadd.f32 %v1109_v62, %v1108_v61  ;;  %v7980_v62 = vpack.c.bf16 %v1504_v60, %v1503_v59  ;;  %v9665_v60 = vmov 0.0|0.0  }
 0x3fd   :  { %v1104_v1 = vrot.slane %v1103_v63, 2 }
 0x3fe   :  { %v1111_v2 = vrot.slane %v1110_v0, 2 }
 0x3ff   :  { %v1105_v50 = vadd.f32 %v1104_v1, %v1103_v63  ;;  %v1487_v63 = vld [vmem:[%s11581_s21 + $0x20] sm:$0xff]  ;;  %v1505_v1 = vld [vmem:[%s11581_s21 + $0xb0] sm:$0xff] }
 0x400   :  { %v1112_v5 = vadd.f32 %v1111_v2, %v1110_v0  ;;  %v1488_v0 = vld [vmem:[%s11581_s21 + $0x28] sm:$0xff]  ;;  %v1506_v2 = vld [vmem:[%s11581_s21 + $0xb8] sm:$0xff] }
 0x401   :  { %v1106_v6 = vrot.slane %v1105_v50, 1 }
 0x402   :  { %v1113_v7 = vrot.slane %v1112_v5, 1 }
 0x403   :  { %v1107_v9 = vadd.f32 %v1106_v6, %v1105_v50  ;;  %v7982_v50 = vpack.c.bf16 %v1488_v0, %v1487_v63  ;;  %v1489_v6 = vld [vmem:[%s11581_s21 + $0x30] sm:$0xff]  ;;  %v1598_v0 = vld [vmem:[%s11582_s11 + $0x20] sm:$0xff] }
 0x404   :  { %v1114_v8 = vadd.f32 %v1113_v7, %v1112_v5  ;;  %v7984_v5 = vpack.c.bf16 %v1506_v2, %v1505_v1  ;;  %v1490_v7 = vld [vmem:[%s11581_s21 + $0x38] sm:$0xff]  ;;  %v1599_v1 = vld [vmem:[%s11582_s11 + $0x28] sm:$0xff] }
 0x405   :  { %v8011_v2 = vpack.c.bf16 %v1599_v1, %v1598_v0  ;;  %v6861_v0 = vld [vmem:[#allocation12] ss:$0 sm:$0xff] }
 0x406   :  { %1179 = vmatprep.mubr.f32.mxu1 %v1114_v8  ;;  %v1507_v8 = vld [vmem:[%s11581_s21 + $0xc0] sm:$0xff] }
 0x407   :  { %1180 = vmatmul.mubr.f32.vlgmr.msra.gmra.mrb[0].mxu1 %v1107_v9  ;;  %v1508_v9 = vld [vmem:[%s11581_s21 + $0xc8] sm:$0xff] }
 0x408   :  { %6848 = vmatpush1.msk.msra.mxu1 %vm1192_vm1, %v1099_v10  ;;  %1261 = vmatprep.mubr.f32.mxu1 %v11480_v13 }
 0x409   :  { %7941 = vmatprep.subr.bf16.mxu1 %v10190_v40 }
 0x4da   :  { %v6962_v14 = vpop.f32.mrb[0].mxu1 }
 0x4db   :  { %v6963_v15 = vpop.f32.mrb[1].mxu1 }
 0x4dc   :  { %v6964_v17 = vadd.f32 %v6963_v15, %v6962_v14  ;;  %v1491_v14 = vld [vmem:[%s11581_s21 + $0x40] sm:$0xff]  ;;  %v1492_v15 = vld [vmem:[%s11581_s21 + $0x48] sm:$0xff] }
 0x4de   :  { %v1185_v18 = vmul.f32 0.0078125, %v6964_v17  ;;  %v7990_v17 = vpack.c.bf16 %v1492_v15, %v1491_v14 }
 0x4e0   :  { %6849 = vmatmul.mubr.msk.f32.vlgmr.msra.gmra.mrb[2].mxu1 %vm1188_vm2, %v1185_v18  ;;  %v1509_v18 = vld [vmem:[%s11581_s21 + $0xd0] sm:$0xff] }
 0x4e1   :  { %7943 = vmatpush3.bf16.msra.mxu1 %v10195_v45 }
 0x4e2   :  { %7945 = vmatprep.subr.bf16.mxu1 %v10197_v48 }
 0x4e5   :  { %7947 = vmatpush3.bf16.msra.mxu1 %v10207_v55 }
 0x4e6   :  { %7949 = vmatprep.subr.bf16.mxu1 %v10211_v58 }
 0x4e9   :  { %7951 = vmatpush3.bf16.msra.mxu1 %v10221_v3 }
 0x4ea   :  { %7953 = vmatprep.subr.bf16.mxu1 %v10224_v4 }
 0x4ed   :  { %7955 = vmatpush3.bf16.msra.mxu1 %v10233_v12 }
 0x4ee   :  { %7957 = vmatprep.subr.bf16.mxu1 %v10354_v22 }
 0x4f1   :  { %7959 = vmatpush3.bf16.msra.mxu1 %v10358_v25 }
 0x4f2   :  { %7961 = vmatprep.subr.bf16.mxu1 %v10364_v27 }
 0x4f5   :  { %7963 = vmatpush3.bf16.msra.mxu1 %v10368_v30 }
 0x4f6   :  { %7965 = vmatprep.subr.bf16.mxu1 %v10374_v35  ;;  %v1499_v35 = vld [vmem:[%s11581_s21 + $0x80] sm:$0xff] }
 0x4f7   :  { %v7972_v36 = vpack.c.bf16 %v1500_v16, %v1499_v35 }
 0x4f9   :  { %7967 = vmatpush3.bf16.msra.mxu1 %v7934_v37 }
 0x4fa   :  { %7969 = vmatprep.subr.bf16.mxu1 %v7936_v43 }
 0x4fd   :  { %7971 = vmatpush3.bf16.msra.mxu1 %v7938_v46  ;;  %v1484_v46 = vld [vmem:[%s11581_s21 + $0x8] sm:$0xff] }
 0x4fe   :  { %6850 = vmatprep.subr.msk.mxu1 %vm1192_vm1, %v1187_v11  ;;  %v7974_v53 = vpack.c.bf16 %v1484_v46, %v1483_v44  ;;  %v7988_v11 = vpack.c.bf16 %v1508_v9, %v1507_v8  ;;  %v6853_v8 = vld [vmem:[#allocation9] ss:$0 sm:$0xff] }
 0x5b3   :  { %v1263_v40 = vpop.f32.mrb[2].mxu1 }
 0x5b4   :  { %v1271_v45 = vrot.slane %v1263_v40, %v10384_v49  ;;  %v1265_v48 = vpop.f32.mrb[3].mxu1  ;;  %v1510_v40 = vld [vmem:[%s11581_s21 + $0xd8] sm:$0xff] }
 0x5b5   :  { %v1275_v55 = vrot.slane %v1265_v48, %v10384_v49  ;;  %v1493_v48 = vld [vmem:[%s11581_s21 + $0x50] sm:$0xff] }
 0x5b6   :  { %v10413_v58 = vsub.f32 %v8943_v56, %v1271_v45  ;;  %v1485_v56 = vld [vmem:[%s11581_s21 + $0x10] sm:$0xff]  ;;  %v7992_v45 = vpack.c.bf16 %v1510_v40, %v1509_v18 }
 0x5b7   :  { %v10415_v3 = vsub.f32 %v8944_v20, %v1275_v55  ;;  %v7978_v61 = vpack.c.bf16 %v1486_v57, %v1485_v56  ;;  %v1494_v55 = vld [vmem:[%s11581_s21 + $0x58] sm:$0xff] }
 0x5b8   :  { %v1278_v4 = vmul.f32 %v10413_v58, %v10413_v58 }
 0x5b9   :  { %v1279_v12 = vmul.f32 %v10415_v3, %v10415_v3 }
 0x5ba   :  { %v1280_v19 = vsel %vm1100_vm0, %v1278_v4, 0.0  ;;  %v7994_v4 = vpack.c.bf16 %v1494_v55, %v1493_v48  ;;  %v1602_v55 = vld [vmem:[#allocation13] sm:$0xf] }
 0x5bb   :  { %v1281_v21 = vrot.slane %v1280_v19, 4  ;;  %v1287_v22 = vsel %vm1100_vm0, %v1279_v12, 0.0  ;;  %v1511_v12 = vld [vmem:[%s11581_s21 + $0xe0] sm:$0xff] }
 0x5bc   :  { %v1288_v23 = vrot.slane %v1287_v22, 4 }
 0x5bd   :  { %v1282_v24 = vadd.f32 %v1281_v21, %v1280_v19  ;;  %v1512_v19 = vld [vmem:[%s11581_s21 + $0xe8] sm:$0xff] }
 0x5be   :  { %v1289_v25 = vadd.f32 %v1288_v23, %v1287_v22  ;;  %v7996_v21 = vpack.c.bf16 %v1512_v19, %v1511_v12  ;;  %v1495_v22 = vld [vmem:[%s11581_s21 + $0x60] sm:$0xff]  ;;  %v1496_v23 = vld [vmem:[%s11581_s21 + $0x68] sm:$0xff] }
 0x5bf   :  { %v1283_v26 = vrot.slane %v1282_v24, 2 }
 0x5c0   :  { %v1290_v31 = vrot.slane %v1289_v25, 2 }
 0x5c1   :  { %v1284_v27 = vadd.f32 %v1283_v26, %v1282_v24  ;;  %v7998_v24 = vpack.c.bf16 %v1496_v23, %v1495_v22  ;;  %v1514_v26 = vld [vmem:[%s11581_s21 + $0xf8] sm:$0xff] }
 0x5c2   :  { %v1291_v28 = vadd.f32 %v1290_v31, %v1289_v25  ;;  %v1513_v25 = vld [vmem:[%s11581_s21 + $0xf0] sm:$0xff] }
 0x5c3   :  { %v1285_v29 = vrot.slane %v1284_v27, 1  ;;  %v8000_v31 = vpack.c.bf16 %v1514_v26, %v1513_v25 }
 0x5c4   :  { %v1292_v30 = vrot.slane %v1291_v28, 1 }
 0x5c5   :  { %v1286_v33 = vadd.f32 %v1285_v29, %v1284_v27  ;;  %v1497_v27 = vld [vmem:[%s11581_s21 + $0x70] sm:$0xff] }
 0x5c6   :  { %v1293_v32 = vadd.f32 %v1292_v30, %v1291_v28  ;;  %v1498_v28 = vld [vmem:[%s11581_s21 + $0x78] sm:$0xff]  ;;  %v1065_v30 = vld [vmem:[#allocation4] sm:$0x3] }
 0x5c7   :  { %v8002_v29 = vpack.c.bf16 %v1498_v28, %v1497_v27  ;;  %v1455_v16 = vrot.slane %v1065_v30, %v10384_v49 }
 0x5c8   :  { %1358 = vmatprep.mubr.f32.mxu1 %v1293_v32  ;;  %v1066_v32 = vld [vmem:[#allocation6] sm:$0x3] }
 0x5c9   :  { %1359 = vmatmul.mubr.f32.vlgmr.msra.gmra.mrb[4].mxu1 %v1286_v33  ;;  %v1472_v44 = vrot.slane %v1066_v32, %v10387_v47 }
 0x5ca   :  { %6851 = vmatpush1.msk.msra.mxu1 %vm1192_vm1, %v1099_v10  ;;  %1434 = vmatprep.mubr.f32.mxu1 %v11480_v13  ;;  %v7986_v10 = vpack.c.bf16 %v1490_v7, %v1489_v6 }
 0x5cb   :  { %7973 = vmatprep.subr.bf16.mxu1 %v7972_v36 }
 0x69c   :  { %v6997_v37 = vpop.f32.mrb[4].mxu1 }
 0x69d   :  { %v6998_v38 = vpop.f32.mrb[5].mxu1 }
 0x69e   :  { %v6999_v39 = vadd.f32 %v6998_v38, %v6997_v37  ;;  %v1459_v38 = vrot.slane %v1065_v30, %v10387_v47 }
 0x6a0   :  { %v1364_v41 = vmul.f32 0.0078125, %v6999_v39 }
 0x6a2   :  { %v1365_v43 = vadd.f32 1e-05, %v1364_v41  ;;  %v1468_v41 = vrot.slane %v1066_v32, %v10384_v49 }
 0x6a4   :  { %9046 = vrsqrt.f32 %v1365_v43 }
 0x6ae   :  { %v9047_v20 = vpop.eup %9046 }
 0x6af   :  { %6852 = vmatmul.mubr.msk.f32.vlgmr.msra.gmra.mrb[6].mxu1 %vm1188_vm2, %v9047_v20  ;;  %v1595_v20 = vld [vmem:[%s11582_s11 + $0x8] sm:$0xff] }
 0x6b0   :  { %7975 = vmatpush3.bf16.msra.mxu1 %v7974_v53 }
 0x6b1   :  { %7977 = vmatprep.subr.bf16.mxu1 %v7976_v54 }
 0x6b4   :  { %7979 = vmatpush3.bf16.msra.mxu1 %v7978_v61  ;;  %v1596_v61 = vld [vmem:[%s11582_s11 + $0x10] sm:$0xff] }
 0x6b5   :  { %7981 = vmatprep.subr.bf16.mxu1 %v7980_v62  ;;  %v1597_v62 = vld [vmem:[%s11582_s11 + $0x18] sm:$0xff] }
 0x6b6   :  { %v8008_v63 = vpack.c.bf16 %v1597_v62, %v1596_v61  ;;  %v6860_v62 = vld [vmem:[#allocation10] ss:$0 sm:$0xff] }
 0x6b8   :  { %7983 = vmatpush3.bf16.msra.mxu1 %v7982_v50  ;;  %v1600_v50 = vld [vmem:[%s11582_s11 + $0x30] sm:$0xff] }
 0x6b9   :  { %7985 = vmatprep.subr.bf16.mxu1 %v7984_v5  ;;  %v1601_v5 = vld [vmem:[%s11582_s11 + $0x38] sm:$0xff] }
 0x6ba   :  { %v8014_v6 = vpack.c.bf16 %v1601_v5, %v1600_v50 }
 0x6bc   :  { %7987 = vmatpush3.bf16.msra.mxu1 %v7986_v10 }
 0x6bd   :  { %7989 = vmatprep.subr.bf16.mxu1 %v7988_v11 }
 0x6c0   :  { %7991 = vmatpush3.bf16.msra.mxu1 %v7990_v17 }
 0x6c1   :  { %7993 = vmatprep.subr.bf16.mxu1 %v7992_v45 }
 0x6c4   :  { %7995 = vmatpush3.bf16.msra.mxu1 %v7994_v4 }
 0x6c5   :  { %7997 = vmatprep.subr.bf16.mxu1 %v7996_v21 }
 0x6c8   :  { %7999 = vmatpush3.bf16.msra.mxu1 %v7998_v24 }
 0x6c9   :  { %8001 = vmatprep.subr.bf16.mxu1 %v8000_v31 }
 0x6cc   :  { %8003 = vmatpush3.bf16.msra.mxu1 %v8002_v29 }
 0x6cd   :  { %8004 = vmatprep.subr.bf16.mxu1 %v9665_v60 }
 0x782   :  { %v1436_v33 = vpop.f32.mrb[6].mxu1 }
 0x783   :  { %v1444_v35 = vrot.slane %v1436_v33, %v10384_v49  ;;  %v1438_v36 = vpop.f32.mrb[7].mxu1 }
 0x784   :  { %v1448_v37 = vrot.slane %v1438_v36, %v10384_v49 }
 0x785   :  { %v1449_v39 = vmul.f32 %v1444_v35, %v10413_v58 }
 0x786   :  { %v1450_v43 = vmul.f32 %v1448_v37, %v10415_v3  ;;  %v1594_v3 = vld [vmem:[%s11582_s11] sm:$0xff] }
 0x787   :  { %v1462_v46 = vmul.f32 %v1455_v16, %v1449_v39  ;;  %v8005_v59 = vpack.c.bf16 %v1595_v20, %v1594_v3  ;;  %v1946_v37 = vld [vmem:[%s11583_s25] sm:$0xff] }
 0x788   :  { %v1463_v51 = vmul.f32 %v1459_v38, %v1450_v43  ;;  %v1947_v38 = vld [vmem:[%s11583_s25 + $0x8] sm:$0xff]  ;;  %v1948_v43 = vld [vmem:[%s11583_s25 + $0x10] sm:$0xff] }
 0x789   :  { %v1475_v52 = vadd.f32 %v1468_v41, %v1462_v46  ;;  %v8029_v39 = vpack.c.bf16 %v1947_v38, %v1946_v37 }
 0x78a   :  { %v1476_v53 = vadd.f32 %v1472_v44, %v1463_v51  ;;  %v1949_v44 = vld [vmem:[%s11583_s25 + $0x18] sm:$0xff]  ;;  %v1950_v51 = vld [vmem:[%s11583_s25 + $0x20] sm:$0xff] }
 0x78b   :  { %v1479_v54 = vmul.f32 0.2, %v1475_v52  ;;  %vm1477_vm4 = vcmp.ge.f32.partialorder %v1475_v52, 0.0  ;;  %v8032_v46 = vpack.c.bf16 %v1949_v44, %v1948_v43 }
 0x78c   :  { %vm1478_vm3 = vcmp.ge.f32.partialorder %v1476_v53, 0.0  ;;  %v1480_v56 = vmul.f32 0.2, %v1476_v53 }
 0x78d   :  { %v10469_v58 = vsel %vm1477_vm4, %v1475_v52, %v1479_v54  ;;  %v1951_v52 = vld [vmem:[%s11583_s25 + $0x28] sm:$0xff]  ;;  %v1952_v54 = vld [vmem:[%s11583_s25 + $0x30] sm:$0xff] }
 0x78e   :  { %v10466_v57 = vsel %vm1478_vm3, %v1476_v53, %v1480_v56  ;;  %v8035_v53 = vpack.c.bf16 %v1951_v52, %v1950_v51  ;;  %v1953_v56 = vld [vmem:[%s11583_s25 + $0x38] sm:$0xff] }
 0x78f   :  { %1586 = vmatprep.mubr.f32.mxu1 %v10466_v57  ;;  %v8038_v3 = vpack.c.bf16 %v1953_v56, %v1952_v54  ;;  %v6870_v52 = vld [vmem:[#allocation16] ss:$0 sm:$0xff]  ;;  %v6871_v54 = vld [vmem:[#allocation18] ss:$0 sm:$0xff] }
 0x790   :  { %1587 = vmatmul.mubr.f32.vlgmr.msra.gmra.mrb[8].mxu1 %v10469_v58 }
 0x791   :  { %8006 = vmatpush3.bf16.msra.mxu1 %v8005_v59  ;;  %7483 = vmatprep.mubr.msk.f32.mxu1 %vm9666_vm5, %v11480_v13 }
 0x792   :  { %8007 = vmatprep.subr.bf16.mxu1 %v9665_v60 }
 0x795   :  { %8009 = vmatpush3.bf16.msra.mxu1 %v8008_v63 }
 0x796   :  { %8010 = vmatprep.subr.bf16.mxu1 %v9665_v60 }
 0x799   :  { %8012 = vmatpush3.bf16.msra.mxu1 %v8011_v2 }
 0x79a   :  { %8013 = vmatprep.subr.bf16.mxu1 %v9665_v60 }
 0x79d   :  { %8015 = vmatpush3.bf16.msra.mxu1 %v8014_v6 }
 0x79e   :  { %7486 = vmatprep.subr.mxu1 %v11480_v13 }
 0x863   :  { %v7032_v7 = vpop.f32.mrb[8].mxu1 }
 0x864   :  { %v7033_v9 = vpop.f32.mrb[9].mxu1 }
 0x865   :  { %v7034_v10 = vadd.f32 %v7033_v9, %v7032_v7  ;;  %v2037_v7 = vld [vmem:[%s11584_s15 + $0x8] sm:$0xff]  ;;  %v6862_v9 = vld [vmem:[#allocation15] ss:$0 sm:$0xff] }
 0x867   :  { %v1589_v11 = vadd.f32 %v7034_v10, %v6853_v8 }
 0x869   :  { %v1604_v14 = vsel %vm1603_vm6, %v1589_v11, 0.0 }
 0x86a   :  { %v1605_v15 = vrot.slane %v1604_v14, 4 }
 0x86c   :  { %v1606_v17 = vadd.f32 %v1605_v15, %v1604_v14 }
 0x86e   :  { %v1607_v18 = vrot.slane %v1606_v17, 2 }
 0x870   :  { %v1608_v40 = vadd.f32 %v1607_v18, %v1606_v17 }
 0x872   :  { %v1609_v45 = vrot.slane %v1608_v40, 1 }
 0x874   :  { %v1610_v48 = vadd.f32 %v1609_v45, %v1608_v40 }
 0x876   :  { %7484 = vmatmul.mubr.msk.f32.vlgmr.msra.gmra.mrb[10].mxu1 %vm1611_vm7, %v1610_v48 }
 0x877   :  { %7487 = vmatpush3.msk.msra.mxu1 %vm1192_vm1, %v1602_v55  ;;  %7488 = vmatprep.mubr.msk.f32.mxu1 %vm9666_vm5, %v11480_v13 }
 0x878   :  { %8016 = vmatprep.subr.bf16.mxu1 %v9665_v60 }
 0x949   :  { %v1681_v4 = vpop.f32.mrb[10].mxu1 }
 0x94a   :  { %v1685_v12 = vmul.f32 0.03125, %v1681_v4  ;;  %v7485_v19 = vpop.f32.mrb[11].mxu1  ;;  %v2038_v4 = vld [vmem:[%s11585_s30] sm:$0xf] }
 0x94c   :  { %7489 = vmatmul.mubr.msk.f32.vlgmr.msra.gmra.mrb[12].mxu1 %vm1188_vm2, %v1685_v12 }
 0x94d   :  { %8018 = vmatpush3.bf16.msra.mxu1 %v8005_v59  ;;  %7507 = vmatprep.mubr.msk.f32.mxu1 %vm9666_vm5, %v11480_v13 }
 0x94e   :  { %8019 = vmatprep.subr.bf16.mxu1 %v9665_v60 }
 0x951   :  { %8021 = vmatpush3.bf16.msra.mxu1 %v8008_v63 }
 0x952   :  { %8022 = vmatprep.subr.bf16.mxu1 %v9665_v60 }
 0x955   :  { %8024 = vmatpush3.bf16.msra.mxu1 %v8011_v2 }
 0x956   :  { %8025 = vmatprep.subr.bf16.mxu1 %v9665_v60 }
 0x959   :  { %8027 = vmatpush3.bf16.msra.mxu1 %v8014_v6  ;;  %v2036_v6 = vld [vmem:[%s11584_s15] sm:$0xff] }
 0x95a   :  { %7510 = vmatprep.subr.mxu1 %v11480_v13  ;;  %v8041_v8 = vpack.c.bf16 %v2037_v7, %v2036_v6 }
 0xa1f   :  { %v1758_v21 = vpop.f32.mrb[12].mxu1 }
 0xa20   :  { %v1765_v22 = vrot.slane %v1758_v21, %v10384_v49  ;;  %v7490_v23 = vpop.f32.mrb[13].mxu1 }
 0xa22   :  { %v1766_v24 = vsub.f32 %v1589_v11, %v1765_v22 }
 0xa24   :  { %v1767_v25 = vmul.f32 %v1766_v24, %v1766_v24 }
 0xa26   :  { %v1768_v26 = vsel %vm1603_vm6, %v1767_v25, 0.0 }
 0xa27   :  { %v1769_v31 = vrot.slane %v1768_v26, 4 }
 0xa29   :  { %v1770_v27 = vadd.f32 %v1769_v31, %v1768_v26 }
 0xa2b   :  { %v1771_v28 = vrot.slane %v1770_v27, 2 }
 0xa2d   :  { %v1772_v29 = vadd.f32 %v1771_v28, %v1770_v27 }
 0xa2f   :  { %v1773_v30 = vrot.slane %v1772_v29, 1 }
 0xa31   :  { %v1774_v32 = vadd.f32 %v1773_v30, %v1772_v29 }
 0xa33   :  { %7508 = vmatmul.mubr.msk.f32.vlgmr.msra.gmra.mrb[14].mxu1 %vm1611_vm7, %v1774_v32 }
 0xa34   :  { %7511 = vmatpush3.msk.msra.mxu1 %vm1192_vm1, %v1602_v55  ;;  %7512 = vmatprep.mubr.msk.f32.mxu1 %vm9666_vm5, %v11480_v13 }
 0xa35   :  { %8028 = vmatprep.subr.bf16.mxu1 %v9665_v60 }
 0xb06   :  { %v1844_v33 = vpop.f32.mrb[14].mxu1 }
 0xb07   :  { %v1848_v35 = vmul.f32 0.03125, %v1844_v33  ;;  %v7509_v16 = vpop.f32.mrb[15].mxu1 }
 0xb09   :  { %v1849_v36 = vadd.f32 1e-05, %v1848_v35 }
 0xb0b   :  { %9048 = vrsqrt.f32 %v1849_v36 }
 0xb15   :  { %v9049_v41 = vpop.eup %9048 }
 0xb16   :  { %7513 = vmatmul.mubr.msk.f32.vlgmr.msra.gmra.mrb[16].mxu1 %vm1188_vm2, %v9049_v41  ;;  %v2383_v41 = vld [vmem:[%s11586_s8 + $0x8] sm:$0xff] }
 0xb17   :  { %8030 = vmatpush3.bf16.msra.mxu1 %v8029_v39  ;;  %7531 = vmatprep.mubr.msk.f32.mxu1 %vm9666_vm5, %v11480_v13  ;;  %v2382_v39 = vld [vmem:[%s11586_s8] sm:$0xff] }
 0xb18   :  { %8031 = vmatprep.subr.bf16.mxu1 %v9665_v60  ;;  %v8047_v43 = vpack.c.bf16 %v2383_v41, %v2382_v39  ;;  %v2901_v39 = vld [vmem:[%s11587_s16 + $0x8] sm:$0xff] }
 0xb1b   :  { %8033 = vmatpush3.bf16.msra.mxu1 %v8032_v46 }
 0xb1c   :  { %8034 = vmatprep.subr.bf16.mxu1 %v9665_v60 }
 0xb1f   :  { %8036 = vmatpush3.bf16.msra.mxu1 %v8035_v53 }
 0xb20   :  { %8037 = vmatprep.subr.bf16.mxu1 %v9665_v60 }
 0xb23   :  { %8039 = vmatpush3.bf16.msra.mxu1 %v8038_v3 }
 0xb24   :  { %8040 = vmatprep.subr.bf16.mxu1 %v9665_v60 }
 0xbe9   :  { %v1920_v20 = vpop.f32.mrb[16].mxu1 }
 0xbea   :  { %v1927_v59 = vrot.slane %v1920_v20, %v10384_v49  ;;  %v7514_v61 = vpop.f32.mrb[17].mxu1 }
 0xbeb   :  { %v2466_v61 = vld [vmem:[#allocation24] sm:$0xf] }
 0xbec   :  { %v1928_v63 = vmul.f32 %v1927_v59, %v1766_v24 }
 0xbee   :  { %v1935_v1 = vmul.f32 %v6860_v62, %v1928_v63  ;;  %v6872_v62 = vld [vmem:[#allocation19] ss:$0 sm:$0xff] }
 0xbf0   :  { %v1942_v2 = vadd.f32 %v6861_v0, %v1935_v1 }
 0xbf2   :  { %vm1943_vm8 = vcmp.ge.f32.partialorder %v1942_v2, 0.0  ;;  %v1944_v50 = vmul.f32 0.2, %v1942_v2 }
 0xbf4   :  { %v10523_v5 = vsel %vm1943_vm8, %v1942_v2, %v1944_v50 }
 0xbf5   :  { %7532 = vmatmul.mubr.msk.f32.vlgmr.msra.gmra.mrb[18].mxu1 %vm1611_vm7, %v10523_v5 }
 0xbf6   :  { %7538 = vmatprep.mubr.msk.f32.mxu1 %vm9666_vm5, %v11480_v13  ;;  %8042 = vmatpush3.bf16.msra.mxu1 %v8041_v8 }
 0xbf7   :  { %7541 = vmatprep.subr.mxu1 %v11480_v13 }
 0xcc8   :  { %v2030_v10 = vpop.f32.mrb[18].mxu1 }
 0xcc9   :  { %v2031_v11 = vadd.f32 %v6862_v9, %v2030_v10  ;;  %v7533_v14 = vpop.f32.mrb[19].mxu1 }
 0xccb   :  { %v2040_v15 = vsel %vm2039_vm9, %v2031_v11, 0.0 }
 0xccc   :  { %v2041_v17 = vrot.slane %v2040_v15, 4 }
 0xcce   :  { %v2042_v18 = vadd.f32 %v2041_v17, %v2040_v15 }
 0xcd0   :  { %v2043_v40 = vrot.slane %v2042_v18, 2 }
 0xcd2   :  { %v2044_v45 = vadd.f32 %v2043_v40, %v2042_v18 }
 0xcd4   :  { %v2045_v48 = vrot.slane %v2044_v45, 1 }
 0xcd6   :  { %v2046_v55 = vadd.f32 %v2045_v48, %v2044_v45 }
 0xcd8   :  { %7539 = vmatmul.mubr.msk.f32.vlgmr.msra.gmra.mrb[20].mxu1 %vm2047_vm10, %v2046_v55 }
 0xcd9   :  { %7542 = vmatpush3.msk.msra.mxu1 %vm1192_vm1, %v2038_v4  ;;  %7543 = vmatprep.mubr.msk.f32.mxu1 %vm9666_vm5, %v11480_v13 }
 0xcda   :  { %8043 = vmatprep.subr.bf16.mxu1 %v9665_v60 }
 0xdab   :  { %v2117_v12 = vpop.f32.mrb[20].mxu1 }
 0xdac   :  { %v2121_v19 = vmul.f32 0.125, %v2117_v12  ;;  %v7540_v21 = vpop.f32.mrb[21].mxu1 }
 0xdae   :  { %7544 = vmatmul.mubr.msk.f32.vlgmr.msra.gmra.mrb[22].mxu1 %vm1188_vm2, %v2121_v19 }
 0xdaf   :  { %8045 = vmatpush3.bf16.msra.mxu1 %v8041_v8  ;;  %7550 = vmatprep.mubr.msk.f32.mxu1 %vm9666_vm5, %v11480_v13 }
 0xdb0   :  { %7553 = vmatprep.subr.mxu1 %v11480_v13 }
 0xe81   :  { %v2194_v22 = vpop.f32.mrb[22].mxu1 }
 0xe82   :  { %v2201_v23 = vrot.slane %v2194_v22, %v10384_v49  ;;  %v7545_v24 = vpop.f32.mrb[23].mxu1 }
 0xe84   :  { %v2202_v25 = vsub.f32 %v2031_v11, %v2201_v23  ;;  %v2467_v11 = vld [vmem:[#allocation25] sm:$0xf] }
 0xe86   :  { %v2203_v26 = vmul.f32 %v2202_v25, %v2202_v25 }
 0xe88   :  { %v2204_v31 = vsel %vm2039_vm9, %v2203_v26, 0.0 }
 0xe89   :  { %v2205_v27 = vrot.slane %v2204_v31, 4 }
 0xe8b   :  { %v2206_v28 = vadd.f32 %v2205_v27, %v2204_v31 }
 0xe8d   :  { %v2207_v29 = vrot.slane %v2206_v28, 2 }
 0xe8f   :  { %v2208_v30 = vadd.f32 %v2207_v29, %v2206_v28  ;;  %v2813_v29 = vld [vmem:[#allocation27] sm:$0xf] }
 0xe91   :  { %v2209_v32 = vrot.slane %v2208_v30, 1 }
 0xe93   :  { %v2210_v33 = vadd.f32 %v2209_v32, %v2208_v30 }
 0xe95   :  { %7551 = vmatmul.mubr.msk.f32.vlgmr.msra.gmra.mrb[24].mxu1 %vm2047_vm10, %v2210_v33 }
 0xe96   :  { %7554 = vmatpush3.msk.msra.mxu1 %vm1192_vm1, %v2038_v4  ;;  %7555 = vmatprep.mubr.msk.f32.mxu1 %vm9666_vm5, %v11480_v13 }
 0xe97   :  { %8046 = vmatprep.subr.bf16.mxu1 %v9665_v60 }
 0xf68   :  { %v2280_v35 = vpop.f32.mrb[24].mxu1 }
 0xf69   :  { %v2284_v16 = vmul.f32 0.125, %v2280_v35  ;;  %v7552_v36 = vpop.f32.mrb[25].mxu1  ;;  %v6882_v35 = vld [vmem:[#allocation21] ss:$0 sm:$0xff] }
 0xf6a   :  { %v6883_v36 = vld [vmem:[#allocation22] ss:$0 sm:$0xff] }
 0xf6b   :  { %v2285_v37 = vadd.f32 1e-05, %v2284_v16 }
 0xf6d   :  { %9050 = vrsqrt.f32 %v2285_v37 }
 0xf77   :  { %v9051_v38 = vpop.eup %9050 }
 0xf78   :  { %7556 = vmatmul.mubr.msk.f32.vlgmr.msra.gmra.mrb[26].mxu1 %vm1188_vm2, %v9051_v38  ;;  %v2900_v38 = vld [vmem:[%s11587_s16] sm:$0xff] }
 0xf79   :  { %7562 = vmatprep.mubr.msk.f32.mxu1 %vm9666_vm5, %v11480_v13  ;;  %8048 = vmatpush3.bf16.msra.mxu1 %v8047_v43 }
 0xf7a   :  { %7565 = vmatprep.subr.mxu1 %v11480_v13 }
0x104b   :  { %v2356_v44 = vpop.f32.mrb[26].mxu1 }
0x104c   :  { %v2363_v46 = vrot.slane %v2356_v44, %v10384_v49  ;;  %v7557_v51 = vpop.f32.mrb[27].mxu1  ;;  %v8050_v44 = vpack.c.bf16 %v2901_v39, %v2900_v38  ;;  %v3420_v38 = vld [vmem:[%s11591_s22 + $0x8] sm:$0xff]  ;;  %v3422_v39 = vld [vmem:[%s11591_s22 + $0x18] sm:$0xff] }
0x104d   :  { %v2898_v51 = vld [vmem:[%s11588_s9] sm:$0xff] }
0x104e   :  { %v2364_v53 = vmul.f32 %v2363_v46, %v2202_v25 }
0x1050   :  { %v2371_v56 = vmul.f32 %v6870_v52, %v2364_v53  ;;  %v2899_v52 = vld [vmem:[%s11588_s9 + $0x8] sm:$0xff] }
0x1051   :  { %v8053_v53 = vpack.c.bf16 %v2899_v52, %v2898_v51  ;;  %v3419_v52 = vld [vmem:[%s11591_s22] sm:$0xff] }
0x1052   :  { %v2378_v3 = vadd.f32 %v6871_v54, %v2371_v56  ;;  %v6884_v54 = vld [vmem:[#allocation28] ss:$0 sm:$0xff] }
0x1054   :  { %vm2379_vm11 = vcmp.ge.f32.partialorder %v2378_v3, 0.0  ;;  %v2380_v20 = vmul.f32 0.2, %v2378_v3 }
0x1056   :  { %v10557_v59 = vsel %vm2379_vm11, %v2378_v3, %v2380_v20 }
0x1057   :  { %7563 = vmatmul.mubr.msk.f32.vlgmr.msra.gmra.mrb[28].mxu1 %vm2047_vm10, %v10557_v59 }
0x1058   :  { %7567 = vmatprep.mubr.msk.f32.mxu1 %vm9666_vm5, %v11480_v13  ;;  %7566 = vmatpush3.msk.msra.mxu1 %vm1192_vm1, %v2466_v61 }
0x1059   :  { %7570 = vmatprep.subr.mxu1 %v11480_v13 }
0x112a   :  { %v2460_v63 = vpop.f32.mrb[28].mxu1 }
0x112b   :  { %v2461_v0 = vadd.f32 %v6872_v62, %v2460_v63  ;;  %v7564_v1 = vpop.f32.mrb[29].mxu1  ;;  %v3055_v63 = vld [vmem:[%s11589_s18] sm:$0xff] }
0x112d   :  { %v2469_v2 = vsel %vm2468_vm12, %v2461_v0, 0.0 }
0x112e   :  { %v2470_v50 = vrot.slane %v2469_v2, 4 }
0x1130   :  { %v2471_v6 = vadd.f32 %v2470_v50, %v2469_v2  ;;  %v3057_v2 = vld [vmem:[%s11589_s18 + $0x10] sm:$0xff]  ;;  %v3058_v50 = vld [vmem:[%s11589_s18 + $0x18] sm:$0xff] }
0x1132   :  { %v2472_v7 = vrot.slane %v2471_v6, 2 }
0x1134   :  { %v2473_v8 = vadd.f32 %v2472_v7, %v2471_v6  ;;  %v8059_v6 = vpack.c.bf16 %v3058_v50, %v3057_v2  ;;  %v3059_v7 = vld [vmem:[%s11589_s18 + $0x20] sm:$0xff] }
0x1135   :  { %v3427_v50 = vld [vmem:[%s11591_s22 + $0x40] sm:$0xff] }
0x1136   :  { %v2474_v9 = vrot.slane %v2473_v8, 1 }
0x1138   :  { %v2475_v10 = vadd.f32 %v2474_v9, %v2473_v8  ;;  %v3060_v8 = vld [vmem:[%s11589_s18 + $0x28] sm:$0xff] }
0x1139   :  { %v8062_v9 = vpack.c.bf16 %v3060_v8, %v3059_v7  ;;  %v3432_v7 = vld [vmem:[%s11591_s22 + $0x68] sm:$0xff]  ;;  %v3434_v8 = vld [vmem:[%s11591_s22 + $0x78] sm:$0xff] }
0x113a   :  { %7568 = vmatmul.mubr.msk.f32.vlgmr.msra.gmra.mrb[30].mxu1 %vm1188_vm2, %v2475_v10  ;;  %v3061_v10 = vld [vmem:[%s11589_s18 + $0x30] sm:$0xff] }
0x113b   :  { %7571 = vmatpush3.msk.msra.mxu1 %vm1192_vm1, %v2467_v11  ;;  %7572 = vmatprep.mubr.msk.f32.mxu1 %vm9666_vm5, %v11480_v13 }
0x113c   :  { %7575 = vmatprep.subr.mxu1 %v11480_v13 }
0x120d   :  { %v2548_v14 = vpop.f32.mrb[30].mxu1 }
0x120e   :  { %v2552_v15 = vmul.f32 0.5, %v2548_v14  ;;  %v7569_v17 = vpop.f32.mrb[31].mxu1 }
0x120f   :  { %v6889_v17 = vld [vmem:[#allocation30] ss:$0 sm:$0xff] }
0x1210   :  { %7573 = vmatmul.mubr.msk.f32.vlgmr.msra.gmra.mrb[32].mxu1 %vm1188_vm2, %v2552_v15 }
0x1211   :  { %7576 = vmatpush3.msk.msra.mxu1 %vm1192_vm1, %v2466_v61  ;;  %7577 = vmatprep.mubr.msk.f32.mxu1 %vm9666_vm5, %v11480_v13 }
0x1212   :  { %7580 = vmatprep.subr.mxu1 %v11480_v13 }
0x12e3   :  { %v2625_v18 = vpop.f32.mrb[32].mxu1 }
0x12e4   :  { %v2632_v40 = vrot.slane %v2625_v18, %v10384_v49  ;;  %v7574_v45 = vpop.f32.mrb[33].mxu1 }
0x12e6   :  { %v2633_v48 = vsub.f32 %v2461_v0, %v2632_v40  ;;  %v3056_v0 = vld [vmem:[%s11589_s18 + $0x8] sm:$0xff] }
0x12e7   :  { %v8056_v1 = vpack.c.bf16 %v3056_v0, %v3055_v63  ;;  %v3428_v63 = vld [vmem:[%s11591_s22 + $0x48] sm:$0xff]  ;;  %v3430_v0 = vld [vmem:[%s11591_s22 + $0x58] sm:$0xff] }
0x12e8   :  { %v2634_v55 = vmul.f32 %v2633_v48, %v2633_v48  ;;  %v8087_v2 = vpack.c.bf16 %v3430_v0, %v3428_v63 }
0x12ea   :  { %v2635_v4 = vsel %vm2468_vm12, %v2634_v55, 0.0 }
0x12eb   :  { %v2636_v12 = vrot.slane %v2635_v4, 4 }
0x12ed   :  { %v2637_v19 = vadd.f32 %v2636_v12, %v2635_v4 }
0x12ef   :  { %v2638_v21 = vrot.slane %v2637_v19, 2 }
0x12f1   :  { %v2639_v22 = vadd.f32 %v2638_v21, %v2637_v19 }
0x12f3   :  { %v2640_v23 = vrot.slane %v2639_v22, 1 }
0x12f5   :  { %v2641_v24 = vadd.f32 %v2640_v23, %v2639_v22  ;;  %v3063_v23 = vld [vmem:[%s11590_s17] sm:$0xf] }
0x12f7   :  { %7578 = vmatmul.mubr.msk.f32.vlgmr.msra.gmra.mrb[34].mxu1 %vm1188_vm2, %v2641_v24 }
0x12f8   :  { %7581 = vmatpush3.msk.msra.mxu1 %vm1192_vm1, %v2467_v11  ;;  %7582 = vmatprep.mubr.msk.f32.mxu1 %vm9666_vm5, %v11480_v13  ;;  %v3062_v11 = vld [vmem:[%s11589_s18 + $0x38] sm:$0xff] }
0x12f9   :  { %7585 = vmatprep.subr.mxu1 %v11480_v13  ;;  %v8065_v14 = vpack.c.bf16 %v3062_v11, %v3061_v10  ;;  %v8091_v10 = vpack.c.bf16 %v3434_v8, %v3432_v7  ;;  %v3431_v11 = vld [vmem:[%s11591_s22 + $0x60] sm:$0xff] }
0x13ca   :  { %v2711_v25 = vpop.f32.mrb[34].mxu1 }
0x13cb   :  { %v2715_v26 = vmul.f32 0.5, %v2711_v25  ;;  %v7579_v31 = vpop.f32.mrb[35].mxu1 }
0x13cd   :  { %v2716_v27 = vadd.f32 1e-05, %v2715_v26 }
0x13cf   :  { %9052 = vrsqrt.f32 %v2716_v27 }
0x13d9   :  { %v9053_v28 = vpop.eup %9052 }
0x13da   :  { %7583 = vmatmul.mubr.msk.f32.vlgmr.msra.gmra.mrb[36].mxu1 %vm1188_vm2, %v9053_v28 }
0x13db   :  { %7587 = vmatprep.mubr.msk.f32.mxu1 %vm9666_vm5, %v11480_v13  ;;  %7586 = vmatpush3.msk.msra.mxu1 %vm1192_vm1, %v2813_v29 }
0x13dc   :  { %8049 = vmatprep.subr.bf16.mxu1 %v9665_v60 }
0x14ad   :  { %v2787_v30 = vpop.f32.mrb[36].mxu1 }
0x14ae   :  { %v2794_v32 = vrot.slane %v2787_v30, %v10384_v49  ;;  %v7584_v33 = vpop.f32.mrb[37].mxu1 }
0x14b0   :  { %v2795_v16 = vmul.f32 %v2794_v32, %v2633_v48 }
0x14b2   :  { %v2802_v37 = vmul.f32 %v6882_v35, %v2795_v16 }
0x14b4   :  { %v2809_v41 = vadd.f32 %v6883_v36, %v2802_v37 }
0x14b6   :  { %vm2810_vm13 = vcmp.ge.f32.partialorder %v2809_v41, 0.0  ;;  %v2811_v43 = vmul.f32 0.2, %v2809_v41 }
0x14b8   :  { %v2812_v46 = vsel %vm2810_vm13, %v2809_v41, %v2811_v43  ;;  %v8079_v41 = vpack.c.bf16 %v3422_v39, %v3420_v38  ;;  %v3597_v39 = vld [vmem:[%s11593_s26 + $0x8] sm:$0xff] }
0x14b9   :  { %7588 = vmatmul.mubr.msk.f32.vlgmr.msra.gmra.mrb[38].mxu1 %vm1188_vm2, %v2812_v46 }
0x14ba   :  { %8051 = vmatpush3.bf16.msra.mxu1 %v8050_v44  ;;  %7594 = vmatprep.mubr.msk.f32.mxu1 %vm9666_vm5, %v11480_v13 }
0x14bb   :  { %8052 = vmatprep.subr.bf16.mxu1 %v9665_v60 }
0x14bd   :  { %7595 = vmatmul.mubr.msk.f32.vlgmr.msra.gmra.mrb[40].mxu1 %vm2047_vm10, %v10557_v59 }
0x14be   :  { %7601 = vmatprep.mubr.msk.f32.mxu1 %vm9666_vm5, %v11480_v13  ;;  %8054 = vmatpush3.bf16.msra.mxu1 %v8053_v53  ;;  %v3421_v53 = vld [vmem:[%s11591_s22 + $0x10] sm:$0xff] }
0x14bf   :  { %8055 = vmatprep.subr.bf16.mxu1 %v9665_v60 }
0x158c   :  { %v2893_v56 = vpop.f32.mrb[38].mxu1 }
0x158d   :  { %v2894_v3 = vadd.f32 %v6884_v54, %v2893_v56  ;;  %v7589_v20 = vpop.f32.mrb[39].mxu1  ;;  %v3424_v54 = vld [vmem:[%s11591_s22 + $0x28] sm:$0xff]  ;;  %v3426_v56 = vld [vmem:[%s11591_s22 + $0x38] sm:$0xff] }
0x158e   :  { %v8083_v20 = vpack.c.bf16 %v3426_v56, %v3424_v54  ;;  %v3617_v54 = vld [vmem:[%s11593_s26 + $0xa8] sm:$0xff] }
0x158f   :  { %v2897_v61 = vmax.f32 %v2894_v3, 0.0  ;;  %v8081_v3 = vpack.c.bf16 %v3421_v53, %v3419_v52  ;;  %v3599_v52 = vld [vmem:[%s11593_s26 + $0x18] sm:$0xff]  ;;  %v3616_v53 = vld [vmem:[%s11593_s26 + $0xa0] sm:$0xff] }
0x1590   :  { %v2968_v59 = vpop.f32.mrb[40].mxu1 }
0x1591   :  { %v7596_v62 = vpop.f32.mrb[41].mxu1  ;;  %7602 = vmatmul.mubr.msk.f32.vlgmr.msra.gmra.mrb[42].mxu1 %vm2047_vm10, %v2897_v61  ;;  %v3423_v61 = vld [vmem:[%s11591_s22 + $0x20] sm:$0xff] }
0x1592   :  { %7620 = vmatprep.mubr.msk.f32.mxu1 %vm9666_vm5, %v11480_v13  ;;  %8057 = vmatpush3.bf16.msra.mxu1 %v8056_v1 }
0x1593   :  { %8058 = vmatprep.subr.bf16.mxu1 %v9665_v60 }
0x1596   :  { %8060 = vmatpush3.bf16.msra.mxu1 %v8059_v6 }
0x1597   :  { %8061 = vmatprep.subr.bf16.mxu1 %v9665_v60 }
0x159a   :  { %8063 = vmatpush3.bf16.msra.mxu1 %v8062_v9 }
0x159b   :  { %8064 = vmatprep.subr.bf16.mxu1 %v9665_v60 }
0x159e   :  { %8066 = vmatpush3.bf16.msra.mxu1 %v8065_v14 }
0x159f   :  { %7623 = vmatprep.subr.mxu1 %v11480_v13 }
0x1664   :  { %v3041_v15 = vpop.f32.mrb[42].mxu1 }
0x1665   :  { %v3042_v18 = vadd.f32 %v3041_v15, %v2968_v59  ;;  %v7603_v40 = vpop.f32.mrb[43].mxu1  ;;  %v3425_v59 = vld [vmem:[%s11591_s22 + $0x30] sm:$0xff]  ;;  %v3404_v15 = vld [vmem:[%s11592_s23 + $0x8] sm:$0xff] }
0x1667   :  { %v3052_v45 = vadd.f32 %v6889_v17, %v3042_v18  ;;  %v3406_v17 = vld [vmem:[%s11592_s23 + $0x18] sm:$0xff] }
0x1668   :  { %v8095_v40 = vpack.c.bf16 %v3406_v17, %v3404_v15 }
0x1669   :  { %v3064_v48 = vsel %vm1603_vm6, %v3052_v45, 0.0 }
0x166a   :  { %v3065_v55 = vrot.slane %v3064_v48, 4 }
0x166c   :  { %v3066_v4 = vadd.f32 %v3065_v55, %v3064_v48  ;;  %v3405_v48 = vld [vmem:[%s11592_s23 + $0x10] sm:$0xff]  ;;  %v3408_v55 = vld [vmem:[%s11592_s23 + $0x28] sm:$0xff] }
0x166e   :  { %v3067_v12 = vrot.slane %v3066_v4, 2 }
0x1670   :  { %v3068_v19 = vadd.f32 %v3067_v12, %v3066_v4  ;;  %v3410_v4 = vld [vmem:[%s11592_s23 + $0x38] sm:$0xff] }
0x1672   :  { %v3069_v21 = vrot.slane %v3068_v19, 1 }
0x1674   :  { %v3070_v22 = vadd.f32 %v3069_v21, %v3068_v19  ;;  %v8099_v19 = vpack.c.bf16 %v3410_v4, %v3408_v55  ;;  %v3407_v21 = vld [vmem:[%s11592_s23 + $0x20] sm:$0xff]  ;;  %v3622_v4 = vld [vmem:[%s11593_s26 + $0xd0] sm:$0xff] }
0x1676   :  { %7621 = vmatmul.mubr.msk.f32.vlgmr.msra.gmra.mrb[44].mxu1 %vm1611_vm7, %v3070_v22  ;;  %v3409_v22 = vld [vmem:[%s11592_s23 + $0x30] sm:$0xff] }
0x1677   :  { %7624 = vmatpush3.msk.msra.mxu1 %vm1192_vm1, %v3063_v23  ;;  %7625 = vmatprep.mubr.msk.f32.mxu1 %vm9666_vm5, %v11480_v13 }
0x1678   :  { %8067 = vmatprep.subr.bf16.mxu1 %v9665_v60 }
0x1749   :  { %v3140_v24 = vpop.f32.mrb[44].mxu1 }
0x174a   :  { %v3144_v25 = vmul.f32 0.03125, %v3140_v24  ;;  %v7622_v26 = vpop.f32.mrb[45].mxu1  ;;  %v3412_v24 = vld [vmem:[%s11592_s23 + $0x48] sm:$0xff] }
0x174c   :  { %7626 = vmatmul.mubr.msk.f32.vlgmr.msra.gmra.mrb[46].mxu1 %vm1188_vm2, %v3144_v25  ;;  %v3414_v25 = vld [vmem:[%s11592_s23 + $0x58] sm:$0xff] }
0x174d   :  { %8069 = vmatpush3.bf16.msra.mxu1 %v8056_v1  ;;  %7644 = vmatprep.mubr.msk.f32.mxu1 %vm9666_vm5, %v11480_v13  ;;  %v8085_v1 = vpack.c.bf16 %v3425_v59, %v3423_v61  ;;  %v8103_v26 = vpack.c.bf16 %v3414_v25, %v3412_v24  ;;  %v3601_v61 = vld [vmem:[%s11593_s26 + $0x28] sm:$0xff]  ;;  %v3618_v59 = vld [vmem:[%s11593_s26 + $0xb0] sm:$0xff]  ;;  %v3624_v24 = vld [vmem:[%s11593_s26 + $0xe0] sm:$0xff] }
0x174e   :  { %8070 = vmatprep.subr.bf16.mxu1 %v9665_v60  ;;  %v3625_v25 = vld [vmem:[%s11593_s26 + $0xe8] sm:$0xff] }
0x1751   :  { %8072 = vmatpush3.bf16.msra.mxu1 %v8059_v6  ;;  %v3429_v6 = vld [vmem:[%s11591_s22 + $0x50] sm:$0xff] }
0x1752   :  { %8073 = vmatprep.subr.bf16.mxu1 %v9665_v60 }
0x1755   :  { %8075 = vmatpush3.bf16.msra.mxu1 %v8062_v9  ;;  %v8089_v9 = vpack.c.bf16 %v3429_v6, %v3427_v50 }
0x1756   :  { %8076 = vmatprep.subr.bf16.mxu1 %v9665_v60 }
0x1759   :  { %8078 = vmatpush3.bf16.msra.mxu1 %v8065_v14  ;;  %v3433_v14 = vld [vmem:[%s11591_s22 + $0x70] sm:$0xff] }
0x175a   :  { %7647 = vmatprep.subr.mxu1 %v11480_v13  ;;  %v8093_v18 = vpack.c.bf16 %v3433_v14, %v3431_v11  ;;  %v6897_v11 = vld [vmem:[#allocation33] ss:$0 sm:$0xff] }
0x181f   :  { %v3217_v31 = vpop.f32.mrb[46].mxu1 }
0x1820   :  { %v3224_v27 = vrot.slane %v3217_v31, %v10384_v49  ;;  %v7627_v28 = vpop.f32.mrb[47].mxu1  ;;  %v3411_v31 = vld [vmem:[%s11592_s23 + $0x40] sm:$0xff] }
0x1821   :  { %v3416_v28 = vld [vmem:[%s11592_s23 + $0x68] sm:$0xff] }
0x1822   :  { %v10632_v29 = vsub.f32 %v3052_v45, %v3224_v27  ;;  %v3403_v45 = vld [vmem:[%s11592_s23] sm:$0xff] }
0x1823   :  { %v8097_v12 = vpack.c.bf16 %v3405_v48, %v3403_v45  ;;  %v3604_v48 = vld [vmem:[%s11593_s26 + $0x40] sm:$0xff] }
0x1824   :  { %v3226_v30 = vmul.f32 %v10632_v29, %v10632_v29 }
0x1826   :  { %v3227_v32 = vsel %vm1603_vm6, %v3226_v30, 0.0  ;;  %v3418_v30 = vld [vmem:[%s11592_s23 + $0x78] sm:$0xff] }
0x1827   :  { %v3228_v33 = vrot.slane %v3227_v32, 4 }
0x1829   :  { %v3229_v35 = vadd.f32 %v3228_v33, %v3227_v32  ;;  %v8107_v32 = vpack.c.bf16 %v3418_v30, %v3416_v28  ;;  %v3415_v33 = vld [vmem:[%s11592_s23 + $0x60] sm:$0xff]  ;;  %v3626_v28 = vld [vmem:[%s11593_s26 + $0xf0] sm:$0xff]  ;;  %v3627_v30 = vld [vmem:[%s11593_s26 + $0xf8] sm:$0xff] }
0x182b   :  { %v3230_v16 = vrot.slane %v3229_v35, 2 }
0x182d   :  { %v3231_v60 = vadd.f32 %v3230_v16, %v3229_v35  ;;  %v3417_v35 = vld [vmem:[%s11592_s23 + $0x70] sm:$0xff] }
0x182e   :  { %v8109_v16 = vpack.c.bf16 %v3417_v35, %v3415_v33  ;;  %v8139_v33 = vpack.c.bf16 %v3627_v30, %v3626_v28  ;;  %v3611_v35 = vld [vmem:[%s11593_s26 + $0x78] sm:$0xff]  ;;  %v4280_v30 = vld [vmem:[#allocation36 + $0x98] sm:$0xff] }
0x182f   :  { %v3232_v36 = vrot.slane %v3231_v60, 1 }
0x1831   :  { %v3233_v37 = vadd.f32 %v3232_v36, %v3231_v60  ;;  %v3612_v60 = vld [vmem:[%s11593_s26 + $0x80] sm:$0xff]  ;;  %v3613_v36 = vld [vmem:[%s11593_s26 + $0x88] sm:$0xff] }
0x1832   :  { %v10681_v38 = vpack.c.bf16 %v3613_v36, %v3612_v60  ;;  %v3580_v60 = vld [vmem:[%s11594_s28] sm:$0x3] }
0x1833   :  { %7645 = vmatmul.mubr.msk.f32.vlgmr.msra.gmra.mrb[48].mxu1 %vm1611_vm7, %v3233_v37  ;;  %v3596_v37 = vld [vmem:[%s11593_s26] sm:$0xff]  ;;  %v3585_v36 = vrot.slane %v3580_v60, %v10384_v49 }
0x1834   :  { %7648 = vmatpush3.msk.msra.mxu1 %vm1192_vm1, %v3063_v23  ;;  %7649 = vmatprep.mubr.msk.f32.mxu1 %vm9666_vm5, %v11480_v13  ;;  %v8101_v23 = vpack.c.bf16 %v3409_v22, %v3407_v21  ;;  %v3606_v21 = vld [vmem:[%s11593_s26 + $0x50] sm:$0xff]  ;;  %v3607_v22 = vld [vmem:[%s11593_s26 + $0x58] sm:$0xff] }
0x1835   :  { %8080 = vmatprep.subr.bf16.mxu1 %v8079_v41  ;;  %v3614_v41 = vld [vmem:[%s11593_s26 + $0x90] sm:$0xff]  ;;  %8112 = vmatprep.subr.bf16.mxu0 %v10681_v38 }
0x1906   :  { %v3303_v43 = vpop.f32.mrb[48].mxu1 }
0x1907   :  { %v3307_v44 = vmul.f32 0.03125, %v3303_v43  ;;  %v7646_v46 = vpop.f32.mrb[49].mxu1  ;;  %v3615_v43 = vld [vmem:[%s11593_s26 + $0x98] sm:$0xff] }
0x1908   :  { %v10688_v46 = vpack.c.bf16 %v3615_v43, %v3614_v41 }
0x1909   :  { %v3308_v51 = vadd.f32 1e-05, %v3307_v44  ;;  %v10686_v44 = vpack.c.bf16 %v3597_v39, %v3596_v37  ;;  %v3589_v37 = vrot.slane %v3580_v60, %v10387_v47 }
0x190b   :  { %9054 = vrsqrt.f32 %v3308_v51  ;;  %v3598_v51 = vld [vmem:[%s11593_s26 + $0x10] sm:$0xff]  ;;  %8114 = vmatpush3.bf16.msra.mxu0 %v10686_v44 }
0x190c   :  { %v10696_v56 = vpack.c.bf16 %v3599_v52, %v3598_v51  ;;  %8116 = vmatprep.subr.bf16.mxu0 %v10688_v46 }
0x190f   :  { %8118 = vmatpush3.bf16.msra.mxu0 %v10696_v56 }
0x1915   :  { %v9055_v62 = vpop.eup %9054 }
0x1916   :  { %7650 = vmatmul.mubr.msk.f32.vlgmr.msra.gmra.mrb[50].mxu1 %vm1188_vm2, %v9055_v62  ;;  %v3619_v62 = vld [vmem:[%s11593_s26 + $0xb8] sm:$0xff] }
0x1917   :  { %8082 = vmatpush1.bf16.msra.mxu1 %v8081_v3  ;;  %3499 = vmatprep.mubr.f32.mxu1 %v11480_v13  ;;  %v10699_v3 = vpack.c.bf16 %v3617_v54, %v3616_v53  ;;  %v10709_v0 = vpack.c.bf16 %v3619_v62, %v3618_v59 }
0x1918   :  { %8084 = vmatprep.subr.bf16.mxu1 %v8083_v20  ;;  %v3600_v20 = vld [vmem:[%s11593_s26 + $0x20] sm:$0xff] }
0x1919   :  { %v10706_v63 = vpack.c.bf16 %v3601_v61, %v3600_v20  ;;  %8120 = vmatprep.subr.bf16.mxu0 %v10699_v3 }
0x191b   :  { %8086 = vmatpush1.bf16.msra.mxu1 %v8085_v1  ;;  %v3602_v1 = vld [vmem:[%s11593_s26 + $0x30] sm:$0xff]  ;;  %8122 = vmatpush3.bf16.msra.mxu0 %v10706_v63 }
0x191c   :  { %8088 = vmatprep.subr.bf16.mxu1 %v8087_v2  ;;  %v3603_v2 = vld [vmem:[%s11593_s26 + $0x38] sm:$0xff]  ;;  %8124 = vmatprep.subr.bf16.mxu0 %v10709_v0 }
0x191d   :  { %v10714_v50 = vpack.c.bf16 %v3603_v2, %v3602_v1 }
0x191f   :  { %8090 = vmatpush1.bf16.msra.mxu1 %v8089_v9  ;;  %8126 = vmatpush3.bf16.msra.mxu0 %v10714_v50  ;;  %v6896_v9 = vld [vmem:[#allocation31] ss:$0 sm:$0xff] }
0x1920   :  { %8092 = vmatprep.subr.bf16.mxu1 %v8091_v10 }
0x1923   :  { %8094 = vmatpush1.bf16.msra.mxu1 %v8093_v18  ;;  %v3620_v18 = vld [vmem:[%s11593_s26 + $0xc0] sm:$0xff] }
0x1924   :  { %8096 = vmatprep.subr.bf16.mxu1 %v8095_v40  ;;  %v3621_v40 = vld [vmem:[%s11593_s26 + $0xc8] sm:$0xff] }
0x1925   :  { %v10724_v45 = vpack.c.bf16 %v3621_v40, %v3620_v18 }
0x1926   :  { %6898 = vmatmul.mubr.msk.f32.vlgmr.msra.gmra.mrb[52].mxu1 %vm1611_vm7, %v10523_v5  ;;  %v3413_v5 = vld [vmem:[%s11592_s23 + $0x50] sm:$0xff] }
0x1927   :  { %8098 = vmatpush1.bf16.msra.mxu1 %v8097_v12  ;;  %3573 = vmatprep.mubr.f32.mxu1 %v11480_v13  ;;  %v8105_v27 = vpack.c.bf16 %v3413_v5, %v3411_v31  ;;  %v3623_v12 = vld [vmem:[%s11593_s26 + $0xd8] sm:$0xff]  ;;  %v3608_v31 = vld [vmem:[%s11593_s26 + $0x60] sm:$0xff]  ;;  %v3609_v5 = vld [vmem:[%s11593_s26 + $0x68] sm:$0xff] }
0x1928   :  { %8100 = vmatprep.subr.bf16.mxu1 %v8099_v19  ;;  %8128 = vmatprep.subr.bf16.mxu0 %v10724_v45  ;;  %v10734_v19 = vpack.c.bf16 %v3623_v12, %v3622_v4 }
0x192b   :  { %8102 = vmatpush1.bf16.msra.mxu1 %v8101_v23  ;;  %v10738_v23 = vpack.c.bf16 %v3607_v22, %v3606_v21 }
0x192c   :  { %8104 = vmatprep.subr.bf16.mxu1 %v8103_v26  ;;  %v8135_v26 = vpack.c.bf16 %v3625_v25, %v3624_v24 }
0x192f   :  { %8106 = vmatpush1.bf16.msra.mxu1 %v8105_v27  ;;  %v8137_v27 = vpack.c.bf16 %v3609_v5, %v3608_v31  ;;  %v4263_v5 = vld [vmem:[#allocation36 + $0x10] sm:$0xff] }
0x1930   :  { %8108 = vmatprep.subr.bf16.mxu1 %v8107_v32  ;;  %v3610_v32 = vld [vmem:[%s11593_s26 + $0x70] sm:$0xff] }
0x1933   :  { %8110 = vmatpush1.bf16.msra.mxu1 %v8109_v16  ;;  %v8141_v16 = vpack.c.bf16 %v3611_v35, %v3610_v32  ;;  %v4288_v32 = vld [vmem:[#allocation36 + $0xd8] sm:$0xff] }
0x1934   :  { %v8243_v60 = vpack.c.bf16 %v4288_v32, %v4280_v30  ;;  %v4415_v30 = vld [vmem:[#allocation36 + $0x4d0] sm:$0xff]  ;;  %v4424_v32 = vld [vmem:[#allocation36 + $0x518] sm:$0xff] }
0x19e9   :  { %v3379_v6 = vpop.f32.mrb[50].mxu1 }
0x19ea   :  { %v3386_v7 = vrot.slane %v3379_v6, %v10384_v49  ;;  %v7651_v8 = vpop.f32.mrb[51].mxu1 }
0x19ec   :  { %v3387_v10 = vmul.f32 %v3386_v7, %v10632_v29  ;;  %v3605_v29 = vld [vmem:[%s11593_s26 + $0x48] sm:$0xff] }
0x19ed   :  { %v10728_v55 = vpack.c.bf16 %v3605_v29, %v3604_v48 }
0x19ee   :  { %v3394_v14 = vmul.f32 %v6896_v9, %v3387_v10 }
0x19ef   :  { %8130 = vmatpush3.bf16.msra.mxu0 %v10728_v55 }
0x19f0   :  { %v3401_v15 = vadd.f32 %v6897_v11, %v3394_v14  ;;  %8132 = vmatprep.subr.bf16.mxu0 %v10734_v19  ;;  %v3628_v11 = vld [vmem:[%s11595_s29] sm:$0xff] }
0x19f1   :  { %v3715_v14 = vcombine.high %v3628_v11, %v3628_v11 }
0x19f2   :  { %v3402_v17 = vmax.f32 %v3401_v15, 0.0 }
0x19f3   :  { %8134 = vmatpush3.bf16.msra.mxu0 %v10738_v23  ;;  %6900 = vmatprep.subr.msk.mxu1 %vm1192_vm1, %v3715_v14 }
0x19f4   :  { %6899 = vmatmul.mubr.msk.f32.vlgmr.msra.gmra.mrb[52].mxu1 %vm1611_vm7, %v3402_v17  ;;  %8136 = vmatprep.subr.bf16.mxu0 %v8135_v26 }
0x19f5   :  { %3787 = vmatprep.mubr.f32.mxu1 %v11480_v13  ;;  %6901 = vmatpush1.msk.msra.mxu1 %vm1192_vm1, %v3628_v11 }
0x19f6   :  { %8144 = vmatprep.subr.bf16.mxu1 %v10681_v38  ;;  %v4264_v38 = vld [vmem:[#allocation36 + $0x18] sm:$0xff] }
0x19f7   :  { %8138 = vmatpush3.bf16.msra.mxu0 %v8137_v27 }
0x19f8   :  { %8140 = vmatprep.subr.bf16.mxu0 %v8139_v33 }
0x19fb   :  { %8142 = vmatpush3.bf16.msra.mxu0 %v8141_v16 }
0x19fc   :  { %6903 = vmatprep.subr.msk.mxu0 %vm1192_vm1, %v3715_v14  ;;  %v4352_v14 = vld [vmem:[#allocation36 + $0x2d8] sm:$0xff] }
0x1ac7   :  { %v3575_v39 = vpop.f32.mrb[52].mxu1 }
0x1ac8   :  { %v3592_v41 = vadd.f32 %v3585_v36, %v3575_v39  ;;  %v3577_v43 = vpop.f32.mrb[53].mxu1  ;;  %v4279_v36 = vld [vmem:[#allocation36 + $0x90] sm:$0xff]  ;;  %v4296_v39 = vld [vmem:[#allocation36 + $0x118] sm:$0xff] }
0x1ac9   :  { %v3593_v51 = vadd.f32 %v3589_v37, %v3577_v43  ;;  %v4287_v37 = vld [vmem:[#allocation36 + $0xd0] sm:$0xff] }
0x1aca   :  { %v3629_v52 = vsel %vm1100_vm0, %v3592_v41, 0.0  ;;  %v8245_v43 = vpack.c.bf16 %v4287_v37, %v4279_v36  ;;  %v4431_v36 = vld [vmem:[#allocation36 + $0x550] sm:$0xff]  ;;  %v4440_v37 = vld [vmem:[#allocation36 + $0x598] sm:$0xff] }
0x1acb   :  { %v3630_v53 = vrot.slane %v3629_v52, 4  ;;  %v3636_v54 = vsel %vm1100_vm0, %v3593_v51, 0.0 }
0x1acc   :  { %v3637_v20 = vrot.slane %v3636_v54, 4 }
0x1acd   :  { %v3631_v61 = vadd.f32 %v3630_v53, %v3629_v52  ;;  %v4295_v52 = vld [vmem:[#allocation36 + $0x110] sm:$0xff] }
0x1ace   :  { %v3638_v59 = vadd.f32 %v3637_v20, %v3636_v54  ;;  %v4303_v53 = vld [vmem:[#allocation36 + $0x150] sm:$0xff]  ;;  %v4312_v54 = vld [vmem:[#allocation36 + $0x198] sm:$0xff] }
0x1acf   :  { %v3632_v62 = vrot.slane %v3631_v61, 2  ;;  %v4320_v20 = vld [vmem:[#allocation36 + $0x1d8] sm:$0xff] }
0x1ad0   :  { %v3639_v1 = vrot.slane %v3638_v59, 2 }
0x1ad1   :  { %v3633_v2 = vadd.f32 %v3632_v62, %v3631_v61  ;;  %v8249_v61 = vpack.c.bf16 %v4303_v53, %v4295_v52  ;;  %v4311_v62 = vld [vmem:[#allocation36 + $0x190] sm:$0xff]  ;;  %v4456_v53 = vld [vmem:[#allocation36 + $0x618] sm:$0xff] }
0x1ad2   :  { %v3640_v6 = vadd.f32 %v3639_v1, %v3638_v59  ;;  %v8251_v59 = vpack.c.bf16 %v4320_v20, %v4312_v54  ;;  %v4319_v1 = vld [vmem:[#allocation36 + $0x1d0] sm:$0xff]  ;;  %v4464_v54 = vld [vmem:[#allocation36 + $0x658] sm:$0xff] }
0x1ad3   :  { %v3634_v7 = vrot.slane %v3633_v2, 1  ;;  %v4447_v52 = vld [vmem:[#allocation36 + $0x5d0] sm:$0xff] }
0x1ad4   :  { %v3641_v8 = vrot.slane %v3640_v6, 1 }
0x1ad5   :  { %v3635_v10 = vadd.f32 %v3634_v7, %v3633_v2  ;;  %v4328_v2 = vld [vmem:[#allocation36 + $0x218] sm:$0xff]  ;;  %v8253_v7 = vpack.c.bf16 %v4319_v1, %v4311_v62  ;;  %v4463_v62 = vld [vmem:[#allocation36 + $0x650] sm:$0xff] }
0x1ad6   :  { %v3642_v9 = vadd.f32 %v3641_v8, %v3640_v6  ;;  %v4336_v6 = vld [vmem:[#allocation36 + $0x258] sm:$0xff] }
0x1ad7   :  { %v8255_v8 = vpack.c.bf16 %v4336_v6, %v4328_v2  ;;  %v4472_v1 = vld [vmem:[#allocation36 + $0x698] sm:$0xff] }
0x1ad8   :  { %3707 = vmatprep.mubr.f32.mxu0 %v3642_v9  ;;  %v4327_v9 = vld [vmem:[#allocation36 + $0x210] sm:$0xff]  ;;  %v4480_v2 = vld [vmem:[#allocation36 + $0x6d8] sm:$0xff] }
0x1ad9   :  { %3708 = vmatmul.mubr.f32.vlgmr.msra.gmra.mrb[2].mxu0 %v3635_v10  ;;  %v4335_v10 = vld [vmem:[#allocation36 + $0x250] sm:$0xff] }
0x1ada   :  { %3960 = vmatprep.mubr.f32.mxu0 %v11480_v13  ;;  %6904 = vmatpush1.msk.msra.mxu0 %vm1192_vm1, %v3628_v11  ;;  %v4344_v11 = vld [vmem:[#allocation36 + $0x298] sm:$0xff] }
0x1bac   :  { %v7149_v15 = vpop.f32.mrb[2].mxu0 }
0x1bad   :  { %v7150_v17 = vpop.f32.mrb[3].mxu0 }
0x1bae   :  { %v7151_v18 = vadd.f32 %v7150_v17, %v7149_v15  ;;  %v8257_v15 = vpack.c.bf16 %v4335_v10, %v4327_v9  ;;  %v8259_v17 = vpack.c.bf16 %v4352_v14, %v4344_v11  ;;  %v4479_v9 = vld [vmem:[#allocation36 + $0x6d0] sm:$0xff]  ;;  %v4488_v10 = vld [vmem:[#allocation36 + $0x718] sm:$0xff] }
0x1baf   :  { %v4496_v11 = vld [vmem:[#allocation36 + $0x758] sm:$0xff] }
0x1bb0   :  { %v3713_v40 = vmul.f32 0.0078125, %v7151_v18  ;;  %v4343_v18 = vld [vmem:[#allocation36 + $0x290] sm:$0xff] }
0x1bb2   :  { %6902 = vmatmul.mubr.msk.f32.vlgmr.msra.gmra.mrb[54].mxu1 %vm1188_vm2, %v3713_v40  ;;  %v4351_v40 = vld [vmem:[#allocation36 + $0x2d0] sm:$0xff] }
0x1bb3   :  { %8146 = vmatpush3.bf16.msra.mxu1 %v10686_v44  ;;  %v4272_v44 = vld [vmem:[#allocation36 + $0x58] sm:$0xff] }
0x1bb4   :  { %8148 = vmatprep.subr.bf16.mxu1 %v10688_v46  ;;  %v8239_v46 = vpack.c.bf16 %v4272_v44, %v4264_v38  ;;  %v4360_v38 = vld [vmem:[#allocation36 + $0x318] sm:$0xff] }
0x1bb5   :  { %v4368_v44 = vld [vmem:[#allocation36 + $0x358] sm:$0xff] }
0x1bb7   :  { %8150 = vmatpush3.bf16.msra.mxu1 %v10696_v56 }
0x1bb8   :  { %8152 = vmatprep.subr.bf16.mxu1 %v10699_v3 }
0x1bbb   :  { %8154 = vmatpush3.bf16.msra.mxu1 %v10706_v63 }
0x1bbc   :  { %8156 = vmatprep.subr.bf16.mxu1 %v10709_v0 }
0x1bbf   :  { %8158 = vmatpush3.bf16.msra.mxu1 %v10714_v50 }
0x1bc0   :  { %8160 = vmatprep.subr.bf16.mxu1 %v10724_v45 }
0x1bc3   :  { %8162 = vmatpush3.bf16.msra.mxu1 %v10728_v55 }
0x1bc4   :  { %8164 = vmatprep.subr.bf16.mxu1 %v10734_v19 }
0x1bc7   :  { %8166 = vmatpush3.bf16.msra.mxu1 %v10738_v23 }
0x1bc8   :  { %8168 = vmatprep.subr.bf16.mxu1 %v8135_v26 }
0x1bcb   :  { %8170 = vmatpush3.bf16.msra.mxu1 %v8137_v27  ;;  %v4271_v27 = vld [vmem:[#allocation36 + $0x50] sm:$0xff] }
0x1bcc   :  { %8172 = vmatprep.subr.bf16.mxu1 %v8139_v33  ;;  %v8241_v35 = vpack.c.bf16 %v4271_v27, %v4263_v5 }
0x1bcf   :  { %8174 = vmatpush3.bf16.msra.mxu1 %v8141_v16 }
0x1bd0   :  { %8240 = vmatprep.subr.bf16.mxu1 %v8239_v46  ;;  %v8261_v46 = vpack.c.bf16 %v4351_v40, %v4343_v18  ;;  %v4495_v18 = vld [vmem:[#allocation36 + $0x750] sm:$0xff]  ;;  %v4504_v40 = vld [vmem:[#allocation36 + $0x798] sm:$0xff] }
0x1c85   :  { %v3789_v56 = vpop.f32.mrb[54].mxu1 }
0x1c86   :  { %v3797_v3 = vrot.slane %v3789_v56, %v10384_v49  ;;  %v3791_v63 = vpop.f32.mrb[55].mxu1  ;;  %v8263_v56 = vpack.c.bf16 %v4368_v44, %v4360_v38  ;;  %v4512_v38 = vld [vmem:[#allocation36 + $0x7d8] sm:$0xff] }
0x1c87   :  { %v3801_v0 = vrot.slane %v3791_v63, %v10384_v49  ;;  %v4367_v63 = vld [vmem:[#allocation36 + $0x350] sm:$0xff] }
0x1c88   :  { %v10776_v50 = vsub.f32 %v3592_v41, %v3797_v3  ;;  %v4304_v41 = vld [vmem:[#allocation36 + $0x158] sm:$0xff]  ;;  %v4359_v3 = vld [vmem:[#allocation36 + $0x310] sm:$0xff] }
0x1c89   :  { %v10778_v45 = vsub.f32 %v3593_v51, %v3801_v0  ;;  %v8247_v51 = vpack.c.bf16 %v4304_v41, %v4296_v39  ;;  %v4376_v0 = vld [vmem:[#allocation36 + $0x398] sm:$0xff] }
0x1c8a   :  { %v3804_v48 = vmul.f32 %v10776_v50, %v10776_v50  ;;  %v4448_v39 = vld [vmem:[#allocation36 + $0x5d8] sm:$0xff] }
0x1c8b   :  { %v3805_v29 = vmul.f32 %v10778_v45, %v10778_v45 }
0x1c8c   :  { %v3806_v55 = vsel %vm1100_vm0, %v3804_v48, 0.0  ;;  %v4384_v48 = vld [vmem:[#allocation36 + $0x3d8] sm:$0xff] }
0x1c8d   :  { %v3807_v4 = vrot.slane %v3806_v55, 4  ;;  %v3813_v12 = vsel %vm1100_vm0, %v3805_v29, 0.0  ;;  %v8265_v29 = vpack.c.bf16 %v4367_v63, %v4359_v3  ;;  %v4511_v3 = vld [vmem:[#allocation36 + $0x7d0] sm:$0xff]  ;;  %v4268_v63 = vld [vmem:[#allocation36 + $0x38] sm:$0xff] }
0x1c8e   :  { %v3814_v19 = vrot.slane %v3813_v12, 4 }
0x1c8f   :  { %v3808_v21 = vadd.f32 %v3807_v4, %v3806_v55  ;;  %v8267_v55 = vpack.c.bf16 %v4384_v48, %v4376_v0  ;;  %v4375_v4 = vld [vmem:[#allocation36 + $0x390] sm:$0xff]  ;;  %v4276_v0 = vld [vmem:[#allocation36 + $0x78] sm:$0xff] }
0x1c90   :  { %v3815_v22 = vadd.f32 %v3814_v19, %v3813_v12  ;;  %v4383_v12 = vld [vmem:[#allocation36 + $0x3d0] sm:$0xff]  ;;  %v4392_v19 = vld [vmem:[#allocation36 + $0x418] sm:$0xff] }
0x1c91   :  { %v3809_v23 = vrot.slane %v3808_v21, 2 }
0x1c92   :  { %v3816_v24 = vrot.slane %v3815_v22, 2 }
0x1c93   :  { %v3810_v25 = vadd.f32 %v3809_v23, %v3808_v21  ;;  %v4400_v21 = vld [vmem:[#allocation36 + $0x458] sm:$0xff] }
0x1c94   :  { %v3817_v26 = vadd.f32 %v3816_v24, %v3815_v22  ;;  %v8269_v22 = vpack.c.bf16 %v4383_v12, %v4375_v4  ;;  %v8271_v23 = vpack.c.bf16 %v4400_v21, %v4392_v19  ;;  %v4391_v24 = vld [vmem:[#allocation36 + $0x410] sm:$0xff]  ;;  %v4284_v12 = vld [vmem:[#allocation36 + $0xb8] sm:$0xff] }
0x1c95   :  { %v3811_v31 = vrot.slane %v3810_v25, 1  ;;  %v4275_v4 = vld [vmem:[#allocation36 + $0x70] sm:$0xff]  ;;  %v4292_v19 = vld [vmem:[#allocation36 + $0xf8] sm:$0xff] }
0x1c96   :  { %v3818_v28 = vrot.slane %v3817_v26, 1 }
0x1c97   :  { %v3812_v16 = vadd.f32 %v3811_v31, %v3810_v25  ;;  %v4399_v25 = vld [vmem:[#allocation36 + $0x450] sm:$0xff]  ;;  %v4416_v31 = vld [vmem:[#allocation36 + $0x4d8] sm:$0xff] }
0x1c98   :  { %v3819_v33 = vadd.f32 %v3818_v28, %v3817_v26  ;;  %v4408_v26 = vld [vmem:[#allocation36 + $0x498] sm:$0xff]  ;;  %v8273_v5 = vpack.c.bf16 %v4399_v25, %v4391_v24  ;;  %v4407_v28 = vld [vmem:[#allocation36 + $0x490] sm:$0xff] }
0x1c99   :  { %v8275_v27 = vpack.c.bf16 %v4416_v31, %v4408_v26  ;;  %v4291_v24 = vld [vmem:[#allocation36 + $0xf0] sm:$0xff]  ;;  %v4300_v25 = vld [vmem:[#allocation36 + $0x138] sm:$0xff] }
0x1c9a   :  { %3884 = vmatprep.mubr.f32.mxu1 %v3819_v33  ;;  %v4432_v33 = vld [vmem:[#allocation36 + $0x558] sm:$0xff] }
0x1c9b   :  { %3885 = vmatmul.mubr.f32.vlgmr.msra.gmra.mrb[56].mxu1 %v3812_v16  ;;  %v8279_v16 = vpack.c.bf16 %v4432_v33, %v4424_v32  ;;  %v4308_v26 = vld [vmem:[#allocation36 + $0x178] sm:$0xff] }
0x1c9c   :  { %8242 = vmatpush1.bf16.msra.mxu1 %v8241_v35  ;;  %4652 = vmatprep.mubr.f32.mxu1 %v10466_v57  ;;  %v8277_v35 = vpack.c.bf16 %v4415_v30, %v4407_v28  ;;  %v4307_v28 = vld [vmem:[#allocation36 + $0x170] sm:$0xff]  ;;  %v4316_v30 = vld [vmem:[#allocation36 + $0x1b8] sm:$0xff] }
0x1c9d   :  { %8244 = vmatprep.subr.bf16.mxu1 %v8243_v60  ;;  %v4423_v60 = vld [vmem:[#allocation36 + $0x510] sm:$0xff]  ;;  %v4324_v32 = vld [vmem:[#allocation36 + $0x1f8] sm:$0xff] }
0x1c9e   :  { %v8281_v41 = vpack.c.bf16 %v4431_v36, %v4423_v60  ;;  %v4323_v60 = vld [vmem:[#allocation36 + $0x1f0] sm:$0xff]  ;;  %v4332_v36 = vld [vmem:[#allocation36 + $0x238] sm:$0xff] }
0x1ca0   :  { %8246 = vmatpush1.bf16.msra.mxu1 %v8245_v43  ;;  %v8283_v43 = vpack.c.bf16 %v4448_v39, %v4440_v37  ;;  %v4340_v37 = vld [vmem:[#allocation36 + $0x278] sm:$0xff] }
0x1ca1   :  { %8248 = vmatprep.subr.bf16.mxu1 %v8247_v51  ;;  %v4439_v51 = vld [vmem:[#allocation36 + $0x590] sm:$0xff] }
0x1ca2   :  { %v8285_v20 = vpack.c.bf16 %v4447_v52, %v4439_v51  ;;  %v4339_v51 = vld [vmem:[#allocation36 + $0x270] sm:$0xff]  ;;  %v4348_v52 = vld [vmem:[#allocation36 + $0x2b8] sm:$0xff] }
0x1ca4   :  { %8250 = vmatpush1.bf16.msra.mxu1 %v8249_v61  ;;  %v8287_v61 = vpack.c.bf16 %v4464_v54, %v4456_v53  ;;  %v4356_v53 = vld [vmem:[#allocation36 + $0x2f8] sm:$0xff] }
0x1ca5   :  { %8252 = vmatprep.subr.bf16.mxu1 %v8251_v59  ;;  %v4455_v59 = vld [vmem:[#allocation36 + $0x610] sm:$0xff] }
0x1ca6   :  { %v8289_v6 = vpack.c.bf16 %v4463_v62, %v4455_v59  ;;  %v4355_v59 = vld [vmem:[#allocation36 + $0x2f0] sm:$0xff]  ;;  %v4364_v62 = vld [vmem:[#allocation36 + $0x338] sm:$0xff] }
0x1ca8   :  { %8254 = vmatpush1.bf16.msra.mxu1 %v8253_v7  ;;  %v8291_v7 = vpack.c.bf16 %v4480_v2, %v4472_v1  ;;  %v4372_v1 = vld [vmem:[#allocation36 + $0x378] sm:$0xff] }
0x1ca9   :  { %8256 = vmatprep.subr.bf16.mxu1 %v8255_v8  ;;  %v4471_v8 = vld [vmem:[#allocation36 + $0x690] sm:$0xff] }
0x1caa   :  { %v8293_v14 = vpack.c.bf16 %v4479_v9, %v4471_v8  ;;  %v4371_v8 = vld [vmem:[#allocation36 + $0x370] sm:$0xff]  ;;  %v4380_v9 = vld [vmem:[#allocation36 + $0x3b8] sm:$0xff] }
0x1cac   :  { %8258 = vmatpush1.bf16.msra.mxu1 %v8257_v15  ;;  %v8295_v15 = vpack.c.bf16 %v4496_v11, %v4488_v10  ;;  %v4388_v10 = vld [vmem:[#allocation36 + $0x3f8] sm:$0xff] }
0x1cad   :  { %8260 = vmatprep.subr.bf16.mxu1 %v8259_v17  ;;  %v4487_v17 = vld [vmem:[#allocation36 + $0x710] sm:$0xff] }
0x1cae   :  { %v8297_v44 = vpack.c.bf16 %v4495_v18, %v4487_v17  ;;  %v4387_v17 = vld [vmem:[#allocation36 + $0x3f0] sm:$0xff]  ;;  %v4396_v18 = vld [vmem:[#allocation36 + $0x438] sm:$0xff] }
0x1cb0   :  { %8262 = vmatpush1.bf16.msra.mxu1 %v8261_v46  ;;  %v8299_v46 = vpack.c.bf16 %v4512_v38, %v4504_v40  ;;  %v4404_v40 = vld [vmem:[#allocation36 + $0x478] sm:$0xff] }
0x1cb1   :  { %8264 = vmatprep.subr.bf16.mxu1 %v8263_v56  ;;  %v4503_v56 = vld [vmem:[#allocation36 + $0x790] sm:$0xff] }
0x1cb2   :  { %v8301_v48 = vpack.c.bf16 %v4511_v3, %v4503_v56  ;;  %v4403_v56 = vld [vmem:[#allocation36 + $0x470] sm:$0xff]  ;;  %v4412_v3 = vld [vmem:[#allocation36 + $0x4b8] sm:$0xff] }
0x1cb4   :  { %8266 = vmatpush1.bf16.msra.mxu1 %v8265_v29  ;;  %v8367_v29 = vpack.c.bf16 %v4276_v0, %v4268_v63  ;;  %v4420_v63 = vld [vmem:[#allocation36 + $0x4f8] sm:$0xff]  ;;  %v4262_v0 = vld [vmem:[#allocation36 + $0x8] sm:$0xff] }
0x1cb5   :  { %8268 = vmatprep.subr.bf16.mxu1 %v8267_v55  ;;  %v4267_v55 = vld [vmem:[#allocation36 + $0x30] sm:$0xff] }
0x1cb6   :  { %v8369_v21 = vpack.c.bf16 %v4275_v4, %v4267_v55  ;;  %v8403_v4 = vpack.c.bf16 %v4420_v63, %v4412_v3 }
0x1cb8   :  { %8270 = vmatpush1.bf16.msra.mxu1 %v8269_v22  ;;  %v8371_v22 = vpack.c.bf16 %v4292_v19, %v4284_v12  ;;  %v4411_v12 = vld [vmem:[#allocation36 + $0x4b0] sm:$0xff] }
0x1cb9   :  { %8272 = vmatprep.subr.bf16.mxu1 %v8271_v23  ;;  %v4283_v23 = vld [vmem:[#allocation36 + $0xb0] sm:$0xff] }
0x1cba   :  { %v8373_v31 = vpack.c.bf16 %v4291_v24, %v4283_v23  ;;  %v4419_v19 = vld [vmem:[#allocation36 + $0x4f0] sm:$0xff] }
0x1cbb   :  { %v8405_v23 = vpack.c.bf16 %v4419_v19, %v4411_v12  ;;  %v4008_v12 = vld [vmem:[#allocation34 + $0x18] sm:$0xff] }
0x1cbc   :  { %8274 = vmatpush1.bf16.msra.mxu1 %v8273_v5  ;;  %v8375_v5 = vpack.c.bf16 %v4308_v26, %v4300_v25  ;;  %v4427_v25 = vld [vmem:[#allocation36 + $0x530] sm:$0xff] }
0x1cbd   :  { %8276 = vmatprep.subr.bf16.mxu1 %v8275_v27  ;;  %v4299_v27 = vld [vmem:[#allocation36 + $0x130] sm:$0xff] }
0x1cbe   :  { %v8377_v33 = vpack.c.bf16 %v4307_v28, %v4299_v27  ;;  %v4435_v26 = vld [vmem:[#allocation36 + $0x570] sm:$0xff] }
0x1cbf   :  { %v8409_v27 = vpack.c.bf16 %v4435_v26, %v4427_v25  ;;  %v4310_v25 = vld [vmem:[#allocation36 + $0x188] sm:$0xff] }
0x1cc0   :  { %8278 = vmatpush1.bf16.msra.mxu1 %v8277_v35  ;;  %v8379_v35 = vpack.c.bf16 %v4324_v32, %v4316_v30  ;;  %v4443_v30 = vld [vmem:[#allocation36 + $0x5b0] sm:$0xff] }
0x1cc1   :  { %8280 = vmatprep.subr.bf16.mxu1 %v8279_v16  ;;  %v4315_v16 = vld [vmem:[#allocation36 + $0x1b0] sm:$0xff] }
0x1cc2   :  { %v8381_v39 = vpack.c.bf16 %v4323_v60, %v4315_v16  ;;  %v4451_v32 = vld [vmem:[#allocation36 + $0x5f0] sm:$0xff] }
0x1cc3   :  { %v8413_v16 = vpack.c.bf16 %v4451_v32, %v4443_v30  ;;  %v4024_v30 = vld [vmem:[#allocation34 + $0x98] sm:$0xff] }
0x1cc4   :  { %8282 = vmatpush1.bf16.msra.mxu1 %v8281_v41  ;;  %v8383_v41 = vpack.c.bf16 %v4340_v37, %v4332_v36  ;;  %v4459_v36 = vld [vmem:[#allocation36 + $0x630] sm:$0xff]  ;;  %v4032_v32 = vld [vmem:[#allocation34 + $0xd8] sm:$0xff] }
0x1cc5   :  { %8284 = vmatprep.subr.bf16.mxu1 %v8283_v43  ;;  %v4331_v43 = vld [vmem:[#allocation36 + $0x230] sm:$0xff] }
0x1cc6   :  { %v8385_v54 = vpack.c.bf16 %v4339_v51, %v4331_v43  ;;  %v4467_v37 = vld [vmem:[#allocation36 + $0x670] sm:$0xff] }
0x1cc7   :  { %v8417_v43 = vpack.c.bf16 %v4467_v37, %v4459_v36  ;;  %v4031_v36 = vld [vmem:[#allocation34 + $0xd0] sm:$0xff] }
0x1cc8   :  { %8286 = vmatpush1.bf16.msra.mxu1 %v8285_v20  ;;  %v8387_v20 = vpack.c.bf16 %v4356_v53, %v4348_v52  ;;  %v4475_v52 = vld [vmem:[#allocation36 + $0x6b0] sm:$0xff] }
0x1cc9   :  { %8288 = vmatprep.subr.bf16.mxu1 %v8287_v61  ;;  %v4347_v61 = vld [vmem:[#allocation36 + $0x2b0] sm:$0xff] }
0x1cca   :  { %v8389_v2 = vpack.c.bf16 %v4355_v59, %v4347_v61  ;;  %v4483_v53 = vld [vmem:[#allocation36 + $0x6f0] sm:$0xff] }
0x1ccb   :  { %v8421_v61 = vpack.c.bf16 %v4483_v53, %v4475_v52  ;;  %v4326_v52 = vld [vmem:[#allocation36 + $0x208] sm:$0xff] }
0x1ccc   :  { %8290 = vmatpush1.bf16.msra.mxu1 %v8289_v6  ;;  %v8391_v6 = vpack.c.bf16 %v4372_v1, %v4364_v62  ;;  %v4491_v62 = vld [vmem:[#allocation36 + $0x730] sm:$0xff]  ;;  %v4334_v53 = vld [vmem:[#allocation36 + $0x248] sm:$0xff] }
0x1ccd   :  { %8292 = vmatprep.subr.bf16.mxu1 %v8291_v7  ;;  %v4363_v7 = vld [vmem:[#allocation36 + $0x330] sm:$0xff] }
0x1cce   :  { %v8393_v11 = vpack.c.bf16 %v4371_v8, %v4363_v7  ;;  %v4499_v1 = vld [vmem:[#allocation36 + $0x770] sm:$0xff] }
0x1ccf   :  { %v8425_v7 = vpack.c.bf16 %v4499_v1, %v4491_v62  ;;  %v4047_v62 = vld [vmem:[#allocation34 + $0x150] sm:$0xff]  ;;  %v8191_v1 = vpack.c.bf16 %v4334_v53, %v4326_v52  ;;  %v4397_v53 = vld [vmem:[#allocation36 + $0x440] sm:$0xff] }
0x1cd0   :  { %8294 = vmatpush1.bf16.msra.mxu1 %v8293_v14  ;;  %v8395_v14 = vpack.c.bf16 %v4388_v10, %v4380_v9  ;;  %v4507_v9 = vld [vmem:[#allocation36 + $0x7b0] sm:$0xff] }
0x1cd1   :  { %8296 = vmatprep.subr.bf16.mxu1 %v8295_v15  ;;  %v4379_v15 = vld [vmem:[#allocation36 + $0x3b0] sm:$0xff] }
0x1cd2   :  { %v8397_v38 = vpack.c.bf16 %v4387_v17, %v4379_v15  ;;  %v4515_v10 = vld [vmem:[#allocation36 + $0x7f0] sm:$0xff] }
0x1cd4   :  { %8298 = vmatpush1.bf16.msra.mxu1 %v8297_v44  ;;  %v8399_v44 = vpack.c.bf16 %v4404_v40, %v4396_v18 }
0x1cd5   :  { %8300 = vmatprep.subr.bf16.mxu1 %v8299_v46  ;;  %v4395_v46 = vld [vmem:[#allocation36 + $0x430] sm:$0xff] }
0x1cd6   :  { %v8401_v55 = vpack.c.bf16 %v4403_v56, %v4395_v46  ;;  %v4278_v46 = vld [vmem:[#allocation36 + $0x88] sm:$0xff] }
0x1cd7   :  { %v4286_v56 = vld [vmem:[#allocation36 + $0xc8] sm:$0xff] }
0x1cd8   :  { %8302 = vmatpush1.bf16.msra.mxu1 %v8301_v48  ;;  %v4270_v48 = vld [vmem:[#allocation36 + $0x48] sm:$0xff]  ;;  %v8179_v63 = vpack.c.bf16 %v4286_v56, %v4278_v46  ;;  %v4072_v46 = vld [vmem:[#allocation34 + $0x218] sm:$0xff] }
0x1cd9   :  { %8368 = vmatprep.subr.bf16.mxu1 %v8367_v29  ;;  %v8175_v29 = vpack.c.bf16 %v4270_v48, %v4262_v0  ;;  %v4277_v0 = vld [vmem:[#allocation36 + $0x80] sm:$0xff]  ;;  %v4080_v56 = vld [vmem:[#allocation34 + $0x258] sm:$0xff] }
0x1cda   :  { %v4285_v48 = vld [vmem:[#allocation36 + $0xc0] sm:$0xff] }
0x1cdb   :  { %4653 = vmatmul.mubr.f32.vlgmr.msra.gmra.mrb[58].mxu1 %v10469_v58  ;;  %8176 = vmatprep.subr.bf16.mxu0 %v8175_v29  ;;  %v8181_v19 = vpack.c.bf16 %v4285_v48, %v4277_v0  ;;  %v8511_v0 = vpack.c.bf16 %v4080_v56, %v4072_v46  ;;  %v4135_v46 = vld [vmem:[#allocation34 + $0x410] sm:$0xff] }
0x1cdc   :  { %8370 = vmatpush1.bf16.msra.mxu1 %v8369_v21  ;;  %4794 = vmatprep.mubr.f32.mxu1 %v10466_v57  ;;  %v4428_v21 = vld [vmem:[#allocation36 + $0x538] sm:$0xff]  ;;  %v4143_v56 = vld [vmem:[#allocation34 + $0x450] sm:$0xff] }
0x1cdd   :  { %8372 = vmatprep.subr.bf16.mxu1 %v8371_v22  ;;  %v4436_v22 = vld [vmem:[#allocation36 + $0x578] sm:$0xff] }
0x1cde   :  { %v8407_v24 = vpack.c.bf16 %v4436_v22, %v4428_v21  ;;  %v4293_v21 = vld [vmem:[#allocation36 + $0x100] sm:$0xff] }
0x1cdf   :  { %v4301_v22 = vld [vmem:[#allocation36 + $0x140] sm:$0xff] }
0x1ce0   :  { %8374 = vmatpush1.bf16.msra.mxu1 %v8373_v31  ;;  %v4444_v31 = vld [vmem:[#allocation36 + $0x5b8] sm:$0xff] }
0x1ce1   :  { %8376 = vmatprep.subr.bf16.mxu1 %v8375_v5  ;;  %v4452_v5 = vld [vmem:[#allocation36 + $0x5f8] sm:$0xff] }
0x1ce2   :  { %v8411_v28 = vpack.c.bf16 %v4452_v5, %v4444_v31  ;;  %v4007_v31 = vld [vmem:[#allocation34 + $0x10] sm:$0xff] }
0x1ce3   :  { %v4015_v5 = vld [vmem:[#allocation34 + $0x50] sm:$0xff] }
0x1ce4   :  { %8378 = vmatpush1.bf16.msra.mxu1 %v8377_v33  ;;  %v4460_v33 = vld [vmem:[#allocation36 + $0x638] sm:$0xff] }
0x1ce5   :  { %8380 = vmatprep.subr.bf16.mxu1 %v8379_v35  ;;  %v4468_v35 = vld [vmem:[#allocation36 + $0x678] sm:$0xff] }
0x1ce6   :  { %v8415_v60 = vpack.c.bf16 %v4468_v35, %v4460_v33  ;;  %v8499_v33 = vpack.c.bf16 %v4032_v32, %v4024_v30  ;;  %v8185_v35 = vpack.c.bf16 %v4301_v22, %v4293_v21  ;;  %v4088_v22 = vld [vmem:[#allocation34 + $0x298] sm:$0xff]  ;;  %v4381_v32 = vld [vmem:[#allocation36 + $0x3c0] sm:$0xff] }
0x1ce8   :  { %8382 = vmatpush1.bf16.msra.mxu1 %v8381_v39  ;;  %v4476_v39 = vld [vmem:[#allocation36 + $0x6b8] sm:$0xff] }
0x1ce9   :  { %8384 = vmatprep.subr.bf16.mxu1 %v8383_v41  ;;  %v4484_v41 = vld [vmem:[#allocation36 + $0x6f8] sm:$0xff] }
0x1cea   :  { %v8419_v51 = vpack.c.bf16 %v4484_v41, %v4476_v39  ;;  %v4317_v39 = vld [vmem:[#allocation36 + $0x1c0] sm:$0xff] }
0x1cec   :  { %8386 = vmatpush1.bf16.msra.mxu1 %v8385_v54  ;;  %v4492_v54 = vld [vmem:[#allocation36 + $0x738] sm:$0xff] }
0x1ced   :  { %8388 = vmatprep.subr.bf16.mxu1 %v8387_v20  ;;  %v4500_v20 = vld [vmem:[#allocation36 + $0x778] sm:$0xff] }
0x1cee   :  { %v8423_v59 = vpack.c.bf16 %v4500_v20, %v4492_v54 }
0x1cf0   :  { %8390 = vmatpush1.bf16.msra.mxu1 %v8389_v2  ;;  %v4508_v2 = vld [vmem:[#allocation36 + $0x7b8] sm:$0xff] }
0x1cf1   :  { %8392 = vmatprep.subr.bf16.mxu1 %v8391_v6  ;;  %v4516_v6 = vld [vmem:[#allocation36 + $0x7f8] sm:$0xff] }
0x1cf2   :  { %v8427_v8 = vpack.c.bf16 %v4516_v6, %v4508_v2  ;;  %v4333_v2 = vld [vmem:[#allocation36 + $0x240] sm:$0xff] }
0x1cf4   :  { %8394 = vmatpush1.bf16.msra.mxu1 %v8393_v11  ;;  %v8429_v11 = vpack.c.bf16 %v4515_v10, %v4507_v9  ;;  %v4342_v9 = vld [vmem:[#allocation36 + $0x288] sm:$0xff] }
0x1cf5   :  { %8396 = vmatprep.subr.bf16.mxu1 %v8395_v14  ;;  %v4350_v10 = vld [vmem:[#allocation36 + $0x2c8] sm:$0xff] }
0x1cf8   :  { %8398 = vmatpush1.bf16.msra.mxu1 %v8397_v38  ;;  %v4261_v38 = vld [vmem:[#allocation36] sm:$0xff] }
0x1cf9   :  { %8400 = vmatprep.subr.bf16.mxu1 %v8399_v44  ;;  %v4269_v44 = vld [vmem:[#allocation36 + $0x40] sm:$0xff] }
0x1cfa   :  { %v8177_v3 = vpack.c.bf16 %v4269_v44, %v4261_v38  ;;  %v4349_v38 = vld [vmem:[#allocation36 + $0x2c0] sm:$0xff] }
0x1cfc   :  { %8402 = vmatpush1.bf16.msra.mxu1 %v8401_v55  ;;  %v4294_v55 = vld [vmem:[#allocation36 + $0x108] sm:$0xff] }
0x1cfd   :  { %8404 = vmatprep.subr.bf16.mxu1 %v8403_v4  ;;  %v4302_v4 = vld [vmem:[#allocation36 + $0x148] sm:$0xff] }
0x1d00   :  { %8406 = vmatpush1.bf16.msra.mxu1 %v8405_v23  ;;  %v4016_v23 = vld [vmem:[#allocation34 + $0x58] sm:$0xff] }
0x1d01   :  { %8408 = vmatprep.subr.bf16.mxu1 %v8407_v24  ;;  %v8183_v24 = vpack.c.bf16 %v4302_v4, %v4294_v55  ;;  %v8495_v26 = vpack.c.bf16 %v4016_v23, %v4008_v12  ;;  %v4071_v55 = vld [vmem:[#allocation34 + $0x210] sm:$0xff]  ;;  %v4096_v23 = vld [vmem:[#allocation34 + $0x2d8] sm:$0xff] }
0x1d02   :  { %v4079_v4 = vld [vmem:[#allocation34 + $0x250] sm:$0xff] }
0x1d03   :  { %v8513_v21 = vpack.c.bf16 %v4079_v4, %v4071_v55  ;;  %v4438_v55 = vld [vmem:[#allocation36 + $0x588] sm:$0xff] }
0x1d04   :  { %8410 = vmatpush1.bf16.msra.mxu1 %v8409_v27  ;;  %v4318_v27 = vld [vmem:[#allocation36 + $0x1c8] sm:$0xff] }
0x1d05   :  { %8412 = vmatprep.subr.bf16.mxu1 %v8411_v28  ;;  %v8497_v28 = vpack.c.bf16 %v4015_v5, %v4007_v31  ;;  %v8187_v37 = vpack.c.bf16 %v4318_v27, %v4310_v25  ;;  %v4382_v25 = vld [vmem:[#allocation36 + $0x3c8] sm:$0xff]  ;;  %v4373_v5 = vld [vmem:[#allocation36 + $0x380] sm:$0xff]  ;;  %v4087_v27 = vld [vmem:[#allocation34 + $0x290] sm:$0xff] }
0x1d06   :  { %v4446_v4 = vld [vmem:[#allocation36 + $0x5c8] sm:$0xff] }
0x1d08   :  { %8414 = vmatpush1.bf16.msra.mxu1 %v8413_v16  ;;  %v4309_v16 = vld [vmem:[#allocation36 + $0x180] sm:$0xff] }
0x1d09   :  { %8416 = vmatprep.subr.bf16.mxu1 %v8415_v60  ;;  %v4023_v60 = vld [vmem:[#allocation34 + $0x90] sm:$0xff]  ;;  %v8189_v20 = vpack.c.bf16 %v4317_v39, %v4309_v16  ;;  %v4112_v16 = vld [vmem:[#allocation34 + $0x358] sm:$0xff]  ;;  %v8205_v39 = vpack.c.bf16 %v4381_v32, %v4373_v5 }
0x1d0a   :  { %v8501_v41 = vpack.c.bf16 %v4031_v36, %v4023_v60  ;;  %v4390_v60 = vld [vmem:[#allocation36 + $0x408] sm:$0xff]  ;;  %v4176_v5 = vld [vmem:[#allocation34 + $0x558] sm:$0xff] }
0x1d0b   :  { %v4398_v36 = vld [vmem:[#allocation36 + $0x448] sm:$0xff] }
0x1d0c   :  { %8418 = vmatpush1.bf16.msra.mxu1 %v8417_v43  ;;  %v4040_v43 = vld [vmem:[#allocation34 + $0x118] sm:$0xff]  ;;  %v8207_v52 = vpack.c.bf16 %v4398_v36, %v4390_v60  ;;  %v4461_v36 = vld [vmem:[#allocation36 + $0x640] sm:$0xff] }
0x1d0d   :  { %8420 = vmatprep.subr.bf16.mxu1 %v8419_v51  ;;  %v4048_v51 = vld [vmem:[#allocation34 + $0x158] sm:$0xff] }
0x1d0e   :  { %v8503_v54 = vpack.c.bf16 %v4048_v51, %v4040_v43  ;;  %v4103_v43 = vld [vmem:[#allocation34 + $0x310] sm:$0xff] }
0x1d0f   :  { %v4111_v51 = vld [vmem:[#allocation34 + $0x350] sm:$0xff] }
0x1d10   :  { %8422 = vmatpush1.bf16.msra.mxu1 %v8421_v61  ;;  %v4325_v61 = vld [vmem:[#allocation36 + $0x200] sm:$0xff] }
0x1d11   :  { %8424 = vmatprep.subr.bf16.mxu1 %v8423_v59  ;;  %v4039_v59 = vld [vmem:[#allocation34 + $0x110] sm:$0xff] }
0x1d12   :  { %v8505_v6 = vpack.c.bf16 %v4047_v62, %v4039_v59  ;;  %v4406_v59 = vld [vmem:[#allocation36 + $0x488] sm:$0xff] }
0x1d13   :  { %v4414_v62 = vld [vmem:[#allocation36 + $0x4c8] sm:$0xff] }
0x1d14   :  { %8426 = vmatpush1.bf16.msra.mxu1 %v8425_v7  ;;  %v4056_v7 = vld [vmem:[#allocation34 + $0x198] sm:$0xff] }
0x1d15   :  { %8428 = vmatprep.subr.bf16.mxu1 %v8427_v8  ;;  %v4064_v8 = vld [vmem:[#allocation34 + $0x1d8] sm:$0xff] }
0x1d18   :  { %8430 = vmatpush1.bf16.msra.mxu1 %v8429_v11  ;;  %v8507_v11 = vpack.c.bf16 %v4064_v8, %v4056_v7  ;;  %v4119_v7 = vld [vmem:[#allocation34 + $0x390] sm:$0xff] }
0x1d19   :  { %8496 = vmatprep.subr.bf16.mxu1 %v8495_v26  ;;  %v8515_v26 = vpack.c.bf16 %v4096_v23, %v4088_v22  ;;  %v4127_v8 = vld [vmem:[#allocation34 + $0x3d0] sm:$0xff] }
0x1d1a   :  { %v4151_v22 = vld [vmem:[#allocation34 + $0x490] sm:$0xff] }
0x1d1b   :  { %4795 = vmatmul.mubr.f32.vlgmr.msra.gmra.mrb[60].mxu1 %v10469_v58  ;;  %v4159_v23 = vld [vmem:[#allocation34 + $0x4d0] sm:$0xff] }
0x1d1c   :  { %8498 = vmatpush1.bf16.msra.mxu1 %v8497_v28  ;;  %v4095_v28 = vld [vmem:[#allocation34 + $0x2d0] sm:$0xff] }
0x1d1d   :  { %8500 = vmatprep.subr.bf16.mxu1 %v8499_v33  ;;  %v8517_v33 = vpack.c.bf16 %v4095_v28, %v4087_v27  ;;  %v4454_v27 = vld [vmem:[#allocation36 + $0x608] sm:$0xff] }
0x1d1e   :  { %v4462_v28 = vld [vmem:[#allocation36 + $0x648] sm:$0xff] }
0x1d1f   :  { %v8223_v60 = vpack.c.bf16 %v4462_v28, %v4454_v27  ;;  %v4297_v28 = vld [vmem:[#allocation36 + $0x120] sm:$0xff] }
0x1d20   :  { %8502 = vmatpush1.bf16.msra.mxu1 %v8501_v41  ;;  %v4389_v41 = vld [vmem:[#allocation36 + $0x400] sm:$0xff] }
0x1d21   :  { %8504 = vmatprep.subr.bf16.mxu1 %v8503_v54  ;;  %v8521_v54 = vpack.c.bf16 %v4111_v51, %v4103_v43  ;;  %v4470_v43 = vld [vmem:[#allocation36 + $0x688] sm:$0xff] }
0x1d22   :  { %v4478_v51 = vld [vmem:[#allocation36 + $0x6c8] sm:$0xff] }
0x1d24   :  { %8506 = vmatpush1.bf16.msra.mxu1 %v8505_v6  ;;  %v4405_v6 = vld [vmem:[#allocation36 + $0x480] sm:$0xff] }
0x1d25   :  { %8508 = vmatprep.subr.bf16.mxu1 %v8507_v11  ;;  %v8525_v11 = vpack.c.bf16 %v4127_v8, %v4119_v7  ;;  %v4486_v7 = vld [vmem:[#allocation36 + $0x708] sm:$0xff] }
0x1d26   :  { %v4494_v8 = vld [vmem:[#allocation36 + $0x748] sm:$0xff] }
0x1d6e   :  { %v7184_v14 = vpop.f32.mrb[56].mxu1 }
0x1d6f   :  { %v7185_v15 = vpop.f32.mrb[57].mxu1 }
0x1d70   :  { %v7186_v17 = vadd.f32 %v7185_v15, %v7184_v14  ;;  %v8193_v14 = vpack.c.bf16 %v4333_v2, %v4325_v61  ;;  %v4341_v15 = vld [vmem:[#allocation36 + $0x280] sm:$0xff]  ;;  %v4128_v61 = vld [vmem:[#allocation34 + $0x3d8] sm:$0xff]  ;;  %v8209_v2 = vpack.c.bf16 %v4397_v53, %v4389_v41 }
0x1d71   :  { %v8197_v48 = vpack.c.bf16 %v4349_v38, %v4341_v15  ;;  %v4144_v15 = vld [vmem:[#allocation34 + $0x458] sm:$0xff] }
0x1d72   :  { %v3890_v18 = vmul.f32 0.0078125, %v7186_v17  ;;  %v4055_v17 = vld [vmem:[#allocation34 + $0x190] sm:$0xff]  ;;  %v4192_v41 = vld [vmem:[#allocation34 + $0x5d8] sm:$0xff] }
0x1d74   :  { %v3891_v40 = vadd.f32 1e-05, %v3890_v18  ;;  %v4063_v18 = vld [vmem:[#allocation34 + $0x1d0] sm:$0xff] }
0x1d75   :  { %v8509_v44 = vpack.c.bf16 %v4063_v18, %v4055_v17  ;;  %v4422_v17 = vld [vmem:[#allocation36 + $0x508] sm:$0xff] }
0x1d76   :  { %9056 = vrsqrt.f32 %v3891_v40  ;;  %v8195_v40 = vpack.c.bf16 %v4350_v10, %v4342_v9  ;;  %v8211_v9 = vpack.c.bf16 %v4414_v62, %v4406_v59  ;;  %v4413_v10 = vld [vmem:[#allocation36 + $0x4c0] sm:$0xff]  ;;  %v4430_v18 = vld [vmem:[#allocation36 + $0x548] sm:$0xff]  ;;  %v8227_v59 = vpack.c.bf16 %v4478_v51, %v4470_v43 }
0x1d77   :  { %8510 = vmatpush1.bf16.msra.mxu1 %v8509_v44  ;;  %v8213_v38 = vpack.c.bf16 %v4413_v10, %v4405_v6  ;;  %v4421_v44 = vld [vmem:[#allocation36 + $0x500] sm:$0xff]  ;;  %v4208_v6 = vld [vmem:[#allocation34 + $0x658] sm:$0xff] }
0x1d78   :  { %8512 = vmatprep.subr.bf16.mxu1 %v8511_v0  ;;  %v8529_v0 = vpack.c.bf16 %v4143_v56, %v4135_v46  ;;  %v4477_v62 = vld [vmem:[#allocation36 + $0x6c0] sm:$0xff] }
0x1d79   :  { %v4337_v51 = vld [vmem:[#allocation36 + $0x260] sm:$0xff] }
0x1d7b   :  { %8514 = vmatpush1.bf16.msra.mxu1 %v8513_v21  ;;  %v4437_v21 = vld [vmem:[#allocation36 + $0x580] sm:$0xff] }
0x1d7c   :  { %8516 = vmatprep.subr.bf16.mxu1 %v8515_v26  ;;  %v8533_v26 = vpack.c.bf16 %v4159_v23, %v4151_v22 }
0x1d7f   :  { %8518 = vmatpush1.bf16.msra.mxu1 %v8517_v33  ;;  %v4453_v33 = vld [vmem:[#allocation36 + $0x600] sm:$0xff] }
0x1d80   :  { %v9057_v29 = vpop.eup %9056  ;;  %v8225_v53 = vpack.c.bf16 %v4461_v36, %v4453_v33  ;;  %v4322_v33 = vld [vmem:[#allocation36 + $0x1e8] sm:$0xff]  ;;  %v4321_v36 = vld [vmem:[#allocation36 + $0x1e0] sm:$0xff] }
0x1d81   :  { %6905 = vmatmul.mubr.msk.f32.vlgmr.msra.gmra.mrb[4].mxu0 %vm1188_vm2, %v9057_v29  ;;  %v4357_v29 = vld [vmem:[#allocation36 + $0x300] sm:$0xff] }
0x1d82   :  { %8178 = vmatpush1.bf16.msra.mxu0 %v8177_v3  ;;  %4581 = vmatprep.mubr.f32.mxu0 %v10466_v57  ;;  %v4358_v3 = vld [vmem:[#allocation36 + $0x308] sm:$0xff] }
0x1d83   :  { %8180 = vmatprep.subr.bf16.mxu0 %v8179_v63  ;;  %v4366_v63 = vld [vmem:[#allocation36 + $0x348] sm:$0xff] }
0x1d84   :  { %v8199_v12 = vpack.c.bf16 %v4366_v63, %v4358_v3  ;;  %v8215_v3 = vpack.c.bf16 %v4430_v18, %v4422_v17  ;;  %v4429_v63 = vld [vmem:[#allocation36 + $0x540] sm:$0xff] }
0x1d85   :  { %v4485_v17 = vld [vmem:[#allocation36 + $0x700] sm:$0xff] }
0x1d86   :  { %8182 = vmatpush1.bf16.msra.mxu0 %v8181_v19  ;;  %v4365_v19 = vld [vmem:[#allocation36 + $0x340] sm:$0xff] }
0x1d87   :  { %8184 = vmatprep.subr.bf16.mxu0 %v8183_v24  ;;  %v4374_v24 = vld [vmem:[#allocation36 + $0x388] sm:$0xff]  ;;  %v8201_v31 = vpack.c.bf16 %v4365_v19, %v4357_v29  ;;  %v4160_v29 = vld [vmem:[#allocation34 + $0x4d8] sm:$0xff]  ;;  %v8217_v19 = vpack.c.bf16 %v4429_v63, %v4421_v44  ;;  %v4493_v18 = vld [vmem:[#allocation36 + $0x740] sm:$0xff] }
0x1d88   :  { %v8203_v30 = vpack.c.bf16 %v4382_v25, %v4374_v24  ;;  %v8219_v24 = vpack.c.bf16 %v4446_v4, %v4438_v55  ;;  %v4445_v25 = vld [vmem:[#allocation36 + $0x5c0] sm:$0xff]  ;;  %v4510_v44 = vld [vmem:[#allocation36 + $0x7c8] sm:$0xff]  ;;  %v8233_v46 = vpack.c.bf16 %v4493_v18, %v4485_v17  ;;  %v4215_v17 = vld [vmem:[#allocation34 + $0x690] sm:$0xff] }
0x1d89   :  { %v8221_v32 = vpack.c.bf16 %v4445_v25, %v4437_v21  ;;  %v4509_v63 = vld [vmem:[#allocation36 + $0x7c0] sm:$0xff]  ;;  %v4290_v21 = vld [vmem:[#allocation36 + $0xe8] sm:$0xff]  ;;  %v4223_v18 = vld [vmem:[#allocation34 + $0x6d0] sm:$0xff] }
0x1d8a   :  { %8186 = vmatpush1.bf16.msra.mxu0 %v8185_v35  ;;  %v4104_v35 = vld [vmem:[#allocation34 + $0x318] sm:$0xff]  ;;  %v4265_v4 = vld [vmem:[#allocation36 + $0x20] sm:$0xff] }
0x1d8b   :  { %8188 = vmatprep.subr.bf16.mxu0 %v8187_v37  ;;  %v8519_v37 = vpack.c.bf16 %v4112_v16, %v4104_v35  ;;  %v4167_v35 = vld [vmem:[#allocation34 + $0x510] sm:$0xff]  ;;  %v4289_v25 = vld [vmem:[#allocation36 + $0xe0] sm:$0xff] }
0x1d8c   :  { %v4175_v16 = vld [vmem:[#allocation34 + $0x550] sm:$0xff] }
0x1d8d   :  { %8520 = vmatprep.subr.bf16.mxu1 %v8519_v37  ;;  %v8537_v37 = vpack.c.bf16 %v4175_v16, %v4167_v35 }
0x1d8e   :  { %8190 = vmatpush1.bf16.msra.mxu0 %v8189_v20  ;;  %v4120_v20 = vld [vmem:[#allocation34 + $0x398] sm:$0xff]  ;;  %8522 = vmatpush1.bf16.msra.mxu1 %v8521_v54  ;;  %v4469_v54 = vld [vmem:[#allocation36 + $0x680] sm:$0xff] }
0x1d8f   :  { %8192 = vmatprep.subr.bf16.mxu0 %v8191_v1  ;;  %v8523_v1 = vpack.c.bf16 %v4128_v61, %v4120_v20  ;;  %v4183_v20 = vld [vmem:[#allocation34 + $0x590] sm:$0xff]  ;;  %v8229_v10 = vpack.c.bf16 %v4477_v62, %v4469_v54  ;;  %v4362_v62 = vld [vmem:[#allocation36 + $0x328] sm:$0xff] }
0x1d90   :  { %v4191_v61 = vld [vmem:[#allocation34 + $0x5d0] sm:$0xff] }
0x1d91   :  { %8524 = vmatprep.subr.bf16.mxu1 %v8523_v1  ;;  %v8541_v1 = vpack.c.bf16 %v4191_v61, %v4183_v20  ;;  %v4345_v61 = vld [vmem:[#allocation36 + $0x2a0] sm:$0xff] }
0x1d92   :  { %8194 = vmatpush1.bf16.msra.mxu0 %v8193_v14  ;;  %v4136_v14 = vld [vmem:[#allocation34 + $0x418] sm:$0xff]  ;;  %8526 = vmatpush1.bf16.msra.mxu1 %v8525_v11  ;;  %v4199_v11 = vld [vmem:[#allocation34 + $0x610] sm:$0xff] }
0x1d93   :  { %8196 = vmatprep.subr.bf16.mxu0 %v8195_v40  ;;  %v8527_v40 = vpack.c.bf16 %v4144_v15, %v4136_v14  ;;  %v4207_v14 = vld [vmem:[#allocation34 + $0x650] sm:$0xff]  ;;  %v8231_v15 = vpack.c.bf16 %v4494_v8, %v4486_v7  ;;  %v4216_v7 = vld [vmem:[#allocation34 + $0x698] sm:$0xff] }
0x1d95   :  { %8528 = vmatprep.subr.bf16.mxu1 %v8527_v40  ;;  %v8545_v40 = vpack.c.bf16 %v4207_v14, %v4199_v11  ;;  %v4224_v11 = vld [vmem:[#allocation34 + $0x6d8] sm:$0xff]  ;;  %v4386_v14 = vld [vmem:[#allocation36 + $0x3e8] sm:$0xff] }
0x1d96   :  { %8198 = vmatpush1.bf16.msra.mxu0 %v8197_v48  ;;  %v4152_v48 = vld [vmem:[#allocation34 + $0x498] sm:$0xff]  ;;  %8530 = vmatpush1.bf16.msra.mxu1 %v8529_v0  ;;  %v4266_v0 = vld [vmem:[#allocation36 + $0x28] sm:$0xff] }
0x1d97   :  { %8200 = vmatprep.subr.bf16.mxu0 %v8199_v12  ;;  %v8531_v12 = vpack.c.bf16 %v4160_v29, %v4152_v48  ;;  %v4274_v48 = vld [vmem:[#allocation36 + $0x68] sm:$0xff] }
0x1d98   :  { %v8303_v55 = vpack.c.bf16 %v4274_v48, %v4266_v0  ;;  %v4240_v0 = vld [vmem:[#allocation34 + $0x758] sm:$0xff]  ;;  %v4402_v48 = vld [vmem:[#allocation36 + $0x468] sm:$0xff] }
0x1d99   :  { %8532 = vmatprep.subr.bf16.mxu1 %v8531_v12  ;;  %v4273_v12 = vld [vmem:[#allocation36 + $0x60] sm:$0xff] }
0x1d9a   :  { %8202 = vmatpush1.bf16.msra.mxu0 %v8201_v31  ;;  %v4168_v31 = vld [vmem:[#allocation34 + $0x518] sm:$0xff]  ;;  %8534 = vmatpush1.bf16.msra.mxu1 %v8533_v26  ;;  %v8305_v22 = vpack.c.bf16 %v4273_v12, %v4265_v4  ;;  %v4298_v26 = vld [vmem:[#allocation36 + $0x128] sm:$0xff]  ;;  %v4239_v4 = vld [vmem:[#allocation34 + $0x750] sm:$0xff] }
0x1d9b   :  { %8204 = vmatprep.subr.bf16.mxu0 %v8203_v30  ;;  %v8535_v30 = vpack.c.bf16 %v4176_v5, %v4168_v31  ;;  %v4306_v31 = vld [vmem:[#allocation36 + $0x168] sm:$0xff] }
0x1d9c   :  { %v8311_v27 = vpack.c.bf16 %v4306_v31, %v4298_v26  ;;  %v4256_v26 = vld [vmem:[#allocation34 + $0x7d8] sm:$0xff]  ;;  %v4418_v31 = vld [vmem:[#allocation36 + $0x4e8] sm:$0xff] }
0x1d9d   :  { %8536 = vmatprep.subr.bf16.mxu1 %v8535_v30  ;;  %v4305_v30 = vld [vmem:[#allocation36 + $0x160] sm:$0xff] }
0x1d9e   :  { %8206 = vmatpush1.bf16.msra.mxu0 %v8205_v39  ;;  %v4184_v39 = vld [vmem:[#allocation34 + $0x598] sm:$0xff]  ;;  %8538 = vmatpush1.bf16.msra.mxu1 %v8537_v37  ;;  %v8313_v35 = vpack.c.bf16 %v4305_v30, %v4297_v28  ;;  %v4330_v37 = vld [vmem:[#allocation36 + $0x228] sm:$0xff]  ;;  %v4255_v28 = vld [vmem:[#allocation34 + $0x7d0] sm:$0xff] }
0x1d9f   :  { %8208 = vmatprep.subr.bf16.mxu0 %v8207_v52  ;;  %v8539_v52 = vpack.c.bf16 %v4192_v41, %v4184_v39  ;;  %v4338_v39 = vld [vmem:[#allocation36 + $0x268] sm:$0xff] }
0x1da0   :  { %v8319_v43 = vpack.c.bf16 %v4338_v39, %v4330_v37  ;;  %v4426_v37 = vld [vmem:[#allocation36 + $0x528] sm:$0xff] }
0x1da1   :  { %8540 = vmatprep.subr.bf16.mxu1 %v8539_v52  ;;  %v4346_v52 = vld [vmem:[#allocation36 + $0x2a8] sm:$0xff] }
0x1da2   :  { %8210 = vmatpush1.bf16.msra.mxu0 %v8209_v2  ;;  %v4200_v2 = vld [vmem:[#allocation34 + $0x618] sm:$0xff]  ;;  %8542 = vmatpush1.bf16.msra.mxu1 %v8541_v1  ;;  %v4370_v1 = vld [vmem:[#allocation36 + $0x368] sm:$0xff] }
0x1da3   :  { %8212 = vmatprep.subr.bf16.mxu0 %v8211_v9  ;;  %v8543_v9 = vpack.c.bf16 %v4208_v6, %v4200_v2  ;;  %v4361_v6 = vld [vmem:[#allocation36 + $0x320] sm:$0xff]  ;;  %v8327_v8 = vpack.c.bf16 %v4370_v1, %v4362_v62  ;;  %v4434_v39 = vld [vmem:[#allocation36 + $0x568] sm:$0xff] }
0x1da4   :  { %v4449_v62 = vld [vmem:[#allocation36 + $0x5e0] sm:$0xff]  ;;  %v4458_v1 = vld [vmem:[#allocation36 + $0x628] sm:$0xff] }
0x1da5   :  { %8544 = vmatprep.subr.bf16.mxu1 %v8543_v9  ;;  %v4369_v9 = vld [vmem:[#allocation36 + $0x360] sm:$0xff] }
0x1da6   :  { %8214 = vmatpush1.bf16.msra.mxu0 %v8213_v38  ;;  %v4502_v38 = vld [vmem:[#allocation36 + $0x788] sm:$0xff]  ;;  %8546 = vmatpush1.bf16.msra.mxu1 %v8545_v40  ;;  %v8549_v40 = vpack.c.bf16 %v4223_v18, %v4215_v17  ;;  %v4473_v17 = vld [vmem:[#allocation36 + $0x6a0] sm:$0xff] }
0x1da7   :  { %8216 = vmatprep.subr.bf16.mxu0 %v8215_v3  ;;  %v8235_v56 = vpack.c.bf16 %v4510_v44, %v4502_v38  ;;  %v4501_v3 = vld [vmem:[#allocation36 + $0x780] sm:$0xff]  ;;  %v8329_v38 = vpack.c.bf16 %v4369_v9, %v4361_v6 }
0x1da8   :  { %v8237_v29 = vpack.c.bf16 %v4509_v63, %v4501_v3  ;;  %v4377_v44 = vld [vmem:[#allocation36 + $0x3a0] sm:$0xff]  ;;  %v4394_v63 = vld [vmem:[#allocation36 + $0x428] sm:$0xff] }
0x1da9   :  { %v4385_v3 = vld [vmem:[#allocation36 + $0x3e0] sm:$0xff] }
0x1daa   :  { %8218 = vmatpush1.bf16.msra.mxu0 %v8217_v19  ;;  %v4282_v19 = vld [vmem:[#allocation36 + $0xa8] sm:$0xff]  ;;  %v4465_v9 = vld [vmem:[#allocation36 + $0x660] sm:$0xff] }
0x1dab   :  { %8220 = vmatprep.subr.bf16.mxu0 %v8219_v24  ;;  %v8307_v23 = vpack.c.bf16 %v4290_v21, %v4282_v19  ;;  %v4281_v24 = vld [vmem:[#allocation36 + $0xa0] sm:$0xff]  ;;  %v8333_v19 = vpack.c.bf16 %v4385_v3, %v4377_v44 }
0x1dac   :  { %v8309_v5 = vpack.c.bf16 %v4289_v25, %v4281_v24  ;;  %v4393_v21 = vld [vmem:[#allocation36 + $0x420] sm:$0xff]  ;;  %v4410_v25 = vld [vmem:[#allocation36 + $0x4a8] sm:$0xff] }
0x1dad   :  { %v4401_v24 = vld [vmem:[#allocation36 + $0x460] sm:$0xff] }
0x1dae   :  { %8222 = vmatpush1.bf16.msra.mxu0 %v8221_v32  ;;  %v4314_v32 = vld [vmem:[#allocation36 + $0x1a8] sm:$0xff]  ;;  %v4481_v18 = vld [vmem:[#allocation36 + $0x6e0] sm:$0xff] }
0x1daf   :  { %8224 = vmatprep.subr.bf16.mxu0 %v8223_v60  ;;  %v8315_v16 = vpack.c.bf16 %v4322_v33, %v4314_v32  ;;  %v4313_v60 = vld [vmem:[#allocation36 + $0x1a0] sm:$0xff]  ;;  %v8337_v32 = vpack.c.bf16 %v4401_v24, %v4393_v21  ;;  %v4012_v33 = vld [vmem:[#allocation34 + $0x38] sm:$0xff]  ;;  %v8357_v44 = vpack.c.bf16 %v4481_v18, %v4473_v17  ;;  %v4126_v17 = vld [vmem:[#allocation34 + $0x3c8] sm:$0xff] }
0x1db0   :  { %v8317_v41 = vpack.c.bf16 %v4321_v36, %v4313_v60  ;;  %v4417_v60 = vld [vmem:[#allocation36 + $0x4e0] sm:$0xff]  ;;  %v4020_v36 = vld [vmem:[#allocation34 + $0x78] sm:$0xff] }
0x1db1   :  { %v4497_v3 = vld [vmem:[#allocation36 + $0x760] sm:$0xff] }
0x1db2   :  { %8226 = vmatpush1.bf16.msra.mxu0 %v8225_v53  ;;  %v4354_v53 = vld [vmem:[#allocation36 + $0x2e8] sm:$0xff]  ;;  %v4013_v24 = vld [vmem:[#allocation34 + $0x40] sm:$0xff] }
0x1db3   :  { %8228 = vmatprep.subr.bf16.mxu0 %v8227_v59  ;;  %v8323_v20 = vpack.c.bf16 %v4354_v53, %v4346_v52  ;;  %v4353_v59 = vld [vmem:[#allocation36 + $0x2e0] sm:$0xff]  ;;  %v4442_v53 = vld [vmem:[#allocation36 + $0x5a8] sm:$0xff] }
0x1db4   :  { %v8325_v2 = vpack.c.bf16 %v4353_v59, %v4345_v61  ;;  %v4433_v52 = vld [vmem:[#allocation36 + $0x560] sm:$0xff] }
0x1db5   :  { %v4441_v59 = vld [vmem:[#allocation36 + $0x5a0] sm:$0xff] }
0x1db6   :  { %8230 = vmatpush1.bf16.msra.mxu0 %v8229_v10  ;;  %v4378_v10 = vld [vmem:[#allocation36 + $0x3a8] sm:$0xff]  ;;  %v8349_v6 = vpack.c.bf16 %v4449_v62, %v4441_v59 }
0x1db7   :  { %8232 = vmatprep.subr.bf16.mxu0 %v8231_v15  ;;  %v8547_v15 = vpack.c.bf16 %v4224_v11, %v4216_v7  ;;  %v4482_v11 = vld [vmem:[#allocation36 + $0x6e8] sm:$0xff] }
0x1db8   :  { %v4094_v59 = vld [vmem:[#allocation34 + $0x2c8] sm:$0xff] }
0x1db9   :  { %8548 = vmatprep.subr.bf16.mxu1 %v8547_v15 }
0x1dba   :  { %8234 = vmatpush1.bf16.msra.mxu0 %v8233_v46  ;;  %v4232_v46 = vld [vmem:[#allocation34 + $0x718] sm:$0xff]  ;;  %8550 = vmatpush1.bf16.msra.mxu1 %v8549_v40  ;;  %v4490_v40 = vld [vmem:[#allocation36 + $0x728] sm:$0xff] }
0x1dbb   :  { %8236 = vmatprep.subr.bf16.mxu0 %v8235_v56  ;;  %v8331_v56 = vpack.c.bf16 %v4386_v14, %v4378_v10  ;;  %v4474_v10 = vld [vmem:[#allocation36 + $0x6a8] sm:$0xff] }
0x1dbc   :  { %v8355_v15 = vpack.c.bf16 %v4482_v11, %v4474_v10  ;;  %v4101_v11 = vld [vmem:[#allocation34 + $0x300] sm:$0xff] }
0x1dbe   :  { %8238 = vmatpush1.bf16.msra.mxu0 %v8237_v29  ;;  %v8551_v29 = vpack.c.bf16 %v4240_v0, %v4232_v46  ;;  %v4514_v0 = vld [vmem:[#allocation36 + $0x7e8] sm:$0xff] }
0x1dbf   :  { %8304 = vmatprep.subr.bf16.mxu0 %v8303_v55  ;;  %v4231_v55 = vld [vmem:[#allocation34 + $0x710] sm:$0xff] }
0x1dc0   :  { %v8553_v12 = vpack.c.bf16 %v4239_v4, %v4231_v55  ;;  %8552 = vmatprep.subr.bf16.mxu1 %v8551_v29  ;;  %v4505_v55 = vld [vmem:[#allocation36 + $0x7a0] sm:$0xff] }
0x1dc1   :  { %4582 = vmatmul.mubr.f32.vlgmr.msra.gmra.mrb[6].mxu0 %v10469_v58  ;;  %v4513_v4 = vld [vmem:[#allocation36 + $0x7e0] sm:$0xff] }
0x1dc2   :  { %8306 = vmatpush1.bf16.msra.mxu0 %v8305_v22  ;;  %4723 = vmatprep.mubr.f32.mxu0 %v10466_v57  ;;  %v4329_v57 = vld [vmem:[#allocation36 + $0x220] sm:$0xff]  ;;  %v4248_v22 = vld [vmem:[#allocation34 + $0x798] sm:$0xff]  ;;  %v8365_v21 = vpack.c.bf16 %v4513_v4, %v4505_v55  ;;  %v4158_v55 = vld [vmem:[#allocation34 + $0x4c8] sm:$0xff] }
0x1dc3   :  { %8308 = vmatprep.subr.bf16.mxu0 %v8307_v23  ;;  %v8321_v54 = vpack.c.bf16 %v4337_v51, %v4329_v57  ;;  %v8335_v23 = vpack.c.bf16 %v4402_v48, %v4394_v63  ;;  %8554 = vmatpush1.bf16.msra.mxu1 %v8553_v12  ;;  %v8343_v57 = vpack.c.bf16 %v4434_v39, %v4426_v37  ;;  %v4425_v51 = vld [vmem:[#allocation36 + $0x520] sm:$0xff]  ;;  %v4506_v63 = vld [vmem:[#allocation36 + $0x7a8] sm:$0xff] }
0x1dc4   :  { %v8363_v29 = vpack.c.bf16 %v4514_v0, %v4506_v63  ;;  %v4006_v12 = vld [vmem:[#allocation34 + $0x8] sm:$0xff]  ;;  %v4133_v0 = vld [vmem:[#allocation34 + $0x400] sm:$0xff] }
0x1dc5   :  { %v4062_v37 = vld [vmem:[#allocation34 + $0x1c8] sm:$0xff] }
0x1dc6   :  { %8310 = vmatpush1.bf16.msra.mxu0 %v8309_v5  ;;  %v8555_v5 = vpack.c.bf16 %v4256_v26, %v4248_v22  ;;  %v4030_v26 = vld [vmem:[#allocation34 + $0xc8] sm:$0xff] }
0x1dc7   :  { %8312 = vmatprep.subr.bf16.mxu0 %v8311_v27  ;;  %v4247_v27 = vld [vmem:[#allocation34 + $0x790] sm:$0xff] }
0x1dc8   :  { %v8557_v30 = vpack.c.bf16 %v4255_v28, %v4247_v27  ;;  %8556 = vmatprep.subr.bf16.mxu1 %v8555_v5  ;;  %v4021_v27 = vld [vmem:[#allocation34 + $0x80] sm:$0xff] }
0x1dc9   :  { %v4029_v28 = vld [vmem:[#allocation34 + $0xc0] sm:$0xff] }
0x1dca   :  { %8314 = vmatpush1.bf16.msra.mxu0 %v8313_v35  ;;  %v8339_v35 = vpack.c.bf16 %v4418_v31, %v4410_v25  ;;  %8558 = vmatpush1.bf16.msra.mxu1 %v8557_v30  ;;  %v4022_v25 = vld [vmem:[#allocation34 + $0x88] sm:$0xff] }
0x1dcb   :  { %8316 = vmatprep.subr.bf16.mxu0 %v8315_v16  ;;  %v4409_v16 = vld [vmem:[#allocation36 + $0x4a0] sm:$0xff]  ;;  %v8435_v5 = vpack.c.bf16 %v4030_v26, %v4022_v25  ;;  %v4038_v30 = vld [vmem:[#allocation34 + $0x108] sm:$0xff] }
0x1dcc   :  { %v4165_v26 = vld [vmem:[#allocation34 + $0x500] sm:$0xff] }
0x1dce   :  { %8318 = vmatpush1.bf16.msra.mxu0 %v8317_v41  ;;  %v8623_v41 = vpack.c.bf16 %v4020_v36, %v4012_v33  ;;  %v8437_v33 = vpack.c.bf16 %v4029_v28, %v4021_v27  ;;  %v4054_v36 = vld [vmem:[#allocation34 + $0x188] sm:$0xff] }
0x1dcf   :  { %8320 = vmatprep.subr.bf16.mxu0 %v8319_v43  ;;  %v8341_v43 = vpack.c.bf16 %v4417_v60, %v4409_v16  ;;  %v4037_v16 = vld [vmem:[#allocation34 + $0x100] sm:$0xff]  ;;  %v4190_v27 = vld [vmem:[#allocation34 + $0x5c8] sm:$0xff] }
0x1dd0   :  { %8624 = vmatprep.subr.bf16.mxu1 %v8623_v41  ;;  %v4045_v60 = vld [vmem:[#allocation34 + $0x140] sm:$0xff]  ;;  %v8443_v41 = vpack.c.bf16 %v4062_v37, %v4054_v36 }
0x1dd1   :  { %v8441_v39 = vpack.c.bf16 %v4045_v60, %v4037_v16  ;;  %v4206_v16 = vld [vmem:[#allocation34 + $0x648] sm:$0xff]  ;;  %v4197_v37 = vld [vmem:[#allocation34 + $0x600] sm:$0xff] }
0x1dd2   :  { %8322 = vmatpush1.bf16.msra.mxu0 %v8321_v54  ;;  %v4450_v54 = vld [vmem:[#allocation36 + $0x5e8] sm:$0xff] }
0x1dd3   :  { %8324 = vmatprep.subr.bf16.mxu0 %v8323_v20  ;;  %v8345_v20 = vpack.c.bf16 %v4433_v52, %v4425_v51  ;;  %v8347_v61 = vpack.c.bf16 %v4450_v54, %v4442_v53  ;;  %v4070_v51 = vld [vmem:[#allocation34 + $0x208] sm:$0xff]  ;;  %v4069_v54 = vld [vmem:[#allocation34 + $0x200] sm:$0xff] }
0x1dd4   :  { %v4078_v52 = vld [vmem:[#allocation34 + $0x248] sm:$0xff] }
0x1dd6   :  { %8326 = vmatpush1.bf16.msra.mxu0 %v8325_v2  ;;  %v4466_v2 = vld [vmem:[#allocation36 + $0x668] sm:$0xff] }
0x1dd7   :  { %8328 = vmatprep.subr.bf16.mxu0 %v8327_v8  ;;  %v8351_v7 = vpack.c.bf16 %v4466_v2, %v4458_v1  ;;  %v4457_v8 = vld [vmem:[#allocation36 + $0x620] sm:$0xff] }
0x1dd8   :  { %v8353_v14 = vpack.c.bf16 %v4465_v9, %v4457_v8  ;;  %v4085_v2 = vld [vmem:[#allocation34 + $0x280] sm:$0xff]  ;;  %v4110_v8 = vld [vmem:[#allocation34 + $0x348] sm:$0xff] }
0x1dda   :  { %8330 = vmatpush1.bf16.msra.mxu0 %v8329_v38  ;;  %v4498_v38 = vld [vmem:[#allocation36 + $0x768] sm:$0xff] }
0x1ddb   :  { %8332 = vmatprep.subr.bf16.mxu0 %v8331_v56  ;;  %v8359_v46 = vpack.c.bf16 %v4498_v38, %v4490_v40  ;;  %v4489_v56 = vld [vmem:[#allocation36 + $0x720] sm:$0xff] }
0x1ddc   :  { %v8361_v48 = vpack.c.bf16 %v4497_v3, %v4489_v56  ;;  %v4117_v38 = vld [vmem:[#allocation34 + $0x380] sm:$0xff]  ;;  %v4142_v56 = vld [vmem:[#allocation34 + $0x448] sm:$0xff] }
0x1dde   :  { %8334 = vmatpush1.bf16.msra.mxu0 %v8333_v19  ;;  %v4014_v19 = vld [vmem:[#allocation34 + $0x48] sm:$0xff] }
0x1ddf   :  { %8336 = vmatprep.subr.bf16.mxu0 %v8335_v23  ;;  %v8431_v22 = vpack.c.bf16 %v4014_v19, %v4006_v12  ;;  %v4005_v23 = vld [vmem:[#allocation34] sm:$0xff] }
0x1de0   :  { %v8433_v31 = vpack.c.bf16 %v4013_v24, %v4005_v23  ;;  %v4149_v19 = vld [vmem:[#allocation34 + $0x480] sm:$0xff]  ;;  %v4174_v23 = vld [vmem:[#allocation34 + $0x548] sm:$0xff] }
0x1de2   :  { %8338 = vmatpush1.bf16.msra.mxu0 %v8337_v32  ;;  %v4046_v32 = vld [vmem:[#allocation34 + $0x148] sm:$0xff] }
0x1de3   :  { %8340 = vmatprep.subr.bf16.mxu0 %v8339_v35  ;;  %v8439_v35 = vpack.c.bf16 %v4046_v32, %v4038_v30  ;;  %v4181_v32 = vld [vmem:[#allocation34 + $0x580] sm:$0xff] }
0x1de6   :  { %8342 = vmatpush1.bf16.msra.mxu0 %v8341_v43  ;;  %v4053_v43 = vld [vmem:[#allocation34 + $0x180] sm:$0xff] }
0x1de7   :  { %8344 = vmatprep.subr.bf16.mxu0 %v8343_v57  ;;  %v4061_v57 = vld [vmem:[#allocation34 + $0x1c0] sm:$0xff] }
0x1de8   :  { %v8445_v53 = vpack.c.bf16 %v4061_v57, %v4053_v43  ;;  %v4222_v43 = vld [vmem:[#allocation34 + $0x6c8] sm:$0xff] }
0x1dea   :  { %8346 = vmatpush1.bf16.msra.mxu0 %v8345_v20  ;;  %v4077_v20 = vld [vmem:[#allocation34 + $0x240] sm:$0xff] }
0x1deb   :  { %8348 = vmatprep.subr.bf16.mxu0 %v8347_v61  ;;  %v4086_v61 = vld [vmem:[#allocation34 + $0x288] sm:$0xff]  ;;  %v8449_v62 = vpack.c.bf16 %v4077_v20, %v4069_v54 }
0x1dec   :  { %v8451_v1 = vpack.c.bf16 %v4094_v59, %v4086_v61  ;;  %v4238_v54 = vld [vmem:[#allocation34 + $0x748] sm:$0xff]  ;;  %v4229_v59 = vld [vmem:[#allocation34 + $0x700] sm:$0xff] }
0x1dee   :  { %8350 = vmatpush1.bf16.msra.mxu0 %v8349_v6  ;;  %v4093_v6 = vld [vmem:[#allocation34 + $0x2c0] sm:$0xff] }
0x1def   :  { %8352 = vmatprep.subr.bf16.mxu0 %v8351_v7  ;;  %v4102_v7 = vld [vmem:[#allocation34 + $0x308] sm:$0xff]  ;;  %v8453_v9 = vpack.c.bf16 %v4093_v6, %v4085_v2 }
0x1df0   :  { %v8455_v10 = vpack.c.bf16 %v4110_v8, %v4102_v7  ;;  %v4254_v2 = vld [vmem:[#allocation34 + $0x7c8] sm:$0xff]  ;;  %v4245_v8 = vld [vmem:[#allocation34 + $0x780] sm:$0xff] }
0x1df2   :  { %8354 = vmatpush1.bf16.msra.mxu0 %v8353_v14  ;;  %v4109_v14 = vld [vmem:[#allocation34 + $0x340] sm:$0xff] }
0x1df3   :  { %8356 = vmatprep.subr.bf16.mxu0 %v8355_v15  ;;  %v4118_v15 = vld [vmem:[#allocation34 + $0x388] sm:$0xff]  ;;  %v8457_v18 = vpack.c.bf16 %v4109_v14, %v4101_v11 }
0x1df4   :  { %v8459_v40 = vpack.c.bf16 %v4126_v17, %v4118_v15  ;;  %v4018_v11 = vld [vmem:[#allocation34 + $0x68] sm:$0xff] }
0x1df5   :  { %v3594_v17 = vld [vmem:[%s11596_s3] sm:$0x3] }
0x1df6   :  { %8358 = vmatpush1.bf16.msra.mxu0 %v8357_v44  ;;  %v4125_v44 = vld [vmem:[#allocation34 + $0x3c0] sm:$0xff] }
0x1df7   :  { %8360 = vmatprep.subr.bf16.mxu0 %v8359_v46  ;;  %v4134_v46 = vld [vmem:[#allocation34 + $0x408] sm:$0xff]  ;;  %v8461_v3 = vpack.c.bf16 %v4125_v44, %v4117_v38  ;;  %v3981_v44 = vrot.slane %v3594_v17, %v10384_v49 }
0x1df8   :  { %v8463_v63 = vpack.c.bf16 %v4142_v56, %v4134_v46 }
0x1dfa   :  { %8362 = vmatpush1.bf16.msra.mxu0 %v8361_v48  ;;  %v4141_v48 = vld [vmem:[#allocation34 + $0x440] sm:$0xff] }
0x1dfb   :  { %8364 = vmatprep.subr.bf16.mxu0 %v8363_v29  ;;  %v4150_v29 = vld [vmem:[#allocation34 + $0x488] sm:$0xff]  ;;  %v8465_v4 = vpack.c.bf16 %v4141_v48, %v4133_v0 }
0x1dfc   :  { %v8467_v12 = vpack.c.bf16 %v4158_v55, %v4150_v29 }
0x1dfe   :  { %8366 = vmatpush1.bf16.msra.mxu0 %v8365_v21  ;;  %v4157_v21 = vld [vmem:[#allocation34 + $0x4c0] sm:$0xff] }
0x1dff   :  { %8432 = vmatprep.subr.bf16.mxu0 %v8431_v22  ;;  %v4166_v22 = vld [vmem:[#allocation34 + $0x508] sm:$0xff]  ;;  %v8469_v24 = vpack.c.bf16 %v4157_v21, %v4149_v19  ;;  %v4017_v21 = vld [vmem:[#allocation34 + $0x60] sm:$0xff] }
0x1e00   :  { %v8471_v25 = vpack.c.bf16 %v4174_v23, %v4166_v22  ;;  %v4011_v22 = vld [vmem:[#allocation34 + $0x30] sm:$0xff] }
0x1e01   :  { %4724 = vmatmul.mubr.f32.vlgmr.msra.gmra.mrb[8].mxu0 %v10469_v58  ;;  %v8447_v58 = vpack.c.bf16 %v4078_v52, %v4070_v51  ;;  %v4213_v52 = vld [vmem:[#allocation34 + $0x680] sm:$0xff]  ;;  %v4019_v23 = vld [vmem:[#allocation34 + $0x70] sm:$0xff] }
0x1e02   :  { %8434 = vmatpush1.bf16.msra.mxu0 %v8433_v31  ;;  %v4173_v31 = vld [vmem:[#allocation34 + $0x540] sm:$0xff] }
0x1e03   :  { %8436 = vmatprep.subr.bf16.mxu0 %v8435_v5  ;;  %v4182_v5 = vld [vmem:[#allocation34 + $0x588] sm:$0xff]  ;;  %v8473_v28 = vpack.c.bf16 %v4173_v31, %v4165_v26  ;;  %v4028_v31 = vld [vmem:[#allocation34 + $0xb8] sm:$0xff] }
0x1e04   :  { %v8475_v30 = vpack.c.bf16 %v4190_v27, %v4182_v5  ;;  %v4034_v26 = vld [vmem:[#allocation34 + $0xe8] sm:$0xff]  ;;  %v4036_v5 = vld [vmem:[#allocation34 + $0xf8] sm:$0xff] }
0x1e06   :  { %8438 = vmatpush1.bf16.msra.mxu0 %v8437_v33  ;;  %v4189_v33 = vld [vmem:[#allocation34 + $0x5c0] sm:$0xff] }
0x1e07   :  { %8440 = vmatprep.subr.bf16.mxu0 %v8439_v35  ;;  %v4198_v35 = vld [vmem:[#allocation34 + $0x608] sm:$0xff]  ;;  %v8477_v60 = vpack.c.bf16 %v4189_v33, %v4181_v32  ;;  %v4033_v32 = vld [vmem:[#allocation34 + $0xe0] sm:$0xff]  ;;  %v4027_v33 = vld [vmem:[#allocation34 + $0xb0] sm:$0xff] }
0x1e08   :  { %v8479_v36 = vpack.c.bf16 %v4206_v16, %v4198_v35  ;;  %v4035_v35 = vld [vmem:[#allocation34 + $0xf0] sm:$0xff]  ;;  %v4042_v16 = vld [vmem:[#allocation34 + $0x128] sm:$0xff] }
0x1e0a   :  { %8442 = vmatpush1.bf16.msra.mxu0 %v8441_v39  ;;  %v4205_v39 = vld [vmem:[#allocation34 + $0x640] sm:$0xff] }
0x1e0b   :  { %8444 = vmatprep.subr.bf16.mxu0 %v8443_v41  ;;  %v4214_v41 = vld [vmem:[#allocation34 + $0x688] sm:$0xff]  ;;  %v8481_v57 = vpack.c.bf16 %v4205_v39, %v4197_v37  ;;  %v4044_v39 = vld [vmem:[#allocation34 + $0x138] sm:$0xff] }
0x1e0c   :  { %v8483_v51 = vpack.c.bf16 %v4222_v43, %v4214_v41  ;;  %v4050_v37 = vld [vmem:[#allocation34 + $0x168] sm:$0xff]  ;;  %v4052_v41 = vld [vmem:[#allocation34 + $0x178] sm:$0xff] }
0x1e0e   :  { %8446 = vmatpush1.bf16.msra.mxu0 %v8445_v53  ;;  %v4221_v53 = vld [vmem:[#allocation34 + $0x6c0] sm:$0xff] }
0x1e0f   :  { %8448 = vmatprep.subr.bf16.mxu0 %v8447_v58  ;;  %v4230_v58 = vld [vmem:[#allocation34 + $0x708] sm:$0xff]  ;;  %v8485_v20 = vpack.c.bf16 %v4221_v53, %v4213_v52  ;;  %v4049_v52 = vld [vmem:[#allocation34 + $0x160] sm:$0xff]  ;;  %v8567_v53 = vpack.c.bf16 %v4050_v37, %v4042_v16  ;;  %v4115_v37 = vld [vmem:[#allocation34 + $0x370] sm:$0xff] }
0x1e10   :  { %v8487_v61 = vpack.c.bf16 %v4238_v54, %v4230_v58  ;;  %v8631_v58 = vpack.c.bf16 %v4052_v41, %v4044_v39  ;;  %v4043_v54 = vld [vmem:[#allocation34 + $0x130] sm:$0xff]  ;;  %v4122_v39 = vld [vmem:[#allocation34 + $0x3a8] sm:$0xff] }
0x1e11   :  { %v4130_v41 = vld [vmem:[#allocation34 + $0x3e8] sm:$0xff] }
0x1e12   :  { %8450 = vmatpush1.bf16.msra.mxu0 %v8449_v62  ;;  %v4237_v62 = vld [vmem:[#allocation34 + $0x740] sm:$0xff] }
0x1e13   :  { %8452 = vmatprep.subr.bf16.mxu0 %v8451_v1  ;;  %v4246_v1 = vld [vmem:[#allocation34 + $0x788] sm:$0xff]  ;;  %v8489_v6 = vpack.c.bf16 %v4237_v62, %v4229_v59  ;;  %v4060_v62 = vld [vmem:[#allocation34 + $0x1b8] sm:$0xff] }
0x1e14   :  { %v8491_v7 = vpack.c.bf16 %v4254_v2, %v4246_v1  ;;  %v4066_v59 = vld [vmem:[#allocation34 + $0x1e8] sm:$0xff]  ;;  %v4068_v1 = vld [vmem:[#allocation34 + $0x1f8] sm:$0xff] }
0x1e16   :  { %8454 = vmatpush1.bf16.msra.mxu0 %v8453_v9  ;;  %v4253_v9 = vld [vmem:[#allocation34 + $0x7c0] sm:$0xff] }
0x1e17   :  { %8456 = vmatprep.subr.bf16.mxu0 %v8455_v10  ;;  %v4010_v10 = vld [vmem:[#allocation34 + $0x28] sm:$0xff]  ;;  %v8493_v14 = vpack.c.bf16 %v4253_v9, %v4245_v8  ;;  %v4065_v8 = vld [vmem:[#allocation34 + $0x1e0] sm:$0xff] }
0x1e18   :  { %v8559_v15 = vpack.c.bf16 %v4018_v11, %v4010_v10  ;;  %v8635_v10 = vpack.c.bf16 %v4068_v1, %v4060_v62  ;;  %v4059_v11 = vld [vmem:[#allocation34 + $0x1b0] sm:$0xff]  ;;  %v4138_v62 = vld [vmem:[#allocation34 + $0x428] sm:$0xff] }
0x1e19   :  { %v4146_v1 = vld [vmem:[#allocation34 + $0x468] sm:$0xff] }
0x1e1a   :  { %8458 = vmatpush1.bf16.msra.mxu0 %v8457_v18  ;;  %v3595_v18 = vld [vmem:[%s11597_s5] sm:$0x3] }
0x1e1b   :  { %8460 = vmatprep.subr.bf16.mxu0 %v8459_v40  ;;  %v3994_v0 = vrot.slane %v3595_v18, %v10384_v49  ;;  %v3998_v29 = vrot.slane %v3595_v18, %v10387_v47  ;;  %v4076_v18 = vld [vmem:[#allocation34 + $0x238] sm:$0xff] }
0x1e1e   :  { %8462 = vmatpush1.bf16.msra.mxu0 %v8461_v3  ;;  %v3985_v3 = vrot.slane %v3594_v17, %v10387_v47  ;;  %v4082_v17 = vld [vmem:[#allocation34 + $0x268] sm:$0xff] }
0x1e1f   :  { %8464 = vmatprep.subr.bf16.mxu0 %v8463_v63 }
0x1e22   :  { %8466 = vmatpush1.bf16.msra.mxu0 %v8465_v4 }
0x1e23   :  { %8468 = vmatprep.subr.bf16.mxu0 %v8467_v12  ;;  %v4009_v12 = vld [vmem:[#allocation34 + $0x20] sm:$0xff] }
0x1e26   :  { %8470 = vmatpush1.bf16.msra.mxu0 %v8469_v24 }
0x1e27   :  { %8472 = vmatprep.subr.bf16.mxu0 %v8471_v25  ;;  %v4026_v25 = vld [vmem:[#allocation34 + $0xa8] sm:$0xff] }
0x1e2a   :  { %8474 = vmatpush1.bf16.msra.mxu0 %v8473_v28  ;;  %v8625_v28 = vpack.c.bf16 %v4019_v23, %v4011_v22  ;;  %v4089_v22 = vld [vmem:[#allocation34 + $0x2a0] sm:$0xff] }
0x1e2b   :  { %8476 = vmatprep.subr.bf16.mxu0 %v8475_v30  ;;  %v4025_v30 = vld [vmem:[#allocation34 + $0xa0] sm:$0xff] }
0x1e2c   :  { %v8565_v43 = vpack.c.bf16 %v4033_v32, %v4025_v30  ;;  %v4097_v23 = vld [vmem:[#allocation34 + $0x2e0] sm:$0xff] }
0x1e2d   :  { %v8581_v30 = vpack.c.bf16 %v4097_v23, %v4089_v22 }
0x1e2e   :  { %8478 = vmatpush1.bf16.msra.mxu0 %v8477_v60  ;;  %v8563_v60 = vpack.c.bf16 %v4034_v26, %v4026_v25  ;;  %v4091_v26 = vld [vmem:[#allocation34 + $0x2b0] sm:$0xff] }
0x1e2f   :  { %8480 = vmatprep.subr.bf16.mxu0 %v8479_v36  ;;  %v8627_v36 = vpack.c.bf16 %v4036_v5, %v4028_v31  ;;  %v4099_v31 = vld [vmem:[#allocation34 + $0x2f0] sm:$0xff]  ;;  %v4106_v5 = vld [vmem:[#allocation34 + $0x328] sm:$0xff] }
0x1e30   :  { %v8645_v32 = vpack.c.bf16 %v4099_v31, %v4091_v26 }
0x1e32   :  { %8482 = vmatpush1.bf16.msra.mxu0 %v8481_v57  ;;  %v8629_v57 = vpack.c.bf16 %v4035_v35, %v4027_v33  ;;  %v4105_v33 = vld [vmem:[#allocation34 + $0x320] sm:$0xff] }
0x1e33   :  { %8484 = vmatprep.subr.bf16.mxu0 %v8483_v51  ;;  %v4041_v51 = vld [vmem:[#allocation34 + $0x120] sm:$0xff] }
0x1e34   :  { %v8569_v2 = vpack.c.bf16 %v4049_v52, %v4041_v51  ;;  %v4113_v35 = vld [vmem:[#allocation34 + $0x360] sm:$0xff] }
0x1e35   :  { %v8585_v51 = vpack.c.bf16 %v4113_v35, %v4105_v33 }
0x1e36   :  { %8486 = vmatpush1.bf16.msra.mxu0 %v8485_v20  ;;  %v4051_v20 = vld [vmem:[#allocation34 + $0x170] sm:$0xff] }
0x1e37   :  { %8488 = vmatprep.subr.bf16.mxu0 %v8487_v61  ;;  %v4058_v61 = vld [vmem:[#allocation34 + $0x1a8] sm:$0xff] }
0x1e38   :  { %v8571_v9 = vpack.c.bf16 %v4066_v59, %v4058_v61  ;;  %v4123_v61 = vld [vmem:[#allocation34 + $0x3b0] sm:$0xff] }
0x1e39   :  { %v4131_v59 = vld [vmem:[#allocation34 + $0x3f0] sm:$0xff] }
0x1e3a   :  { %8490 = vmatpush1.bf16.msra.mxu0 %v8489_v6  ;;  %v8633_v6 = vpack.c.bf16 %v4051_v20, %v4043_v54  ;;  %v8587_v54 = vpack.c.bf16 %v4130_v41, %v4122_v39  ;;  %v4187_v39 = vld [vmem:[#allocation34 + $0x5b0] sm:$0xff] }
0x1e3b   :  { %8492 = vmatprep.subr.bf16.mxu0 %v8491_v7  ;;  %v4057_v7 = vld [vmem:[#allocation34 + $0x1a0] sm:$0xff]  ;;  %v4195_v41 = vld [vmem:[#allocation34 + $0x5f0] sm:$0xff] }
0x1e3e   :  { %8494 = vmatpush1.bf16.msra.mxu0 %v8493_v14  ;;  %v4067_v14 = vld [vmem:[#allocation34 + $0x1f0] sm:$0xff] }
0x1e3f   :  { %8560 = vmatprep.subr.bf16.mxu0 %v8559_v15  ;;  %v4074_v15 = vld [vmem:[#allocation34 + $0x228] sm:$0xff] }
0x1e54   :  { %v3962_v40 = vpop.f32.mrb[4].mxu0 }
0x1e55   :  { %v3970_v38 = vrot.slane %v3962_v40, %v10384_v49  ;;  %v3964_v46 = vpop.f32.mrb[5].mxu0  ;;  %v4084_v40 = vld [vmem:[#allocation34 + $0x278] sm:$0xff] }
0x1e56   :  { %v3974_v56 = vrot.slane %v3964_v46, %v10384_v49  ;;  %v4073_v46 = vld [vmem:[#allocation34 + $0x220] sm:$0xff] }
0x1e57   :  { %v3975_v63 = vmul.f32 %v3970_v38, %v10776_v50  ;;  %v8561_v50 = vpack.c.bf16 %v4017_v21, %v4009_v12  ;;  %v8573_v38 = vpack.c.bf16 %v4065_v8, %v4057_v7  ;;  %v4100_v12 = vld [vmem:[#allocation34 + $0x2f8] sm:$0xff]  ;;  %v8653_v8 = vpack.c.bf16 %v4131_v59, %v4123_v61 }
0x1e58   :  { %v3976_v48 = vmul.f32 %v3974_v56, %v10778_v45  ;;  %v4081_v56 = vld [vmem:[#allocation34 + $0x260] sm:$0xff] }
0x1e59   :  { %v3988_v55 = vmul.f32 %v3981_v44, %v3975_v63  ;;  %v8637_v44 = vpack.c.bf16 %v4067_v14, %v4059_v11  ;;  %v8639_v63 = vpack.c.bf16 %v4084_v40, %v4076_v18  ;;  %v8591_v11 = vpack.c.bf16 %v4146_v1, %v4138_v62  ;;  %v4154_v18 = vld [vmem:[#allocation34 + $0x4a8] sm:$0xff]  ;;  %v4203_v62 = vld [vmem:[#allocation34 + $0x630] sm:$0xff] }
0x1e5a   :  { %v3989_v4 = vmul.f32 %v3985_v3, %v3976_v48  ;;  %v8575_v3 = vpack.c.bf16 %v4082_v17, %v4074_v15  ;;  %v4083_v48 = vld [vmem:[#allocation34 + $0x270] sm:$0xff]  ;;  %v4162_v40 = vld [vmem:[#allocation34 + $0x4e8] sm:$0xff] }
0x1e5b   :  { %v4001_v19 = vadd.f32 %v3994_v0, %v3988_v55  ;;  %v4075_v0 = vld [vmem:[#allocation34 + $0x230] sm:$0xff]  ;;  %v4098_v55 = vld [vmem:[#allocation34 + $0x2e8] sm:$0xff] }
0x1e5c   :  { %v4002_v24 = vadd.f32 %v3998_v29, %v3989_v4  ;;  %v4090_v29 = vld [vmem:[#allocation34 + $0x2a8] sm:$0xff]  ;;  %v4092_v4 = vld [vmem:[#allocation34 + $0x2b8] sm:$0xff]  ;;  %v8641_v21 = vpack.c.bf16 %v4083_v48, %v4075_v0  ;;  %v4139_v15 = vld [vmem:[#allocation34 + $0x430] sm:$0xff]  ;;  %v8595_v0 = vpack.c.bf16 %v4162_v40, %v4154_v18 }
0x1e5d   :  { %v10805_v45 = vmax.f32 %v4001_v19, 0.0  ;;  %v8577_v19 = vpack.c.bf16 %v4081_v56, %v4073_v46  ;;  %v8643_v25 = vpack.c.bf16 %v4100_v12, %v4092_v4  ;;  %v4147_v17 = vld [vmem:[#allocation34 + $0x470] sm:$0xff]  ;;  %v4170_v4 = vld [vmem:[#allocation34 + $0x528] sm:$0xff] }
0x1e5e   :  { %v4004_v27 = vmax.f32 %v4002_v24, 0.0  ;;  %v8579_v24 = vpack.c.bf16 %v4098_v55, %v4090_v29  ;;  %v8657_v56 = vpack.c.bf16 %v4147_v17, %v4139_v15  ;;  %v4155_v29 = vld [vmem:[#allocation34 + $0x4b0] sm:$0xff]  ;;  %v4178_v12 = vld [vmem:[#allocation34 + $0x568] sm:$0xff] }
0x1e5f   :  { %v4163_v55 = vld [vmem:[#allocation34 + $0x4f0] sm:$0xff]  ;;  %v8599_v26 = vpack.c.bf16 %v4178_v12, %v4170_v4 }
0x1e60   :  { %4865 = vmatprep.mubr.f32.mxu0 %v4004_v27  ;;  %4936 = vmatprep.mubr.f32.mxu1 %v4004_v27  ;;  %v8661_v23 = vpack.c.bf16 %v4163_v55, %v4155_v29  ;;  %v4211_v1 = vld [vmem:[#allocation34 + $0x670] sm:$0xff] }
0x1e61   :  { %4866 = vmatmul.mubr.f32.vlgmr.msra.gmra.mrb[6].mxu0 %v10805_v45  ;;  %4937 = vmatmul.mubr.f32.vlgmr.msra.gmra.mrb[58].mxu1 %v10805_v45  ;;  %v4219_v18 = vld [vmem:[#allocation34 + $0x6b0] sm:$0xff] }
0x1e62   :  { %8562 = vmatpush1.bf16.msra.mxu0 %v8561_v50  ;;  %8626 = vmatpush1.bf16.msra.mxu1 %v8625_v28  ;;  %v4108_v50 = vld [vmem:[#allocation34 + $0x338] sm:$0xff]  ;;  %v4227_v40 = vld [vmem:[#allocation34 + $0x6f0] sm:$0xff] }
0x1e63   :  { %5007 = vmatprep.mubr.f32.mxu0 %v4004_v27  ;;  %5078 = vmatprep.mubr.f32.mxu1 %v4004_v27  ;;  %v4114_v27 = vld [vmem:[#allocation34 + $0x368] sm:$0xff]  ;;  %v4116_v28 = vld [vmem:[#allocation34 + $0x378] sm:$0xff]  ;;  %v4235_v4 = vld [vmem:[#allocation34 + $0x730] sm:$0xff] }
0x1e64   :  { %8564 = vmatprep.subr.bf16.mxu0 %v8563_v60  ;;  %8628 = vmatprep.subr.bf16.mxu1 %v8627_v36  ;;  %v8583_v16 = vpack.c.bf16 %v4114_v27, %v4106_v5  ;;  %v8647_v60 = vpack.c.bf16 %v4116_v28, %v4108_v50  ;;  %v4107_v36 = vld [vmem:[#allocation34 + $0x330] sm:$0xff]  ;;  %v4186_v50 = vld [vmem:[#allocation34 + $0x5a8] sm:$0xff] }
0x1e65   :  { %v8649_v52 = vpack.c.bf16 %v4115_v37, %v4107_v36  ;;  %v4171_v5 = vld [vmem:[#allocation34 + $0x530] sm:$0xff]  ;;  %v4194_v28 = vld [vmem:[#allocation34 + $0x5e8] sm:$0xff] }
0x1e66   :  { %8566 = vmatpush1.bf16.msra.mxu0 %v8565_v43  ;;  %8630 = vmatpush1.bf16.msra.mxu1 %v8629_v57  ;;  %v4124_v43 = vld [vmem:[#allocation34 + $0x3b8] sm:$0xff]  ;;  %v4179_v27 = vld [vmem:[#allocation34 + $0x570] sm:$0xff]  ;;  %v8603_v36 = vpack.c.bf16 %v4194_v28, %v4186_v50 }
0x1e67   :  { %8568 = vmatprep.subr.bf16.mxu0 %v8567_v53  ;;  %8632 = vmatprep.subr.bf16.mxu1 %v8631_v58  ;;  %v4132_v57 = vld [vmem:[#allocation34 + $0x3f8] sm:$0xff]  ;;  %v4121_v53 = vld [vmem:[#allocation34 + $0x3a0] sm:$0xff]  ;;  %v8665_v35 = vpack.c.bf16 %v4179_v27, %v4171_v5  ;;  %v4243_v12 = vld [vmem:[#allocation34 + $0x770] sm:$0xff] }
0x1e68   :  { %v4129_v58 = vld [vmem:[#allocation34 + $0x3e0] sm:$0xff]  ;;  %v8651_v20 = vpack.c.bf16 %v4132_v57, %v4124_v43  ;;  %v4202_v43 = vld [vmem:[#allocation34 + $0x628] sm:$0xff]  ;;  %v4251_v50 = vld [vmem:[#allocation34 + $0x7b0] sm:$0xff] }
0x1e69   :  { %v8589_v7 = vpack.c.bf16 %v4129_v58, %v4121_v53  ;;  %v4210_v57 = vld [vmem:[#allocation34 + $0x668] sm:$0xff]  ;;  %v8669_v58 = vpack.c.bf16 %v4195_v41, %v4187_v39  ;;  %v4259_v28 = vld [vmem:[#allocation34 + $0x7f0] sm:$0xff] }
0x1e6a   :  { %8570 = vmatpush1.bf16.msra.mxu0 %v8569_v2  ;;  %8634 = vmatpush1.bf16.msra.mxu1 %v8633_v6  ;;  %v4140_v2 = vld [vmem:[#allocation34 + $0x438] sm:$0xff]  ;;  %v8607_v61 = vpack.c.bf16 %v4210_v57, %v4202_v43  ;;  %v5169_v43 = vld [vmem:[%s9905_s12 + $0x100] sm:$0xff]  ;;  %v5170_v57 = vld [vmem:[%s9905_s12 + $0x108] sm:$0xff] }
0x1e6b   :  { %8572 = vmatprep.subr.bf16.mxu0 %v8571_v9  ;;  %8636 = vmatprep.subr.bf16.mxu1 %v8635_v10  ;;  %v4148_v6 = vld [vmem:[#allocation34 + $0x478] sm:$0xff]  ;;  %v4137_v9 = vld [vmem:[#allocation34 + $0x420] sm:$0xff] }
0x1e6c   :  { %v4145_v10 = vld [vmem:[#allocation34 + $0x460] sm:$0xff]  ;;  %v8655_v14 = vpack.c.bf16 %v4148_v6, %v4140_v2  ;;  %v4218_v2 = vld [vmem:[#allocation34 + $0x6a8] sm:$0xff] }
0x1e6d   :  { %v8593_v46 = vpack.c.bf16 %v4145_v10, %v4137_v9  ;;  %v4226_v6 = vld [vmem:[#allocation34 + $0x6e8] sm:$0xff]  ;;  %v8673_v10 = vpack.c.bf16 %v4211_v1, %v4203_v62 }
0x1e6e   :  { %8574 = vmatpush1.bf16.msra.mxu0 %v8573_v38  ;;  %8638 = vmatpush1.bf16.msra.mxu1 %v8637_v44  ;;  %v4156_v38 = vld [vmem:[#allocation34 + $0x4b8] sm:$0xff]  ;;  %v8611_v15 = vpack.c.bf16 %v4226_v6, %v4218_v2  ;;  %v5172_v6 = vld [vmem:[%s9905_s12 + $0x118] sm:$0xff] }
0x1e6f   :  { %8576 = vmatprep.subr.bf16.mxu0 %v8575_v3  ;;  %8640 = vmatprep.subr.bf16.mxu1 %v8639_v63  ;;  %v4164_v44 = vld [vmem:[#allocation34 + $0x4f8] sm:$0xff]  ;;  %v4153_v3 = vld [vmem:[#allocation34 + $0x4a0] sm:$0xff] }
0x1e70   :  { %v4161_v63 = vld [vmem:[#allocation34 + $0x4e0] sm:$0xff]  ;;  %v8659_v48 = vpack.c.bf16 %v4164_v44, %v4156_v38  ;;  %v4234_v38 = vld [vmem:[#allocation34 + $0x728] sm:$0xff]  ;;  %v5171_v2 = vld [vmem:[%s9905_s12 + $0x110] sm:$0xff] }
0x1e71   :  { %v8597_v22 = vpack.c.bf16 %v4161_v63, %v4153_v3  ;;  %v4242_v44 = vld [vmem:[#allocation34 + $0x768] sm:$0xff]  ;;  %v8677_v63 = vpack.c.bf16 %v4227_v40, %v4219_v18 }
0x1e72   :  { %8578 = vmatpush1.bf16.msra.mxu0 %v8577_v19  ;;  %8642 = vmatpush1.bf16.msra.mxu1 %v8641_v21  ;;  %v4172_v19 = vld [vmem:[#allocation34 + $0x538] sm:$0xff]  ;;  %v8615_v29 = vpack.c.bf16 %v4242_v44, %v4234_v38  ;;  %v5174_v38 = vld [vmem:[%s9905_s12 + $0x128] sm:$0xff] }
0x1e73   :  { %8580 = vmatprep.subr.bf16.mxu0 %v8579_v24  ;;  %8644 = vmatprep.subr.bf16.mxu1 %v8643_v25  ;;  %v4180_v21 = vld [vmem:[#allocation34 + $0x578] sm:$0xff]  ;;  %v4169_v24 = vld [vmem:[#allocation34 + $0x520] sm:$0xff] }
0x1e74   :  { %v4177_v25 = vld [vmem:[#allocation34 + $0x560] sm:$0xff]  ;;  %v8663_v31 = vpack.c.bf16 %v4180_v21, %v4172_v19  ;;  %v4250_v19 = vld [vmem:[#allocation34 + $0x7a8] sm:$0xff]  ;;  %v5159_v44 = vld [vmem:[%s9905_s12 + $0xb0] sm:$0xff] }
0x1e75   :  { %v8601_v33 = vpack.c.bf16 %v4177_v25, %v4169_v24  ;;  %v4258_v21 = vld [vmem:[#allocation34 + $0x7e8] sm:$0xff]  ;;  %v8681_v25 = vpack.c.bf16 %v4243_v12, %v4235_v4  ;;  %v5144_v4 = vld [vmem:[%s9905_s12 + $0x38] sm:$0xff]  ;;  %v5175_v12 = vld [vmem:[%s9905_s12 + $0x130] sm:$0xff] }
0x1e76   :  { %8582 = vmatpush1.bf16.msra.mxu0 %v8581_v30  ;;  %8646 = vmatpush1.bf16.msra.mxu1 %v8645_v32  ;;  %v4188_v30 = vld [vmem:[#allocation34 + $0x5b8] sm:$0xff]  ;;  %v8619_v5 = vpack.c.bf16 %v4258_v21, %v4250_v19  ;;  %v5176_v19 = vld [vmem:[%s9905_s12 + $0x138] sm:$0xff] }
0x1e77   :  { %8584 = vmatprep.subr.bf16.mxu0 %v8583_v16  ;;  %8648 = vmatprep.subr.bf16.mxu1 %v8647_v60  ;;  %v4196_v32 = vld [vmem:[#allocation34 + $0x5f8] sm:$0xff]  ;;  %v4185_v16 = vld [vmem:[#allocation34 + $0x5a0] sm:$0xff] }
0x1e78   :  { %v4193_v60 = vld [vmem:[#allocation34 + $0x5e0] sm:$0xff]  ;;  %v8667_v37 = vpack.c.bf16 %v4196_v32, %v4188_v30  ;;  %v5153_v30 = vld [vmem:[%s9905_s12 + $0x80] sm:$0xff]  ;;  %v5154_v32 = vld [vmem:[%s9905_s12 + $0x88] sm:$0xff] }
0x1e79   :  { %v8605_v53 = vpack.c.bf16 %v4193_v60, %v4185_v16  ;;  %v8685_v60 = vpack.c.bf16 %v4259_v28, %v4251_v50  ;;  %v10815_v39 = vpack.c.bf16 %v5154_v32, %v5153_v30  ;;  %v5177_v30 = vld [vmem:[%s9905_s12 + $0x140] sm:$0xff]  ;;  %v5178_v32 = vld [vmem:[%s9905_s12 + $0x148] sm:$0xff] }
0x1e7a   :  { %8586 = vmatpush1.bf16.msra.mxu0 %v8585_v51  ;;  %8650 = vmatpush1.bf16.msra.mxu1 %v8649_v52  ;;  %v4204_v51 = vld [vmem:[#allocation34 + $0x638] sm:$0xff] }
0x1e7b   :  { %8588 = vmatprep.subr.bf16.mxu0 %v8587_v54  ;;  %8652 = vmatprep.subr.bf16.mxu1 %v8651_v20  ;;  %v4212_v52 = vld [vmem:[#allocation34 + $0x678] sm:$0xff]  ;;  %v4201_v54 = vld [vmem:[#allocation34 + $0x620] sm:$0xff] }
0x1e7c   :  { %v4209_v20 = vld [vmem:[#allocation34 + $0x660] sm:$0xff]  ;;  %v8671_v59 = vpack.c.bf16 %v4212_v52, %v4204_v51  ;;  %v5155_v51 = vld [vmem:[%s9905_s12 + $0x90] sm:$0xff] }
0x1e7d   :  { %v8609_v9 = vpack.c.bf16 %v4209_v20, %v4201_v54  ;;  %v5156_v52 = vld [vmem:[%s9905_s12 + $0x98] sm:$0xff]  ;;  %v10827_v20 = vpack.c.bf16 %v5170_v57, %v5169_v43  ;;  %v5147_v43 = vld [vmem:[%s9905_s12 + $0x50] sm:$0xff] }
0x1e7e   :  { %8590 = vmatpush1.bf16.msra.mxu0 %v8589_v7  ;;  %8654 = vmatpush1.bf16.msra.mxu1 %v8653_v8  ;;  %v4220_v7 = vld [vmem:[#allocation34 + $0x6b8] sm:$0xff]  ;;  %v10833_v62 = vpack.c.bf16 %v5156_v52, %v5155_v51  ;;  %v5148_v57 = vld [vmem:[%s9905_s12 + $0x58] sm:$0xff] }
0x1e7f   :  { %8592 = vmatprep.subr.bf16.mxu0 %v8591_v11  ;;  %8656 = vmatprep.subr.bf16.mxu1 %v8655_v14  ;;  %v4228_v8 = vld [vmem:[#allocation34 + $0x6f8] sm:$0xff]  ;;  %v4217_v11 = vld [vmem:[#allocation34 + $0x6a0] sm:$0xff]  ;;  %v10921_v52 = vpack.c.bf16 %v5148_v57, %v5147_v43  ;;  %v10985_v43 = vld [vmem:[%s11598_s1] sm:$0xff]  ;;  %v10988_v57 = vsub.s32 3, %v10037_v34 }
0x1e80   :  { %v4225_v14 = vld [vmem:[#allocation34 + $0x6e0] sm:$0xff]  ;;  %v8675_v17 = vpack.c.bf16 %v4228_v8, %v4220_v7  ;;  %v5157_v7 = vld [vmem:[%s9905_s12 + $0xa0] sm:$0xff]  ;;  %v5158_v8 = vld [vmem:[%s9905_s12 + $0xa8] sm:$0xff] }
0x1e81   :  { %v8613_v3 = vpack.c.bf16 %v4225_v14, %v4217_v11  ;;  %v10849_v14 = vpack.c.bf16 %v5172_v6, %v5171_v2  ;;  %v10855_v18 = vpack.c.bf16 %v5158_v8, %v5157_v7  ;;  %v5166_v2 = vld [vmem:[%s9905_s12 + $0xe8] sm:$0xff]  ;;  %v5197_v6 = vld [vmem:[%s9905_s12 + $0x1e0] sm:$0xff]  ;;  %11600 = vst [vmem:[#allocation84_spill] sm:$0xff] %v10988_v57 }
0x1e82   :  { %8594 = vmatpush1.bf16.msra.mxu0 %v8593_v46  ;;  %8658 = vmatpush1.bf16.msra.mxu1 %v8657_v56  ;;  %v4236_v46 = vld [vmem:[#allocation34 + $0x738] sm:$0xff]  ;;  %v5198_v8 = vld [vmem:[%s9905_s12 + $0x1e8] sm:$0xff] }
0x1e83   :  { %8596 = vmatprep.subr.bf16.mxu0 %v8595_v0  ;;  %8660 = vmatprep.subr.bf16.mxu1 %v8659_v48  ;;  %v4244_v56 = vld [vmem:[#allocation34 + $0x778] sm:$0xff]  ;;  %v4233_v0 = vld [vmem:[#allocation34 + $0x720] sm:$0xff] }
0x1e84   :  { %v4241_v48 = vld [vmem:[#allocation34 + $0x760] sm:$0xff]  ;;  %v8679_v55 = vpack.c.bf16 %v4244_v56, %v4236_v46  ;;  %v5191_v56 = vld [vmem:[%s9905_s12 + $0x1b0] sm:$0xff] }
0x1e85   :  { %v8617_v24 = vpack.c.bf16 %v4241_v48, %v4233_v0  ;;  %v5160_v46 = vld [vmem:[%s9905_s12 + $0xb8] sm:$0xff]  ;;  %v5143_v48 = vld [vmem:[%s9905_s12 + $0x30] sm:$0xff] }
0x1e86   :  { %8598 = vmatpush1.bf16.msra.mxu0 %v8597_v22  ;;  %8662 = vmatpush1.bf16.msra.mxu1 %v8661_v23  ;;  %v4252_v22 = vld [vmem:[#allocation34 + $0x7b8] sm:$0xff]  ;;  %v10883_v21 = vpack.c.bf16 %v5144_v4, %v5143_v48  ;;  %v5200_v4 = vld [vmem:[%s9905_s12 + $0x1f8] sm:$0xff] }
0x1e87   :  { %8600 = vmatprep.subr.bf16.mxu0 %v8599_v26  ;;  %8664 = vmatprep.subr.bf16.mxu1 %v8663_v31  ;;  %v4260_v23 = vld [vmem:[#allocation34 + $0x7f8] sm:$0xff]  ;;  %v4249_v26 = vld [vmem:[#allocation34 + $0x7a0] sm:$0xff] }
0x1e88   :  { %v4257_v31 = vld [vmem:[#allocation34 + $0x7e0] sm:$0xff]  ;;  %v8683_v27 = vpack.c.bf16 %v4260_v23, %v4252_v22  ;;  %v10885_v22 = vpack.c.bf16 %v5176_v19, %v5175_v12  ;;  %v5161_v23 = vld [vmem:[%s9905_s12 + $0xc0] sm:$0xff]  ;;  %v5151_v12 = vld [vmem:[%s9905_s12 + $0x70] sm:$0xff] }
0x1e89   :  { %v8621_v16 = vpack.c.bf16 %v4257_v31, %v4249_v26  ;;  %v5194_v31 = vld [vmem:[%s9905_s12 + $0x1c8] sm:$0xff]  ;;  %v5152_v19 = vld [vmem:[%s9905_s12 + $0x78] sm:$0xff] }
0x1e8a   :  { %8602 = vmatpush1.bf16.msra.mxu0 %v8601_v33  ;;  %8666 = vmatpush1.bf16.msra.mxu1 %v8665_v35  ;;  %v5185_v33 = vld [vmem:[%s9905_s12 + $0x180] sm:$0xff]  ;;  %v5186_v35 = vld [vmem:[%s9905_s12 + $0x188] sm:$0xff] }
0x1e8b   :  { %8604 = vmatprep.subr.bf16.mxu0 %v8603_v36  ;;  %8668 = vmatprep.subr.bf16.mxu1 %v8667_v37  ;;  %v5137_v36 = vld [vmem:[%s9905_s12] sm:$0xff]  ;;  %v5138_v37 = vld [vmem:[%s9905_s12 + $0x8] sm:$0xff]  ;;  %v10817_v41 = vpack.c.bf16 %v5186_v35, %v5185_v33  ;;  %v10906_v33 = vpack.c.bf16 %v5178_v32, %v5177_v30  ;;  %v5163_v35 = vld [vmem:[%s9905_s12 + $0xd0] sm:$0xff] }
0x1e8c   :  { %v10825_v54 = vpack.c.bf16 %v5138_v37, %v5137_v36  ;;  %v5196_v37 = vld [vmem:[%s9905_s12 + $0x1d8] sm:$0xff]  ;;  %v5218_v30 = vld [vmem:[%s9905_s12 + $0x288] sm:$0xff]  ;;  %v5249_v32 = vld [vmem:[%s9905_s12 + $0x380] sm:$0xff] }
0x1e8e   :  { %8606 = vmatpush1.bf16.msra.mxu0 %v8605_v53  ;;  %8670 = vmatpush1.bf16.msra.mxu1 %v8669_v58  ;;  %v5187_v53 = vld [vmem:[%s9905_s12 + $0x190] sm:$0xff]  ;;  %v5188_v58 = vld [vmem:[%s9905_s12 + $0x198] sm:$0xff] }
0x1e8f   :  { %8608 = vmatprep.subr.bf16.mxu0 %v8607_v61  ;;  %8672 = vmatprep.subr.bf16.mxu1 %v8671_v59  ;;  %v5139_v61 = vld [vmem:[%s9905_s12 + $0x10] sm:$0xff]  ;;  %v5140_v59 = vld [vmem:[%s9905_s12 + $0x18] sm:$0xff]  ;;  %v10835_v1 = vpack.c.bf16 %v5188_v58, %v5187_v53 }
0x1e90   :  { %v10847_v11 = vpack.c.bf16 %v5140_v59, %v5139_v61  ;;  %v5179_v53 = vld [vmem:[%s9905_s12 + $0x150] sm:$0xff]  ;;  %v5180_v58 = vld [vmem:[%s9905_s12 + $0x158] sm:$0xff]  ;;  %v5165_v59 = vld [vmem:[%s9905_s12 + $0xe0] sm:$0xff] }
0x1e91   :  { %v10926_v61 = vpack.c.bf16 %v5180_v58, %v5179_v53  ;;  %v10934_v7 = vpack.c.bf16 %v5166_v2, %v5165_v59  ;;  %v5090_v53 = vrot.slane %v10985_v43, %v10384_v49  ;;  %v5094_v59 = vrot.slane %v10985_v43, %v10387_v47  ;;  %v5251_v47 = vld [vmem:[%s9905_s12 + $0x390] sm:$0xff]  ;;  %v5236_v49 = vld [vmem:[%s9905_s12 + $0x318] sm:$0xff] }
0x1e92   :  { %8610 = vmatpush1.bf16.msra.mxu0 %v8609_v9  ;;  %8674 = vmatpush1.bf16.msra.mxu1 %v8673_v10  ;;  %v5189_v9 = vld [vmem:[%s9905_s12 + $0x1a0] sm:$0xff]  ;;  %v5190_v10 = vld [vmem:[%s9905_s12 + $0x1a8] sm:$0xff]  ;;  %v5102_v2 = vrot.slane %v10985_v43, %v10988_v57 }
0x1e93   :  { %8612 = vmatprep.subr.bf16.mxu0 %v8611_v15  ;;  %8676 = vmatprep.subr.bf16.mxu1 %v8675_v17  ;;  %v5141_v15 = vld [vmem:[%s9905_s12 + $0x20] sm:$0xff]  ;;  %v5142_v17 = vld [vmem:[%s9905_s12 + $0x28] sm:$0xff]  ;;  %v10857_v40 = vpack.c.bf16 %v5190_v10, %v5189_v9 }
0x1e94   :  { %v5149_v9 = vld [vmem:[%s9905_s12 + $0x60] sm:$0xff]  ;;  %v5150_v10 = vld [vmem:[%s9905_s12 + $0x68] sm:$0xff] }
0x1e95   :  { %v5201_v57 = vld [vmem:[%s9905_s12 + $0x200] sm:$0xff] }
0x1e96   :  { %8614 = vmatpush1.bf16.msra.mxu0 %v8613_v3  ;;  %8678 = vmatpush1.bf16.msra.mxu1 %v8677_v63  ;;  %v5192_v3 = vld [vmem:[%s9905_s12 + $0x1b8] sm:$0xff]  ;;  %v10867_v63 = vpack.c.bf16 %v5142_v17, %v5141_v15  ;;  %v10939_v15 = vpack.c.bf16 %v5198_v8, %v5197_v6  ;;  %v10941_v17 = vpack.c.bf16 %v5150_v10, %v5149_v9 }
0x1e97   :  { %8616 = vmatprep.subr.bf16.mxu0 %v8615_v29  ;;  %8680 = vmatprep.subr.bf16.mxu1 %v8679_v55  ;;  %v10874_v29 = vpack.c.bf16 %v5160_v46, %v5159_v44  ;;  %v10876_v55 = vpack.c.bf16 %v5192_v3, %v5191_v56  ;;  %v5167_v46 = vld [vmem:[%s9905_s12 + $0xf0] sm:$0xff]  ;;  %v5168_v56 = vld [vmem:[%s9905_s12 + $0xf8] sm:$0xff] }
0x1e98   :  { %v5199_v3 = vld [vmem:[%s9905_s12 + $0x1f0] sm:$0xff]  ;;  %v10954_v48 = vpack.c.bf16 %v5168_v56, %v5167_v46 }
0x1e9a   :  { %8618 = vmatpush1.bf16.msra.mxu0 %v8617_v24  ;;  %8682 = vmatpush1.bf16.msra.mxu1 %v8681_v25  ;;  %v5162_v24 = vld [vmem:[%s9905_s12 + $0xc8] sm:$0xff]  ;;  %v5193_v25 = vld [vmem:[%s9905_s12 + $0x1c0] sm:$0xff] }
0x1e9b   :  { %8620 = vmatprep.subr.bf16.mxu0 %v8619_v5  ;;  %8684 = vmatprep.subr.bf16.mxu1 %v8683_v27  ;;  %v10894_v26 = vpack.c.bf16 %v5162_v24, %v5161_v23  ;;  %v5145_v5 = vld [vmem:[%s9905_s12 + $0x40] sm:$0xff]  ;;  %v5146_v27 = vld [vmem:[%s9905_s12 + $0x48] sm:$0xff]  ;;  %v10899_v50 = vpack.c.bf16 %v5194_v31, %v5193_v25  ;;  %v10959_v23 = vpack.c.bf16 %v5200_v4, %v5199_v3  ;;  %v5183_v25 = vld [vmem:[%s9905_s12 + $0x170] sm:$0xff] }
0x1e9c   :  { %v10901_v28 = vpack.c.bf16 %v5146_v27, %v5145_v5  ;;  %v10961_v24 = vpack.c.bf16 %v5152_v19, %v5151_v12  ;;  %v5184_v31 = vld [vmem:[%s9905_s12 + $0x178] sm:$0xff]  ;;  %v5217_v27 = vld [vmem:[%s9905_s12 + $0x280] sm:$0xff] }
0x1e9d   :  { %v10966_v5 = vpack.c.bf16 %v5184_v31, %v5183_v25 }
0x1e9e   :  { %8622 = vmatpush1.bf16.msra.mxu0 %v8621_v16  ;;  %8686 = vmatpush1.bf16.msra.mxu1 %v8685_v60  ;;  %v5164_v16 = vld [vmem:[%s9905_s12 + $0xd8] sm:$0xff]  ;;  %v5195_v60 = vld [vmem:[%s9905_s12 + $0x1d0] sm:$0xff] }
0x1e9f   :  { %8688 = vmatprep.subr.bf16.mxu0 %v10815_v39  ;;  %8720 = vmatprep.subr.bf16.mxu1 %v10817_v41  ;;  %v10914_v36 = vpack.c.bf16 %v5164_v16, %v5163_v35  ;;  %v10919_v51 = vpack.c.bf16 %v5196_v37, %v5195_v60  ;;  %v10974_v35 = vpack.c.bf16 %v5218_v30, %v5217_v27  ;;  %v5250_v16 = vld [vmem:[%s9905_s12 + $0x388] sm:$0xff]  ;;  %v10982_v37 = vsub.s32 2, %v10037_v34 }
0x1ea0   :  { %v10977_v60 = vpack.c.bf16 %v5250_v16, %v5249_v32 }
0x1ea1   :  { %5008 = vmatmul.mubr.f32.vlgmr.msra.gmra.mrb[8].mxu0 %v10805_v45  ;;  %5079 = vmatmul.mubr.f32.vlgmr.msra.gmra.mrb[60].mxu1 %v10805_v45  ;;  %v5173_v45 = vld [vmem:[%s9905_s12 + $0x120] sm:$0xff]  ;;  %11599 = vst [vmem:[#allocation83_spill] sm:$0xff] %v10982_v37  ;;  %v5098_v58 = vrot.slane %v10985_v43, %v10982_v37  ;;  %v5220_v37 = vld [vmem:[%s9905_s12 + $0x298] sm:$0xff] }
0x1ea2   :  { %8690 = vmatpush3.bf16.msra.mxu0 %v10825_v54  ;;  %8722 = vmatpush3.bf16.msra.mxu1 %v10827_v20  ;;  %v10869_v0 = vpack.c.bf16 %v5174_v38, %v5173_v45  ;;  %v5181_v45 = vld [vmem:[%s9905_s12 + $0x160] sm:$0xff]  ;;  %v5182_v38 = vld [vmem:[%s9905_s12 + $0x168] sm:$0xff] }
0x1ea3   :  { %8692 = vmatprep.subr.bf16.mxu0 %v10833_v62  ;;  %8724 = vmatprep.subr.bf16.mxu1 %v10835_v1  ;;  %v10946_v44 = vpack.c.bf16 %v5182_v38, %v5181_v45 }
0x1ea6   :  { %8694 = vmatpush3.bf16.msra.mxu0 %v10847_v11  ;;  %8726 = vmatpush3.bf16.msra.mxu1 %v10849_v14 }
0x1ea7   :  { %8696 = vmatprep.subr.bf16.mxu0 %v10855_v18  ;;  %8728 = vmatprep.subr.bf16.mxu1 %v10857_v40 }
0x1eaa   :  { %8698 = vmatpush3.bf16.msra.mxu0 %v10867_v63  ;;  %8730 = vmatpush3.bf16.msra.mxu1 %v10869_v0 }
0x1eab   :  { %8700 = vmatprep.subr.bf16.mxu0 %v10874_v29  ;;  %8732 = vmatprep.subr.bf16.mxu1 %v10876_v55 }
0x1eae   :  { %8702 = vmatpush3.bf16.msra.mxu0 %v10883_v21  ;;  %8734 = vmatpush3.bf16.msra.mxu1 %v10885_v22 }
0x1eaf   :  { %8704 = vmatprep.subr.bf16.mxu0 %v10894_v26  ;;  %8736 = vmatprep.subr.bf16.mxu1 %v10899_v50 }
0x1eb2   :  { %8706 = vmatpush3.bf16.msra.mxu0 %v10901_v28  ;;  %8738 = vmatpush3.bf16.msra.mxu1 %v10906_v33 }
0x1eb3   :  { %8708 = vmatprep.subr.bf16.mxu0 %v10914_v36  ;;  %8740 = vmatprep.subr.bf16.mxu1 %v10919_v51 }
0x1eb6   :  { %8710 = vmatpush3.bf16.msra.mxu0 %v10921_v52  ;;  %8742 = vmatpush3.bf16.msra.mxu1 %v10926_v61 }
0x1eb7   :  { %8712 = vmatprep.subr.bf16.mxu0 %v10934_v7  ;;  %8744 = vmatprep.subr.bf16.mxu1 %v10939_v15 }
0x1eba   :  { %8714 = vmatpush3.bf16.msra.mxu0 %v10941_v17  ;;  %8746 = vmatpush3.bf16.msra.mxu1 %v10946_v44 }
0x1ebb   :  { %8716 = vmatprep.subr.bf16.mxu0 %v10954_v48  ;;  %8748 = vmatprep.subr.bf16.mxu1 %v10959_v23 }
0x1ebe   :  { %8718 = vmatpush3.bf16.msra.mxu0 %v10961_v24  ;;  %8750 = vmatpush3.bf16.msra.mxu1 %v10966_v5 }
0x1ebf   :  { %8752 = vmatprep.subr.bf16.mxu0 %v10974_v35  ;;  %8784 = vmatprep.subr.bf16.mxu1 %v10977_v60 }
0x1f34   :  { %v4867_v6 = vpop.f32.mrb[6].mxu0  ;;  %v4938_v8 = vpop.f32.mrb[58].mxu1 }
0x1f35   :  { %v10998_v9 = vadd.f32 %v5090_v53, %v4867_v6  ;;  %v11000_v10 = vadd.f32 %v5098_v58, %v4938_v8  ;;  %v4869_v45 = vpop.f32.mrb[7].mxu0  ;;  %v4940_v38 = vpop.f32.mrb[59].mxu1 }
0x1f36   :  { %v11002_v46 = vadd.f32 %v5094_v59, %v4869_v45  ;;  %v11004_v56 = vadd.f32 %v5102_v2, %v4940_v38 }
0x1f37   :  { %11601 = vst [vmem:[#allocation85_spill] sm:$0xff] %v10998_v9  ;;  %11602 = vst [vmem:[#allocation86_spill] sm:$0xff] %v11000_v10  ;;  %v5269_v3 = vsel %vm1100_vm0, %v10998_v9, 0.0  ;;  %v5283_v4 = vsel %vm1100_vm0, %v11000_v10, 0.0  ;;  %v5235_v9 = vld [vmem:[%s9905_s12 + $0x310] sm:$0xff] }
0x1f38   :  { %11603 = vst [vmem:[#allocation87_spill] sm:$0xff] %v11002_v46  ;;  %11604 = vst [vmem:[#allocation88_spill] sm:$0xff] %v11004_v56  ;;  %v5270_v12 = vrot.slane %v5269_v3, 4  ;;  %v5284_v19 = vrot.slane %v5283_v4, 4  ;;  %v5276_v25 = vsel %vm1100_vm0, %v11002_v46, 0.0  ;;  %v5290_v31 = vsel %vm1100_vm0, %v11004_v56, 0.0 }
0x1f39   :  { %v5277_v27 = vrot.slane %v5276_v25, 4  ;;  %v5291_v30 = vrot.slane %v5290_v31, 4 }
0x1f3a   :  { %v5271_v32 = vadd.f32 %v5270_v12, %v5269_v3  ;;  %v5285_v16 = vadd.f32 %v5284_v19, %v5283_v4  ;;  %v5202_v3 = vld [vmem:[%s9905_s12 + $0x208] sm:$0xff]  ;;  %v5233_v19 = vld [vmem:[%s9905_s12 + $0x300] sm:$0xff] }
0x1f3b   :  { %v5278_v53 = vadd.f32 %v5277_v27, %v5276_v25  ;;  %v5292_v58 = vadd.f32 %v5291_v30, %v5290_v31  ;;  %v5234_v25 = vld [vmem:[%s9905_s12 + $0x308] sm:$0xff]  ;;  %v5219_v31 = vld [vmem:[%s9905_s12 + $0x290] sm:$0xff] }
0x1f3c   :  { %v5272_v59 = vrot.slane %v5271_v32, 2  ;;  %v5286_v2 = vrot.slane %v5285_v16, 2  ;;  %v11028_v10 = vpack.c.bf16 %v5220_v37, %v5219_v31  ;;  %v11042_v37 = vpack.c.bf16 %v5236_v49, %v5235_v9  ;;  %v5224_v49 = vld [vmem:[%s9905_s12 + $0x2b8] sm:$0xff]  ;;  %v5255_v9 = vld [vmem:[%s9905_s12 + $0x3b0] sm:$0xff] }
0x1f3d   :  { %v5279_v6 = vrot.slane %v5278_v53, 2  ;;  %v5293_v8 = vrot.slane %v5292_v58, 2  ;;  %v5256_v31 = vld [vmem:[%s9905_s12 + $0x3b8] sm:$0xff] }
0x1f3e   :  { %v5273_v45 = vadd.f32 %v5272_v59, %v5271_v32  ;;  %v5287_v38 = vadd.f32 %v5286_v2, %v5285_v16  ;;  %v5252_v32 = vld [vmem:[%s9905_s12 + $0x398] sm:$0xff]  ;;  %v11024_v59 = vpack.c.bf16 %v5234_v25, %v5233_v19  ;;  %v5203_v2 = vld [vmem:[%s9905_s12 + $0x210] sm:$0xff]  ;;  %11607 = vst [vmem:[#allocation91_spill] sm:$0xff] %v11028_v10  ;;  %11610 = vst [vmem:[#allocation94_spill] sm:$0xff] %v11042_v37 }
0x1f3f   :  { %v5280_v13 = vadd.f32 %v5279_v6, %v5278_v53  ;;  %v5294_v42 = vadd.f32 %v5293_v8, %v5292_v58  ;;  %v11022_v58 = vpack.c.bf16 %v5202_v3, %v5201_v57  ;;  %v5204_v6 = vld [vmem:[%s9905_s12 + $0x218] sm:$0xff]  ;;  %v11030_v46 = vpack.c.bf16 %v5252_v32, %v5251_v47  ;;  %v5253_v57 = vld [vmem:[%s9905_s12 + $0x3a0] sm:$0xff]  ;;  %v5254_v3 = vld [vmem:[%s9905_s12 + $0x3a8] sm:$0xff] }
0x1f40   :  { %v5274_v4 = vrot.slane %v5273_v45, 1  ;;  %v5288_v12 = vrot.slane %v5287_v38, 1  ;;  %11606 = vst [vmem:[#allocation90_spill] sm:$0xff] %v11024_v59  ;;  %v11040_v47 = vpack.c.bf16 %v5204_v6, %v5203_v2  ;;  %v5238_v19 = vld [vmem:[%s9905_s12 + $0x328] sm:$0xff]  ;;  %v5223_v25 = vld [vmem:[%s9905_s12 + $0x2b0] sm:$0xff]  ;;  %v11070_v2 = vpack.c.bf16 %v5256_v31, %v5255_v9  ;;  %v5241_v9 = vld [vmem:[%s9905_s12 + $0x340] sm:$0xff] }
0x1f41   :  { %v5281_v27 = vrot.slane %v5280_v13, 1  ;;  %v5295_v30 = vrot.slane %v5294_v42, 1  ;;  %11605 = vst [vmem:[#allocation89_spill] sm:$0xff] %v11022_v58  ;;  %11608 = vst [vmem:[#allocation92_spill] sm:$0xff] %v11030_v46  ;;  %v5207_v32 = vld [vmem:[%s9905_s12 + $0x230] sm:$0xff]  ;;  %v5242_v31 = vld [vmem:[%s9905_s12 + $0x348] sm:$0xff] }
0x1f42   :  { %v5275_v8 = vadd.f32 %v5274_v4, %v5273_v45  ;;  %v5289_v56 = vadd.f32 %v5288_v12, %v5287_v38  ;;  %11609 = vst [vmem:[#allocation93_spill] sm:$0xff] %v11040_v47  ;;  %v5205_v45 = vld [vmem:[%s9905_s12 + $0x220] sm:$0xff]  ;;  %v5206_v38 = vld [vmem:[%s9905_s12 + $0x228] sm:$0xff]  ;;  %11616 = vst [vmem:[#allocation100_spill] sm:$0xff] %v11070_v2 }
0x1f43   :  { %v5282_v16 = vadd.f32 %v5281_v27, %v5280_v13  ;;  %v5296_v53 = vadd.f32 %v5295_v30, %v5294_v42  ;;  %v5221_v13 = vld [vmem:[%s9905_s12 + $0x2a0] sm:$0xff]  ;;  %v5222_v42 = vld [vmem:[%s9905_s12 + $0x2a8] sm:$0xff]  ;;  %v11060_v27 = vpack.c.bf16 %v5206_v38, %v5205_v45  ;;  %v5239_v6 = vld [vmem:[%s9905_s12 + $0x330] sm:$0xff] }
0x1f44   :  { %v11048_v4 = vpack.c.bf16 %v5222_v42, %v5221_v13  ;;  %v5237_v12 = vld [vmem:[%s9905_s12 + $0x320] sm:$0xff]  ;;  %v5226_v42 = vld [vmem:[%s9905_s12 + $0x2c8] sm:$0xff] }
0x1f45   :  { %5389 = vmatprep.mubr.f32.mxu0 %v5282_v16  ;;  %5459 = vmatprep.mubr.f32.mxu1 %v5296_v53  ;;  %11613 = vst [vmem:[#allocation97_spill] sm:$0xff] %v11060_v27  ;;  %v11062_v30 = vpack.c.bf16 %v5238_v19, %v5237_v12  ;;  %v5208_v16 = vld [vmem:[%s9905_s12 + $0x238] sm:$0xff]  ;;  %v11068_v53 = vpack.c.bf16 %v5224_v49, %v5223_v25  ;;  %v5225_v13 = vld [vmem:[%s9905_s12 + $0x2c0] sm:$0xff]  ;;  %v5210_v19 = vld [vmem:[%s9905_s12 + $0x248] sm:$0xff] }
0x1f46   :  { %5390 = vmatmul.mubr.f32.vlgmr.msra.gmra.mrb[10].mxu0 %v5275_v8  ;;  %5460 = vmatmul.mubr.f32.vlgmr.msra.gmra.mrb[62].mxu1 %v5289_v56  ;;  %11611 = vst [vmem:[#allocation95_spill] sm:$0xff] %v11048_v4  ;;  %v11050_v56 = vpack.c.bf16 %v5254_v3, %v5253_v57  ;;  %v5240_v8 = vld [vmem:[%s9905_s12 + $0x338] sm:$0xff]  ;;  %v5257_v57 = vld [vmem:[%s9905_s12 + $0x3c0] sm:$0xff]  ;;  %v5258_v3 = vld [vmem:[%s9905_s12 + $0x3c8] sm:$0xff]  ;;  %v11080_v45 = vpack.c.bf16 %v5208_v16, %v5207_v32 }
0x1f47   :  { %8754 = vmatpush3.bf16.msra.mxu0 %v11022_v58  ;;  %8786 = vmatpush3.bf16.msra.mxu1 %v11024_v59  ;;  %11614 = vst [vmem:[#allocation98_spill] sm:$0xff] %v11062_v30  ;;  %11615 = vst [vmem:[#allocation99_spill] sm:$0xff] %v11068_v53  ;;  %v11082_v38 = vpack.c.bf16 %v5240_v8, %v5239_v6  ;;  %v5209_v12 = vld [vmem:[%s9905_s12 + $0x240] sm:$0xff]  ;;  %v11088_v25 = vpack.c.bf16 %v5226_v42, %v5225_v13  ;;  %v5227_v32 = vld [vmem:[%s9905_s12 + $0x2d0] sm:$0xff] }
0x1f48   :  { %8756 = vmatprep.subr.bf16.mxu0 %v11028_v10  ;;  %8788 = vmatprep.subr.bf16.mxu1 %v11030_v46  ;;  %11612 = vst [vmem:[#allocation96_spill] sm:$0xff] %v11050_v56  ;;  %11617 = vst [vmem:[#allocation101_spill] sm:$0xff] %v11080_v45  ;;  %v11090_v49 = vpack.c.bf16 %v5258_v3, %v5257_v57  ;;  %v5228_v16 = vld [vmem:[%s9905_s12 + $0x2d8] sm:$0xff]  ;;  %v5259_v6 = vld [vmem:[%s9905_s12 + $0x3d0] sm:$0xff]  ;;  %v11100_v13 = vpack.c.bf16 %v5210_v19, %v5209_v12 }
0x1f49   :  { %11618 = vst [vmem:[#allocation102_spill] sm:$0xff] %v11082_v38  ;;  %11619 = vst [vmem:[#allocation103_spill] sm:$0xff] %v11088_v25  ;;  %v5260_v8 = vld [vmem:[%s9905_s12 + $0x3d8] sm:$0xff]  ;;  %v11102_v42 = vpack.c.bf16 %v5242_v31, %v5241_v9  ;;  %v5211_v57 = vld [vmem:[%s9905_s12 + $0x250] sm:$0xff] }
0x1f4a   :  { %11620 = vst [vmem:[#allocation104_spill] sm:$0xff] %v11090_v49  ;;  %11621 = vst [vmem:[#allocation105_spill] sm:$0xff] %v11100_v13  ;;  %v5212_v3 = vld [vmem:[%s9905_s12 + $0x258] sm:$0xff]  ;;  %v5229_v12 = vld [vmem:[%s9905_s12 + $0x2e0] sm:$0xff] }
0x1f4b   :  { %8758 = vmatpush3.bf16.msra.mxu0 %v11040_v47  ;;  %8790 = vmatpush3.bf16.msra.mxu1 %v11042_v37  ;;  %11622 = vst [vmem:[#allocation106_spill] sm:$0xff] %v11102_v42  ;;  %v5230_v19 = vld [vmem:[%s9905_s12 + $0x2e8] sm:$0xff]  ;;  %v5261_v9 = vld [vmem:[%s9905_s12 + $0x3e0] sm:$0xff] }
0x1f4c   :  { %8760 = vmatprep.subr.bf16.mxu0 %v11048_v4  ;;  %8792 = vmatprep.subr.bf16.mxu1 %v11050_v56  ;;  %v5243_v56 = vld [vmem:[%s9905_s12 + $0x350] sm:$0xff]  ;;  %v5262_v31 = vld [vmem:[%s9905_s12 + $0x3e8] sm:$0xff] }
0x1f4f   :  { %8762 = vmatpush3.bf16.msra.mxu0 %v11060_v27  ;;  %8794 = vmatpush3.bf16.msra.mxu1 %v11062_v30  ;;  %v11110_v30 = vpack.c.bf16 %v5260_v8, %v5259_v6  ;;  %v5213_v6 = vld [vmem:[%s9905_s12 + $0x260] sm:$0xff]  ;;  %v5214_v8 = vld [vmem:[%s9905_s12 + $0x268] sm:$0xff] }
0x1f50   :  { %8764 = vmatprep.subr.bf16.mxu0 %v11068_v53  ;;  %8796 = vmatprep.subr.bf16.mxu1 %v11070_v2  ;;  %v11108_v2 = vpack.c.bf16 %v5228_v16, %v5227_v32  ;;  %v11120_v32 = vpack.c.bf16 %v5212_v3, %v5211_v57  ;;  %v5231_v57 = vld [vmem:[%s9905_s12 + $0x2f0] sm:$0xff]  ;;  %v5232_v3 = vld [vmem:[%s9905_s12 + $0x2f8] sm:$0xff] }
0x1f51   :  { %11624 = vst [vmem:[#allocation108_spill] sm:$0xff] %v11110_v30  ;;  %v5248_v53 = vld [vmem:[%s9905_s12 + $0x378] sm:$0xff] }
0x1f52   :  { %11623 = vst [vmem:[#allocation107_spill] sm:$0xff] %v11108_v2  ;;  %11625 = vst [vmem:[#allocation109_spill] sm:$0xff] %v11120_v32 }
0x1f53   :  { %8766 = vmatpush3.bf16.msra.mxu0 %v11080_v45  ;;  %8798 = vmatpush3.bf16.msra.mxu1 %v11082_v38  ;;  %v5244_v45 = vld [vmem:[%s9905_s12 + $0x358] sm:$0xff]  ;;  %v11130_v38 = vpack.c.bf16 %v5262_v31, %v5261_v9 }
0x1f54   :  { %8768 = vmatprep.subr.bf16.mxu0 %v11088_v25  ;;  %8800 = vmatprep.subr.bf16.mxu1 %v11090_v49  ;;  %v11122_v16 = vpack.c.bf16 %v5244_v45, %v5243_v56  ;;  %v11128_v49 = vpack.c.bf16 %v5230_v19, %v5229_v12  ;;  %v5245_v25 = vld [vmem:[%s9905_s12 + $0x360] sm:$0xff]  ;;  %v5263_v56 = vld [vmem:[%s9905_s12 + $0x3f0] sm:$0xff]  ;;  %v5264_v45 = vld [vmem:[%s9905_s12 + $0x3f8] sm:$0xff]  ;;  %v11147_v19 = vpack.c.bf16 %v5232_v3, %v5231_v57  ;;  %v11172_v57 = vsub.s32 5, %v10037_v34 }
0x1f55   :  { %11628 = vst [vmem:[#allocation112_spill] sm:$0xff] %v11130_v38  ;;  %v5215_v12 = vld [vmem:[%s9905_s12 + $0x270] sm:$0xff]  ;;  %v11149_v9 = vpack.c.bf16 %v5264_v45, %v5263_v56  ;;  %v5216_v31 = vld [vmem:[%s9905_s12 + $0x278] sm:$0xff] }
0x1f56   :  { %11626 = vst [vmem:[#allocation110_spill] sm:$0xff] %v11122_v16  ;;  %11627 = vst [vmem:[#allocation111_spill] sm:$0xff] %v11128_v49 }
0x1f57   :  { %8770 = vmatpush3.bf16.msra.mxu0 %v11100_v13  ;;  %8802 = vmatpush3.bf16.msra.mxu1 %v11102_v42  ;;  %v5246_v13 = vld [vmem:[%s9905_s12 + $0x368] sm:$0xff]  ;;  %v11140_v42 = vpack.c.bf16 %v5214_v8, %v5213_v6  ;;  %11631 = vst [vmem:[#allocation115_spill] sm:$0xff] %v11147_v19  ;;  %11632 = vst [vmem:[#allocation116_spill] sm:$0xff] %v11149_v9  ;;  %v11156_v6 = vpack.c.bf16 %v5216_v31, %v5215_v12  ;;  %v11169_v8 = vsub.s32 6, %v10037_v34 }
0x1f58   :  { %8772 = vmatprep.subr.bf16.mxu0 %v11108_v2  ;;  %8804 = vmatprep.subr.bf16.mxu1 %v11110_v30  ;;  %v11142_v30 = vpack.c.bf16 %v5246_v13, %v5245_v25  ;;  %v5247_v2 = vld [vmem:[%s9905_s12 + $0x370] sm:$0xff]  ;;  %v11166_v13 = vsub.s32 4, %v10037_v34  ;;  %11637 = vst [vmem:[#allocation121_spill] sm:$0xff] %v11172_v57 }
0x1f59   :  { %11629 = vst [vmem:[#allocation113_spill] sm:$0xff] %v11140_v42  ;;  %11633 = vst [vmem:[#allocation117_spill] sm:$0xff] %v11156_v6  ;;  %v11158_v25 = vpack.c.bf16 %v5248_v53, %v5247_v2  ;;  %v11175_v53 = vsub.s32 7, %v10037_v34  ;;  %v5114_v3 = vrot.slane %v10985_v43, %v11169_v8 }
0x1f5a   :  { %11630 = vst [vmem:[#allocation114_spill] sm:$0xff] %v11142_v30  ;;  %11635 = vst [vmem:[#allocation119_spill] sm:$0xff] %v11166_v13  ;;  %v5106_v2 = vrot.slane %v10985_v43, %v11166_v13 }
0x1f5b   :  { %8774 = vmatpush3.bf16.msra.mxu0 %v11120_v32  ;;  %8806 = vmatpush3.bf16.msra.mxu1 %v11122_v16  ;;  %11634 = vst [vmem:[#allocation118_spill] sm:$0xff] %v11158_v25  ;;  %11636 = vst [vmem:[#allocation120_spill] sm:$0xff] %v11169_v8  ;;  %v5118_v56 = vrot.slane %v10985_v43, %v11175_v53 }
0x1f5c   :  { %8776 = vmatprep.subr.bf16.mxu0 %v11128_v49  ;;  %8808 = vmatprep.subr.bf16.mxu1 %v11130_v38  ;;  %11638 = vst [vmem:[#allocation122_spill] sm:$0xff] %v11175_v53 }
0x1f5f   :  { %8778 = vmatpush3.bf16.msra.mxu0 %v11140_v42  ;;  %8810 = vmatpush3.bf16.msra.mxu1 %v11142_v30 }
0x1f60   :  { %8780 = vmatprep.subr.bf16.mxu0 %v11147_v19  ;;  %8812 = vmatprep.subr.bf16.mxu1 %v11149_v9 }
0x1f63   :  { %8782 = vmatpush3.bf16.msra.mxu0 %v11156_v6  ;;  %8814 = vmatpush3.bf16.msra.mxu1 %v11158_v25 }
0x1f64   :  { %8848 = vmatprep.subr.bf16.mxu1 %v10817_v41  ;;  %v5110_v41 = vrot.slane %v10985_v43, %v11172_v57 }
0x1f74   :  { %v5009_v45 = vpop.f32.mrb[8].mxu0  ;;  %v5080_v12 = vpop.f32.mrb[60].mxu1 }
0x1f75   :  { %v11185_v31 = vadd.f32 %v5106_v2, %v5009_v45  ;;  %v11187_v25 = vadd.f32 %v5114_v3, %v5080_v12  ;;  %v5011_v34 = vpop.f32.mrb[9].mxu0  ;;  %v5082_v9 = vpop.f32.mrb[61].mxu1 }
0x1f76   :  { %v11189_v30 = vadd.f32 %v5110_v41, %v5011_v34  ;;  %v11191_v13 = vadd.f32 %v5118_v56, %v5082_v9 }
0x1f77   :  { %11639 = vst [vmem:[#allocation123_spill] sm:$0xff] %v11187_v25  ;;  %v5297_v8 = vsel %vm1100_vm0, %v11185_v31, 0.0  ;;  %v5311_v57 = vsel %vm1100_vm0, %v11187_v25, 0.0 }
0x1f78   :  { %v5298_v6 = vrot.slane %v5297_v8, 4  ;;  %v5312_v43 = vrot.slane %v5311_v57, 4  ;;  %v5304_v2 = vsel %vm1100_vm0, %v11189_v30, 0.0  ;;  %v5318_v3 = vsel %vm1100_vm0, %v11191_v13, 0.0 }
0x1f79   :  { %v5305_v45 = vrot.slane %v5304_v2, 4  ;;  %v5319_v12 = vrot.slane %v5318_v3, 4 }
0x1f7a   :  { %v5299_v41 = vadd.f32 %v5298_v6, %v5297_v8  ;;  %v5313_v34 = vadd.f32 %v5312_v43, %v5311_v57  ;;  %v11640_v6 = vmov 0.0  }
0x1f7b   :  { %v5306_v9 = vadd.f32 %v5305_v45, %v5304_v2  ;;  %v5320_v56 = vadd.f32 %v5319_v12, %v5318_v3 }
0x1f7c   :  { %v5300_v53 = vrot.slane %v5299_v41, 2  ;;  %v5314_v38 = vrot.slane %v5313_v34, 2 }
0x1f7d   :  { %v5307_v19 = vrot.slane %v5306_v9, 2  ;;  %v5321_v16 = vrot.slane %v5320_v56, 2 }
0x1f7e   :  { %v5301_v42 = vadd.f32 %v5300_v53, %v5299_v41  ;;  %v5315_v49 = vadd.f32 %v5314_v38, %v5313_v34 }
0x1f7f   :  { %v5308_v32 = vadd.f32 %v5307_v19, %v5306_v9  ;;  %v5322_v37 = vadd.f32 %v5321_v16, %v5320_v56 }
0x1f80   :  { %v5302_v27 = vrot.slane %v5301_v42, 1  ;;  %v5316_v46 = vrot.slane %v5315_v49, 1 }
0x1f81   :  { %v5309_v4 = vrot.slane %v5308_v32, 1  ;;  %v5323_v59 = vrot.slane %v5322_v37, 1 }
0x1f82   :  { %v5303_v10 = vadd.f32 %v5302_v27, %v5301_v42  ;;  %v5317_v58 = vadd.f32 %v5316_v46, %v5315_v49 }
0x1f83   :  { %v5310_v47 = vadd.f32 %v5309_v4, %v5308_v32  ;;  %v5324_v25 = vadd.f32 %v5323_v59, %v5322_v37  ;;  %v11246_v4 = vld [vmem:[%s9910_s24 + $0x18] sm:$0xff] }
0x1f84   :  { %v11256_v27 = vcombine.high %v11246_v4, %v11246_v4  ;;  %v11645_v32 = vld [vmem:[#allocation88_spill] sm:$0xff] }
0x1f85   :  { %5529 = vmatprep.mubr.f32.mxu0 %v5310_v47  ;;  %5599 = vmatprep.mubr.f32.mxu1 %v5324_v25 }
0x1f86   :  { %5530 = vmatmul.mubr.f32.vlgmr.msra.gmra.mrb[12].mxu0 %v5303_v10  ;;  %5600 = vmatmul.mubr.f32.vlgmr.msra.gmra.mrb[64].mxu1 %v5317_v58  ;;  %v11239_v58 = vld [vmem:[%s9910_s24 + $0x10] sm:$0xff] }
0x1f87   :  { %5697 = vmatprep.mubr.f32.mxu0 %v11640_v6  ;;  %8850 = vmatpush3.bf16.msra.mxu1 %v10827_v20  ;;  %v11219_v20 = vld [vmem:[%s9910_s24] sm:$0xff]  ;;  %v11243_v37 = vcombine.high %v11239_v58, %v11239_v58 }
0x1f88   :  { %8852 = vmatprep.subr.bf16.mxu1 %v10835_v1  ;;  %v11223_v1 = vcombine.high %v11219_v20, %v11219_v20 }
0x1f8a   :  { %6906 = vmatprep.subr.msk.mxu0 %vm1192_vm1, %v11223_v1 }
0x1f8b   :  { %8854 = vmatpush3.bf16.msra.mxu1 %v10849_v14  ;;  %v11228_v14 = vld [vmem:[%s9910_s24 + $0x8] sm:$0xff]  ;;  %6907 = vmatpush1.msk.msra.mxu0 %vm1192_vm1, %v11219_v20  ;;  %s11677_s24 = sld [smem:[#allocation79_spill]] }
0x1f8c   :  { %8856 = vmatprep.subr.bf16.mxu1 %v10857_v40  ;;  %v11234_v40 = vcombine.high %v11228_v14, %v11228_v14 }
0x1f8e   :  { %6909 = vmatprep.subr.msk.mxu0 %vm1192_vm1, %v11234_v40 }
0x1f8f   :  { %8858 = vmatpush3.bf16.msra.mxu1 %v10869_v0 }
0x1f90   :  { %8860 = vmatprep.subr.bf16.mxu1 %v10876_v55 }
0x1f93   :  { %8862 = vmatpush3.bf16.msra.mxu1 %v10885_v22 }
0x1f94   :  { %8864 = vmatprep.subr.bf16.mxu1 %v10899_v50 }
0x1f97   :  { %8866 = vmatpush3.bf16.msra.mxu1 %v10906_v33 }
0x1f98   :  { %8868 = vmatprep.subr.bf16.mxu1 %v10919_v51 }
0x1f9b   :  { %8870 = vmatpush3.bf16.msra.mxu1 %v10926_v61 }
0x1f9c   :  { %8872 = vmatprep.subr.bf16.mxu1 %v10939_v15 }
0x1f9f   :  { %8874 = vmatpush3.bf16.msra.mxu1 %v10946_v44 }
0x1fa0   :  { %8876 = vmatprep.subr.bf16.mxu1 %v10959_v23 }
0x1fa3   :  { %8878 = vmatpush3.bf16.msra.mxu1 %v10966_v5 }
0x1fa4   :  { %8912 = vmatprep.subr.bf16.mxu1 %v10977_v60 }
0x2019   :  { %v7219_v0 = vpop.f32.mrb[10].mxu0  ;;  %v7254_v55 = vpop.f32.mrb[62].mxu1 }
0x201a   :  { %v7220_v22 = vpop.f32.mrb[11].mxu0  ;;  %v7255_v50 = vpop.f32.mrb[63].mxu1 }
0x201b   :  { %v7221_v33 = vadd.f32 %v7220_v22, %v7219_v0  ;;  %v7256_v51 = vadd.f32 %v7255_v50, %v7254_v55 }
0x201d   :  { %v5462_v61 = vadd.f32 %v7256_v51, %v7221_v33 }
0x2059   :  { %v7289_v15 = vpop.f32.mrb[12].mxu0  ;;  %v7324_v44 = vpop.f32.mrb[64].mxu1 }
0x205a   :  { %v7290_v23 = vpop.f32.mrb[13].mxu0  ;;  %v7325_v5 = vpop.f32.mrb[65].mxu1 }
0x205b   :  { %v7291_v60 = vadd.f32 %v7290_v23, %v7289_v15  ;;  %v7326_v10 = vadd.f32 %v7325_v5, %v7324_v44 }
0x205d   :  { %v5532_v46 = vadd.f32 %v7291_v60, %v5462_v61 }
0x205f   :  { %v5602_v59 = vadd.f32 %v7326_v10, %v5532_v46 }
0x2061   :  { %v5605_v47 = vmul.f32 0.001953125, %v5602_v59 }
0x2063   :  { %6908 = vmatmul.mubr.msk.f32.vlgmr.msra.gmra.mrb[14].mxu0 %vm1188_vm2, %v5605_v47 }
0x2064   :  { %6910 = vmatpush1.msk.msra.mxu0 %vm1192_vm1, %v11228_v14  ;;  %5768 = vmatprep.mubr.f32.mxu0 %v11640_v6 }
0x2065   :  { %6912 = vmatprep.subr.msk.mxu0 %vm1192_vm1, %v11243_v37 }
0x2067   :  { %6911 = vmatmul.mubr.msk.f32.vlgmr.msra.gmra.mrb[16].mxu0 %vm1188_vm2, %v5605_v47 }
0x2068   :  { %6913 = vmatpush1.msk.msra.mxu0 %vm1192_vm1, %v11239_v58  ;;  %5839 = vmatprep.mubr.f32.mxu0 %v11640_v6 }
0x2069   :  { %6915 = vmatprep.subr.msk.mxu0 %vm1192_vm1, %v11256_v27 }
0x206b   :  { %6914 = vmatmul.mubr.msk.f32.vlgmr.msra.gmra.mrb[18].mxu0 %vm1188_vm2, %v5605_v47 }
0x206c   :  { %6916 = vmatpush1.msk.msra.mxu0 %vm1192_vm1, %v11246_v4  ;;  %5910 = vmatprep.mubr.f32.mxu0 %v11640_v6 }
0x206d   :  { %8816 = vmatprep.subr.bf16.mxu0 %v10815_v39 }
0x206f   :  { %6917 = vmatmul.mubr.msk.f32.vlgmr.msra.gmra.mrb[20].mxu0 %vm1188_vm2, %v5605_v47 }
0x2070   :  { %8818 = vmatpush3.bf16.msra.mxu0 %v10825_v54  ;;  %v11641_v54 = vld [vmem:[#allocation81_spill] sm:$0xff] }
0x2071   :  { %8820 = vmatprep.subr.bf16.mxu0 %v10833_v62 }
0x2074   :  { %8822 = vmatpush3.bf16.msra.mxu0 %v10847_v11 }
0x2075   :  { %8824 = vmatprep.subr.bf16.mxu0 %v10855_v18 }
0x2078   :  { %8826 = vmatpush3.bf16.msra.mxu0 %v10867_v63  ;;  %v11642_v63 = vld [vmem:[#allocation85_spill] sm:$0xff] }
0x2079   :  { %8828 = vmatprep.subr.bf16.mxu0 %v10874_v29 }
0x207c   :  { %8830 = vmatpush3.bf16.msra.mxu0 %v10883_v21  ;;  %v11643_v21 = vld [vmem:[#allocation87_spill] sm:$0xff] }
0x207d   :  { %8832 = vmatprep.subr.bf16.mxu0 %v10894_v26 }
0x2080   :  { %8834 = vmatpush3.bf16.msra.mxu0 %v10901_v28 }
0x2081   :  { %8836 = vmatprep.subr.bf16.mxu0 %v10914_v36 }
0x2084   :  { %8838 = vmatpush3.bf16.msra.mxu0 %v10921_v52 }
0x2085   :  { %8840 = vmatprep.subr.bf16.mxu0 %v10934_v7 }
0x2088   :  { %8842 = vmatpush3.bf16.msra.mxu0 %v10941_v17 }
0x2089   :  { %8844 = vmatprep.subr.bf16.mxu0 %v10954_v48 }
0x208c   :  { %8846 = vmatpush3.bf16.msra.mxu0 %v10961_v24 }
0x208d   :  { %8880 = vmatprep.subr.bf16.mxu0 %v10974_v35  ;;  %v11644_v35 = vld [vmem:[#allocation86_spill] sm:$0xff] }
0x2136   :  { %v5699_v39 = vpop.f32.mrb[14].mxu0 }
0x2137   :  { %v5920_v62 = vrot.slane %v5699_v39, %v11641_v54  ;;  %v5701_v11 = vpop.f32.mrb[15].mxu0 }
0x2138   :  { %v5924_v18 = vrot.slane %v5701_v11, %v11641_v54 }
0x2139   :  { %v11289_v29 = vsub.f32 %v11642_v63, %v5920_v62 }
0x213a   :  { %v11292_v26 = vsub.f32 %v11643_v21, %v5924_v18  ;;  %v5770_v28 = vpop.f32.mrb[16].mxu0 }
0x213b   :  { %v5957_v36 = vmul.f32 %v11289_v29, %v11289_v29  ;;  %v5928_v52 = vrot.slane %v5770_v28, %v11641_v54  ;;  %v5772_v7 = vpop.f32.mrb[17].mxu0 }
0x213c   :  { %v5958_v17 = vmul.f32 %v11292_v26, %v11292_v26  ;;  %v5932_v48 = vrot.slane %v5772_v7, %v11641_v54 }
0x213d   :  { %v5965_v24 = vsel %vm1100_vm0, %v5957_v36, 0.0  ;;  %v11302_v38 = vsub.f32 %v11644_v35, %v5928_v52  ;;  %v11646_v35 = vld [vmem:[#allocation89_spill] sm:$0xff] }
0x213e   :  { %v5966_v49 = vrot.slane %v5965_v24, 4  ;;  %v5972_v42 = vsel %vm1100_vm0, %v5958_v17, 0.0  ;;  %v11306_v16 = vsub.f32 %v11645_v32, %v5932_v48  ;;  %v5841_v19 = vpop.f32.mrb[18].mxu0  ;;  %v11647_v32 = vld [vmem:[#allocation91_spill] sm:$0xff] }
0x213f   :  { %v5973_v25 = vrot.slane %v5972_v42, 4  ;;  %v5959_v8 = vmul.f32 %v11302_v38, %v11302_v38  ;;  %v5843_v57 = vpop.f32.mrb[19].mxu0 }
0x2140   :  { %v5967_v53 = vadd.f32 %v5966_v49, %v5965_v24  ;;  %v5960_v43 = vmul.f32 %v11306_v16, %v11306_v16  ;;  %v5940_v2 = vrot.slane %v5843_v57, %v11641_v54  ;;  %v11648_v57 = vld [vmem:[#allocation123_spill] sm:$0xff] }
0x2141   :  { %v5974_v3 = vadd.f32 %v5973_v25, %v5972_v42  ;;  %v5979_v45 = vsel %vm1100_vm0, %v5959_v8, 0.0 }
0x2142   :  { %v5968_v12 = vrot.slane %v5967_v53, 2  ;;  %v5980_v41 = vrot.slane %v5979_v45, 4  ;;  %v5986_v34 = vsel %vm1100_vm0, %v5960_v43, 0.0  ;;  %v11316_v9 = vsub.f32 %v11189_v30, %v5940_v2  ;;  %v5912_v56 = vpop.f32.mrb[20].mxu0  ;;  %v11649_v43 = vld [vmem:[#allocation93_spill] sm:$0xff] }
0x2143   :  { %v5987_v0 = vrot.slane %v5986_v34, 4  ;;  %v5914_v55 = vpop.f32.mrb[21].mxu0  ;;  %v5975_v22 = vrot.slane %v5974_v3, 2  ;;  %v5936_v30 = vrot.slane %v5841_v19, %v11641_v54  ;;  %v5944_v17 = vrot.slane %v5912_v56, %v11641_v54 }
0x2144   :  { %v5981_v50 = vadd.f32 %v5980_v41, %v5979_v45  ;;  %v5962_v33 = vmul.f32 %v11316_v9, %v11316_v9  ;;  %v5948_v51 = vrot.slane %v5914_v55, %v11641_v54  ;;  %v5969_v61 = vadd.f32 %v5968_v12, %v5967_v53  ;;  %v11650_v45 = vld [vmem:[#allocation90_spill] sm:$0xff]  ;;  %v11651_v12 = vld [vmem:[#allocation95_spill] sm:$0xff]  ;;  %v11653_v55 = vld [vmem:[#allocation97_spill] sm:$0xff] }
0x2145   :  { %v5988_v15 = vadd.f32 %v5987_v0, %v5986_v34  ;;  %v5976_v44 = vadd.f32 %v5975_v22, %v5974_v3  ;;  %v11330_v36 = vsub.f32 %v11185_v31, %v5936_v30  ;;  %v11338_v53 = vsub.f32 %v11648_v57, %v5944_v17  ;;  %v11652_v34 = vld [vmem:[#allocation92_spill] sm:$0xff]  ;;  %v11659_v30 = vld [vmem:[#allocation103_spill] sm:$0xff]  ;;  %v11669_v17 = vld [vmem:[#allocation113_spill] sm:$0xff] }
0x2146   :  { %v5982_v23 = vrot.slane %v5981_v50, 2  ;;  %v6000_v5 = vsel %vm1100_vm0, %v5962_v33, 0.0  ;;  %v11323_v60 = vsub.f32 %v11191_v13, %v5948_v51  ;;  %v5970_v59 = vrot.slane %v5969_v61, 1  ;;  %v11654_v33 = vld [vmem:[#allocation94_spill] sm:$0xff]  ;;  %v11655_v51 = vld [vmem:[#allocation99_spill] sm:$0xff] }
0x2147   :  { %v6001_v10 = vrot.slane %v6000_v5, 4  ;;  %v5977_v46 = vrot.slane %v5976_v44, 1  ;;  %v5989_v39 = vrot.slane %v5988_v15, 2  ;;  %v5961_v19 = vmul.f32 %v11330_v36, %v11330_v36  ;;  %v11676_v57 = vld [vmem:[#allocation118_spill] sm:$0xff] }
0x2148   :  { %v5964_v47 = vmul.f32 %v11323_v60, %v11323_v60  ;;  %v5983_v62 = vadd.f32 %v5982_v23, %v5981_v50  ;;  %v5971_v21 = vadd.f32 %v5970_v59, %v5969_v61  ;;  %v5963_v0 = vmul.f32 %v11338_v53, %v11338_v53  ;;  %v11656_v61 = vld [vmem:[#allocation96_spill] sm:$0xff]  ;;  %v11661_v59 = vld [vmem:[#allocation105_spill] sm:$0xff] }
0x2149   :  { %v6002_v11 = vadd.f32 %v6001_v10, %v6000_v5  ;;  %v5978_v18 = vadd.f32 %v5977_v46, %v5976_v44  ;;  %v5990_v28 = vadd.f32 %v5989_v39, %v5988_v15  ;;  %v5993_v41 = vsel %vm1100_vm0, %v5961_v19, 0.0  ;;  %v11657_v44 = vld [vmem:[#allocation101_spill] sm:$0xff]  ;;  %v11658_v5 = vld [vmem:[#allocation98_spill] sm:$0xff]  ;;  %v11660_v46 = vld [vmem:[#allocation100_spill] sm:$0xff] }
0x214a   :  { %v6014_v63 = vsel %vm1100_vm0, %v5964_v47, 0.0  ;;  %v5984_v52 = vrot.slane %v5983_v62, 1  ;;  %v5994_v50 = vrot.slane %v5993_v41, 4  ;;  %v6007_v15 = vsel %vm1100_vm0, %v5963_v0, 0.0  ;;  %v11662_v39 = vld [vmem:[#allocation102_spill] sm:$0xff] }
0x214b   :  { %v6015_v13 = vrot.slane %v6014_v63, 4  ;;  %6085 = vmatprep.mubr.f32.mxu0 %v5978_v18  ;;  %v6003_v7 = vrot.slane %v6002_v11, 2  ;;  %v5991_v48 = vrot.slane %v5990_v28, 1  ;;  %v6008_v10 = vrot.slane %v6007_v15, 4  ;;  %v11664_v18 = vld [vmem:[#allocation104_spill] sm:$0xff]  ;;  %v11674_v19 = vld [vmem:[#allocation114_spill] sm:$0xff] }
0x214c   :  { %6086 = vmatmul.mubr.f32.vlgmr.msra.gmra.mrb[22].mxu0 %v5971_v21  ;;  %v5985_v31 = vadd.f32 %v5984_v52, %v5983_v62  ;;  %v5995_v23 = vadd.f32 %v5994_v50, %v5993_v41  ;;  %v11663_v62 = vld [vmem:[#allocation107_spill] sm:$0xff]  ;;  %v11666_v21 = vld [vmem:[#allocation106_spill] sm:$0xff] }
0x214d   :  { %v6016_v24 = vadd.f32 %v6015_v13, %v6014_v63  ;;  %8882 = vmatpush3.bf16.msra.mxu0 %v11646_v35  ;;  %v6004_v49 = vadd.f32 %v6003_v7, %v6002_v11  ;;  %v5992_v42 = vadd.f32 %v5991_v48, %v5990_v28  ;;  %v6009_v11 = vadd.f32 %v6008_v10, %v6007_v15  ;;  %v11665_v63 = vld [vmem:[#allocation109_spill] sm:$0xff]  ;;  %v11667_v28 = vld [vmem:[#allocation111_spill] sm:$0xff]  ;;  %v11668_v7 = vld [vmem:[#allocation108_spill] sm:$0xff] }
0x214e   :  { %8884 = vmatprep.subr.bf16.mxu0 %v11647_v32  ;;  %v5996_v47 = vrot.slane %v5995_v23, 2  ;;  %v11670_v48 = vld [vmem:[#allocation110_spill] sm:$0xff]  ;;  %v11673_v32 = vld [vmem:[#allocation117_spill] sm:$0xff] }
0x214f   :  { %v6005_v25 = vrot.slane %v6004_v49, 1  ;;  %v6017_v8 = vrot.slane %v6016_v24, 2  ;;  %6155 = vmatprep.mubr.f32.mxu1 %v5992_v42  ;;  %v6010_v52 = vrot.slane %v6009_v11, 2  ;;  %v11400_v15 = vld [vmem:[%s9900_s19] sm:$0xff] }
0x2150   :  { %6156 = vmatmul.mubr.f32.vlgmr.msra.gmra.mrb[66].mxu1 %v5985_v31  ;;  %v5997_v13 = vadd.f32 %v5996_v47, %v5995_v23  ;;  %v11680_v47 = vld [vmem:[#allocation122_spill] sm:$0xff] }
0x2151   :  { %8886 = vmatpush3.bf16.msra.mxu0 %v11649_v43  ;;  %v6006_v2 = vadd.f32 %v6005_v25, %v6004_v49  ;;  %v6018_v3 = vadd.f32 %v6017_v8, %v6016_v24  ;;  %8914 = vmatpush3.bf16.msra.mxu1 %v11650_v45  ;;  %v11671_v24 = vld [vmem:[#allocation115_spill] sm:$0xff]  ;;  %v11672_v49 = vld [vmem:[#allocation112_spill] sm:$0xff]  ;;  %v6011_v42 = vadd.f32 %v6010_v52, %v6009_v11 }
0x2152   :  { %8888 = vmatprep.subr.bf16.mxu0 %v11651_v12  ;;  %8916 = vmatprep.subr.bf16.mxu1 %v11652_v34  ;;  %v5998_v35 = vrot.slane %v5997_v13, 1  ;;  %v11675_v25 = vld [vmem:[#allocation116_spill] sm:$0xff]  ;;  %v6712_v52 = vrot.slane %v11400_v15, %v11680_v47 }
0x2153   :  { %6225 = vmatprep.mubr.f32.mxu0 %v6006_v2  ;;  %v6019_v56 = vrot.slane %v6018_v3, 1  ;;  %v6012_v8 = vrot.slane %v6011_v42, 1 }
0x2154   :  { %v5999_v31 = vadd.f32 %v5998_v35, %v5997_v13 }
0x2155   :  { %8890 = vmatpush3.bf16.msra.mxu0 %v11653_v55  ;;  %v6020_v22 = vadd.f32 %v6019_v56, %v6018_v3  ;;  %8918 = vmatpush3.bf16.msra.mxu1 %v11654_v33  ;;  %v6013_v43 = vadd.f32 %v6012_v8, %v6011_v42 }
0x2156   :  { %8892 = vmatprep.subr.bf16.mxu0 %v11655_v51  ;;  %8920 = vmatprep.subr.bf16.mxu1 %v11656_v61  ;;  %v11397_v61 = vld [vmem:[%s11677_s24] sm:$0xff] }
0x2157   :  { %6295 = vmatprep.mubr.f32.mxu1 %v6020_v22 }
0x2159   :  { %8894 = vmatpush3.bf16.msra.mxu0 %v11657_v44  ;;  %8922 = vmatpush3.bf16.msra.mxu1 %v11658_v5  ;;  %v11678_v5 = vld [vmem:[#allocation120_spill] sm:$0xff] }
0x215a   :  { %8896 = vmatprep.subr.bf16.mxu0 %v11659_v30  ;;  %8924 = vmatprep.subr.bf16.mxu1 %v11660_v46  ;;  %v6708_v11 = vrot.slane %v11400_v15, %v11678_v5 }
0x215d   :  { %8898 = vmatpush3.bf16.msra.mxu0 %v11661_v59  ;;  %8926 = vmatpush3.bf16.msra.mxu1 %v11662_v39  ;;  %v6663_v39 = vrot.slane %v11397_v61, %v11680_v47  ;;  %v11685_v47 = vld [vmem:[#allocation80_spill] sm:$0xff] }
0x215e   :  { %8900 = vmatprep.subr.bf16.mxu0 %v11663_v62  ;;  %8928 = vmatprep.subr.bf16.mxu1 %v11664_v18  ;;  %v6684_v62 = vrot.slane %v11400_v15, %v11641_v54 }
0x2161   :  { %8902 = vmatpush3.bf16.msra.mxu0 %v11665_v63  ;;  %8930 = vmatpush3.bf16.msra.mxu1 %v11666_v21 }
0x2162   :  { %8904 = vmatprep.subr.bf16.mxu0 %v11667_v28  ;;  %8932 = vmatprep.subr.bf16.mxu1 %v11668_v7 }
0x2165   :  { %8906 = vmatpush3.bf16.msra.mxu0 %v11669_v17  ;;  %8934 = vmatpush3.bf16.msra.mxu1 %v11670_v48 }
0x2166   :  { %8908 = vmatprep.subr.bf16.mxu0 %v11671_v24  ;;  %8936 = vmatprep.subr.bf16.mxu1 %v11672_v49  ;;  %v11681_v24 = vld [vmem:[#allocation83_spill] sm:$0xff]  ;;  %v11682_v49 = vld [vmem:[#allocation84_spill] sm:$0xff] }
0x2167   :  { %v6643_v35 = vrot.slane %v11397_v61, %v11681_v24  ;;  %v6647_v42 = vrot.slane %v11397_v61, %v11682_v49 }
0x2169   :  { %8910 = vmatpush3.bf16.msra.mxu0 %v11673_v32  ;;  %8938 = vmatpush3.bf16.msra.mxu1 %v11674_v19  ;;  %v6692_v19 = vrot.slane %v11400_v15, %v11681_v24 }
0x216a   :  { %6918 = vmatprep.subr.msk.mxu0 %vm1192_vm1, %v11223_v1  ;;  %8940 = vmatprep.subr.bf16.mxu1 %v11675_v25 }
0x216c   :  { %6226 = vmatmul.mubr.f32.vlgmr.msra.gmra.mrb[24].mxu0 %v5999_v31 }
0x216d   :  { %6919 = vmatpush1.msk.msra.mxu0 %vm1192_vm1, %v11219_v20  ;;  %6371 = vmatprep.mubr.f32.mxu0 %v11640_v6 }
0x216e   :  { %8942 = vmatpush3.bf16.msra.mxu1 %v11676_v57  ;;  %6921 = vmatprep.subr.msk.mxu0 %vm1192_vm1, %v11234_v40 }
0x216f   :  { %6927 = vmatprep.subr.msk.mxu1 %vm1192_vm1, %v11256_v27 }
0x2171   :  { %6296 = vmatmul.mubr.f32.vlgmr.msra.gmra.mrb[68].mxu1 %v6013_v43 }
0x2172   :  { %6928 = vmatpush1.msk.msra.mxu1 %vm1192_vm1, %v11246_v4  ;;  %6584 = vmatprep.mubr.f32.mxu1 %v11640_v6 }
0x221f   :  { %v7359_v1 = vpop.f32.mrb[22].mxu0 }
0x2220   :  { %v7360_v2 = vpop.f32.mrb[23].mxu0 }
0x2221   :  { %v7361_v20 = vadd.f32 %v7360_v2, %v7359_v1  ;;  %v11683_v2 = vld [vmem:[#allocation119_spill] sm:$0xff] }
0x2223   :  { %v7394_v3 = vpop.f32.mrb[66].mxu1 }
0x2224   :  { %v7395_v45 = vpop.f32.mrb[67].mxu1 }
0x2225   :  { %v7396_v12 = vadd.f32 %v7395_v45, %v7394_v3 }
0x2227   :  { %v6158_v41 = vadd.f32 %v7396_v12, %v7361_v20  ;;  %v6651_v20 = vrot.slane %v11397_v61, %v11683_v2 }
0x223f   :  { %v7429_v34 = vpop.f32.mrb[24].mxu0 }
0x2240   :  { %v7430_v56 = vpop.f32.mrb[25].mxu0 }
0x2241   :  { %v7431_v40 = vadd.f32 %v7430_v56, %v7429_v34  ;;  %v11684_v34 = vld [vmem:[#allocation121_spill] sm:$0xff] }
0x2242   :  { %v6655_v56 = vrot.slane %v11397_v61, %v11684_v34 }
0x2243   :  { %v6228_v0 = vadd.f32 %v7431_v40, %v6158_v41 }
0x2244   :  { %v7464_v55 = vpop.f32.mrb[68].mxu1 }
0x2245   :  { %v7465_v22 = vpop.f32.mrb[69].mxu1 }
0x2246   :  { %v7466_v27 = vadd.f32 %v7465_v22, %v7464_v55 }
0x2248   :  { %v6298_v50 = vadd.f32 %v7466_v27, %v6228_v0 }
0x224a   :  { %v6301_v4 = vmul.f32 0.001953125, %v6298_v50 }
0x224c   :  { %v6302_v33 = vadd.f32 1e-05, %v6301_v4 }
0x224e   :  { %9058 = vrsqrt.f32 %v6302_v33 }
0x2258   :  { %v9059_v51 = vpop.eup %9058 }
0x2259   :  { %6920 = vmatmul.mubr.msk.f32.vlgmr.msra.gmra.mrb[26].mxu0 %vm1188_vm2, %v9059_v51  ;;  %6929 = vmatmul.mubr.msk.f32.vlgmr.msra.gmra.mrb[70].mxu1 %vm1188_vm2, %v9059_v51 }
0x225a   :  { %6922 = vmatpush1.msk.msra.mxu0 %vm1192_vm1, %v11228_v14  ;;  %6442 = vmatprep.mubr.f32.mxu0 %v11640_v6  ;;  %v6635_v14 = vrot.slane %v11397_v61, %v11641_v54 }
0x225b   :  { %6924 = vmatprep.subr.msk.mxu0 %vm1192_vm1, %v11243_v37  ;;  %v6659_v37 = vrot.slane %v11397_v61, %v11678_v5 }
0x225d   :  { %6923 = vmatmul.mubr.msk.f32.vlgmr.msra.gmra.mrb[28].mxu0 %vm1188_vm2, %v9059_v51 }
0x225e   :  { %6925 = vmatpush1.msk.msra.mxu0 %vm1192_vm1, %v11239_v58  ;;  %6513 = vmatprep.mubr.f32.mxu0 %v11640_v6  ;;  %v11679_v6 = vld [vmem:[#allocation82_spill] sm:$0xff] }
0x225f   :  { %v6639_v46 = vrot.slane %v11397_v61, %v11679_v6  ;;  %v6688_v13 = vrot.slane %v11400_v15, %v11679_v6  ;;  %v6704_v61 = vrot.slane %v11400_v15, %v11684_v34 }
0x2261   :  { %6926 = vmatmul.mubr.msk.f32.vlgmr.msra.gmra.mrb[30].mxu0 %vm1188_vm2, %v9059_v51 }
0x232c   :  { %v6373_v44 = vpop.f32.mrb[26].mxu0  ;;  %v6586_v23 = vpop.f32.mrb[70].mxu1 }
0x232d   :  { %v6594_v30 = vrot.slane %v6373_v44, %v11641_v54  ;;  %v6618_v58 = vrot.slane %v6586_v23, %v11641_v54  ;;  %v6375_v10 = vpop.f32.mrb[27].mxu0  ;;  %v6588_v59 = vpop.f32.mrb[71].mxu1 }
0x232e   :  { %v6598_v18 = vrot.slane %v6375_v10, %v11641_v54  ;;  %v6622_v63 = vrot.slane %v6588_v59, %v11641_v54 }
0x232f   :  { %v6623_v21 = vmul.f32 %v6594_v30, %v11289_v29  ;;  %v6629_v28 = vmul.f32 %v6618_v58, %v11338_v53 }
0x2330   :  { %v6624_v7 = vmul.f32 %v6598_v18, %v11292_v26  ;;  %v6630_v17 = vmul.f32 %v6622_v63, %v11323_v60  ;;  %v6444_v48 = vpop.f32.mrb[28].mxu0  ;;  %v6696_v60 = vrot.slane %v11400_v15, %v11682_v49 }
0x2331   :  { %v6672_v29 = vmul.f32 %v6635_v14, %v6623_v21  ;;  %v6678_v32 = vmul.f32 %v6659_v37, %v6629_v28  ;;  %v6602_v53 = vrot.slane %v6444_v48, %v11641_v54  ;;  %v6446_v31 = vpop.f32.mrb[29].mxu0 }
0x2332   :  { %v6673_v25 = vmul.f32 %v6639_v46, %v6624_v7  ;;  %v6679_v8 = vmul.f32 %v6663_v39, %v6630_v17  ;;  %v6606_v26 = vrot.slane %v6446_v31, %v11641_v54 }
0x2333   :  { %v6721_v57 = vadd.f32 %v6684_v62, %v6672_v29  ;;  %v6727_v43 = vadd.f32 %v6708_v11, %v6678_v32  ;;  %v6625_v1 = vmul.f32 %v6602_v53, %v11302_v38 }
0x2334   :  { %v6722_v3 = vadd.f32 %v6688_v13, %v6673_v25  ;;  %v6728_v45 = vadd.f32 %v6712_v52, %v6679_v8  ;;  %v6626_v12 = vmul.f32 %v6606_v26, %v11306_v16  ;;  %v6515_v41 = vpop.f32.mrb[30].mxu0  ;;  %v6700_v16 = vrot.slane %v11400_v15, %v11683_v2 }
0x2335   :  { %v6729_v40 = vmax.f32 %v6721_v57, 0.0  ;;  %v6735_v0 = vmax.f32 %v6727_v43, 0.0  ;;  %v6674_v55 = vmul.f32 %v6643_v35, %v6625_v1  ;;  %v6610_v22 = vrot.slane %v6515_v41, %v11641_v54  ;;  %v6517_v27 = vpop.f32.mrb[31].mxu0 }
0x2336   :  { %v6730_v50 = vmax.f32 %v6722_v3, 0.0  ;;  %v6736_v4 = vmax.f32 %v6728_v45, 0.0  ;;  %v6675_v38 = vmul.f32 %v6647_v42, %v6626_v12  ;;  %v6614_v33 = vrot.slane %v6517_v27, %v11641_v54 }
0x2337   :  { %v6723_v51 = vadd.f32 %v6692_v19, %v6674_v55  ;;  %v6627_v44 = vmul.f32 %v6610_v22, %v11330_v36 }
0x2338   :  { %v6745_v14 = vcombine.low %v6729_v40, %v6730_v50  ;;  %v6763_v23 = vcombine.low %v6735_v0, %v6736_v4  ;;  %v6724_v5 = vadd.f32 %v6696_v60, %v6675_v38  ;;  %v6628_v37 = vmul.f32 %v6614_v33, %v11316_v9 }
0x2339   :  { %v6731_v30 = vmax.f32 %v6723_v51, 0.0  ;;  %v6676_v58 = vmul.f32 %v6651_v20, %v6627_v44 }
0x233a   :  { %v6732_v10 = vmax.f32 %v6724_v5, 0.0  ;;  %v6677_v54 = vmul.f32 %v6655_v56, %v6628_v37  ;;  %v6753_v39 = vrot.slane %v6745_v14, %v11685_v47  ;;  %v6777_v63 = vrot.slane %v6763_v23, %v11685_v47 }
0x233b   :  { %v6725_v6 = vadd.f32 %v6700_v16, %v6676_v58 }
0x233c   :  { %v6746_v46 = vcombine.low %v6731_v30, %v6732_v10  ;;  %v6726_v36 = vadd.f32 %v6704_v61, %v6677_v54 }
0x233d   :  { %v6733_v59 = vmax.f32 %v6725_v6, 0.0 }
0x233e   :  { %v6760_v62 = vrot.slane %v6746_v46, %v11685_v47  ;;  %v6734_v15 = vmax.f32 %v6726_v36, 0.0 }
0x2340   :  { %v6761_v11 = vcombine.low %v6753_v39, %v6760_v62  ;;  %v6762_v18 = vcombine.low %v6733_v59, %v6734_v15 }
0x2342   :  { %6781 = vst [vmem:[%s9915_s4] sm:$0xff] %v6761_v11  ;;  %v6770_v9 = vrot.slane %v6762_v18, %v11685_v47 }
0x2344   :  { %v6778_v21 = vcombine.low %v6770_v9, %v6777_v63 }
0x2346   :  { %6782 = vst [vmem:[%s9915_s4 + $0x8] sm:$0xff] %v6778_v21 }
0x2347   :  { %6787 = vsyncpa [#allocation3], 1 }
0x2348   :  { %6788 = vsyncpa [#allocation5], 1 }
0x2349   :  { %6789 = vsyncpa [#allocation8], 1 }
0x234a   :  { %6790 = vsyncpa [#allocation11], 1 }
0x234b   :  { %6791 = vsyncpa [#allocation14], 1 }
0x234c   :  { %6792 = vsyncpa [#allocation17], 1 }
0x234d   :  { %6793 = vsyncpa [#allocation20], 1 }
0x234e   :  { %6794 = vsyncpa [#allocation23], 1 }
0x234f   :  { %6795 = vsyncpa [#allocation26], 1 }
0x2350   :  { %6796 = vsyncpa [#allocation29], 1 }
0x2351   :  { %6797 = vsyncpa [#allocation32], 1 }
0x2352   :  { %6798 = vsyncpa [#allocation35], 1 }

</bundles_post_ra>
